<compile_context>
chip_gen: v7x
topology: tpu7x:2x2x1
jax: 0.10.0
libtpu: 0.0.40
codegen_flags: <defaults>
</compile_context>

<pallas_src>
import jax
import jax.numpy as jnp
import numpy as np
from jax.experimental import pallas as pl
from jax.experimental.pallas import tpu as pltpu

EPS = 1e-5  # nn.BatchNorm2d default


# ----------------------------- Pallas kernel ------------------------------ #
def _bn_affine(acc, gamma, beta):
    """Training-mode BatchNorm folded to a per-channel affine (one-pass stats)."""
    inv_m = 1.0 / acc.shape[0]
    mean = jnp.sum(acc, axis=0, keepdims=True) * inv_m
    mean_sq = jnp.sum(acc * acc, axis=0, keepdims=True) * inv_m
    var = jnp.maximum(mean_sq - mean * mean, 0.0)
    s = gamma * jax.lax.rsqrt(var + EPS)
    t = beta - mean * s
    return acc * s + t


def fused_discriminator_kernel(
        p1_ref, w1_ref, g1_ref, b1_ref,
        sel2_ref, w2_ref, g2_ref, b2_ref,
        sel3_ref, w3_ref, g3_ref, b3_ref,
        sel4_ref, w4_ref, g4_ref, b4_ref,
        o_ref):
    # ---- layer 1: conv (pre-built im2col patches) + BN + ReLU --------------
    acc = jnp.dot(p1_ref[...], w1_ref[...], preferred_element_type=jnp.float32)
    x = jnp.maximum(_bn_affine(acc, g1_ref[...], b1_ref[...]), 0.0)
    x = x.astype(jnp.bfloat16)                       # next layer's matmul lhs

    # ---- layers 2..4: in-kernel stride-2 tap accumulation ------------------
    layers = ((sel2_ref, w2_ref, g2_ref, b2_ref),
              (sel3_ref, w3_ref, g3_ref, b3_ref),
              (sel4_ref, w4_ref, g4_ref, b4_ref))
    for li, (sel_ref, w_ref, g_ref, b_ref) in enumerate(layers):
        acc = None
        for t in range(9):                           # t = kh*3 + kw
            # One-hot selection matmul == exact row gather of the tap rows.
            tap = jnp.dot(sel_ref[t], x, preferred_element_type=jnp.float32)
            contrib = jnp.dot(tap.astype(jnp.bfloat16), w_ref[t],
                              preferred_element_type=jnp.float32)
            acc = contrib if acc is None else acc + contrib
        y = jnp.maximum(_bn_affine(acc, g_ref[...], b_ref[...]), 0.0)
        if li == len(layers) - 1:
            o_ref[...] = jax.nn.sigmoid(y)
        else:
            x = y.astype(jnp.bfloat16)


# ------------------------------ JAX glue ---------------------------------- #
def extract_patches(x_nhwc, k=3, stride=2):
    """im2col for layer 1: (N,H,W,C) -> (N*Ho*Wo, k*k*C), tap-major then C."""
    N, H, W, C = x_nhwc.shape
    Ho = (H - k) // stride + 1
    Wo = (W - k) // stride + 1
    taps = []
    for kh in range(k):
        for kw in range(k):
            taps.append(jax.lax.slice(
                x_nhwc,
                (0, kh, kw, 0),
                (N, kh + stride * (Ho - 1) + 1, kw + stride * (Wo - 1) + 1, C),
                (1, stride, stride, 1)))
    p = jnp.stack(taps, axis=3)                       # (N, Ho, Wo, k*k, C)
    return p.reshape(N * Ho * Wo, k * k * C), (Ho, Wo)


def _make_tap_selectors(n, h, w, ho, wo):
    """One-hot (9, N*Ho*Wo, N*H*W) selectors for a 3x3 stride-2 VALID conv."""
    sel = np.zeros((9, n * ho * wo, n * h * w), np.float32)
    for kh in range(3):
        for kw in range(3):
            t = kh * 3 + kw
            row = 0
            for nn in range(n):
                for i in range(ho):
                    for j in range(wo):
                        sel[t, row, nn * h * w + (2 * i + kh) * w + (2 * j + kw)] = 1.0
                        row += 1
    return sel


@jax.jit
def discriminator_forward(params, gray_nchw, color_nchw):
    x = jnp.concatenate([gray_nchw, color_nchw], axis=1)   # NCHW, C = 1 + 3 = 4
    x = jnp.transpose(x, (0, 2, 3, 1))                      # NHWC
    N, H, W, _ = x.shape

    # Layer 1: tiny im2col built once in XLA (16 KB input, Cin=4).
    w1, _, g1, b1 = params[0]
    c1_out, c1_in, k, _ = w1.shape
    patches, (Ho, Wo) = extract_patches(x, k=k, stride=2)
    kernel_inputs = [
        patches.astype(jnp.bfloat16),
        jnp.transpose(w1, (2, 3, 1, 0)).reshape(k * k * c1_in, c1_out).astype(jnp.bfloat16),
        g1.reshape(1, -1).astype(jnp.float32),
        b1.reshape(1, -1).astype(jnp.float32),
    ]

    # Layers 2-4: per-tap one-hot selectors + tap weights (conv bias dropped:
    # it cancels exactly under the batch-stat BatchNorm that follows).
    h, w_sp = Ho, Wo
    c_last = c1_out
    for (wl, _, gl, bl) in params[1:]:
        c_out, c_in, k, _ = wl.shape
        ho = (h - k) // 2 + 1
        wo = (w_sp - k) // 2 + 1
        kernel_inputs += [
            jnp.asarray(_make_tap_selectors(N, h, w_sp, ho, wo), dtype=jnp.bfloat16),
            jnp.transpose(wl, (2, 3, 1, 0)).reshape(k * k, c_in, c_out).astype(jnp.bfloat16),
            gl.reshape(1, -1).astype(jnp.float32),
            bl.reshape(1, -1).astype(jnp.float32),
        ]
        h, w_sp, c_last = ho, wo, c_out

    vspec = pl.BlockSpec(memory_space=pltpu.MemorySpace.VMEM)
    out = pl.pallas_call(
        fused_discriminator_kernel,
        out_shape=jax.ShapeDtypeStruct((N * h * w_sp, c_last), jnp.float32),
        in_specs=[vspec] * len(kernel_inputs),
        out_specs=vspec,
    )(*kernel_inputs)

    out = out.reshape(N, h, w_sp, c_last)
    return jnp.transpose(out, (0, 3, 1, 2))                 # back to NCHW


# --------------------------- pure-JAX reference ---------------------------- #
def reference_forward(params, gray, color):
    """Faithful forward (conv+bias, batch-stat BN, ReLU, final Sigmoid).

    Uses the same bf16-operand / f32-accumulate conv precision as the kernel so
    the comparison isolates implementation error rather than rounding mode.
    """
    x = jnp.concatenate([gray, color], axis=1)
    n_layers = len(params)
    for i, (w, b, g, bt) in enumerate(params):
        x = jax.lax.conv_general_dilated(
            x.astype(jnp.bfloat16), w.astype(jnp.bfloat16), (2, 2), 'VALID',
            dimension_numbers=('NCHW', 'OIHW', 'NCHW'),
            preferred_element_type=jnp.float32)
        x = x + b.reshape(1, -1, 1, 1)
        mean = jnp.mean(x, axis=(0, 2, 3), keepdims=True)
        var = jnp.mean((x - mean) ** 2, axis=(0, 2, 3), keepdims=True)
        x = (x - mean) * jax.lax.rsqrt(var + EPS)
        x = x * g.reshape(1, -1, 1, 1) + bt.reshape(1, -1, 1, 1)
        x = jnp.maximum(x, 0.0)
        if i == n_layers - 1:
            x = jax.nn.sigmoid(x)
    return x


# --------------------------------- main ------------------------------------ #
if __name__ == "__main__":
    key = jax.random.PRNGKey(0)
    N, H, W = 2, 32, 32  # 32 -> 15 -> 7 -> 3 -> 1 through four stride-2 VALID convs
    k_g, k_c, *layer_keys = jax.random.split(key, 6)

    gray = jax.random.normal(k_g, (N, 1, H, W), jnp.float32)
    color = jax.random.normal(k_c, (N, 3, H, W), jnp.float32)

    # Deterministic synthetic parameters (shapes follow the PyTorch module).
    chans = [(4, 64), (64, 128), (128, 256), (256, 1)]
    params = []
    for lk, (cin, cout) in zip(layer_keys, chans):
        kw_, kb_, kg_, kbeta_ = jax.random.split(lk, 4)
        w = 0.05 * jax.random.normal(kw_, (cout, cin, 3, 3), jnp.float32)
        b = 0.01 * jax.random.normal(kb_, (cout,), jnp.float32)
        g = 1.0 + 0.1 * jax.random.normal(kg_, (cout,), jnp.float32)
        bt = 0.1 * jax.random.normal(kbeta_, (cout,), jnp.float32)
        params.append((w, b, g, bt))

    out = jax.block_until_ready(discriminator_forward(params, gray, color))
    ref = jax.block_until_ready(reference_forward(params, gray, color))

    assert out.shape == (N, 1, 1, 1), out.shape
    out_np = np.asarray(out, np.float32)
    ref_np = np.asarray(ref, np.float32)
    assert np.allclose(out_np, ref_np, rtol=1e-2, atol=1e-2), (
        np.max(np.abs(out_np - ref_np)))

    print("KERNEL_OK")
</pallas_src>

<mosaic_0001>
module attributes {stable_mosaic.version = 11 : i64} {
  func.func @fused_discriminator_kernel(%arg0: memref<450x36xbf16, #tpu.memory_space<vmem>>, %arg1: memref<36x64xbf16, #tpu.memory_space<vmem>>, %arg2: memref<1x64xf32, #tpu.memory_space<vmem>>, %arg3: memref<1x64xf32, #tpu.memory_space<vmem>>, %arg4: memref<9x98x450xbf16, #tpu.memory_space<vmem>>, %arg5: memref<9x64x128xbf16, #tpu.memory_space<vmem>>, %arg6: memref<1x128xf32, #tpu.memory_space<vmem>>, %arg7: memref<1x128xf32, #tpu.memory_space<vmem>>, %arg8: memref<9x18x98xbf16, #tpu.memory_space<vmem>>, %arg9: memref<9x128x256xbf16, #tpu.memory_space<vmem>>, %arg10: memref<1x256xf32, #tpu.memory_space<vmem>>, %arg11: memref<1x256xf32, #tpu.memory_space<vmem>>, %arg12: memref<9x2x18xbf16, #tpu.memory_space<vmem>>, %arg13: memref<9x256x1xbf16, #tpu.memory_space<vmem>>, %arg14: memref<1x1xf32, #tpu.memory_space<vmem>>, %arg15: memref<1x1xf32, #tpu.memory_space<vmem>>, %arg16: memref<2x1xf32, #tpu.memory_space<vmem>>) attributes {dimension_semantics = [], scalar_prefetch = 0 : i64, scratch_operands = 0 : i64, tpu.core_type = #tpu.core_type<tc>} {
    %c0 = arith.constant 0 : index
    %c0_0 = arith.constant 0 : index
    %0 = vector.load %arg0[%c0, %c0_0] : memref<450x36xbf16, #tpu.memory_space<vmem>>, vector<450x36xbf16>
    %c0_1 = arith.constant 0 : index
    %c0_2 = arith.constant 0 : index
    %1 = vector.load %arg1[%c0_1, %c0_2] : memref<36x64xbf16, #tpu.memory_space<vmem>>, vector<36x64xbf16>
    %cst = arith.constant dense<0.000000e+00> : vector<450x64xf32>
    %2 = tpu.matmul %0, %1, %cst {dimension_numbers = #tpu.dot_dimension_numbers<[1], [0], [0], [1], [0, 0, 1, 1], [], []>} : vector<450x36xbf16>, vector<36x64xbf16>, vector<450x64xf32> -> vector<450x64xf32>
    %c0_3 = arith.constant 0 : index
    %c0_4 = arith.constant 0 : index
    %3 = vector.load %arg2[%c0_3, %c0_4] : memref<1x64xf32, #tpu.memory_space<vmem>>, vector<1x64xf32>
    %c0_5 = arith.constant 0 : index
    %c0_6 = arith.constant 0 : index
    %4 = vector.load %arg3[%c0_5, %c0_6] : memref<1x64xf32, #tpu.memory_space<vmem>>, vector<1x64xf32>
    %cst_7 = arith.constant dense<0.000000e+00> : vector<64xf32>
    %5 = vector.multi_reduction <add>, %2, %cst_7 [0] : vector<450x64xf32> to vector<64xf32>
    %6 = vector.shape_cast %5 : vector<64xf32> to vector<1x64xf32>
    %cst_8 = arith.constant 0.00222222228 : f32
    %7 = vector.broadcast %cst_8 : f32 to vector<1x64xf32>
    %8 = arith.mulf %6, %7 : vector<1x64xf32>
    %9 = arith.mulf %2, %2 : vector<450x64xf32>
    %cst_9 = arith.constant dense<0.000000e+00> : vector<64xf32>
    %10 = vector.multi_reduction <add>, %9, %cst_9 [0] : vector<450x64xf32> to vector<64xf32>
    %11 = vector.shape_cast %10 : vector<64xf32> to vector<1x64xf32>
    %cst_10 = arith.constant 0.00222222228 : f32
    %12 = vector.broadcast %cst_10 : f32 to vector<1x64xf32>
    %13 = arith.mulf %11, %12 : vector<1x64xf32>
    %14 = arith.mulf %8, %8 : vector<1x64xf32>
    %15 = arith.subf %13, %14 : vector<1x64xf32>
    %cst_11 = arith.constant 0.000000e+00 : f32
    %16 = vector.broadcast %cst_11 : f32 to vector<1x64xf32>
    %17 = arith.maximumf %15, %16 : vector<1x64xf32>
    %cst_12 = arith.constant 9.99999974E-6 : f32
    %18 = vector.broadcast %cst_12 : f32 to vector<1x64xf32>
    %19 = arith.addf %17, %18 : vector<1x64xf32>
    %20 = math.rsqrt %19 : vector<1x64xf32>
    %21 = arith.mulf %3, %20 : vector<1x64xf32>
    %22 = arith.mulf %8, %21 : vector<1x64xf32>
    %23 = arith.subf %4, %22 : vector<1x64xf32>
    %24 = vector.broadcast %21 : vector<1x64xf32> to vector<450x64xf32>
    %25 = arith.mulf %2, %24 : vector<450x64xf32>
    %26 = vector.broadcast %23 : vector<1x64xf32> to vector<450x64xf32>
    %27 = arith.addf %25, %26 : vector<450x64xf32>
    %cst_13 = arith.constant 0.000000e+00 : f32
    %28 = vector.broadcast %cst_13 : f32 to vector<450x64xf32>
    %29 = arith.maximumf %27, %28 : vector<450x64xf32>
    %30 = arith.truncf %29 : vector<450x64xf32> to vector<450x64xbf16>
    %c0_14 = arith.constant 0 : index
    %c0_15 = arith.constant 0 : index
    %c0_16 = arith.constant 0 : index
    %31 = vector.load %arg4[%c0_14, %c0_15, %c0_16] : memref<9x98x450xbf16, #tpu.memory_space<vmem>>, vector<1x98x450xbf16>
    %32 = vector.shape_cast %31 : vector<1x98x450xbf16> to vector<98x450xbf16>
    %cst_17 = arith.constant dense<0.000000e+00> : vector<98x64xf32>
    %33 = tpu.matmul %32, %30, %cst_17 {dimension_numbers = #tpu.dot_dimension_numbers<[1], [0], [0], [1], [0, 0, 1, 1], [], []>} : vector<98x450xbf16>, vector<450x64xbf16>, vector<98x64xf32> -> vector<98x64xf32>
    %34 = arith.truncf %33 : vector<98x64xf32> to vector<98x64xbf16>
    %c0_18 = arith.constant 0 : index
    %c0_19 = arith.constant 0 : index
    %c0_20 = arith.constant 0 : index
    %35 = vector.load %arg5[%c0_18, %c0_19, %c0_20] : memref<9x64x128xbf16, #tpu.memory_space<vmem>>, vector<1x64x128xbf16>
    %36 = vector.shape_cast %35 : vector<1x64x128xbf16> to vector<64x128xbf16>
    %cst_21 = arith.constant dense<0.000000e+00> : vector<98x128xf32>
    %37 = tpu.matmul %34, %36, %cst_21 {dimension_numbers = #tpu.dot_dimension_numbers<[1], [0], [0], [1], [0, 0, 1, 1], [], []>} : vector<98x64xbf16>, vector<64x128xbf16>, vector<98x128xf32> -> vector<98x128xf32>
    %c1 = arith.constant 1 : index
    %c0_22 = arith.constant 0 : index
    %c0_23 = arith.constant 0 : index
    %38 = vector.load %arg4[%c1, %c0_22, %c0_23] : memref<9x98x450xbf16, #tpu.memory_space<vmem>>, vector<1x98x450xbf16>
    %39 = vector.shape_cast %38 : vector<1x98x450xbf16> to vector<98x450xbf16>
    %cst_24 = arith.constant dense<0.000000e+00> : vector<98x64xf32>
    %40 = tpu.matmul %39, %30, %cst_24 {dimension_numbers = #tpu.dot_dimension_numbers<[1], [0], [0], [1], [0, 0, 1, 1], [], []>} : vector<98x450xbf16>, vector<450x64xbf16>, vector<98x64xf32> -> vector<98x64xf32>
    %41 = arith.truncf %40 : vector<98x64xf32> to vector<98x64xbf16>
    %c1_25 = arith.constant 1 : index
    %c0_26 = arith.constant 0 : index
    %c0_27 = arith.constant 0 : index
    %42 = vector.load %arg5[%c1_25, %c0_26, %c0_27] : memref<9x64x128xbf16, #tpu.memory_space<vmem>>, vector<1x64x128xbf16>
    %43 = vector.shape_cast %42 : vector<1x64x128xbf16> to vector<64x128xbf16>
    %cst_28 = arith.constant dense<0.000000e+00> : vector<98x128xf32>
    %44 = tpu.matmul %41, %43, %cst_28 {dimension_numbers = #tpu.dot_dimension_numbers<[1], [0], [0], [1], [0, 0, 1, 1], [], []>} : vector<98x64xbf16>, vector<64x128xbf16>, vector<98x128xf32> -> vector<98x128xf32>
    %45 = arith.addf %37, %44 : vector<98x128xf32>
    %c2 = arith.constant 2 : index
    %c0_29 = arith.constant 0 : index
    %c0_30 = arith.constant 0 : index
    %46 = vector.load %arg4[%c2, %c0_29, %c0_30] : memref<9x98x450xbf16, #tpu.memory_space<vmem>>, vector<1x98x450xbf16>
    %47 = vector.shape_cast %46 : vector<1x98x450xbf16> to vector<98x450xbf16>
    %cst_31 = arith.constant dense<0.000000e+00> : vector<98x64xf32>
    %48 = tpu.matmul %47, %30, %cst_31 {dimension_numbers = #tpu.dot_dimension_numbers<[1], [0], [0], [1], [0, 0, 1, 1], [], []>} : vector<98x450xbf16>, vector<450x64xbf16>, vector<98x64xf32> -> vector<98x64xf32>
    %49 = arith.truncf %48 : vector<98x64xf32> to vector<98x64xbf16>
    %c2_32 = arith.constant 2 : index
    %c0_33 = arith.constant 0 : index
    %c0_34 = arith.constant 0 : index
    %50 = vector.load %arg5[%c2_32, %c0_33, %c0_34] : memref<9x64x128xbf16, #tpu.memory_space<vmem>>, vector<1x64x128xbf16>
    %51 = vector.shape_cast %50 : vector<1x64x128xbf16> to vector<64x128xbf16>
    %cst_35 = arith.constant dense<0.000000e+00> : vector<98x128xf32>
    %52 = tpu.matmul %49, %51, %cst_35 {dimension_numbers = #tpu.dot_dimension_numbers<[1], [0], [0], [1], [0, 0, 1, 1], [], []>} : vector<98x64xbf16>, vector<64x128xbf16>, vector<98x128xf32> -> vector<98x128xf32>
    %53 = arith.addf %45, %52 : vector<98x128xf32>
    %c3 = arith.constant 3 : index
    %c0_36 = arith.constant 0 : index
    %c0_37 = arith.constant 0 : index
    %54 = vector.load %arg4[%c3, %c0_36, %c0_37] : memref<9x98x450xbf16, #tpu.memory_space<vmem>>, vector<1x98x450xbf16>
    %55 = vector.shape_cast %54 : vector<1x98x450xbf16> to vector<98x450xbf16>
    %cst_38 = arith.constant dense<0.000000e+00> : vector<98x64xf32>
    %56 = tpu.matmul %55, %30, %cst_38 {dimension_numbers = #tpu.dot_dimension_numbers<[1], [0], [0], [1], [0, 0, 1, 1], [], []>} : vector<98x450xbf16>, vector<450x64xbf16>, vector<98x64xf32> -> vector<98x64xf32>
    %57 = arith.truncf %56 : vector<98x64xf32> to vector<98x64xbf16>
    %c3_39 = arith.constant 3 : index
    %c0_40 = arith.constant 0 : index
    %c0_41 = arith.constant 0 : index
    %58 = vector.load %arg5[%c3_39, %c0_40, %c0_41] : memref<9x64x128xbf16, #tpu.memory_space<vmem>>, vector<1x64x128xbf16>
    %59 = vector.shape_cast %58 : vector<1x64x128xbf16> to vector<64x128xbf16>
    %cst_42 = arith.constant dense<0.000000e+00> : vector<98x128xf32>
    %60 = tpu.matmul %57, %59, %cst_42 {dimension_numbers = #tpu.dot_dimension_numbers<[1], [0], [0], [1], [0, 0, 1, 1], [], []>} : vector<98x64xbf16>, vector<64x128xbf16>, vector<98x128xf32> -> vector<98x128xf32>
    %61 = arith.addf %53, %60 : vector<98x128xf32>
    %c4 = arith.constant 4 : index
    %c0_43 = arith.constant 0 : index
    %c0_44 = arith.constant 0 : index
    %62 = vector.load %arg4[%c4, %c0_43, %c0_44] : memref<9x98x450xbf16, #tpu.memory_space<vmem>>, vector<1x98x450xbf16>
    %63 = vector.shape_cast %62 : vector<1x98x450xbf16> to vector<98x450xbf16>
    %cst_45 = arith.constant dense<0.000000e+00> : vector<98x64xf32>
    %64 = tpu.matmul %63, %30, %cst_45 {dimension_numbers = #tpu.dot_dimension_numbers<[1], [0], [0], [1], [0, 0, 1, 1], [], []>} : vector<98x450xbf16>, vector<450x64xbf16>, vector<98x64xf32> -> vector<98x64xf32>
    %65 = arith.truncf %64 : vector<98x64xf32> to vector<98x64xbf16>
    %c4_46 = arith.constant 4 : index
    %c0_47 = arith.constant 0 : index
    %c0_48 = arith.constant 0 : index
    %66 = vector.load %arg5[%c4_46, %c0_47, %c0_48] : memref<9x64x128xbf16, #tpu.memory_space<vmem>>, vector<1x64x128xbf16>
    %67 = vector.shape_cast %66 : vector<1x64x128xbf16> to vector<64x128xbf16>
    %cst_49 = arith.constant dense<0.000000e+00> : vector<98x128xf32>
    %68 = tpu.matmul %65, %67, %cst_49 {dimension_numbers = #tpu.dot_dimension_numbers<[1], [0], [0], [1], [0, 0, 1, 1], [], []>} : vector<98x64xbf16>, vector<64x128xbf16>, vector<98x128xf32> -> vector<98x128xf32>
    %69 = arith.addf %61, %68 : vector<98x128xf32>
    %c5 = arith.constant 5 : index
    %c0_50 = arith.constant 0 : index
    %c0_51 = arith.constant 0 : index
    %70 = vector.load %arg4[%c5, %c0_50, %c0_51] : memref<9x98x450xbf16, #tpu.memory_space<vmem>>, vector<1x98x450xbf16>
    %71 = vector.shape_cast %70 : vector<1x98x450xbf16> to vector<98x450xbf16>
    %cst_52 = arith.constant dense<0.000000e+00> : vector<98x64xf32>
    %72 = tpu.matmul %71, %30, %cst_52 {dimension_numbers = #tpu.dot_dimension_numbers<[1], [0], [0], [1], [0, 0, 1, 1], [], []>} : vector<98x450xbf16>, vector<450x64xbf16>, vector<98x64xf32> -> vector<98x64xf32>
    %73 = arith.truncf %72 : vector<98x64xf32> to vector<98x64xbf16>
    %c5_53 = arith.constant 5 : index
    %c0_54 = arith.constant 0 : index
    %c0_55 = arith.constant 0 : index
    %74 = vector.load %arg5[%c5_53, %c0_54, %c0_55] : memref<9x64x128xbf16, #tpu.memory_space<vmem>>, vector<1x64x128xbf16>
    %75 = vector.shape_cast %74 : vector<1x64x128xbf16> to vector<64x128xbf16>
    %cst_56 = arith.constant dense<0.000000e+00> : vector<98x128xf32>
    %76 = tpu.matmul %73, %75, %cst_56 {dimension_numbers = #tpu.dot_dimension_numbers<[1], [0], [0], [1], [0, 0, 1, 1], [], []>} : vector<98x64xbf16>, vector<64x128xbf16>, vector<98x128xf32> -> vector<98x128xf32>
    %77 = arith.addf %69, %76 : vector<98x128xf32>
    %c6 = arith.constant 6 : index
    %c0_57 = arith.constant 0 : index
    %c0_58 = arith.constant 0 : index
    %78 = vector.load %arg4[%c6, %c0_57, %c0_58] : memref<9x98x450xbf16, #tpu.memory_space<vmem>>, vector<1x98x450xbf16>
    %79 = vector.shape_cast %78 : vector<1x98x450xbf16> to vector<98x450xbf16>
    %cst_59 = arith.constant dense<0.000000e+00> : vector<98x64xf32>
    %80 = tpu.matmul %79, %30, %cst_59 {dimension_numbers = #tpu.dot_dimension_numbers<[1], [0], [0], [1], [0, 0, 1, 1], [], []>} : vector<98x450xbf16>, vector<450x64xbf16>, vector<98x64xf32> -> vector<98x64xf32>
    %81 = arith.truncf %80 : vector<98x64xf32> to vector<98x64xbf16>
    %c6_60 = arith.constant 6 : index
    %c0_61 = arith.constant 0 : index
    %c0_62 = arith.constant 0 : index
    %82 = vector.load %arg5[%c6_60, %c0_61, %c0_62] : memref<9x64x128xbf16, #tpu.memory_space<vmem>>, vector<1x64x128xbf16>
    %83 = vector.shape_cast %82 : vector<1x64x128xbf16> to vector<64x128xbf16>
    %cst_63 = arith.constant dense<0.000000e+00> : vector<98x128xf32>
    %84 = tpu.matmul %81, %83, %cst_63 {dimension_numbers = #tpu.dot_dimension_numbers<[1], [0], [0], [1], [0, 0, 1, 1], [], []>} : vector<98x64xbf16>, vector<64x128xbf16>, vector<98x128xf32> -> vector<98x128xf32>
    %85 = arith.addf %77, %84 : vector<98x128xf32>
    %c7 = arith.constant 7 : index
    %c0_64 = arith.constant 0 : index
    %c0_65 = arith.constant 0 : index
    %86 = vector.load %arg4[%c7, %c0_64, %c0_65] : memref<9x98x450xbf16, #tpu.memory_space<vmem>>, vector<1x98x450xbf16>
    %87 = vector.shape_cast %86 : vector<1x98x450xbf16> to vector<98x450xbf16>
    %cst_66 = arith.constant dense<0.000000e+00> : vector<98x64xf32>
    %88 = tpu.matmul %87, %30, %cst_66 {dimension_numbers = #tpu.dot_dimension_numbers<[1], [0], [0], [1], [0, 0, 1, 1], [], []>} : vector<98x450xbf16>, vector<450x64xbf16>, vector<98x64xf32> -> vector<98x64xf32>
    %89 = arith.truncf %88 : vector<98x64xf32> to vector<98x64xbf16>
    %c7_67 = arith.constant 7 : index
    %c0_68 = arith.constant 0 : index
    %c0_69 = arith.constant 0 : index
    %90 = vector.load %arg5[%c7_67, %c0_68, %c0_69] : memref<9x64x128xbf16, #tpu.memory_space<vmem>>, vector<1x64x128xbf16>
    %91 = vector.shape_cast %90 : vector<1x64x128xbf16> to vector<64x128xbf16>
    %cst_70 = arith.constant dense<0.000000e+00> : vector<98x128xf32>
    %92 = tpu.matmul %89, %91, %cst_70 {dimension_numbers = #tpu.dot_dimension_numbers<[1], [0], [0], [1], [0, 0, 1, 1], [], []>} : vector<98x64xbf16>, vector<64x128xbf16>, vector<98x128xf32> -> vector<98x128xf32>
    %93 = arith.addf %85, %92 : vector<98x128xf32>
    %c8 = arith.constant 8 : index
    %c0_71 = arith.constant 0 : index
    %c0_72 = arith.constant 0 : index
    %94 = vector.load %arg4[%c8, %c0_71, %c0_72] : memref<9x98x450xbf16, #tpu.memory_space<vmem>>, vector<1x98x450xbf16>
    %95 = vector.shape_cast %94 : vector<1x98x450xbf16> to vector<98x450xbf16>
    %cst_73 = arith.constant dense<0.000000e+00> : vector<98x64xf32>
    %96 = tpu.matmul %95, %30, %cst_73 {dimension_numbers = #tpu.dot_dimension_numbers<[1], [0], [0], [1], [0, 0, 1, 1], [], []>} : vector<98x450xbf16>, vector<450x64xbf16>, vector<98x64xf32> -> vector<98x64xf32>
    %97 = arith.truncf %96 : vector<98x64xf32> to vector<98x64xbf16>
    %c8_74 = arith.constant 8 : index
    %c0_75 = arith.constant 0 : index
    %c0_76 = arith.constant 0 : index
    %98 = vector.load %arg5[%c8_74, %c0_75, %c0_76] : memref<9x64x128xbf16, #tpu.memory_space<vmem>>, vector<1x64x128xbf16>
    %99 = vector.shape_cast %98 : vector<1x64x128xbf16> to vector<64x128xbf16>
    %cst_77 = arith.constant dense<0.000000e+00> : vector<98x128xf32>
    %100 = tpu.matmul %97, %99, %cst_77 {dimension_numbers = #tpu.dot_dimension_numbers<[1], [0], [0], [1], [0, 0, 1, 1], [], []>} : vector<98x64xbf16>, vector<64x128xbf16>, vector<98x128xf32> -> vector<98x128xf32>
    %101 = arith.addf %93, %100 : vector<98x128xf32>
    %c0_78 = arith.constant 0 : index
    %c0_79 = arith.constant 0 : index
    %102 = vector.load %arg6[%c0_78, %c0_79] : memref<1x128xf32, #tpu.memory_space<vmem>>, vector<1x128xf32>
    %c0_80 = arith.constant 0 : index
    %c0_81 = arith.constant 0 : index
    %103 = vector.load %arg7[%c0_80, %c0_81] : memref<1x128xf32, #tpu.memory_space<vmem>>, vector<1x128xf32>
    %cst_82 = arith.constant dense<0.000000e+00> : vector<128xf32>
    %104 = vector.multi_reduction <add>, %101, %cst_82 [0] : vector<98x128xf32> to vector<128xf32>
    %105 = vector.shape_cast %104 : vector<128xf32> to vector<1x128xf32>
    %cst_83 = arith.constant 0.0102040814 : f32
    %106 = vector.broadcast %cst_83 : f32 to vector<1x128xf32>
    %107 = arith.mulf %105, %106 : vector<1x128xf32>
    %108 = arith.mulf %101, %101 : vector<98x128xf32>
    %cst_84 = arith.constant dense<0.000000e+00> : vector<128xf32>
    %109 = vector.multi_reduction <add>, %108, %cst_84 [0] : vector<98x128xf32> to vector<128xf32>
    %110 = vector.shape_cast %109 : vector<128xf32> to vector<1x128xf32>
    %cst_85 = arith.constant 0.0102040814 : f32
    %111 = vector.broadcast %cst_85 : f32 to vector<1x128xf32>
    %112 = arith.mulf %110, %111 : vector<1x128xf32>
    %113 = arith.mulf %107, %107 : vector<1x128xf32>
    %114 = arith.subf %112, %113 : vector<1x128xf32>
    %cst_86 = arith.constant 0.000000e+00 : f32
    %115 = vector.broadcast %cst_86 : f32 to vector<1x128xf32>
    %116 = arith.maximumf %114, %115 : vector<1x128xf32>
    %cst_87 = arith.constant 9.99999974E-6 : f32
    %117 = vector.broadcast %cst_87 : f32 to vector<1x128xf32>
    %118 = arith.addf %116, %117 : vector<1x128xf32>
    %119 = math.rsqrt %118 : vector<1x128xf32>
    %120 = arith.mulf %102, %119 : vector<1x128xf32>
    %121 = arith.mulf %107, %120 : vector<1x128xf32>
    %122 = arith.subf %103, %121 : vector<1x128xf32>
    %123 = vector.broadcast %120 : vector<1x128xf32> to vector<98x128xf32>
    %124 = arith.mulf %101, %123 : vector<98x128xf32>
    %125 = vector.broadcast %122 : vector<1x128xf32> to vector<98x128xf32>
    %126 = arith.addf %124, %125 : vector<98x128xf32>
    %cst_88 = arith.constant 0.000000e+00 : f32
    %127 = vector.broadcast %cst_88 : f32 to vector<98x128xf32>
    %128 = arith.maximumf %126, %127 : vector<98x128xf32>
    %129 = arith.truncf %128 : vector<98x128xf32> to vector<98x128xbf16>
    %c0_89 = arith.constant 0 : index
    %c0_90 = arith.constant 0 : index
    %c0_91 = arith.constant 0 : index
    %130 = vector.load %arg8[%c0_89, %c0_90, %c0_91] : memref<9x18x98xbf16, #tpu.memory_space<vmem>>, vector<1x18x98xbf16>
    %131 = vector.shape_cast %130 : vector<1x18x98xbf16> to vector<18x98xbf16>
    %cst_92 = arith.constant dense<0.000000e+00> : vector<18x128xf32>
    %132 = tpu.matmul %131, %129, %cst_92 {dimension_numbers = #tpu.dot_dimension_numbers<[1], [0], [0], [1], [0, 0, 1, 1], [], []>} : vector<18x98xbf16>, vector<98x128xbf16>, vector<18x128xf32> -> vector<18x128xf32>
    %133 = arith.truncf %132 : vector<18x128xf32> to vector<18x128xbf16>
    %c0_93 = arith.constant 0 : index
    %c0_94 = arith.constant 0 : index
    %c0_95 = arith.constant 0 : index
    %134 = vector.load %arg9[%c0_93, %c0_94, %c0_95] : memref<9x128x256xbf16, #tpu.memory_space<vmem>>, vector<1x128x256xbf16>
    %135 = vector.shape_cast %134 : vector<1x128x256xbf16> to vector<128x256xbf16>
    %cst_96 = arith.constant dense<0.000000e+00> : vector<18x256xf32>
    %136 = tpu.matmul %133, %135, %cst_96 {dimension_numbers = #tpu.dot_dimension_numbers<[1], [0], [0], [1], [0, 0, 1, 1], [], []>} : vector<18x128xbf16>, vector<128x256xbf16>, vector<18x256xf32> -> vector<18x256xf32>
    %c1_97 = arith.constant 1 : index
    %c0_98 = arith.constant 0 : index
    %c0_99 = arith.constant 0 : index
    %137 = vector.load %arg8[%c1_97, %c0_98, %c0_99] : memref<9x18x98xbf16, #tpu.memory_space<vmem>>, vector<1x18x98xbf16>
    %138 = vector.shape_cast %137 : vector<1x18x98xbf16> to vector<18x98xbf16>
    %cst_100 = arith.constant dense<0.000000e+00> : vector<18x128xf32>
    %139 = tpu.matmul %138, %129, %cst_100 {dimension_numbers = #tpu.dot_dimension_numbers<[1], [0], [0], [1], [0, 0, 1, 1], [], []>} : vector<18x98xbf16>, vector<98x128xbf16>, vector<18x128xf32> -> vector<18x128xf32>
    %140 = arith.truncf %139 : vector<18x128xf32> to vector<18x128xbf16>
    %c1_101 = arith.constant 1 : index
    %c0_102 = arith.constant 0 : index
    %c0_103 = arith.constant 0 : index
    %141 = vector.load %arg9[%c1_101, %c0_102, %c0_103] : memref<9x128x256xbf16, #tpu.memory_space<vmem>>, vector<1x128x256xbf16>
    %142 = vector.shape_cast %141 : vector<1x128x256xbf16> to vector<128x256xbf16>
    %cst_104 = arith.constant dense<0.000000e+00> : vector<18x256xf32>
    %143 = tpu.matmul %140, %142, %cst_104 {dimension_numbers = #tpu.dot_dimension_numbers<[1], [0], [0], [1], [0, 0, 1, 1], [], []>} : vector<18x128xbf16>, vector<128x256xbf16>, vector<18x256xf32> -> vector<18x256xf32>
    %144 = arith.addf %136, %143 : vector<18x256xf32>
    %c2_105 = arith.constant 2 : index
    %c0_106 = arith.constant 0 : index
    %c0_107 = arith.constant 0 : index
    %145 = vector.load %arg8[%c2_105, %c0_106, %c0_107] : memref<9x18x98xbf16, #tpu.memory_space<vmem>>, vector<1x18x98xbf16>
    %146 = vector.shape_cast %145 : vector<1x18x98xbf16> to vector<18x98xbf16>
    %cst_108 = arith.constant dense<0.000000e+00> : vector<18x128xf32>
    %147 = tpu.matmul %146, %129, %cst_108 {dimension_numbers = #tpu.dot_dimension_numbers<[1], [0], [0], [1], [0, 0, 1, 1], [], []>} : vector<18x98xbf16>, vector<98x128xbf16>, vector<18x128xf32> -> vector<18x128xf32>
    %148 = arith.truncf %147 : vector<18x128xf32> to vector<18x128xbf16>
    %c2_109 = arith.constant 2 : index
    %c0_110 = arith.constant 0 : index
    %c0_111 = arith.constant 0 : index
    %149 = vector.load %arg9[%c2_109, %c0_110, %c0_111] : memref<9x128x256xbf16, #tpu.memory_space<vmem>>, vector<1x128x256xbf16>
    %150 = vector.shape_cast %149 : vector<1x128x256xbf16> to vector<128x256xbf16>
    %cst_112 = arith.constant dense<0.000000e+00> : vector<18x256xf32>
    %151 = tpu.matmul %148, %150, %cst_112 {dimension_numbers = #tpu.dot_dimension_numbers<[1], [0], [0], [1], [0, 0, 1, 1], [], []>} : vector<18x128xbf16>, vector<128x256xbf16>, vector<18x256xf32> -> vector<18x256xf32>
    %152 = arith.addf %144, %151 : vector<18x256xf32>
    %c3_113 = arith.constant 3 : index
    %c0_114 = arith.constant 0 : index
    %c0_115 = arith.constant 0 : index
    %153 = vector.load %arg8[%c3_113, %c0_114, %c0_115] : memref<9x18x98xbf16, #tpu.memory_space<vmem>>, vector<1x18x98xbf16>
    %154 = vector.shape_cast %153 : vector<1x18x98xbf16> to vector<18x98xbf16>
    %cst_116 = arith.constant dense<0.000000e+00> : vector<18x128xf32>
    %155 = tpu.matmul %154, %129, %cst_116 {dimension_numbers = #tpu.dot_dimension_numbers<[1], [0], [0], [1], [0, 0, 1, 1], [], []>} : vector<18x98xbf16>, vector<98x128xbf16>, vector<18x128xf32> -> vector<18x128xf32>
    %156 = arith.truncf %155 : vector<18x128xf32> to vector<18x128xbf16>
    %c3_117 = arith.constant 3 : index
    %c0_118 = arith.constant 0 : index
    %c0_119 = arith.constant 0 : index
    %157 = vector.load %arg9[%c3_117, %c0_118, %c0_119] : memref<9x128x256xbf16, #tpu.memory_space<vmem>>, vector<1x128x256xbf16>
    %158 = vector.shape_cast %157 : vector<1x128x256xbf16> to vector<128x256xbf16>
    %cst_120 = arith.constant dense<0.000000e+00> : vector<18x256xf32>
    %159 = tpu.matmul %156, %158, %cst_120 {dimension_numbers = #tpu.dot_dimension_numbers<[1], [0], [0], [1], [0, 0, 1, 1], [], []>} : vector<18x128xbf16>, vector<128x256xbf16>, vector<18x256xf32> -> vector<18x256xf32>
    %160 = arith.addf %152, %159 : vector<18x256xf32>
    %c4_121 = arith.constant 4 : index
    %c0_122 = arith.constant 0 : index
    %c0_123 = arith.constant 0 : index
    %161 = vector.load %arg8[%c4_121, %c0_122, %c0_123] : memref<9x18x98xbf16, #tpu.memory_space<vmem>>, vector<1x18x98xbf16>
    %162 = vector.shape_cast %161 : vector<1x18x98xbf16> to vector<18x98xbf16>
    %cst_124 = arith.constant dense<0.000000e+00> : vector<18x128xf32>
    %163 = tpu.matmul %162, %129, %cst_124 {dimension_numbers = #tpu.dot_dimension_numbers<[1], [0], [0], [1], [0, 0, 1, 1], [], []>} : vector<18x98xbf16>, vector<98x128xbf16>, vector<18x128xf32> -> vector<18x128xf32>
    %164 = arith.truncf %163 : vector<18x128xf32> to vector<18x128xbf16>
    %c4_125 = arith.constant 4 : index
    %c0_126 = arith.constant 0 : index
    %c0_127 = arith.constant 0 : index
    %165 = vector.load %arg9[%c4_125, %c0_126, %c0_127] : memref<9x128x256xbf16, #tpu.memory_space<vmem>>, vector<1x128x256xbf16>
    %166 = vector.shape_cast %165 : vector<1x128x256xbf16> to vector<128x256xbf16>
    %cst_128 = arith.constant dense<0.000000e+00> : vector<18x256xf32>
    %167 = tpu.matmul %164, %166, %cst_128 {dimension_numbers = #tpu.dot_dimension_numbers<[1], [0], [0], [1], [0, 0, 1, 1], [], []>} : vector<18x128xbf16>, vector<128x256xbf16>, vector<18x256xf32> -> vector<18x256xf32>
    %168 = arith.addf %160, %167 : vector<18x256xf32>
    %c5_129 = arith.constant 5 : index
    %c0_130 = arith.constant 0 : index
    %c0_131 = arith.constant 0 : index
    %169 = vector.load %arg8[%c5_129, %c0_130, %c0_131] : memref<9x18x98xbf16, #tpu.memory_space<vmem>>, vector<1x18x98xbf16>
    %170 = vector.shape_cast %169 : vector<1x18x98xbf16> to vector<18x98xbf16>
    %cst_132 = arith.constant dense<0.000000e+00> : vector<18x128xf32>
    %171 = tpu.matmul %170, %129, %cst_132 {dimension_numbers = #tpu.dot_dimension_numbers<[1], [0], [0], [1], [0, 0, 1, 1], [], []>} : vector<18x98xbf16>, vector<98x128xbf16>, vector<18x128xf32> -> vector<18x128xf32>
    %172 = arith.truncf %171 : vector<18x128xf32> to vector<18x128xbf16>
    %c5_133 = arith.constant 5 : index
    %c0_134 = arith.constant 0 : index
    %c0_135 = arith.constant 0 : index
    %173 = vector.load %arg9[%c5_133, %c0_134, %c0_135] : memref<9x128x256xbf16, #tpu.memory_space<vmem>>, vector<1x128x256xbf16>
    %174 = vector.shape_cast %173 : vector<1x128x256xbf16> to vector<128x256xbf16>
    %cst_136 = arith.constant dense<0.000000e+00> : vector<18x256xf32>
    %175 = tpu.matmul %172, %174, %cst_136 {dimension_numbers = #tpu.dot_dimension_numbers<[1], [0], [0], [1], [0, 0, 1, 1], [], []>} : vector<18x128xbf16>, vector<128x256xbf16>, vector<18x256xf32> -> vector<18x256xf32>
    %176 = arith.addf %168, %175 : vector<18x256xf32>
    %c6_137 = arith.constant 6 : index
    %c0_138 = arith.constant 0 : index
    %c0_139 = arith.constant 0 : index
    %177 = vector.load %arg8[%c6_137, %c0_138, %c0_139] : memref<9x18x98xbf16, #tpu.memory_space<vmem>>, vector<1x18x98xbf16>
    %178 = vector.shape_cast %177 : vector<1x18x98xbf16> to vector<18x98xbf16>
    %cst_140 = arith.constant dense<0.000000e+00> : vector<18x128xf32>
    %179 = tpu.matmul %178, %129, %cst_140 {dimension_numbers = #tpu.dot_dimension_numbers<[1], [0], [0], [1], [0, 0, 1, 1], [], []>} : vector<18x98xbf16>, vector<98x128xbf16>, vector<18x128xf32> -> vector<18x128xf32>
    %180 = arith.truncf %179 : vector<18x128xf32> to vector<18x128xbf16>
    %c6_141 = arith.constant 6 : index
    %c0_142 = arith.constant 0 : index
    %c0_143 = arith.constant 0 : index
    %181 = vector.load %arg9[%c6_141, %c0_142, %c0_143] : memref<9x128x256xbf16, #tpu.memory_space<vmem>>, vector<1x128x256xbf16>
    %182 = vector.shape_cast %181 : vector<1x128x256xbf16> to vector<128x256xbf16>
    %cst_144 = arith.constant dense<0.000000e+00> : vector<18x256xf32>
    %183 = tpu.matmul %180, %182, %cst_144 {dimension_numbers = #tpu.dot_dimension_numbers<[1], [0], [0], [1], [0, 0, 1, 1], [], []>} : vector<18x128xbf16>, vector<128x256xbf16>, vector<18x256xf32> -> vector<18x256xf32>
    %184 = arith.addf %176, %183 : vector<18x256xf32>
    %c7_145 = arith.constant 7 : index
    %c0_146 = arith.constant 0 : index
    %c0_147 = arith.constant 0 : index
    %185 = vector.load %arg8[%c7_145, %c0_146, %c0_147] : memref<9x18x98xbf16, #tpu.memory_space<vmem>>, vector<1x18x98xbf16>
    %186 = vector.shape_cast %185 : vector<1x18x98xbf16> to vector<18x98xbf16>
    %cst_148 = arith.constant dense<0.000000e+00> : vector<18x128xf32>
    %187 = tpu.matmul %186, %129, %cst_148 {dimension_numbers = #tpu.dot_dimension_numbers<[1], [0], [0], [1], [0, 0, 1, 1], [], []>} : vector<18x98xbf16>, vector<98x128xbf16>, vector<18x128xf32> -> vector<18x128xf32>
    %188 = arith.truncf %187 : vector<18x128xf32> to vector<18x128xbf16>
    %c7_149 = arith.constant 7 : index
    %c0_150 = arith.constant 0 : index
    %c0_151 = arith.constant 0 : index
    %189 = vector.load %arg9[%c7_149, %c0_150, %c0_151] : memref<9x128x256xbf16, #tpu.memory_space<vmem>>, vector<1x128x256xbf16>
    %190 = vector.shape_cast %189 : vector<1x128x256xbf16> to vector<128x256xbf16>
    %cst_152 = arith.constant dense<0.000000e+00> : vector<18x256xf32>
    %191 = tpu.matmul %188, %190, %cst_152 {dimension_numbers = #tpu.dot_dimension_numbers<[1], [0], [0], [1], [0, 0, 1, 1], [], []>} : vector<18x128xbf16>, vector<128x256xbf16>, vector<18x256xf32> -> vector<18x256xf32>
    %192 = arith.addf %184, %191 : vector<18x256xf32>
    %c8_153 = arith.constant 8 : index
    %c0_154 = arith.constant 0 : index
    %c0_155 = arith.constant 0 : index
    %193 = vector.load %arg8[%c8_153, %c0_154, %c0_155] : memref<9x18x98xbf16, #tpu.memory_space<vmem>>, vector<1x18x98xbf16>
    %194 = vector.shape_cast %193 : vector<1x18x98xbf16> to vector<18x98xbf16>
    %cst_156 = arith.constant dense<0.000000e+00> : vector<18x128xf32>
    %195 = tpu.matmul %194, %129, %cst_156 {dimension_numbers = #tpu.dot_dimension_numbers<[1], [0], [0], [1], [0, 0, 1, 1], [], []>} : vector<18x98xbf16>, vector<98x128xbf16>, vector<18x128xf32> -> vector<18x128xf32>
    %196 = arith.truncf %195 : vector<18x128xf32> to vector<18x128xbf16>
    %c8_157 = arith.constant 8 : index
    %c0_158 = arith.constant 0 : index
    %c0_159 = arith.constant 0 : index
    %197 = vector.load %arg9[%c8_157, %c0_158, %c0_159] : memref<9x128x256xbf16, #tpu.memory_space<vmem>>, vector<1x128x256xbf16>
    %198 = vector.shape_cast %197 : vector<1x128x256xbf16> to vector<128x256xbf16>
    %cst_160 = arith.constant dense<0.000000e+00> : vector<18x256xf32>
    %199 = tpu.matmul %196, %198, %cst_160 {dimension_numbers = #tpu.dot_dimension_numbers<[1], [0], [0], [1], [0, 0, 1, 1], [], []>} : vector<18x128xbf16>, vector<128x256xbf16>, vector<18x256xf32> -> vector<18x256xf32>
    %200 = arith.addf %192, %199 : vector<18x256xf32>
    %c0_161 = arith.constant 0 : index
    %c0_162 = arith.constant 0 : index
    %201 = vector.load %arg10[%c0_161, %c0_162] : memref<1x256xf32, #tpu.memory_space<vmem>>, vector<1x256xf32>
    %c0_163 = arith.constant 0 : index
    %c0_164 = arith.constant 0 : index
    %202 = vector.load %arg11[%c0_163, %c0_164] : memref<1x256xf32, #tpu.memory_space<vmem>>, vector<1x256xf32>
    %cst_165 = arith.constant dense<0.000000e+00> : vector<256xf32>
    %203 = vector.multi_reduction <add>, %200, %cst_165 [0] : vector<18x256xf32> to vector<256xf32>
    %204 = vector.shape_cast %203 : vector<256xf32> to vector<1x256xf32>
    %cst_166 = arith.constant 0.055555556 : f32
    %205 = vector.broadcast %cst_166 : f32 to vector<1x256xf32>
    %206 = arith.mulf %204, %205 : vector<1x256xf32>
    %207 = arith.mulf %200, %200 : vector<18x256xf32>
    %cst_167 = arith.constant dense<0.000000e+00> : vector<256xf32>
    %208 = vector.multi_reduction <add>, %207, %cst_167 [0] : vector<18x256xf32> to vector<256xf32>
    %209 = vector.shape_cast %208 : vector<256xf32> to vector<1x256xf32>
    %cst_168 = arith.constant 0.055555556 : f32
    %210 = vector.broadcast %cst_168 : f32 to vector<1x256xf32>
    %211 = arith.mulf %209, %210 : vector<1x256xf32>
    %212 = arith.mulf %206, %206 : vector<1x256xf32>
    %213 = arith.subf %211, %212 : vector<1x256xf32>
    %cst_169 = arith.constant 0.000000e+00 : f32
    %214 = vector.broadcast %cst_169 : f32 to vector<1x256xf32>
    %215 = arith.maximumf %213, %214 : vector<1x256xf32>
    %cst_170 = arith.constant 9.99999974E-6 : f32
    %216 = vector.broadcast %cst_170 : f32 to vector<1x256xf32>
    %217 = arith.addf %215, %216 : vector<1x256xf32>
    %218 = math.rsqrt %217 : vector<1x256xf32>
    %219 = arith.mulf %201, %218 : vector<1x256xf32>
    %220 = arith.mulf %206, %219 : vector<1x256xf32>
    %221 = arith.subf %202, %220 : vector<1x256xf32>
    %222 = vector.broadcast %219 : vector<1x256xf32> to vector<18x256xf32>
    %223 = arith.mulf %200, %222 : vector<18x256xf32>
    %224 = vector.broadcast %221 : vector<1x256xf32> to vector<18x256xf32>
    %225 = arith.addf %223, %224 : vector<18x256xf32>
    %cst_171 = arith.constant 0.000000e+00 : f32
    %226 = vector.broadcast %cst_171 : f32 to vector<18x256xf32>
    %227 = arith.maximumf %225, %226 : vector<18x256xf32>
    %228 = arith.truncf %227 : vector<18x256xf32> to vector<18x256xbf16>
    %c0_172 = arith.constant 0 : index
    %c0_173 = arith.constant 0 : index
    %c0_174 = arith.constant 0 : index
    %229 = vector.load %arg12[%c0_172, %c0_173, %c0_174] : memref<9x2x18xbf16, #tpu.memory_space<vmem>>, vector<1x2x18xbf16>
    %230 = vector.shape_cast %229 : vector<1x2x18xbf16> to vector<2x18xbf16>
    %cst_175 = arith.constant dense<0.000000e+00> : vector<2x256xf32>
    %231 = tpu.matmul %230, %228, %cst_175 {dimension_numbers = #tpu.dot_dimension_numbers<[1], [0], [0], [1], [0, 0, 1, 1], [], []>} : vector<2x18xbf16>, vector<18x256xbf16>, vector<2x256xf32> -> vector<2x256xf32>
    %232 = arith.truncf %231 : vector<2x256xf32> to vector<2x256xbf16>
    %c0_176 = arith.constant 0 : index
    %c0_177 = arith.constant 0 : index
    %c0_178 = arith.constant 0 : index
    %233 = vector.load %arg13[%c0_176, %c0_177, %c0_178] : memref<9x256x1xbf16, #tpu.memory_space<vmem>>, vector<1x256x1xbf16>
    %234 = vector.shape_cast %233 : vector<1x256x1xbf16> to vector<256x1xbf16>
    %cst_179 = arith.constant dense<0.000000e+00> : vector<2x1xf32>
    %235 = tpu.matmul %232, %234, %cst_179 {dimension_numbers = #tpu.dot_dimension_numbers<[1], [0], [0], [1], [0, 0, 1, 1], [], []>} : vector<2x256xbf16>, vector<256x1xbf16>, vector<2x1xf32> -> vector<2x1xf32>
    %c1_180 = arith.constant 1 : index
    %c0_181 = arith.constant 0 : index
    %c0_182 = arith.constant 0 : index
    %236 = vector.load %arg12[%c1_180, %c0_181, %c0_182] : memref<9x2x18xbf16, #tpu.memory_space<vmem>>, vector<1x2x18xbf16>
    %237 = vector.shape_cast %236 : vector<1x2x18xbf16> to vector<2x18xbf16>
    %cst_183 = arith.constant dense<0.000000e+00> : vector<2x256xf32>
    %238 = tpu.matmul %237, %228, %cst_183 {dimension_numbers = #tpu.dot_dimension_numbers<[1], [0], [0], [1], [0, 0, 1, 1], [], []>} : vector<2x18xbf16>, vector<18x256xbf16>, vector<2x256xf32> -> vector<2x256xf32>
    %239 = arith.truncf %238 : vector<2x256xf32> to vector<2x256xbf16>
    %c1_184 = arith.constant 1 : index
    %c0_185 = arith.constant 0 : index
    %c0_186 = arith.constant 0 : index
    %240 = vector.load %arg13[%c1_184, %c0_185, %c0_186] : memref<9x256x1xbf16, #tpu.memory_space<vmem>>, vector<1x256x1xbf16>
    %241 = vector.shape_cast %240 : vector<1x256x1xbf16> to vector<256x1xbf16>
    %cst_187 = arith.constant dense<0.000000e+00> : vector<2x1xf32>
    %242 = tpu.matmul %239, %241, %cst_187 {dimension_numbers = #tpu.dot_dimension_numbers<[1], [0], [0], [1], [0, 0, 1, 1], [], []>} : vector<2x256xbf16>, vector<256x1xbf16>, vector<2x1xf32> -> vector<2x1xf32>
    %243 = arith.addf %235, %242 : vector<2x1xf32>
    %c2_188 = arith.constant 2 : index
    %c0_189 = arith.constant 0 : index
    %c0_190 = arith.constant 0 : index
    %244 = vector.load %arg12[%c2_188, %c0_189, %c0_190] : memref<9x2x18xbf16, #tpu.memory_space<vmem>>, vector<1x2x18xbf16>
    %245 = vector.shape_cast %244 : vector<1x2x18xbf16> to vector<2x18xbf16>
    %cst_191 = arith.constant dense<0.000000e+00> : vector<2x256xf32>
    %246 = tpu.matmul %245, %228, %cst_191 {dimension_numbers = #tpu.dot_dimension_numbers<[1], [0], [0], [1], [0, 0, 1, 1], [], []>} : vector<2x18xbf16>, vector<18x256xbf16>, vector<2x256xf32> -> vector<2x256xf32>
    %247 = arith.truncf %246 : vector<2x256xf32> to vector<2x256xbf16>
    %c2_192 = arith.constant 2 : index
    %c0_193 = arith.constant 0 : index
    %c0_194 = arith.constant 0 : index
    %248 = vector.load %arg13[%c2_192, %c0_193, %c0_194] : memref<9x256x1xbf16, #tpu.memory_space<vmem>>, vector<1x256x1xbf16>
    %249 = vector.shape_cast %248 : vector<1x256x1xbf16> to vector<256x1xbf16>
    %cst_195 = arith.constant dense<0.000000e+00> : vector<2x1xf32>
    %250 = tpu.matmul %247, %249, %cst_195 {dimension_numbers = #tpu.dot_dimension_numbers<[1], [0], [0], [1], [0, 0, 1, 1], [], []>} : vector<2x256xbf16>, vector<256x1xbf16>, vector<2x1xf32> -> vector<2x1xf32>
    %251 = arith.addf %243, %250 : vector<2x1xf32>
    %c3_196 = arith.constant 3 : index
    %c0_197 = arith.constant 0 : index
    %c0_198 = arith.constant 0 : index
    %252 = vector.load %arg12[%c3_196, %c0_197, %c0_198] : memref<9x2x18xbf16, #tpu.memory_space<vmem>>, vector<1x2x18xbf16>
    %253 = vector.shape_cast %252 : vector<1x2x18xbf16> to vector<2x18xbf16>
    %cst_199 = arith.constant dense<0.000000e+00> : vector<2x256xf32>
    %254 = tpu.matmul %253, %228, %cst_199 {dimension_numbers = #tpu.dot_dimension_numbers<[1], [0], [0], [1], [0, 0, 1, 1], [], []>} : vector<2x18xbf16>, vector<18x256xbf16>, vector<2x256xf32> -> vector<2x256xf32>
    %255 = arith.truncf %254 : vector<2x256xf32> to vector<2x256xbf16>
    %c3_200 = arith.constant 3 : index
    %c0_201 = arith.constant 0 : index
    %c0_202 = arith.constant 0 : index
    %256 = vector.load %arg13[%c3_200, %c0_201, %c0_202] : memref<9x256x1xbf16, #tpu.memory_space<vmem>>, vector<1x256x1xbf16>
    %257 = vector.shape_cast %256 : vector<1x256x1xbf16> to vector<256x1xbf16>
    %cst_203 = arith.constant dense<0.000000e+00> : vector<2x1xf32>
    %258 = tpu.matmul %255, %257, %cst_203 {dimension_numbers = #tpu.dot_dimension_numbers<[1], [0], [0], [1], [0, 0, 1, 1], [], []>} : vector<2x256xbf16>, vector<256x1xbf16>, vector<2x1xf32> -> vector<2x1xf32>
    %259 = arith.addf %251, %258 : vector<2x1xf32>
    %c4_204 = arith.constant 4 : index
    %c0_205 = arith.constant 0 : index
    %c0_206 = arith.constant 0 : index
    %260 = vector.load %arg12[%c4_204, %c0_205, %c0_206] : memref<9x2x18xbf16, #tpu.memory_space<vmem>>, vector<1x2x18xbf16>
    %261 = vector.shape_cast %260 : vector<1x2x18xbf16> to vector<2x18xbf16>
    %cst_207 = arith.constant dense<0.000000e+00> : vector<2x256xf32>
    %262 = tpu.matmul %261, %228, %cst_207 {dimension_numbers = #tpu.dot_dimension_numbers<[1], [0], [0], [1], [0, 0, 1, 1], [], []>} : vector<2x18xbf16>, vector<18x256xbf16>, vector<2x256xf32> -> vector<2x256xf32>
    %263 = arith.truncf %262 : vector<2x256xf32> to vector<2x256xbf16>
    %c4_208 = arith.constant 4 : index
    %c0_209 = arith.constant 0 : index
    %c0_210 = arith.constant 0 : index
    %264 = vector.load %arg13[%c4_208, %c0_209, %c0_210] : memref<9x256x1xbf16, #tpu.memory_space<vmem>>, vector<1x256x1xbf16>
    %265 = vector.shape_cast %264 : vector<1x256x1xbf16> to vector<256x1xbf16>
    %cst_211 = arith.constant dense<0.000000e+00> : vector<2x1xf32>
    %266 = tpu.matmul %263, %265, %cst_211 {dimension_numbers = #tpu.dot_dimension_numbers<[1], [0], [0], [1], [0, 0, 1, 1], [], []>} : vector<2x256xbf16>, vector<256x1xbf16>, vector<2x1xf32> -> vector<2x1xf32>
    %267 = arith.addf %259, %266 : vector<2x1xf32>
    %c5_212 = arith.constant 5 : index
    %c0_213 = arith.constant 0 : index
    %c0_214 = arith.constant 0 : index
    %268 = vector.load %arg12[%c5_212, %c0_213, %c0_214] : memref<9x2x18xbf16, #tpu.memory_space<vmem>>, vector<1x2x18xbf16>
    %269 = vector.shape_cast %268 : vector<1x2x18xbf16> to vector<2x18xbf16>
    %cst_215 = arith.constant dense<0.000000e+00> : vector<2x256xf32>
    %270 = tpu.matmul %269, %228, %cst_215 {dimension_numbers = #tpu.dot_dimension_numbers<[1], [0], [0], [1], [0, 0, 1, 1], [], []>} : vector<2x18xbf16>, vector<18x256xbf16>, vector<2x256xf32> -> vector<2x256xf32>
    %271 = arith.truncf %270 : vector<2x256xf32> to vector<2x256xbf16>
    %c5_216 = arith.constant 5 : index
    %c0_217 = arith.constant 0 : index
    %c0_218 = arith.constant 0 : index
    %272 = vector.load %arg13[%c5_216, %c0_217, %c0_218] : memref<9x256x1xbf16, #tpu.memory_space<vmem>>, vector<1x256x1xbf16>
    %273 = vector.shape_cast %272 : vector<1x256x1xbf16> to vector<256x1xbf16>
    %cst_219 = arith.constant dense<0.000000e+00> : vector<2x1xf32>
    %274 = tpu.matmul %271, %273, %cst_219 {dimension_numbers = #tpu.dot_dimension_numbers<[1], [0], [0], [1], [0, 0, 1, 1], [], []>} : vector<2x256xbf16>, vector<256x1xbf16>, vector<2x1xf32> -> vector<2x1xf32>
    %275 = arith.addf %267, %274 : vector<2x1xf32>
    %c6_220 = arith.constant 6 : index
    %c0_221 = arith.constant 0 : index
    %c0_222 = arith.constant 0 : index
    %276 = vector.load %arg12[%c6_220, %c0_221, %c0_222] : memref<9x2x18xbf16, #tpu.memory_space<vmem>>, vector<1x2x18xbf16>
    %277 = vector.shape_cast %276 : vector<1x2x18xbf16> to vector<2x18xbf16>
    %cst_223 = arith.constant dense<0.000000e+00> : vector<2x256xf32>
    %278 = tpu.matmul %277, %228, %cst_223 {dimension_numbers = #tpu.dot_dimension_numbers<[1], [0], [0], [1], [0, 0, 1, 1], [], []>} : vector<2x18xbf16>, vector<18x256xbf16>, vector<2x256xf32> -> vector<2x256xf32>
    %279 = arith.truncf %278 : vector<2x256xf32> to vector<2x256xbf16>
    %c6_224 = arith.constant 6 : index
    %c0_225 = arith.constant 0 : index
    %c0_226 = arith.constant 0 : index
    %280 = vector.load %arg13[%c6_224, %c0_225, %c0_226] : memref<9x256x1xbf16, #tpu.memory_space<vmem>>, vector<1x256x1xbf16>
    %281 = vector.shape_cast %280 : vector<1x256x1xbf16> to vector<256x1xbf16>
    %cst_227 = arith.constant dense<0.000000e+00> : vector<2x1xf32>
    %282 = tpu.matmul %279, %281, %cst_227 {dimension_numbers = #tpu.dot_dimension_numbers<[1], [0], [0], [1], [0, 0, 1, 1], [], []>} : vector<2x256xbf16>, vector<256x1xbf16>, vector<2x1xf32> -> vector<2x1xf32>
    %283 = arith.addf %275, %282 : vector<2x1xf32>
    %c7_228 = arith.constant 7 : index
    %c0_229 = arith.constant 0 : index
    %c0_230 = arith.constant 0 : index
    %284 = vector.load %arg12[%c7_228, %c0_229, %c0_230] : memref<9x2x18xbf16, #tpu.memory_space<vmem>>, vector<1x2x18xbf16>
    %285 = vector.shape_cast %284 : vector<1x2x18xbf16> to vector<2x18xbf16>
    %cst_231 = arith.constant dense<0.000000e+00> : vector<2x256xf32>
    %286 = tpu.matmul %285, %228, %cst_231 {dimension_numbers = #tpu.dot_dimension_numbers<[1], [0], [0], [1], [0, 0, 1, 1], [], []>} : vector<2x18xbf16>, vector<18x256xbf16>, vector<2x256xf32> -> vector<2x256xf32>
    %287 = arith.truncf %286 : vector<2x256xf32> to vector<2x256xbf16>
    %c7_232 = arith.constant 7 : index
    %c0_233 = arith.constant 0 : index
    %c0_234 = arith.constant 0 : index
    %288 = vector.load %arg13[%c7_232, %c0_233, %c0_234] : memref<9x256x1xbf16, #tpu.memory_space<vmem>>, vector<1x256x1xbf16>
    %289 = vector.shape_cast %288 : vector<1x256x1xbf16> to vector<256x1xbf16>
    %cst_235 = arith.constant dense<0.000000e+00> : vector<2x1xf32>
    %290 = tpu.matmul %287, %289, %cst_235 {dimension_numbers = #tpu.dot_dimension_numbers<[1], [0], [0], [1], [0, 0, 1, 1], [], []>} : vector<2x256xbf16>, vector<256x1xbf16>, vector<2x1xf32> -> vector<2x1xf32>
    %291 = arith.addf %283, %290 : vector<2x1xf32>
    %c8_236 = arith.constant 8 : index
    %c0_237 = arith.constant 0 : index
    %c0_238 = arith.constant 0 : index
    %292 = vector.load %arg12[%c8_236, %c0_237, %c0_238] : memref<9x2x18xbf16, #tpu.memory_space<vmem>>, vector<1x2x18xbf16>
    %293 = vector.shape_cast %292 : vector<1x2x18xbf16> to vector<2x18xbf16>
    %cst_239 = arith.constant dense<0.000000e+00> : vector<2x256xf32>
    %294 = tpu.matmul %293, %228, %cst_239 {dimension_numbers = #tpu.dot_dimension_numbers<[1], [0], [0], [1], [0, 0, 1, 1], [], []>} : vector<2x18xbf16>, vector<18x256xbf16>, vector<2x256xf32> -> vector<2x256xf32>
    %295 = arith.truncf %294 : vector<2x256xf32> to vector<2x256xbf16>
    %c8_240 = arith.constant 8 : index
    %c0_241 = arith.constant 0 : index
    %c0_242 = arith.constant 0 : index
    %296 = vector.load %arg13[%c8_240, %c0_241, %c0_242] : memref<9x256x1xbf16, #tpu.memory_space<vmem>>, vector<1x256x1xbf16>
    %297 = vector.shape_cast %296 : vector<1x256x1xbf16> to vector<256x1xbf16>
    %cst_243 = arith.constant dense<0.000000e+00> : vector<2x1xf32>
    %298 = tpu.matmul %295, %297, %cst_243 {dimension_numbers = #tpu.dot_dimension_numbers<[1], [0], [0], [1], [0, 0, 1, 1], [], []>} : vector<2x256xbf16>, vector<256x1xbf16>, vector<2x1xf32> -> vector<2x1xf32>
    %299 = arith.addf %291, %298 : vector<2x1xf32>
    %c0_244 = arith.constant 0 : index
    %c0_245 = arith.constant 0 : index
    %300 = vector.load %arg14[%c0_244, %c0_245] : memref<1x1xf32, #tpu.memory_space<vmem>>, vector<1x1xf32>
    %c0_246 = arith.constant 0 : index
    %c0_247 = arith.constant 0 : index
    %301 = vector.load %arg15[%c0_246, %c0_247] : memref<1x1xf32, #tpu.memory_space<vmem>>, vector<1x1xf32>
    %cst_248 = arith.constant dense<0.000000e+00> : vector<1xf32>
    %302 = vector.multi_reduction <add>, %299, %cst_248 [0] : vector<2x1xf32> to vector<1xf32>
    %303 = vector.shape_cast %302 : vector<1xf32> to vector<1x1xf32>
    %cst_249 = arith.constant 5.000000e-01 : f32
    %304 = vector.broadcast %cst_249 : f32 to vector<1x1xf32>
    %305 = arith.mulf %303, %304 : vector<1x1xf32>
    %306 = arith.mulf %299, %299 : vector<2x1xf32>
    %cst_250 = arith.constant dense<0.000000e+00> : vector<1xf32>
    %307 = vector.multi_reduction <add>, %306, %cst_250 [0] : vector<2x1xf32> to vector<1xf32>
    %308 = vector.shape_cast %307 : vector<1xf32> to vector<1x1xf32>
    %cst_251 = arith.constant 5.000000e-01 : f32
    %309 = vector.broadcast %cst_251 : f32 to vector<1x1xf32>
    %310 = arith.mulf %308, %309 : vector<1x1xf32>
    %311 = arith.mulf %305, %305 : vector<1x1xf32>
    %312 = arith.subf %310, %311 : vector<1x1xf32>
    %cst_252 = arith.constant 0.000000e+00 : f32
    %313 = vector.broadcast %cst_252 : f32 to vector<1x1xf32>
    %314 = arith.maximumf %312, %313 : vector<1x1xf32>
    %cst_253 = arith.constant 9.99999974E-6 : f32
    %315 = vector.broadcast %cst_253 : f32 to vector<1x1xf32>
    %316 = arith.addf %314, %315 : vector<1x1xf32>
    %317 = math.rsqrt %316 : vector<1x1xf32>
    %318 = arith.mulf %300, %317 : vector<1x1xf32>
    %319 = arith.mulf %305, %318 : vector<1x1xf32>
    %320 = arith.subf %301, %319 : vector<1x1xf32>
    %321 = vector.broadcast %318 : vector<1x1xf32> to vector<2x1xf32>
    %322 = arith.mulf %299, %321 : vector<2x1xf32>
    %323 = vector.broadcast %320 : vector<1x1xf32> to vector<2x1xf32>
    %324 = arith.addf %322, %323 : vector<2x1xf32>
    %cst_254 = arith.constant 0.000000e+00 : f32
    %325 = vector.broadcast %cst_254 : f32 to vector<2x1xf32>
    %326 = arith.maximumf %324, %325 : vector<2x1xf32>
    %327 = arith.negf %326 : vector<2x1xf32>
    %328 = math.exp %327 : vector<2x1xf32>
    %cst_255 = arith.constant 1.000000e+00 : f32
    %329 = vector.broadcast %cst_255 : f32 to vector<2x1xf32>
    %330 = arith.addf %329, %328 : vector<2x1xf32>
    %331 = arith.divf %329, %330 : vector<2x1xf32>
    %c0_256 = arith.constant 0 : index
    %c0_257 = arith.constant 0 : index
    %332 = vector.load %arg16[%c0_256, %c0_257] : memref<2x1xf32, #tpu.memory_space<vmem>>, vector<2x1xf32>
    tpu.vector_store %arg16[%c0_256, %c0_257], %331 {strides = array<i32>} : memref<2x1xf32, #tpu.memory_space<vmem>>, vector<2x1xf32>,
    return
  }
}

</mosaic_0001>

<bundles_post_ra>
// kernel: discriminator_forward.1
= control target key start
LH: loop header
LB: loop body
LE: loop exit
PB: predicated region body
PF: predicated region fallthrough
CT: control target
= control target key end

     0   :  { %v18661_v0 = vmov 0.0   ;;  %vm14187_vm0 = vmmov 0   ;;  %vm366_vm1 = vcmask 1041408   ;;  %vm278_vm2 = vcmask 293888   ;;  %s18643_s1 = inlined_call_operand.vmem [shape: bf16[36,64], index: 1, kind: input, shape index: {}]   ;;  %s18644_s0 = inlined_call_operand.vmem [shape: bf16[450,36], index: 0, kind: input, shape index: {}]   ;;  %s18645_s4 = inlined_call_operand.vmem [shape: bf16[9,98,450], index: 4, kind: input, shape index: {}]   ;;  %s18646_s2 = inlined_call_operand.vmem [shape: f32[1,64], index: 2, kind: input, shape index: {}]   ;;  %s18647_s3 = inlined_call_operand.vmem [shape: f32[1,64], index: 3, kind: input, shape index: {}]   ;;  %s18648_s5 = inlined_call_operand.vmem [shape: bf16[9,64,128], index: 5, kind: input, shape index: {}]   ;;  %s18649_s8 = inlined_call_operand.vmem [shape: bf16[9,18,98], index: 8, kind: input, shape index: {}]   ;;  %s18650_s6 = inlined_call_operand.vmem [shape: f32[1,128], index: 6, kind: input, shape index: {}]   ;;  %s18651_s7 = inlined_call_operand.vmem [shape: f32[1,128], index: 7, kind: input, shape index: {}]   ;;  %s18652_s9 = inlined_call_operand.vmem [shape: bf16[9,128,256], index: 9, kind: input, shape index: {}]   ;;  %s18653_s13 = inlined_call_operand.vmem [shape: bf16[9,256,1], index: 13, kind: input, shape index: {}]   ;;  %s18654_s10 = inlined_call_operand.vmem [shape: f32[1,256], index: 10, kind: input, shape index: {}]   ;;  %s18655_s11 = inlined_call_operand.vmem [shape: f32[1,256], index: 11, kind: input, shape index: {}]   ;;  %s18656_s12 = inlined_call_operand.vmem [shape: bf16[9,2,18], index: 12, kind: input, shape index: {}]   ;;  %s18657_s14 = inlined_call_operand.<no memory space> [shape: f32[1,1], index: 14, kind: input, shape index: {}]   ;;  %s18658_s15 = inlined_call_operand.<no memory space> [shape: f32[1,1], index: 15, kind: input, shape index: {}]   ;;  %s18659_s16 = inlined_call_operand.vmem [shape: f32[2,1], index: 16, kind: output, shape index: {}]  }
   0x1   :  { %18697 = sst [smem:[#allocation25_spill]] %s18643_s1  ;;  %12457 = vmatprep.subr.bf16.mxu0 %v18661_v0  ;;  %12463 = vmatprep.mubr.msk.bf16.mxu0 %vm14187_vm0, %v18661_v0  ;;  %v13369_v5 = vld [vmem:[%s18644_s0] sm:$0xff]   ;;  %v13370_v6 = vld [vmem:[%s18644_s0 + $0x8] sm:$0xff]   ;;  %v13371_v7 = vld [vmem:[%s18644_s0 + $0x10] sm:$0xff]   ;;  %vm636_vm3 = vcmask 523264   ;;  %vm748_vm4 = vcmask 517120  }
   0x2   :  { %s18698_s23 = sld [smem:[#allocation25_spill]]  ;;  %v13372_v8 = vld [vmem:[%s18644_s0 + $0x18] sm:$0xff]   ;;  %v13373_v9 = vld [vmem:[%s18644_s0 + $0x20] sm:$0xff]   ;;  %v13374_v10 = vld [vmem:[%s18644_s0 + $0x28] sm:$0xff]   ;;  %vm1330_vm5 = vcmask 1040384   ;;  %vm1308_vm6 = vcmask 539648  }
   0x3   :  { %v13375_v11 = vld [vmem:[%s18644_s0 + $0x30] sm:$0xff]   ;;  %v13376_v12 = vld [vmem:[%s18644_s0 + $0x38] sm:$0xff]   ;;  %v13377_v13 = vld [vmem:[%s18644_s0 + $0x40] sm:$0xff]   ;;  %vm5881_vm7 = vcmask 801792   ;;  %vm8001_vm8 = vcmask 146432   ;;  %vm9967_vm9 = vcmask 1024  }
   0x4   :  { %v13378_v14 = vld [vmem:[%s18644_s0 + $0x48] sm:$0xff]   ;;  %v13379_v15 = vld [vmem:[%s18644_s0 + $0x50] sm:$0xff]   ;;  %v13380_v16 = vld [vmem:[%s18644_s0 + $0x58] sm:$0xff]  }
   0x5   :  { %v13381_v17 = vld [vmem:[%s18644_s0 + $0x60] sm:$0xff]   ;;  %v13382_v18 = vld [vmem:[%s18644_s0 + $0x68] sm:$0xff]   ;;  %v13383_v19 = vld [vmem:[%s18644_s0 + $0x70] sm:$0xff]  }
   0x6   :  { %v13384_v20 = vld [vmem:[%s18644_s0 + $0x78] sm:$0xff]   ;;  %v13385_v21 = vld [vmem:[%s18644_s0 + $0x80] sm:$0xff]   ;;  %v13386_v22 = vld [vmem:[%s18644_s0 + $0x88] sm:$0xff]  }
   0x7   :  { %v13387_v23 = vld [vmem:[%s18644_s0 + $0x90] sm:$0xff]   ;;  %v13388_v24 = vld [vmem:[%s18644_s0 + $0x98] sm:$0xff]   ;;  %v13389_v25 = vld [vmem:[%s18644_s0 + $0xa0] sm:$0xff]  }
   0x8   :  { %v13366_v1 = vld [vmem:[%s18698_s23] sm:$0xff]   ;;  %v13367_v2 = vld [vmem:[%s18698_s23 + $0x8] sm:$0xff]   ;;  %v13368_v3 = vld [vmem:[%s18698_s23 + $0x10] ss:$0 sps:$4 sm:$0x33]  }
   0x9   :  { %12458 = vmatpush3.bf16.msra.mxu0 %v13366_v1  ;;  %v368_v4 = vsel %vm366_vm1, %v13368_v3, 0  ;;  %v13390_v26 = vld [vmem:[%s18644_s0 + $0xa8] sm:$0xff]   ;;  %v13391_v27 = vld [vmem:[%s18644_s0 + $0xb0] sm:$0xff]   ;;  %v13392_v28 = vld [vmem:[%s18644_s0 + $0xb8] sm:$0xff]  }
   0xa   :  { %12459 = vmatprep.subr.bf16.mxu0 %v18661_v0  ;;  %v13393_v29 = vld [vmem:[%s18644_s0 + $0xc0] sm:$0xff]   ;;  %v13394_v30 = vld [vmem:[%s18644_s0 + $0xc8] sm:$0xff]   ;;  %v13395_v31 = vld [vmem:[%s18644_s0 + $0xd0] sm:$0xff]  }
   0xb   :  { %v13396_v35 = vld [vmem:[%s18644_s0 + $0xd8] sm:$0xff]   ;;  %v13397_v49 = vld [vmem:[%s18644_s0 + $0xe0] ss:$0 sps:$4 sm:$0x11]  }
   0xd   :  { %12460 = vmatpush3.bf16.msra.mxu0 %v13367_v2 }
   0xe   :  { %12461 = vmatprep.subr.bf16.mxu0 %v18661_v0 }
  0x11   :  { %12462 = vmatpush3.bf16.msra.mxu0 %v368_v4 }
  0x12   :  { %12579 = vmatprep.subr.bf16.mxu0 %v18661_v0 }
  0x14   :  { %12464 = vmatmul.mubr.msk.bf16.vlgmr.msra.gmra.mrb[0].mxu0 %vm278_vm2, %v13369_v5 }
  0x15   :  { %12467 = vmatprep.mubr.msk.bf16.mxu0 %vm14187_vm0, %v18661_v0 }
  0x1c   :  { %12468 = vmatmul.mubr.msk.bf16.gmra.mrb[4].mxu0 %vm278_vm2, %v13370_v6 }
  0x1d   :  { %12471 = vmatprep.mubr.msk.bf16.mxu0 %vm14187_vm0, %v18661_v0 }
  0x24   :  { %12472 = vmatmul.mubr.msk.bf16.gmra.mrb[8].mxu0 %vm278_vm2, %v13371_v7 }
  0x25   :  { %12475 = vmatprep.mubr.msk.bf16.mxu0 %vm14187_vm0, %v18661_v0 }
  0x2c   :  { %12476 = vmatmul.mubr.msk.bf16.gmra.mrb[12].mxu0 %vm278_vm2, %v13372_v8 }
  0x2d   :  { %12479 = vmatprep.mubr.msk.bf16.mxu0 %vm14187_vm0, %v18661_v0 }
  0x34   :  { %12480 = vmatmul.mubr.msk.bf16.gmra.mrb[16].mxu0 %vm278_vm2, %v13373_v9 }
  0x35   :  { %12483 = vmatprep.mubr.msk.bf16.mxu0 %vm14187_vm0, %v18661_v0 }
  0x3c   :  { %12484 = vmatmul.mubr.msk.bf16.gmra.mrb[20].mxu0 %vm278_vm2, %v13374_v10 }
  0x3d   :  { %12487 = vmatprep.mubr.msk.bf16.mxu0 %vm14187_vm0, %v18661_v0 }
  0x44   :  { %12488 = vmatmul.mubr.msk.bf16.gmra.mrb[24].mxu0 %vm278_vm2, %v13375_v11 }
  0x45   :  { %12491 = vmatprep.mubr.msk.bf16.mxu0 %vm14187_vm0, %v18661_v0 }
  0x4c   :  { %12492 = vmatmul.mubr.msk.bf16.gmra.mrb[28].mxu0 %vm278_vm2, %v13376_v12 }
  0x4d   :  { %12495 = vmatprep.mubr.msk.bf16.mxu0 %vm14187_vm0, %v18661_v0 }
  0x54   :  { %12496 = vmatmul.mubr.msk.bf16.gmra.mrb[32].mxu0 %vm278_vm2, %v13377_v13 }
  0x55   :  { %12499 = vmatprep.mubr.msk.bf16.mxu0 %vm14187_vm0, %v18661_v0 }
  0x5c   :  { %12500 = vmatmul.mubr.msk.bf16.gmra.mrb[36].mxu0 %vm278_vm2, %v13378_v14 }
  0x5d   :  { %12503 = vmatprep.mubr.msk.bf16.mxu0 %vm14187_vm0, %v18661_v0 }
  0x64   :  { %12504 = vmatmul.mubr.msk.bf16.gmra.mrb[40].mxu0 %vm278_vm2, %v13379_v15 }
  0x65   :  { %12507 = vmatprep.mubr.msk.bf16.mxu0 %vm14187_vm0, %v18661_v0 }
  0x6c   :  { %12508 = vmatmul.mubr.msk.bf16.gmra.mrb[44].mxu0 %vm278_vm2, %v13380_v16 }
  0x6d   :  { %12511 = vmatprep.mubr.msk.bf16.mxu0 %vm14187_vm0, %v18661_v0 }
  0x74   :  { %12512 = vmatmul.mubr.msk.bf16.gmra.mrb[48].mxu0 %vm278_vm2, %v13381_v17 }
  0x75   :  { %12515 = vmatprep.mubr.msk.bf16.mxu0 %vm14187_vm0, %v18661_v0 }
  0x7c   :  { %12516 = vmatmul.mubr.msk.bf16.gmra.mrb[52].mxu0 %vm278_vm2, %v13382_v18 }
  0x7d   :  { %12519 = vmatprep.mubr.msk.bf16.mxu0 %vm14187_vm0, %v18661_v0 }
  0x84   :  { %12520 = vmatmul.mubr.msk.bf16.gmra.mrb[56].mxu0 %vm278_vm2, %v13383_v19 }
  0x85   :  { %12523 = vmatprep.mubr.msk.bf16.mxu0 %vm14187_vm0, %v18661_v0 }
  0x8c   :  { %12524 = vmatmul.mubr.msk.bf16.gmra.mrb[60].mxu0 %vm278_vm2, %v13384_v20 }
  0x8d   :  { %12527 = vmatprep.mubr.msk.bf16.mxu0 %vm14187_vm0, %v18661_v0 }
  0x94   :  { %12528 = vmatmul.mubr.msk.bf16.gmra.mrb[64].mxu0 %vm278_vm2, %v13385_v21 }
  0x95   :  { %12531 = vmatprep.mubr.msk.bf16.mxu0 %vm14187_vm0, %v18661_v0 }
  0x9c   :  { %12532 = vmatmul.mubr.msk.bf16.gmra.mrb[68].mxu0 %vm278_vm2, %v13386_v22 }
  0x9d   :  { %12535 = vmatprep.mubr.msk.bf16.mxu0 %vm14187_vm0, %v18661_v0 }
  0xa4   :  { %12536 = vmatmul.mubr.msk.bf16.gmra.mrb[72].mxu0 %vm278_vm2, %v13387_v23 }
  0xa5   :  { %12539 = vmatprep.mubr.msk.bf16.mxu0 %vm14187_vm0, %v18661_v0 }
  0xac   :  { %12540 = vmatmul.mubr.msk.bf16.gmra.mrb[76].mxu0 %vm278_vm2, %v13388_v24 }
  0xad   :  { %12543 = vmatprep.mubr.msk.bf16.mxu0 %vm14187_vm0, %v18661_v0 }
  0xb4   :  { %12544 = vmatmul.mubr.msk.bf16.gmra.mrb[80].mxu0 %vm278_vm2, %v13389_v25 }
  0xb5   :  { %12547 = vmatprep.mubr.msk.bf16.mxu0 %vm14187_vm0, %v18661_v0 }
  0xbc   :  { %12548 = vmatmul.mubr.msk.bf16.gmra.mrb[84].mxu0 %vm278_vm2, %v13390_v26 }
  0xbd   :  { %12551 = vmatprep.mubr.msk.bf16.mxu0 %vm14187_vm0, %v18661_v0 }
  0xc4   :  { %12552 = vmatmul.mubr.msk.bf16.gmra.mrb[88].mxu0 %vm278_vm2, %v13391_v27 }
  0xc5   :  { %12555 = vmatprep.mubr.msk.bf16.mxu0 %vm14187_vm0, %v18661_v0 }
  0xcc   :  { %12556 = vmatmul.mubr.msk.bf16.gmra.mrb[92].mxu0 %vm278_vm2, %v13392_v28 }
  0xcd   :  { %12559 = vmatprep.mubr.msk.bf16.mxu0 %vm14187_vm0, %v18661_v0 }
  0xd4   :  { %12560 = vmatmul.mubr.msk.bf16.gmra.mrb[96].mxu0 %vm278_vm2, %v13393_v29 }
  0xd5   :  { %12563 = vmatprep.mubr.msk.bf16.mxu0 %vm14187_vm0, %v18661_v0 }
  0xdc   :  { %12564 = vmatmul.mubr.msk.bf16.gmra.mrb[100].mxu0 %vm278_vm2, %v13394_v30 }
  0xdd   :  { %12567 = vmatprep.mubr.msk.bf16.mxu0 %vm14187_vm0, %v18661_v0 }
  0xe4   :  { %12568 = vmatmul.mubr.msk.bf16.gmra.mrb[104].mxu0 %vm278_vm2, %v13395_v31 }
  0xe5   :  { %12571 = vmatprep.mubr.msk.bf16.mxu0 %vm14187_vm0, %v18661_v0 }
  0xe7   :  { %v14453_v32 = vpop.f32.mrb[0].mxu0 }
  0xe8   :  { %v758_v33 = vmul.f32 %v14453_v32, %v14453_v32  ;;  %v12465_v34 = vpop.f32.mrb[1].mxu0  ;;  %v637_v37 = vsel %vm636_vm3, %v14453_v32, 0.0 }
  0xe9   :  { %v14460_v36 = vpop.f32.mrb[2].mxu0 }
  0xea   :  { %v638_v38 = vsel %vm636_vm3, %v14460_v36, 0.0  ;;  %v759_v39 = vmul.f32 %v14460_v36, %v14460_v36  ;;  %v12466_v40 = vpop.f32.mrb[3].mxu0  ;;  %v815_v42 = vsel %vm636_vm3, %v758_v33, 0.0 }
  0xeb   :  { %v639_v41 = vadd.f32 %v638_v38, %v637_v37 }
  0xec   :  { %v816_v43 = vsel %vm636_vm3, %v759_v39, 0.0  ;;  %12572 = vmatmul.mubr.msk.bf16.gmra.mrb[108].mxu0 %vm278_vm2, %v13396_v35 }
  0xed   :  { %v817_v44 = vadd.f32 %v816_v43, %v815_v42  ;;  %12575 = vmatprep.mubr.msk.bf16.mxu0 %vm14187_vm0, %v18661_v0 }
  0xef   :  { %v14473_v45 = vpop.f32.mrb[4].mxu0 }
  0xf0   :  { %v640_v46 = vsel %vm636_vm3, %v14473_v45, 0.0  ;;  %v760_v47 = vmul.f32 %v14473_v45, %v14473_v45  ;;  %v12469_v48 = vpop.f32.mrb[5].mxu0 }
  0xf1   :  { %v641_v50 = vadd.f32 %v640_v46, %v639_v41  ;;  %v14482_v51 = vpop.f32.mrb[6].mxu0 }
  0xf2   :  { %v818_v52 = vsel %vm636_vm3, %v760_v47, 0.0  ;;  %v642_v53 = vsel %vm636_vm3, %v14482_v51, 0.0  ;;  %v761_v54 = vmul.f32 %v14482_v51, %v14482_v51  ;;  %v12470_v55 = vpop.f32.mrb[7].mxu0 }
  0xf3   :  { %v819_v56 = vadd.f32 %v818_v52, %v817_v44  ;;  %v643_v57 = vadd.f32 %v642_v53, %v641_v50 }
  0xf4   :  { %v820_v58 = vsel %vm636_vm3, %v761_v54, 0.0  ;;  %12576 = vmatmul.mubr.msk.bf16.gmra.mrb[112].mxu0 %vm278_vm2, %v13397_v49 }
  0xf5   :  { %v821_v59 = vadd.f32 %v820_v58, %v819_v56  ;;  %12587 = vmatprep.mubr.msk.bf16.mxu0 %vm14187_vm0, %v18661_v0 }
  0xf7   :  { %v14493_v60 = vpop.f32.mrb[8].mxu0 }
  0xf8   :  { %v644_v61 = vsel %vm636_vm3, %v14493_v60, 0.0  ;;  %v762_v62 = vmul.f32 %v14493_v60, %v14493_v60  ;;  %v12473_v63 = vpop.f32.mrb[9].mxu0 }
  0xf9   :  { %v645_v1 = vadd.f32 %v644_v61, %v643_v57  ;;  %v14499_v2 = vpop.f32.mrb[10].mxu0 }
  0xfa   :  { %v822_v3 = vsel %vm636_vm3, %v762_v62, 0.0  ;;  %v646_v4 = vsel %vm636_vm3, %v14499_v2, 0.0  ;;  %v763_v5 = vmul.f32 %v14499_v2, %v14499_v2  ;;  %v12474_v6 = vpop.f32.mrb[11].mxu0 }
  0xfb   :  { %v823_v7 = vadd.f32 %v822_v3, %v821_v59  ;;  %v647_v8 = vadd.f32 %v646_v4, %v645_v1 }
  0xfc   :  { %v824_v9 = vsel %vm636_vm3, %v763_v5, 0.0 }
  0xfd   :  { %v825_v10 = vadd.f32 %v824_v9, %v823_v7 }
  0xff   :  { %v14507_v11 = vpop.f32.mrb[12].mxu0 }
 0x100   :  { %v648_v12 = vsel %vm636_vm3, %v14507_v11, 0.0  ;;  %v764_v13 = vmul.f32 %v14507_v11, %v14507_v11  ;;  %v12477_v14 = vpop.f32.mrb[13].mxu0 }
 0x101   :  { %v649_v15 = vadd.f32 %v648_v12, %v647_v8  ;;  %v14513_v16 = vpop.f32.mrb[14].mxu0 }
 0x102   :  { %v826_v17 = vsel %vm636_vm3, %v764_v13, 0.0  ;;  %v650_v18 = vsel %vm636_vm3, %v14513_v16, 0.0  ;;  %v765_v19 = vmul.f32 %v14513_v16, %v14513_v16  ;;  %v12478_v20 = vpop.f32.mrb[15].mxu0 }
 0x103   :  { %v827_v21 = vadd.f32 %v826_v17, %v825_v10  ;;  %v651_v22 = vadd.f32 %v650_v18, %v649_v15 }
 0x104   :  { %v828_v23 = vsel %vm636_vm3, %v765_v19, 0.0 }
 0x105   :  { %v829_v24 = vadd.f32 %v828_v23, %v827_v21 }
 0x107   :  { %v14521_v25 = vpop.f32.mrb[16].mxu0 }
 0x108   :  { %v652_v26 = vsel %vm636_vm3, %v14521_v25, 0.0  ;;  %v766_v27 = vmul.f32 %v14521_v25, %v14521_v25  ;;  %v12481_v28 = vpop.f32.mrb[17].mxu0 }
 0x109   :  { %v653_v29 = vadd.f32 %v652_v26, %v651_v22  ;;  %v14527_v30 = vpop.f32.mrb[18].mxu0 }
 0x10a   :  { %v830_v31 = vsel %vm636_vm3, %v766_v27, 0.0  ;;  %v654_v33 = vsel %vm636_vm3, %v14527_v30, 0.0  ;;  %v767_v34 = vmul.f32 %v14527_v30, %v14527_v30  ;;  %v12482_v35 = vpop.f32.mrb[19].mxu0 }
 0x10b   :  { %v831_v37 = vadd.f32 %v830_v31, %v829_v24  ;;  %v655_v38 = vadd.f32 %v654_v33, %v653_v29 }
 0x10c   :  { %v832_v39 = vsel %vm636_vm3, %v767_v34, 0.0 }
 0x10d   :  { %v833_v40 = vadd.f32 %v832_v39, %v831_v37 }
 0x10f   :  { %v14535_v41 = vpop.f32.mrb[20].mxu0 }
 0x110   :  { %v656_v42 = vsel %vm636_vm3, %v14535_v41, 0.0  ;;  %v768_v43 = vmul.f32 %v14535_v41, %v14535_v41  ;;  %v12485_v44 = vpop.f32.mrb[21].mxu0 }
 0x111   :  { %v657_v46 = vadd.f32 %v656_v42, %v655_v38  ;;  %v14541_v47 = vpop.f32.mrb[22].mxu0 }
 0x112   :  { %v834_v48 = vsel %vm636_vm3, %v768_v43, 0.0  ;;  %v658_v49 = vsel %vm636_vm3, %v14541_v47, 0.0  ;;  %v769_v50 = vmul.f32 %v14541_v47, %v14541_v47  ;;  %v12486_v52 = vpop.f32.mrb[23].mxu0 }
 0x113   :  { %v835_v53 = vadd.f32 %v834_v48, %v833_v40  ;;  %v659_v54 = vadd.f32 %v658_v49, %v657_v46 }
 0x114   :  { %v836_v55 = vsel %vm636_vm3, %v769_v50, 0.0 }
 0x115   :  { %v837_v56 = vadd.f32 %v836_v55, %v835_v53 }
 0x117   :  { %v14549_v57 = vpop.f32.mrb[24].mxu0 }
 0x118   :  { %v660_v58 = vsel %vm636_vm3, %v14549_v57, 0.0  ;;  %v770_v59 = vmul.f32 %v14549_v57, %v14549_v57  ;;  %v12489_v61 = vpop.f32.mrb[25].mxu0 }
 0x119   :  { %v661_v62 = vadd.f32 %v660_v58, %v659_v54  ;;  %v14555_v63 = vpop.f32.mrb[26].mxu0 }
 0x11a   :  { %v838_v1 = vsel %vm636_vm3, %v770_v59, 0.0  ;;  %v662_v3 = vsel %vm636_vm3, %v14555_v63, 0.0  ;;  %v771_v4 = vmul.f32 %v14555_v63, %v14555_v63  ;;  %v12490_v5 = vpop.f32.mrb[27].mxu0 }
 0x11b   :  { %v839_v6 = vadd.f32 %v838_v1, %v837_v56  ;;  %v663_v7 = vadd.f32 %v662_v3, %v661_v62 }
 0x11c   :  { %v840_v8 = vsel %vm636_vm3, %v771_v4, 0.0 }
 0x11d   :  { %v841_v9 = vadd.f32 %v840_v8, %v839_v6 }
 0x11f   :  { %v14563_v10 = vpop.f32.mrb[28].mxu0 }
 0x120   :  { %v664_v12 = vsel %vm636_vm3, %v14563_v10, 0.0  ;;  %v772_v13 = vmul.f32 %v14563_v10, %v14563_v10  ;;  %v12493_v14 = vpop.f32.mrb[29].mxu0 }
 0x121   :  { %v665_v15 = vadd.f32 %v664_v12, %v663_v7  ;;  %v14569_v17 = vpop.f32.mrb[30].mxu0 }
 0x122   :  { %v842_v18 = vsel %vm636_vm3, %v772_v13, 0.0  ;;  %v666_v19 = vsel %vm636_vm3, %v14569_v17, 0.0  ;;  %v773_v20 = vmul.f32 %v14569_v17, %v14569_v17  ;;  %v12494_v21 = vpop.f32.mrb[31].mxu0 }
 0x123   :  { %v843_v22 = vadd.f32 %v842_v18, %v841_v9  ;;  %v667_v23 = vadd.f32 %v666_v19, %v665_v15 }
 0x124   :  { %v844_v24 = vsel %vm636_vm3, %v773_v20, 0.0 }
 0x125   :  { %v845_v26 = vadd.f32 %v844_v24, %v843_v22 }
 0x127   :  { %v14577_v27 = vpop.f32.mrb[32].mxu0 }
 0x128   :  { %v668_v28 = vsel %vm636_vm3, %v14577_v27, 0.0  ;;  %v774_v29 = vmul.f32 %v14577_v27, %v14577_v27  ;;  %v12497_v31 = vpop.f32.mrb[33].mxu0 }
 0x129   :  { %v669_v33 = vadd.f32 %v668_v28, %v667_v23  ;;  %v14583_v34 = vpop.f32.mrb[34].mxu0 }
 0x12a   :  { %v846_v35 = vsel %vm636_vm3, %v774_v29, 0.0  ;;  %v670_v37 = vsel %vm636_vm3, %v14583_v34, 0.0  ;;  %v775_v38 = vmul.f32 %v14583_v34, %v14583_v34  ;;  %v12498_v39 = vpop.f32.mrb[35].mxu0 }
 0x12b   :  { %v847_v40 = vadd.f32 %v846_v35, %v845_v26  ;;  %v671_v42 = vadd.f32 %v670_v37, %v669_v33 }
 0x12c   :  { %v848_v43 = vsel %vm636_vm3, %v775_v38, 0.0 }
 0x12d   :  { %v849_v44 = vadd.f32 %v848_v43, %v847_v40 }
 0x12f   :  { %v14591_v46 = vpop.f32.mrb[36].mxu0 }
 0x130   :  { %v672_v48 = vsel %vm636_vm3, %v14591_v46, 0.0  ;;  %v776_v49 = vmul.f32 %v14591_v46, %v14591_v46  ;;  %v12501_v50 = vpop.f32.mrb[37].mxu0 }
 0x131   :  { %v673_v52 = vadd.f32 %v672_v48, %v671_v42  ;;  %v14597_v53 = vpop.f32.mrb[38].mxu0 }
 0x132   :  { %v850_v54 = vsel %vm636_vm3, %v776_v49, 0.0  ;;  %v674_v55 = vsel %vm636_vm3, %v14597_v53, 0.0  ;;  %v777_v56 = vmul.f32 %v14597_v53, %v14597_v53  ;;  %v12502_v58 = vpop.f32.mrb[39].mxu0 }
 0x133   :  { %v851_v59 = vadd.f32 %v850_v54, %v849_v44  ;;  %v675_v61 = vadd.f32 %v674_v55, %v673_v52 }
 0x134   :  { %v852_v62 = vsel %vm636_vm3, %v777_v56, 0.0 }
 0x135   :  { %v853_v1 = vadd.f32 %v852_v62, %v851_v59 }
 0x137   :  { %v14605_v3 = vpop.f32.mrb[40].mxu0 }
 0x138   :  { %v676_v4 = vsel %vm636_vm3, %v14605_v3, 0.0  ;;  %v778_v5 = vmul.f32 %v14605_v3, %v14605_v3  ;;  %v12505_v6 = vpop.f32.mrb[41].mxu0 }
 0x139   :  { %v677_v7 = vadd.f32 %v676_v4, %v675_v61  ;;  %v14611_v8 = vpop.f32.mrb[42].mxu0 }
 0x13a   :  { %v854_v9 = vsel %vm636_vm3, %v778_v5, 0.0  ;;  %v678_v12 = vsel %vm636_vm3, %v14611_v8, 0.0  ;;  %v779_v13 = vmul.f32 %v14611_v8, %v14611_v8  ;;  %v12506_v14 = vpop.f32.mrb[43].mxu0 }
 0x13b   :  { %v855_v15 = vadd.f32 %v854_v9, %v853_v1  ;;  %v679_v18 = vadd.f32 %v678_v12, %v677_v7 }
 0x13c   :  { %v856_v19 = vsel %vm636_vm3, %v779_v13, 0.0 }
 0x13d   :  { %v857_v20 = vadd.f32 %v856_v19, %v855_v15 }
 0x13f   :  { %v14619_v21 = vpop.f32.mrb[44].mxu0 }
 0x140   :  { %v680_v22 = vsel %vm636_vm3, %v14619_v21, 0.0  ;;  %v780_v23 = vmul.f32 %v14619_v21, %v14619_v21  ;;  %v12509_v24 = vpop.f32.mrb[45].mxu0 }
 0x141   :  { %v681_v26 = vadd.f32 %v680_v22, %v679_v18  ;;  %v14625_v28 = vpop.f32.mrb[46].mxu0 }
 0x142   :  { %v858_v29 = vsel %vm636_vm3, %v780_v23, 0.0  ;;  %v682_v31 = vsel %vm636_vm3, %v14625_v28, 0.0  ;;  %v781_v33 = vmul.f32 %v14625_v28, %v14625_v28  ;;  %v12510_v35 = vpop.f32.mrb[47].mxu0 }
 0x143   :  { %v859_v37 = vadd.f32 %v858_v29, %v857_v20  ;;  %v683_v38 = vadd.f32 %v682_v31, %v681_v26 }
 0x144   :  { %v860_v39 = vsel %vm636_vm3, %v781_v33, 0.0 }
 0x145   :  { %v861_v40 = vadd.f32 %v860_v39, %v859_v37 }
 0x147   :  { %v14633_v42 = vpop.f32.mrb[48].mxu0 }
 0x148   :  { %v684_v43 = vsel %vm636_vm3, %v14633_v42, 0.0  ;;  %v782_v44 = vmul.f32 %v14633_v42, %v14633_v42  ;;  %v12513_v48 = vpop.f32.mrb[49].mxu0 }
 0x149   :  { %v685_v49 = vadd.f32 %v684_v43, %v683_v38  ;;  %v14639_v50 = vpop.f32.mrb[50].mxu0 }
 0x14a   :  { %v862_v52 = vsel %vm636_vm3, %v782_v44, 0.0  ;;  %v686_v54 = vsel %vm636_vm3, %v14639_v50, 0.0  ;;  %v783_v55 = vmul.f32 %v14639_v50, %v14639_v50  ;;  %v12514_v56 = vpop.f32.mrb[51].mxu0 }
 0x14b   :  { %v863_v58 = vadd.f32 %v862_v52, %v861_v40  ;;  %v687_v59 = vadd.f32 %v686_v54, %v685_v49 }
 0x14c   :  { %v864_v61 = vsel %vm636_vm3, %v783_v55, 0.0 }
 0x14d   :  { %v865_v62 = vadd.f32 %v864_v61, %v863_v58 }
 0x14f   :  { %v14647_v1 = vpop.f32.mrb[52].mxu0 }
 0x150   :  { %v688_v4 = vsel %vm636_vm3, %v14647_v1, 0.0  ;;  %v784_v5 = vmul.f32 %v14647_v1, %v14647_v1  ;;  %v12517_v6 = vpop.f32.mrb[53].mxu0 }
 0x151   :  { %v689_v7 = vadd.f32 %v688_v4, %v687_v59  ;;  %v14653_v9 = vpop.f32.mrb[54].mxu0 }
 0x152   :  { %v866_v12 = vsel %vm636_vm3, %v784_v5, 0.0  ;;  %v690_v13 = vsel %vm636_vm3, %v14653_v9, 0.0  ;;  %v785_v14 = vmul.f32 %v14653_v9, %v14653_v9  ;;  %v12518_v15 = vpop.f32.mrb[55].mxu0 }
 0x153   :  { %v867_v18 = vadd.f32 %v866_v12, %v865_v62  ;;  %v691_v19 = vadd.f32 %v690_v13, %v689_v7 }
 0x154   :  { %v868_v20 = vsel %vm636_vm3, %v785_v14, 0.0 }
 0x155   :  { %v869_v22 = vadd.f32 %v868_v20, %v867_v18 }
 0x157   :  { %v14661_v23 = vpop.f32.mrb[56].mxu0 }
 0x158   :  { %v692_v24 = vsel %vm636_vm3, %v14661_v23, 0.0  ;;  %v786_v26 = vmul.f32 %v14661_v23, %v14661_v23  ;;  %v12521_v29 = vpop.f32.mrb[57].mxu0 }
 0x159   :  { %v693_v31 = vadd.f32 %v692_v24, %v691_v19  ;;  %v14667_v33 = vpop.f32.mrb[58].mxu0 }
 0x15a   :  { %v870_v35 = vsel %vm636_vm3, %v786_v26, 0.0  ;;  %v694_v37 = vsel %vm636_vm3, %v14667_v33, 0.0  ;;  %v787_v38 = vmul.f32 %v14667_v33, %v14667_v33  ;;  %v12522_v39 = vpop.f32.mrb[59].mxu0 }
 0x15b   :  { %v871_v40 = vadd.f32 %v870_v35, %v869_v22  ;;  %v695_v43 = vadd.f32 %v694_v37, %v693_v31 }
 0x15c   :  { %v872_v44 = vsel %vm636_vm3, %v787_v38, 0.0 }
 0x15d   :  { %v873_v48 = vadd.f32 %v872_v44, %v871_v40 }
 0x15f   :  { %v14675_v49 = vpop.f32.mrb[60].mxu0 }
 0x160   :  { %v696_v52 = vsel %vm636_vm3, %v14675_v49, 0.0  ;;  %v788_v54 = vmul.f32 %v14675_v49, %v14675_v49  ;;  %v12525_v55 = vpop.f32.mrb[61].mxu0 }
 0x161   :  { %v697_v56 = vadd.f32 %v696_v52, %v695_v43  ;;  %v14681_v58 = vpop.f32.mrb[62].mxu0 }
 0x162   :  { %v874_v59 = vsel %vm636_vm3, %v788_v54, 0.0  ;;  %v698_v61 = vsel %vm636_vm3, %v14681_v58, 0.0  ;;  %v789_v62 = vmul.f32 %v14681_v58, %v14681_v58  ;;  %v12526_v4 = vpop.f32.mrb[63].mxu0 }
 0x163   :  { %v875_v5 = vadd.f32 %v874_v59, %v873_v48  ;;  %v699_v6 = vadd.f32 %v698_v61, %v697_v56 }
 0x164   :  { %v876_v7 = vsel %vm636_vm3, %v789_v62, 0.0 }
 0x165   :  { %v877_v12 = vadd.f32 %v876_v7, %v875_v5 }
 0x167   :  { %v14689_v13 = vpop.f32.mrb[64].mxu0 }
 0x168   :  { %v700_v14 = vsel %vm636_vm3, %v14689_v13, 0.0  ;;  %v790_v15 = vmul.f32 %v14689_v13, %v14689_v13  ;;  %v12529_v18 = vpop.f32.mrb[65].mxu0 }
 0x169   :  { %v701_v19 = vadd.f32 %v700_v14, %v699_v6  ;;  %v14695_v20 = vpop.f32.mrb[66].mxu0 }
 0x16a   :  { %v878_v22 = vsel %vm636_vm3, %v790_v15, 0.0  ;;  %v702_v24 = vsel %vm636_vm3, %v14695_v20, 0.0  ;;  %v791_v26 = vmul.f32 %v14695_v20, %v14695_v20  ;;  %v12530_v29 = vpop.f32.mrb[67].mxu0 }
 0x16b   :  { %v879_v31 = vadd.f32 %v878_v22, %v877_v12  ;;  %v703_v35 = vadd.f32 %v702_v24, %v701_v19 }
 0x16c   :  { %v880_v37 = vsel %vm636_vm3, %v791_v26, 0.0 }
 0x16d   :  { %v881_v38 = vadd.f32 %v880_v37, %v879_v31 }
 0x16f   :  { %v14703_v39 = vpop.f32.mrb[68].mxu0 }
 0x170   :  { %v704_v40 = vsel %vm636_vm3, %v14703_v39, 0.0  ;;  %v792_v43 = vmul.f32 %v14703_v39, %v14703_v39  ;;  %v12533_v44 = vpop.f32.mrb[69].mxu0 }
 0x171   :  { %v705_v48 = vadd.f32 %v704_v40, %v703_v35  ;;  %v14709_v52 = vpop.f32.mrb[70].mxu0 }
 0x172   :  { %v882_v54 = vsel %vm636_vm3, %v792_v43, 0.0  ;;  %v706_v55 = vsel %vm636_vm3, %v14709_v52, 0.0  ;;  %v793_v56 = vmul.f32 %v14709_v52, %v14709_v52  ;;  %v12534_v59 = vpop.f32.mrb[71].mxu0 }
 0x173   :  { %v883_v61 = vadd.f32 %v882_v54, %v881_v38  ;;  %v707_v62 = vadd.f32 %v706_v55, %v705_v48 }
 0x174   :  { %v884_v4 = vsel %vm636_vm3, %v793_v56, 0.0 }
 0x175   :  { %v885_v5 = vadd.f32 %v884_v4, %v883_v61 }
 0x177   :  { %v14717_v6 = vpop.f32.mrb[72].mxu0 }
 0x178   :  { %v708_v7 = vsel %vm636_vm3, %v14717_v6, 0.0  ;;  %v794_v12 = vmul.f32 %v14717_v6, %v14717_v6  ;;  %v12537_v14 = vpop.f32.mrb[73].mxu0 }
 0x179   :  { %v709_v15 = vadd.f32 %v708_v7, %v707_v62  ;;  %v14723_v18 = vpop.f32.mrb[74].mxu0 }
 0x17a   :  { %v886_v19 = vsel %vm636_vm3, %v794_v12, 0.0  ;;  %v710_v22 = vsel %vm636_vm3, %v14723_v18, 0.0  ;;  %v795_v24 = vmul.f32 %v14723_v18, %v14723_v18  ;;  %v12538_v26 = vpop.f32.mrb[75].mxu0 }
 0x17b   :  { %v887_v29 = vadd.f32 %v886_v19, %v885_v5  ;;  %v711_v31 = vadd.f32 %v710_v22, %v709_v15 }
 0x17c   :  { %v888_v35 = vsel %vm636_vm3, %v795_v24, 0.0 }
 0x17d   :  { %v889_v37 = vadd.f32 %v888_v35, %v887_v29 }
 0x17f   :  { %v14731_v38 = vpop.f32.mrb[76].mxu0 }
 0x180   :  { %v712_v40 = vsel %vm636_vm3, %v14731_v38, 0.0  ;;  %v796_v43 = vmul.f32 %v14731_v38, %v14731_v38  ;;  %v12541_v44 = vpop.f32.mrb[77].mxu0 }
 0x181   :  { %v713_v48 = vadd.f32 %v712_v40, %v711_v31  ;;  %v14737_v54 = vpop.f32.mrb[78].mxu0 }
 0x182   :  { %18699 = vst [vmem:[#allocation4_spill] sm:$0xff] %v14737_v54  ;;  %v890_v55 = vsel %vm636_vm3, %v796_v43, 0.0  ;;  %v714_v56 = vsel %vm636_vm3, %v14737_v54, 0.0  ;;  %v797_v59 = vmul.f32 %v14737_v54, %v14737_v54  ;;  %v12542_v61 = vpop.f32.mrb[79].mxu0 }
 0x183   :  { %v891_v62 = vadd.f32 %v890_v55, %v889_v37  ;;  %v715_v4 = vadd.f32 %v714_v56, %v713_v48 }
 0x184   :  { %v892_v5 = vsel %vm636_vm3, %v797_v59, 0.0 }
 0x185   :  { %v893_v7 = vadd.f32 %v892_v5, %v891_v62 }
 0x187   :  { %v14745_v12 = vpop.f32.mrb[80].mxu0 }
 0x188   :  { %18700 = vst [vmem:[#allocation5_spill] sm:$0xff] %v14745_v12  ;;  %v716_v14 = vsel %vm636_vm3, %v14745_v12, 0.0  ;;  %v798_v15 = vmul.f32 %v14745_v12, %v14745_v12  ;;  %v12545_v19 = vpop.f32.mrb[81].mxu0 }
 0x189   :  { %v717_v22 = vadd.f32 %v716_v14, %v715_v4  ;;  %v14751_v24 = vpop.f32.mrb[82].mxu0 }
 0x18a   :  { %18701 = vst [vmem:[#allocation6_spill] sm:$0xff] %v14751_v24  ;;  %v894_v26 = vsel %vm636_vm3, %v798_v15, 0.0  ;;  %v718_v29 = vsel %vm636_vm3, %v14751_v24, 0.0  ;;  %v799_v31 = vmul.f32 %v14751_v24, %v14751_v24  ;;  %v12546_v35 = vpop.f32.mrb[83].mxu0 }
 0x18b   :  { %v895_v37 = vadd.f32 %v894_v26, %v893_v7  ;;  %v719_v40 = vadd.f32 %v718_v29, %v717_v22 }
 0x18c   :  { %v896_v43 = vsel %vm636_vm3, %v799_v31, 0.0 }
 0x18d   :  { %v897_v44 = vadd.f32 %v896_v43, %v895_v37 }
 0x18f   :  { %v14759_v48 = vpop.f32.mrb[84].mxu0 }
 0x190   :  { %18702 = vst [vmem:[#allocation7_spill] sm:$0xff] %v14759_v48  ;;  %v720_v55 = vsel %vm636_vm3, %v14759_v48, 0.0  ;;  %v800_v56 = vmul.f32 %v14759_v48, %v14759_v48  ;;  %v12549_v59 = vpop.f32.mrb[85].mxu0 }
 0x191   :  { %v721_v61 = vadd.f32 %v720_v55, %v719_v40  ;;  %v14765_v62 = vpop.f32.mrb[86].mxu0 }
 0x192   :  { %18703 = vst [vmem:[#allocation8_spill] sm:$0xff] %v14765_v62  ;;  %v898_v4 = vsel %vm636_vm3, %v800_v56, 0.0  ;;  %v722_v5 = vsel %vm636_vm3, %v14765_v62, 0.0  ;;  %v801_v7 = vmul.f32 %v14765_v62, %v14765_v62  ;;  %v12550_v14 = vpop.f32.mrb[87].mxu0 }
 0x193   :  { %v899_v15 = vadd.f32 %v898_v4, %v897_v44  ;;  %v723_v19 = vadd.f32 %v722_v5, %v721_v61 }
 0x194   :  { %v900_v22 = vsel %vm636_vm3, %v801_v7, 0.0 }
 0x195   :  { %v901_v26 = vadd.f32 %v900_v22, %v899_v15 }
 0x197   :  { %v14773_v29 = vpop.f32.mrb[88].mxu0 }
 0x198   :  { %18704 = vst [vmem:[#allocation9_spill] sm:$0xff] %v14773_v29  ;;  %v724_v31 = vsel %vm636_vm3, %v14773_v29, 0.0  ;;  %v802_v35 = vmul.f32 %v14773_v29, %v14773_v29  ;;  %v12553_v37 = vpop.f32.mrb[89].mxu0 }
 0x199   :  { %v725_v40 = vadd.f32 %v724_v31, %v723_v19  ;;  %v14779_v43 = vpop.f32.mrb[90].mxu0 }
 0x19a   :  { %18705 = vst [vmem:[#allocation10_spill] sm:$0xff] %v14779_v43  ;;  %v902_v55 = vsel %vm636_vm3, %v802_v35, 0.0  ;;  %v726_v44 = vsel %vm636_vm3, %v14779_v43, 0.0  ;;  %v803_v56 = vmul.f32 %v14779_v43, %v14779_v43  ;;  %v12554_v59 = vpop.f32.mrb[91].mxu0 }
 0x19b   :  { %v903_v61 = vadd.f32 %v902_v55, %v901_v26  ;;  %v727_v4 = vadd.f32 %v726_v44, %v725_v40 }
 0x19c   :  { %v904_v5 = vsel %vm636_vm3, %v803_v56, 0.0 }
 0x19d   :  { %v905_v7 = vadd.f32 %v904_v5, %v903_v61 }
 0x19f   :  { %v14787_v14 = vpop.f32.mrb[92].mxu0 }
 0x1a0   :  { %18706 = vst [vmem:[#allocation11_spill] sm:$0xff] %v14787_v14  ;;  %v728_v15 = vsel %vm636_vm3, %v14787_v14, 0.0  ;;  %v804_v19 = vmul.f32 %v14787_v14, %v14787_v14  ;;  %v12557_v22 = vpop.f32.mrb[93].mxu0 }
 0x1a1   :  { %v729_v31 = vadd.f32 %v728_v15, %v727_v4  ;;  %v14793_v35 = vpop.f32.mrb[94].mxu0 }
 0x1a2   :  { %18707 = vst [vmem:[#allocation12_spill] sm:$0xff] %v14793_v35  ;;  %v906_v37 = vsel %vm636_vm3, %v804_v19, 0.0  ;;  %v730_v26 = vsel %vm636_vm3, %v14793_v35, 0.0  ;;  %v805_v40 = vmul.f32 %v14793_v35, %v14793_v35  ;;  %v12558_v55 = vpop.f32.mrb[95].mxu0 }
 0x1a3   :  { %v907_v44 = vadd.f32 %v906_v37, %v905_v7  ;;  %v731_v56 = vadd.f32 %v730_v26, %v729_v31 }
 0x1a4   :  { %v908_v59 = vsel %vm636_vm3, %v805_v40, 0.0 }
 0x1a5   :  { %v909_v61 = vadd.f32 %v908_v59, %v907_v44 }
 0x1a7   :  { %v14801_v5 = vpop.f32.mrb[96].mxu0 }
 0x1a8   :  { %18708 = vst [vmem:[#allocation13_spill] sm:$0xff] %v14801_v5  ;;  %v732_v4 = vsel %vm636_vm3, %v14801_v5, 0.0  ;;  %v806_v15 = vmul.f32 %v14801_v5, %v14801_v5  ;;  %v12561_v19 = vpop.f32.mrb[97].mxu0 }
 0x1a9   :  { %v733_v22 = vadd.f32 %v732_v4, %v731_v56  ;;  %v14807_v0 = vpop.f32.mrb[98].mxu0 }
 0x1aa   :  { %18709 = vst [vmem:[#allocation14_spill] sm:$0xff] %v14807_v0  ;;  %v910_v35 = vsel %vm636_vm3, %v806_v15, 0.0  ;;  %v734_v7 = vsel %vm636_vm3, %v14807_v0, 0.0  ;;  %v807_v31 = vmul.f32 %v14807_v0, %v14807_v0  ;;  %v12562_v37 = vpop.f32.mrb[99].mxu0 }
 0x1ab   :  { %v911_v26 = vadd.f32 %v910_v35, %v909_v61  ;;  %v735_v40 = vadd.f32 %v734_v7, %v733_v22 }
 0x1ac   :  { %v912_v55 = vsel %vm636_vm3, %v807_v31, 0.0 }
 0x1ad   :  { %v913_v44 = vadd.f32 %v912_v55, %v911_v26 }
 0x1af   :  { %v14815_v59 = vpop.f32.mrb[100].mxu0 }
 0x1b0   :  { %18710 = vst [vmem:[#allocation15_spill] sm:$0xff] %v14815_v59  ;;  %v736_v56 = vsel %vm636_vm3, %v14815_v59, 0.0  ;;  %v808_v4 = vmul.f32 %v14815_v59, %v14815_v59  ;;  %v12565_v15 = vpop.f32.mrb[101].mxu0 }
 0x1b1   :  { %v737_v19 = vadd.f32 %v736_v56, %v735_v40  ;;  %v14821_v5 = vpop.f32.mrb[102].mxu0 }
 0x1b2   :  { %18711 = vst [vmem:[#allocation16_spill] sm:$0xff] %v14821_v5  ;;  %v914_v0 = vsel %vm636_vm3, %v808_v4, 0.0  ;;  %v738_v35 = vsel %vm636_vm3, %v14821_v5, 0.0  ;;  %v809_v61 = vmul.f32 %v14821_v5, %v14821_v5  ;;  %v12566_v22 = vpop.f32.mrb[103].mxu0 }
 0x1b3   :  { %v915_v7 = vadd.f32 %v914_v0, %v913_v44  ;;  %v739_v31 = vadd.f32 %v738_v35, %v737_v19 }
 0x1b4   :  { %v916_v37 = vsel %vm636_vm3, %v809_v61, 0.0 }
 0x1b5   :  { %v917_v26 = vadd.f32 %v916_v37, %v915_v7 }
 0x1b7   :  { %v14829_v55 = vpop.f32.mrb[104].mxu0 }
 0x1b8   :  { %18712 = vst [vmem:[#allocation17_spill] sm:$0xff] %v14829_v55  ;;  %v740_v40 = vsel %vm636_vm3, %v14829_v55, 0.0  ;;  %v810_v56 = vmul.f32 %v14829_v55, %v14829_v55  ;;  %v12569_v4 = vpop.f32.mrb[105].mxu0 }
 0x1b9   :  { %v741_v15 = vadd.f32 %v740_v40, %v739_v31  ;;  %v14835_v59 = vpop.f32.mrb[106].mxu0  ;;  %v13400_v31 = vld [vmem:[%s18645_s4 + $0x4] ss:$16 sps:$4 sm:$0xff]  }
 0x1ba   :  { %18713 = vst [vmem:[#allocation18_spill] sm:$0xff] %v14835_v59  ;;  %v918_v5 = vsel %vm636_vm3, %v810_v56, 0.0  ;;  %v742_v0 = vsel %vm636_vm3, %v14835_v59, 0.0  ;;  %v811_v44 = vmul.f32 %v14835_v59, %v14835_v59  ;;  %v12570_v19 = vpop.f32.mrb[107].mxu0  ;;  %1366 = vmatprep.mubr.bf16.mxu1 %v13400_v31 }
 0x1bb   :  { %v919_v35 = vadd.f32 %v918_v5, %v917_v26  ;;  %v743_v61 = vadd.f32 %v742_v0, %v741_v15 }
 0x1bc   :  { %v920_v22 = vsel %vm636_vm3, %v811_v44, 0.0 }
 0x1bd   :  { %v921_v7 = vadd.f32 %v920_v22, %v919_v35 }
 0x1bf   :  { %v14846_v37 = vpop.f32.mrb[108].mxu0 }
 0x1c0   :  { %18714 = vst [vmem:[#allocation19_spill] sm:$0xff] %v14846_v37  ;;  %v744_v40 = vsel %vm636_vm3, %v14846_v37, 0.0  ;;  %v812_v56 = vmul.f32 %v14846_v37, %v14846_v37  ;;  %v12573_v4 = vpop.f32.mrb[109].mxu0 }
 0x1c1   :  { %v745_v19 = vadd.f32 %v744_v40, %v743_v61  ;;  %v14852_v5 = vpop.f32.mrb[110].mxu0 }
 0x1c2   :  { %18715 = vst [vmem:[#allocation20_spill] sm:$0xff] %v14852_v5  ;;  %v922_v26 = vsel %vm636_vm3, %v812_v56, 0.0  ;;  %v746_v15 = vsel %vm636_vm3, %v14852_v5, 0.0  ;;  %v813_v0 = vmul.f32 %v14852_v5, %v14852_v5  ;;  %v12574_v44 = vpop.f32.mrb[111].mxu0 }
 0x1c3   :  { %v923_v35 = vadd.f32 %v922_v26, %v921_v7  ;;  %v747_v22 = vadd.f32 %v746_v15, %v745_v19 }
 0x1c4   :  { %v924_v59 = vsel %vm636_vm3, %v813_v0, 0.0 }
 0x1c5   :  { %v925_v55 = vadd.f32 %v924_v59, %v923_v35 }
 0x1c7   :  { %v628_v4 = vpop.f32.mrb[112].mxu0 }
 0x1c8   :  { %v749_v31 = vsel %vm748_vm4, %v628_v4, 0.0  ;;  %v814_v61 = vmul.f32 %v628_v4, %v628_v4  ;;  %v12577_v40 = vpop.f32.mrb[113].mxu0 }
 0x1c9   :  { %v750_v37 = vadd.f32 %v749_v31, %v747_v22  ;;  %v631_v14 = vpop.f32.mrb[114].mxu0 }
 0x1ca   :  { %v926_v56 = vsel %vm748_vm4, %v814_v61, 0.0  ;;  %v12578_v43 = vpop.f32.mrb[115].mxu0 }
 0x1cb   :  { %v751_v29 = vrot.slane %v750_v37, 4  ;;  %v927_v62 = vadd.f32 %v926_v56, %v925_v55  ;;  %v944_v43 = vlaneseq }
 0x1cd   :  { %v752_v48 = vadd.f32 %v751_v29, %v750_v37  ;;  %v928_v24 = vrot.slane %v927_v62, 4  ;;  %v14860_v55 = vshrl.u32 %v944_v43, 7  ;;  %v18722_v43 = vld [vmem:[#allocation6_spill] sm:$0xff] }
 0x1cf   :  { %v753_v5 = vrot.slane %v752_v48, 2  ;;  %v929_v44 = vadd.f32 %v928_v24, %v927_v62  ;;  %18716 = vst [vmem:[#allocation21_spill] sm:$0xff] %v14860_v55  ;;  %v634_v24 = vld [vmem:[%s18646_s2] sm:$0x1] }
 0x1d1   :  { %v754_v7 = vadd.f32 %v753_v5, %v752_v48  ;;  %v930_v19 = vrot.slane %v929_v44, 2  ;;  %v14866_v48 = vsub.s32 0, %v14860_v55  ;;  %v18730_v55 = vld [vmem:[#allocation14_spill] sm:$0xff] }
 0x1d3   :  { %v755_v26 = vrot.slane %v754_v7, 1  ;;  %v931_v15 = vadd.f32 %v930_v19, %v929_v44  ;;  %18717 = vst [vmem:[#allocation22_spill] sm:$0xff] %v14866_v48 }
 0x1d5   :  { %v756_v59 = vadd.f32 %v755_v26, %v754_v7  ;;  %v932_v0 = vrot.slane %v931_v15, 1 }
 0x1d7   :  { %v757_v35 = vmul.f32 0.0022222223, %v756_v59  ;;  %v933_v12 = vadd.f32 %v932_v0, %v931_v15 }
 0x1d9   :  { %v934_v54 = vmul.f32 0.0022222223, %v933_v12  ;;  %v935_v40 = vmul.f32 %v757_v35, %v757_v35  ;;  %v635_v12 = vld [vmem:[%s18647_s3] sm:$0x1] }
 0x1db   :  { %v936_v22 = vsub.f32 %v934_v54, %v935_v40 }
 0x1dd   :  { %v937_v14 = vmax.f32 %v936_v22, 0.0 }
 0x1df   :  { %v938_v31 = vadd.f32 1e-05, %v937_v14  ;;  %v18720_v14 = vld [vmem:[#allocation4_spill] sm:$0xff] }
 0x1e1   :  { %14172 = vrsqrt.f32 %v938_v31  ;;  %v18721_v31 = vld [vmem:[#allocation5_spill] sm:$0xff] }
 0x1eb   :  { %v14173_v62 = vpop.eup %14172 }
 0x1ec   :  { %v940_v29 = vmul.f32 %v14173_v62, %v634_v24  ;;  %v18723_v24 = vld [vmem:[#allocation7_spill] sm:$0xff]  ;;  %v18724_v62 = vld [vmem:[#allocation8_spill] sm:$0xff] }
 0x1ee   :  { %v941_v54 = vmul.f32 %v940_v29, %v757_v35  ;;  %v947_v37 = vrot.slane %v940_v29, %v14866_v48  ;;  %v18726_v29 = vld [vmem:[#allocation10_spill] sm:$0xff] }
 0x1f0   :  { %v942_v5 = vsub.f32 %v635_v12, %v941_v54  ;;  %v1005_v61 = vmul.f32 %v947_v37, %v628_v4  ;;  %v949_v56 = vmul.f32 %v947_v37, %v14453_v32  ;;  %v950_v44 = vmul.f32 %v947_v37, %v14460_v36  ;;  %v18725_v12 = vld [vmem:[#allocation9_spill] sm:$0xff]  ;;  %v18727_v54 = vld [vmem:[#allocation11_spill] sm:$0xff] }
 0x1f1   :  { %v951_v7 = vmul.f32 %v947_v37, %v14473_v45  ;;  %v952_v19 = vmul.f32 %v947_v37, %v14482_v51  ;;  %v953_v26 = vmul.f32 %v947_v37, %v14493_v60  ;;  %v954_v15 = vmul.f32 %v947_v37, %v14499_v2 }
 0x1f2   :  { %v14879_v59 = vrot.slane %v942_v5, %v14866_v48  ;;  %v955_v0 = vmul.f32 %v947_v37, %v14507_v11  ;;  %v956_v35 = vmul.f32 %v947_v37, %v14513_v16  ;;  %v957_v4 = vmul.f32 %v947_v37, %v14521_v25  ;;  %v18728_v5 = vld [vmem:[#allocation12_spill] sm:$0xff]  ;;  %v18731_v48 = vld [vmem:[#allocation15_spill] sm:$0xff] }
 0x1f3   :  { %v958_v32 = vmul.f32 %v947_v37, %v14527_v30  ;;  %v959_v36 = vmul.f32 %v947_v37, %v14535_v41  ;;  %v960_v45 = vmul.f32 %v947_v37, %v14541_v47  ;;  %v961_v51 = vmul.f32 %v947_v37, %v14549_v57 }
 0x1f4   :  { %18718 = vst [vmem:[#allocation23_spill] sm:$0xff] %v14879_v59  ;;  %v14889_v60 = vadd.f32 %v14879_v59, %v1005_v61  ;;  %v962_v2 = vmul.f32 %v947_v37, %v14555_v63  ;;  %v963_v40 = vmul.f32 %v947_v37, %v14563_v10  ;;  %v964_v11 = vmul.f32 %v947_v37, %v14569_v17  ;;  %v18729_v61 = vld [vmem:[#allocation13_spill] sm:$0xff] }
 0x1f5   :  { %v965_v16 = vmul.f32 %v947_v37, %v14577_v27  ;;  %v966_v25 = vmul.f32 %v947_v37, %v14583_v34  ;;  %v967_v30 = vmul.f32 %v947_v37, %v14591_v46  ;;  %v968_v41 = vmul.f32 %v947_v37, %v14597_v53  ;;  %v18733_v59 = vld [vmem:[#allocation17_spill] sm:$0xff] }
 0x1f6   :  { %18719 = vst [vmem:[#allocation24_spill] sm:$0xff] %v14889_v60  ;;  %v969_v47 = vmul.f32 %v947_v37, %v14605_v3  ;;  %v970_v57 = vmul.f32 %v947_v37, %v14611_v8  ;;  %v971_v22 = vmul.f32 %v947_v37, %v14619_v21  ;;  %v972_v63 = vmul.f32 %v947_v37, %v14625_v28  ;;  %v18732_v60 = vld [vmem:[#allocation16_spill] sm:$0xff] }
 0x1f7   :  { %v973_v10 = vmul.f32 %v947_v37, %v14633_v42  ;;  %v974_v17 = vmul.f32 %v947_v37, %v14639_v50  ;;  %v975_v27 = vmul.f32 %v947_v37, %v14647_v1  ;;  %v976_v34 = vmul.f32 %v947_v37, %v14653_v9 }
 0x1f8   :  { %v977_v46 = vmul.f32 %v947_v37, %v14661_v23  ;;  %v978_v53 = vmul.f32 %v947_v37, %v14667_v33  ;;  %v979_v3 = vmul.f32 %v947_v37, %v14675_v49  ;;  %v980_v8 = vmul.f32 %v947_v37, %v14681_v58 }
 0x1f9   :  { %v981_v21 = vmul.f32 %v947_v37, %v14689_v13  ;;  %v982_v28 = vmul.f32 %v947_v37, %v14695_v20  ;;  %v983_v42 = vmul.f32 %v947_v37, %v14703_v39  ;;  %v984_v50 = vmul.f32 %v947_v37, %v14709_v52 }
 0x1fa   :  { %v985_v1 = vmul.f32 %v947_v37, %v14717_v6  ;;  %v986_v9 = vmul.f32 %v947_v37, %v14723_v18  ;;  %v987_v23 = vmul.f32 %v947_v37, %v14731_v38  ;;  %v988_v33 = vmul.f32 %v947_v37, %v18720_v14 }
 0x1fb   :  { %v989_v49 = vmul.f32 %v947_v37, %v18721_v31  ;;  %v990_v58 = vmul.f32 %v947_v37, %v18722_v43  ;;  %v991_v13 = vmul.f32 %v947_v37, %v18723_v24  ;;  %v992_v20 = vmul.f32 %v947_v37, %v18724_v62  ;;  %v18734_v62 = vld [vmem:[#allocation18_spill] sm:$0xff] }
 0x1fc   :  { %v993_v39 = vmul.f32 %v947_v37, %v18725_v12  ;;  %v994_v52 = vmul.f32 %v947_v37, %v18726_v29  ;;  %v995_v6 = vmul.f32 %v947_v37, %v18727_v54  ;;  %v996_v18 = vmul.f32 %v947_v37, %v18728_v5  ;;  %v18735_v29 = vld [vmem:[#allocation19_spill] sm:$0xff]  ;;  %v18736_v5 = vld [vmem:[#allocation20_spill] sm:$0xff] }
 0x1fd   :  { %v997_v38 = vmul.f32 %v947_v37, %v18729_v61  ;;  %v998_v14 = vmul.f32 %v947_v37, %v18730_v55  ;;  %v999_v31 = vmul.f32 %v947_v37, %v18731_v48  ;;  %v1000_v43 = vmul.f32 %v947_v37, %v18732_v60  ;;  %v18737_v55 = vld [vmem:[#allocation23_spill] sm:$0xff] }
 0x1fe   :  { %v1001_v24 = vmul.f32 %v947_v37, %v18733_v59  ;;  %v1002_v12 = vmul.f32 %v947_v37, %v18734_v62  ;;  %v1003_v54 = vmul.f32 %v947_v37, %v18735_v29  ;;  %v1004_v61 = vmul.f32 %v947_v37, %v18736_v5 }
 0x1ff   :  { %v14935_v48 = vadd.f32 %v18737_v55, %v949_v56  ;;  %v14938_v60 = vadd.f32 %v18737_v55, %v950_v44  ;;  %v14941_v59 = vadd.f32 %v18737_v55, %v951_v7  ;;  %v14944_v62 = vadd.f32 %v18737_v55, %v952_v19 }
 0x200   :  { %v14947_v29 = vadd.f32 %v18737_v55, %v953_v26  ;;  %v14950_v5 = vadd.f32 %v18737_v55, %v954_v15  ;;  %v14953_v37 = vadd.f32 %v18737_v55, %v955_v0  ;;  %v14956_v56 = vadd.f32 %v18737_v55, %v956_v35 }
 0x201   :  { %v14959_v44 = vadd.f32 %v18737_v55, %v957_v4  ;;  %v14962_v7 = vadd.f32 %v18737_v55, %v958_v32  ;;  %v14965_v19 = vadd.f32 %v18737_v55, %v959_v36  ;;  %v14968_v26 = vadd.f32 %v18737_v55, %v960_v45 }
 0x202   :  { %v14971_v15 = vadd.f32 %v18737_v55, %v961_v51  ;;  %v14974_v0 = vadd.f32 %v18737_v55, %v962_v2  ;;  %v14977_v35 = vadd.f32 %v18737_v55, %v963_v40  ;;  %v14980_v4 = vadd.f32 %v18737_v55, %v964_v11 }
 0x203   :  { %v14983_v32 = vadd.f32 %v18737_v55, %v965_v16  ;;  %v14986_v36 = vadd.f32 %v18737_v55, %v966_v25  ;;  %v14989_v45 = vadd.f32 %v18737_v55, %v967_v30  ;;  %v14992_v51 = vadd.f32 %v18737_v55, %v968_v41 }
 0x204   :  { %v14995_v2 = vadd.f32 %v18737_v55, %v969_v47  ;;  %v14998_v40 = vadd.f32 %v18737_v55, %v970_v57  ;;  %v15001_v11 = vadd.f32 %v18737_v55, %v971_v22  ;;  %v15004_v16 = vadd.f32 %v18737_v55, %v972_v63 }
 0x205   :  { %v15007_v25 = vadd.f32 %v18737_v55, %v973_v10  ;;  %v15010_v30 = vadd.f32 %v18737_v55, %v974_v17  ;;  %v15013_v41 = vadd.f32 %v18737_v55, %v975_v27  ;;  %v15016_v47 = vadd.f32 %v18737_v55, %v976_v34 }
 0x206   :  { %v15019_v57 = vadd.f32 %v18737_v55, %v977_v46  ;;  %v15022_v22 = vadd.f32 %v18737_v55, %v978_v53  ;;  %v15025_v63 = vadd.f32 %v18737_v55, %v979_v3  ;;  %v15028_v10 = vadd.f32 %v18737_v55, %v980_v8 }
 0x207   :  { %v15031_v17 = vadd.f32 %v18737_v55, %v981_v21  ;;  %v15034_v27 = vadd.f32 %v18737_v55, %v982_v28  ;;  %v15037_v34 = vadd.f32 %v18737_v55, %v983_v42  ;;  %v15040_v46 = vadd.f32 %v18737_v55, %v984_v50 }
 0x208   :  { %v15043_v53 = vadd.f32 %v18737_v55, %v985_v1  ;;  %v15046_v3 = vadd.f32 %v18737_v55, %v986_v9  ;;  %v15049_v8 = vadd.f32 %v18737_v55, %v987_v23  ;;  %v15052_v21 = vadd.f32 %v18737_v55, %v988_v33 }
 0x209   :  { %v15055_v28 = vadd.f32 %v18737_v55, %v989_v49  ;;  %v15058_v42 = vadd.f32 %v18737_v55, %v990_v58  ;;  %v15061_v50 = vadd.f32 %v18737_v55, %v991_v13  ;;  %v15064_v1 = vadd.f32 %v18737_v55, %v992_v20 }
 0x20a   :  { %v15067_v9 = vadd.f32 %v18737_v55, %v993_v39  ;;  %v15070_v23 = vadd.f32 %v18737_v55, %v994_v52  ;;  %v15073_v33 = vadd.f32 %v18737_v55, %v995_v6  ;;  %v15076_v49 = vadd.f32 %v18737_v55, %v996_v18 }
 0x20b   :  { %v15079_v58 = vadd.f32 %v18737_v55, %v997_v38  ;;  %v15082_v13 = vadd.f32 %v18737_v55, %v998_v14  ;;  %v15085_v20 = vadd.f32 %v18737_v55, %v999_v31  ;;  %v15088_v39 = vadd.f32 %v18737_v55, %v1000_v43 }
 0x20c   :  { %v15091_v52 = vadd.f32 %v18737_v55, %v1001_v24  ;;  %v15094_v6 = vadd.f32 %v18737_v55, %v1002_v12  ;;  %v15097_v18 = vadd.f32 %v18737_v55, %v1003_v54  ;;  %v15100_v38 = vadd.f32 %v18737_v55, %v1004_v61 }
 0x20d   :  { %18738 = vst [vmem:[#allocation4_spill] sm:$0xff] %v15085_v20  ;;  %v1069_v14 = vmax.f32 %v14935_v48, 0.0  ;;  %v1070_v31 = vmax.f32 %v14938_v60, 0.0  ;;  %v1071_v20 = vmax.f32 %v14941_v59, 0.0  ;;  %v1072_v43 = vmax.f32 %v14944_v62, 0.0 }
 0x20e   :  { %18739 = vst [vmem:[#allocation5_spill] sm:$0xff] %v15091_v52  ;;  %18740 = vst [vmem:[#allocation6_spill] sm:$0xff] %v15097_v18  ;;  %v1073_v24 = vmax.f32 %v14947_v29, 0.0  ;;  %v1074_v52 = vmax.f32 %v14950_v5, 0.0  ;;  %v1075_v12 = vmax.f32 %v14953_v37, 0.0  ;;  %v1076_v54 = vmax.f32 %v14956_v56, 0.0 }
 0x20f   :  { %18741 = vst [vmem:[#allocation7_spill] sm:$0xff] %v15100_v38  ;;  %v1077_v18 = vmax.f32 %v14959_v44, 0.0  ;;  %v1078_v61 = vmax.f32 %v14962_v7, 0.0  ;;  %v1079_v55 = vmax.f32 %v14965_v19, 0.0  ;;  %v1080_v48 = vmax.f32 %v14968_v26, 0.0 }
 0x210   :  { %v1081_v60 = vmax.f32 %v14971_v15, 0.0  ;;  %v1082_v59 = vmax.f32 %v14974_v0, 0.0  ;;  %v1083_v62 = vmax.f32 %v14977_v35, 0.0  ;;  %v1084_v29 = vmax.f32 %v14980_v4, 0.0 }
 0x211   :  { %v1085_v5 = vmax.f32 %v14983_v32, 0.0  ;;  %v1086_v37 = vmax.f32 %v14986_v36, 0.0  ;;  %v1087_v56 = vmax.f32 %v14989_v45, 0.0  ;;  %v1088_v44 = vmax.f32 %v14992_v51, 0.0 }
 0x212   :  { %v1089_v7 = vmax.f32 %v14995_v2, 0.0  ;;  %v1090_v19 = vmax.f32 %v14998_v40, 0.0  ;;  %v1091_v26 = vmax.f32 %v15001_v11, 0.0  ;;  %v1092_v15 = vmax.f32 %v15004_v16, 0.0 }
 0x213   :  { %v1093_v0 = vmax.f32 %v15007_v25, 0.0  ;;  %v1094_v35 = vmax.f32 %v15010_v30, 0.0  ;;  %v1095_v4 = vmax.f32 %v15013_v41, 0.0  ;;  %v1096_v32 = vmax.f32 %v15016_v47, 0.0 }
 0x214   :  { %v1097_v36 = vmax.f32 %v15019_v57, 0.0  ;;  %v1098_v45 = vmax.f32 %v15022_v22, 0.0  ;;  %v1099_v51 = vmax.f32 %v15025_v63, 0.0  ;;  %v1100_v2 = vmax.f32 %v15028_v10, 0.0 }
 0x215   :  { %v1101_v40 = vmax.f32 %v15031_v17, 0.0  ;;  %v1102_v11 = vmax.f32 %v15034_v27, 0.0  ;;  %v1103_v16 = vmax.f32 %v15037_v34, 0.0  ;;  %v1104_v25 = vmax.f32 %v15040_v46, 0.0  ;;  %v18743_v38 = vld [vmem:[#allocation5_spill] sm:$0xff] }
 0x216   :  { %v1105_v30 = vmax.f32 %v15043_v53, 0.0  ;;  %v1106_v41 = vmax.f32 %v15046_v3, 0.0  ;;  %v1107_v47 = vmax.f32 %v15049_v8, 0.0  ;;  %v1108_v57 = vmax.f32 %v15052_v21, 0.0  ;;  %v18742_v21 = vld [vmem:[#allocation4_spill] sm:$0xff] }
 0x217   :  { %v1109_v22 = vmax.f32 %v15055_v28, 0.0  ;;  %v1110_v63 = vmax.f32 %v15058_v42, 0.0  ;;  %v1111_v10 = vmax.f32 %v15061_v50, 0.0  ;;  %v1112_v17 = vmax.f32 %v15064_v1, 0.0 }
 0x218   :  { %v1113_v27 = vmax.f32 %v15067_v9, 0.0  ;;  %v1114_v34 = vmax.f32 %v15070_v23, 0.0  ;;  %v1115_v46 = vmax.f32 %v15073_v33, 0.0  ;;  %v1116_v53 = vmax.f32 %v15076_v49, 0.0  ;;  %v18744_v9 = vld [vmem:[#allocation6_spill] sm:$0xff]  ;;  %v18745_v33 = vld [vmem:[#allocation7_spill] sm:$0xff] }
 0x219   :  { %v1117_v3 = vmax.f32 %v15079_v58, 0.0  ;;  %v1118_v8 = vmax.f32 %v15082_v13, 0.0  ;;  %v1119_v28 = vmax.f32 %v18742_v21, 0.0  ;;  %v1120_v42 = vmax.f32 %v15088_v39, 0.0 }
 0x21a   :  { %v1121_v50 = vmax.f32 %v18743_v38, 0.0  ;;  %v1122_v1 = vmax.f32 %v15094_v6, 0.0  ;;  %v1123_v23 = vmax.f32 %v18744_v9, 0.0  ;;  %v1124_v49 = vmax.f32 %v18745_v33, 0.0 }
 0x21b   :  { %v15158_v58 = vpack.c.bf16 %v1070_v31, %v1069_v14  ;;  %v15160_v13 = vpack.c.bf16 %v1072_v43, %v1071_v20  ;;  %v15162_v21 = vpack.c.bf16 %v1074_v52, %v1073_v24  ;;  %v15164_v39 = vpack.c.bf16 %v1076_v54, %v1075_v12 }
 0x21c   :  { %v15166_v38 = vpack.c.bf16 %v1078_v61, %v1077_v18  ;;  %v15168_v6 = vpack.c.bf16 %v1080_v48, %v1079_v55  ;;  %v15170_v9 = vpack.c.bf16 %v1082_v59, %v1081_v60  ;;  %v15172_v33 = vpack.c.bf16 %v1084_v29, %v1083_v62 }
 0x21d   :  { %18746 = vst [vmem:[#allocation8_spill] sm:$0xff] %v15158_v58  ;;  %v15174_v14 = vpack.c.bf16 %v1086_v37, %v1085_v5  ;;  %v15176_v31 = vpack.c.bf16 %v1088_v44, %v1087_v56  ;;  %v15178_v58 = vpack.c.bf16 %v1090_v19, %v1089_v7  ;;  %v15180_v20 = vpack.c.bf16 %v1092_v15, %v1091_v26  ;;  %v13398_v7 = vld [vmem:[%s18645_s4] ss:$16 sps:$4 sm:$0xff]   ;;  %v13401_v19 = vld [vmem:[%s18645_s4 + $0x24] ss:$16 sps:$4 sm:$0xff]  }
 0x21e   :  { %18747 = vst [vmem:[#allocation9_spill] sm:$0xff] %v15172_v33  ;;  %v15182_v52 = vpack.c.bf16 %v1094_v35, %v1093_v0  ;;  %v15184_v43 = vpack.c.bf16 %v1096_v32, %v1095_v4  ;;  %v15186_v18 = vpack.c.bf16 %v1098_v45, %v1097_v36  ;;  %v15188_v24 = vpack.c.bf16 %v1100_v2, %v1099_v51  ;;  %v13403_v15 = vld [vmem:[%s18645_s4 + $0x20] ss:$16 sps:$4 sm:$0xff]   ;;  %v13404_v0 = vld [vmem:[%s18645_s4 + $0x44] ss:$16 sps:$4 sm:$0xff]  }
 0x21f   :  { %v15190_v12 = vpack.c.bf16 %v1102_v11, %v1101_v40  ;;  %11557 = vmatprep.subr.bf16.mxu1 %v15174_v14  ;;  %v15193_v54 = vpack.c.bf16 %v1104_v25, %v1103_v16  ;;  %v15195_v61 = vpack.c.bf16 %v1106_v41, %v1105_v30  ;;  %v15197_v55 = vpack.c.bf16 %v1108_v57, %v1107_v47  ;;  %v13406_v35 = vld [vmem:[%s18645_s4 + $0x40] ss:$16 sps:$4 sm:$0xff]   ;;  %v13407_v4 = vld [vmem:[%s18645_s4 + $0x64] ss:$16 sps:$4 sm:$0xff]   ;;  %v13420_v47 = vld [vmem:[%s18645_s4 + $0xc] ss:$16 sps:$4 sm:$0xff]  }
 0x220   :  { %18748 = vst [vmem:[#allocation10_spill] sm:$0xff] %v15188_v24  ;;  %v15199_v48 = vpack.c.bf16 %v1110_v63, %v1109_v22  ;;  %v15202_v59 = vpack.c.bf16 %v1112_v17, %v1111_v10  ;;  %v15204_v62 = vpack.c.bf16 %v1114_v34, %v1113_v27  ;;  %v15206_v29 = vpack.c.bf16 %v1116_v53, %v1115_v46  ;;  %v13409_v32 = vld [vmem:[%s18645_s4 + $0x60] ss:$16 sps:$4 sm:$0xff]   ;;  %v13410_v36 = vld [vmem:[%s18645_s4 + $0x84] ss:$16 sps:$4 sm:$0xff]  }
 0x221   :  { %v15208_v5 = vpack.c.bf16 %v1118_v8, %v1117_v3  ;;  %v15211_v37 = vpack.c.bf16 %v1120_v42, %v1119_v28  ;;  %v15213_v56 = vpack.c.bf16 %v1122_v1, %v1121_v50  ;;  %v15215_v44 = vpack.c.bf16 %v1124_v49, %v1123_v23  ;;  %v13412_v45 = vld [vmem:[%s18645_s4 + $0x80] ss:$16 sps:$4 sm:$0xff]   ;;  %v13413_v51 = vld [vmem:[%s18645_s4 + $0xa4] ss:$16 sps:$4 sm:$0xff]   ;;  %v13418_v22 = vld [vmem:[%s18645_s4 + $0x8] ss:$16 sps:$4 sm:$0xff]  }
 0x222   :  { %v18691_v26 = vmov 0   ;;  %v1179_v2 = vld [vmem:[%s18645_s4 + $0xc0] sm:$0x11]  ;;  %v13421_v63 = vld [vmem:[%s18645_s4 + $0x2c] ss:$16 sps:$4 sm:$0xff]   ;;  %v18751_v34 = vmov 0.0  }
 0x223   :  { %v13415_v40 = vld [vmem:[%s18645_s4 + $0xa0] ss:$16 sps:$4 sm:$0xff]   ;;  %v10105_v11 = vcombine.high %v1179_v2, %v1179_v2  ;;  %v10104_v41 = vcombine.low %v1179_v2, %v1179_v2  ;;  %v13423_v17 = vld [vmem:[%s18645_s4 + $0x28] ss:$16 sps:$4 sm:$0xff]   ;;  %v13424_v27 = vld [vmem:[%s18645_s4 + $0x4c] ss:$16 sps:$4 sm:$0xff]  }
 0x224   :  { %v18749_v60 = vld [vmem:[#allocation8_spill] sm:$0xff]  ;;  %v13427_v53 = vld [vmem:[%s18645_s4 + $0x6c] ss:$16 sps:$4 sm:$0xff]  }
 0x225   :  { %11558 = vmatpush3.bf16.msra.mxu1 %v18749_v60  ;;  %v18750_v16 = vld [vmem:[#allocation24_spill] sm:$0xff]  ;;  %v13430_v8 = vld [vmem:[%s18645_s4 + $0x8c] ss:$16 sps:$4 sm:$0xff]  }
 0x226   :  { %11559 = vmatprep.subr.bf16.mxu1 %v15176_v31  ;;  %v1125_v25 = vmax.f32 %v18750_v16, 0.0  ;;  %v13464_v10 = vld [vmem:[%s18648_s5 + $0x20] sm:$0xff]   ;;  %v13426_v46 = vld [vmem:[%s18645_s4 + $0x48] ss:$16 sps:$4 sm:$0xff]   ;;  %v13433_v42 = vld [vmem:[%s18645_s4 + $0xac] ss:$16 sps:$4 sm:$0xff]  }
 0x227   :  { %12580 = vmatpush3.bf16.msra.mxu0 %v13464_v10  ;;  %v13429_v3 = vld [vmem:[%s18645_s4 + $0x68] ss:$16 sps:$4 sm:$0xff]   ;;  %v13452_v2 = vld [vmem:[%s18645_s4 + $0x150] ss:$16 sps:$4 sm:$0xff]  }
 0x228   :  { %v1154_v30 = vpack.c.bf16 %v1125_v25, %v1125_v25  ;;  %12581 = vmatprep.subr.bf16.mxu0 %v18751_v34  ;;  %v13432_v28 = vld [vmem:[%s18645_s4 + $0x88] ss:$16 sps:$4 sm:$0xff]   ;;  %v13455_v16 = vld [vmem:[%s18645_s4 + $0x170] ss:$16 sps:$4 sm:$0xff]  }
 0x229   :  { %11560 = vmatpush3.bf16.msra.mxu1 %v15160_v13  ;;  %v1180_v50 = vld [vmem:[%s18645_s4 + $0xc8] sm:$0x11] }
 0x22a   :  { %11561 = vmatprep.subr.bf16.mxu1 %v15178_v58  ;;  %v15296_v57 = vsel %vm1330_vm5, %v1154_v30, 0  ;;  %v13435_v1 = vld [vmem:[%s18645_s4 + $0xa8] ss:$16 sps:$4 sm:$0xff]   ;;  %v10107_v23 = vcombine.high %v1180_v50, %v1180_v50  ;;  %v10106_v49 = vcombine.low %v1180_v50, %v1180_v50 }
 0x22b   :  { %v13463_v10 = vld [vmem:[%s18645_s4 + $0xf8] ss:$16 sps:$4 sm:$0xff]  }
 0x22c   :  { %v13476_v50 = vld [vmem:[%s18645_s4 + $0x178] ss:$16 sps:$4 sm:$0xff]  }
 0x22d   :  { %11562 = vmatpush3.bf16.msra.mxu1 %v15162_v21 }
 0x22e   :  { %11563 = vmatprep.subr.bf16.mxu1 %v15180_v20 }
 0x231   :  { %11564 = vmatpush3.bf16.msra.mxu1 %v15164_v39 }
 0x232   :  { %11565 = vmatprep.subr.bf16.mxu1 %v15182_v52 }
 0x235   :  { %11566 = vmatpush3.bf16.msra.mxu1 %v15166_v38 }
 0x236   :  { %11567 = vmatprep.subr.bf16.mxu1 %v15184_v43 }
 0x239   :  { %11568 = vmatpush3.bf16.msra.mxu1 %v15168_v6 }
 0x23a   :  { %11569 = vmatprep.subr.bf16.mxu1 %v15186_v18 }
 0x23d   :  { %11570 = vmatpush3.bf16.msra.mxu1 %v15170_v9 }
 0x23e   :  { %11571 = vmatprep.subr.bf16.mxu1 %v15188_v24 }
 0x241   :  { %11572 = vmatpush3.bf16.msra.mxu1 %v15172_v33 }
 0x242   :  { %1422 = vmatprep.subr.bf16.mxu1 %v18691_v26 }
 0x244   :  { %1367 = vmatmul.mubr.bf16.vlgmr.msra.gmra.mrb[0].mxu1 %v13398_v7  ;;  %v13440_v7 = vld [vmem:[%s18645_s4 + $0xd4] ss:$16 sps:$4 sm:$0xff]  }
 0x245   :  { %1423 = vmatpush1.bf16.msra.mxu1 %v15190_v12  ;;  %1374 = vmatprep.mubr.bf16.mxu1 %v13401_v19  ;;  %v13438_v19 = vld [vmem:[%s18645_s4 + $0xd0] ss:$16 sps:$4 sm:$0xff]  }
 0x246   :  { %1424 = vmatprep.subr.bf16.mxu1 %v18691_v26 }
 0x249   :  { %1425 = vmatpush1.bf16.msra.mxu1 %v15193_v54 }
 0x24a   :  { %1426 = vmatprep.subr.bf16.mxu1 %v18691_v26 }
 0x24c   :  { %1375 = vmatmul.mubr.bf16.gmra.mrb[4].mxu1 %v13403_v15  ;;  %v13441_v15 = vld [vmem:[%s18645_s4 + $0xf4] ss:$16 sps:$4 sm:$0xff]  }
 0x24d   :  { %1427 = vmatpush1.bf16.msra.mxu1 %v15195_v61  ;;  %1382 = vmatprep.mubr.bf16.mxu1 %v13404_v0  ;;  %v13487_v0 = vld [vmem:[%s18648_s5 + $0x28] sm:$0xff]  }
 0x24e   :  { %1428 = vmatprep.subr.bf16.mxu1 %v18691_v26  ;;  %12582 = vmatpush3.bf16.msra.mxu0 %v13487_v0  ;;  %v13481_v0 = vld [vmem:[%s18645_s4 + $0x1a4] ss:$16 sps:$4 sm:$0xff]  }
 0x24f   :  { %12583 = vmatprep.subr.bf16.mxu0 %v18751_v34 }
 0x251   :  { %1429 = vmatpush1.bf16.msra.mxu1 %v15197_v55 }
 0x252   :  { %1430 = vmatprep.subr.bf16.mxu1 %v18691_v26 }
 0x254   :  { %1383 = vmatmul.mubr.bf16.gmra.mrb[8].mxu1 %v13406_v35  ;;  %v13443_v35 = vld [vmem:[%s18645_s4 + $0xf0] ss:$16 sps:$4 sm:$0xff]  }
 0x255   :  { %1431 = vmatpush1.bf16.msra.mxu1 %v15199_v48  ;;  %1390 = vmatprep.mubr.bf16.mxu1 %v13407_v4  ;;  %v13444_v4 = vld [vmem:[%s18645_s4 + $0x114] ss:$16 sps:$4 sm:$0xff]  }
 0x256   :  { %1432 = vmatprep.subr.bf16.mxu1 %v18691_v26 }
 0x259   :  { %1433 = vmatpush1.bf16.msra.mxu1 %v15202_v59 }
 0x25a   :  { %1434 = vmatprep.subr.bf16.mxu1 %v18691_v26 }
 0x25c   :  { %1391 = vmatmul.mubr.bf16.gmra.mrb[12].mxu1 %v13409_v32  ;;  %v13446_v32 = vld [vmem:[%s18645_s4 + $0x110] ss:$16 sps:$4 sm:$0xff]  }
 0x25d   :  { %1435 = vmatpush1.bf16.msra.mxu1 %v15204_v62  ;;  %1398 = vmatprep.mubr.bf16.mxu1 %v13410_v36  ;;  %v13447_v36 = vld [vmem:[%s18645_s4 + $0x134] ss:$16 sps:$4 sm:$0xff]  }
 0x25e   :  { %1436 = vmatprep.subr.bf16.mxu1 %v18691_v26 }
 0x261   :  { %1437 = vmatpush1.bf16.msra.mxu1 %v15206_v29 }
 0x262   :  { %1438 = vmatprep.subr.bf16.mxu1 %v18691_v26 }
 0x264   :  { %1399 = vmatmul.mubr.bf16.gmra.mrb[16].mxu1 %v13412_v45  ;;  %v13449_v45 = vld [vmem:[%s18645_s4 + $0x130] ss:$16 sps:$4 sm:$0xff]  }
 0x265   :  { %1439 = vmatpush1.bf16.msra.mxu1 %v15208_v5  ;;  %1406 = vmatprep.mubr.bf16.mxu1 %v13413_v51  ;;  %v13450_v51 = vld [vmem:[%s18645_s4 + $0x154] ss:$16 sps:$4 sm:$0xff]  }
 0x266   :  { %1440 = vmatprep.subr.bf16.mxu1 %v18691_v26 }
 0x269   :  { %1441 = vmatpush1.bf16.msra.mxu1 %v15211_v37 }
 0x26a   :  { %1442 = vmatprep.subr.bf16.mxu1 %v18691_v26 }
 0x26c   :  { %1407 = vmatmul.mubr.bf16.gmra.mrb[20].mxu1 %v13415_v40  ;;  %v13453_v40 = vld [vmem:[%s18645_s4 + $0x174] ss:$16 sps:$4 sm:$0xff]  }
 0x26d   :  { %1443 = vmatpush1.bf16.msra.mxu1 %v15213_v56  ;;  %1414 = vmatprep.mubr.bf16.mxu1 %v10105_v11  ;;  %v10139_v11 = vld [vmem:[%s18645_s4 + $0x190] sm:$0x11] }
 0x26e   :  { %1444 = vmatprep.subr.bf16.mxu1 %v18691_v26  ;;  %v10166_v25 = vcombine.high %v10139_v11, %v10139_v11  ;;  %v10165_v30 = vcombine.low %v10139_v11, %v10139_v11 }
 0x271   :  { %1445 = vmatpush1.bf16.msra.mxu1 %v15215_v44 }
 0x272   :  { %1446 = vmatprep.subr.bf16.mxu1 %v18691_v26 }
 0x274   :  { %1415 = vmatmul.mubr.bf16.gmra.mrb[24].mxu1 %v10104_v41  ;;  %v13460_v41 = vld [vmem:[%s18645_s4 + $0xdc] ss:$16 sps:$4 sm:$0xff]  }
 0x275   :  { %1447 = vmatpush1.bf16.msra.mxu1 %v15296_v57  ;;  %10108 = vmatprep.mubr.msk.bf16.mxu1 %vm1308_vm6, %v13420_v47  ;;  %v13458_v47 = vld [vmem:[%s18645_s4 + $0xd8] ss:$16 sps:$4 sm:$0xff]  }
 0x276   :  { %11615 = vmatprep.subr.bf16.mxu1 %v15174_v14 }
 0x27c   :  { %1455 = vmatmul.mubr.bf16.vlgmr.msra.gmra.mrb[28].mxu1 %v13418_v22  ;;  %v13461_v22 = vld [vmem:[%s18645_s4 + $0xfc] ss:$16 sps:$4 sm:$0xff]  }
 0x27d   :  { %11616 = vmatpush3.bf16.msra.mxu1 %v18749_v60  ;;  %10109 = vmatprep.mubr.msk.bf16.mxu1 %vm1308_vm6, %v13421_v63  ;;  %v13509_v63 = vld [vmem:[%s18648_s5 + $0x30] sm:$0xff]  }
 0x27e   :  { %11617 = vmatprep.subr.bf16.mxu1 %v15176_v31  ;;  %12584 = vmatpush3.bf16.msra.mxu0 %v13509_v63  ;;  %v13485_v63 = vld [vmem:[%s18645_s4 + $0x1e4] ss:$16 sps:$4 sm:$0xff]  }
 0x27f   :  { %12585 = vmatprep.subr.bf16.mxu0 %v18751_v34 }
 0x281   :  { %11618 = vmatpush3.bf16.msra.mxu1 %v15160_v13 }
 0x282   :  { %11619 = vmatprep.subr.bf16.mxu1 %v15178_v58 }
 0x284   :  { %1463 = vmatmul.mubr.bf16.gmra.mrb[32].mxu1 %v13423_v17  ;;  %v13465_v17 = vld [vmem:[%s18645_s4 + $0x11c] ss:$16 sps:$4 sm:$0xff]  }
 0x285   :  { %11620 = vmatpush3.bf16.msra.mxu1 %v15162_v21  ;;  %10110 = vmatprep.mubr.msk.bf16.mxu1 %vm1308_vm6, %v13424_v27  ;;  %v13467_v27 = vld [vmem:[%s18645_s4 + $0x118] ss:$16 sps:$4 sm:$0xff]  }
 0x286   :  { %11621 = vmatprep.subr.bf16.mxu1 %v15180_v20 }
 0x289   :  { %11622 = vmatpush3.bf16.msra.mxu1 %v15164_v39 }
 0x28a   :  { %11623 = vmatprep.subr.bf16.mxu1 %v15182_v52 }
 0x28c   :  { %1471 = vmatmul.mubr.bf16.gmra.mrb[36].mxu1 %v13426_v46  ;;  %v13468_v46 = vld [vmem:[%s18645_s4 + $0x13c] ss:$16 sps:$4 sm:$0xff]  }
 0x28d   :  { %11624 = vmatpush3.bf16.msra.mxu1 %v15166_v38  ;;  %10111 = vmatprep.mubr.msk.bf16.mxu1 %vm1308_vm6, %v13427_v53  ;;  %v13470_v53 = vld [vmem:[%s18645_s4 + $0x138] ss:$16 sps:$4 sm:$0xff]  }
 0x28e   :  { %11625 = vmatprep.subr.bf16.mxu1 %v15184_v43 }
 0x291   :  { %11626 = vmatpush3.bf16.msra.mxu1 %v15168_v6 }
 0x292   :  { %11627 = vmatprep.subr.bf16.mxu1 %v15186_v18 }
 0x294   :  { %1479 = vmatmul.mubr.bf16.gmra.mrb[40].mxu1 %v13429_v3  ;;  %v13471_v3 = vld [vmem:[%s18645_s4 + $0x15c] ss:$16 sps:$4 sm:$0xff]  }
 0x295   :  { %11628 = vmatpush3.bf16.msra.mxu1 %v15170_v9  ;;  %10112 = vmatprep.mubr.msk.bf16.mxu1 %vm1308_vm6, %v13430_v8  ;;  %v13473_v8 = vld [vmem:[%s18645_s4 + $0x158] ss:$16 sps:$4 sm:$0xff]  }
 0x296   :  { %11629 = vmatprep.subr.bf16.mxu1 %v15188_v24 }
 0x299   :  { %11630 = vmatpush3.bf16.msra.mxu1 %v15172_v33 }
 0x29a   :  { %1788 = vmatprep.subr.bf16.mxu1 %v18691_v26 }
 0x29c   :  { %1487 = vmatmul.mubr.bf16.gmra.mrb[44].mxu1 %v13432_v28  ;;  %v13474_v28 = vld [vmem:[%s18645_s4 + $0x17c] ss:$16 sps:$4 sm:$0xff]  }
 0x29d   :  { %10113 = vmatprep.mubr.msk.bf16.mxu1 %vm1308_vm6, %v13433_v42  ;;  %v10140_v42 = vld [vmem:[%s18645_s4 + $0x198] sm:$0x11] }
 0x2a4   :  { %1495 = vmatmul.mubr.bf16.gmra.mrb[48].mxu1 %v13435_v1  ;;  %v10168_v1 = vcombine.high %v10140_v42, %v10140_v42 }
 0x2a5   :  { %10114 = vmatprep.mubr.msk.bf16.mxu1 %vm1308_vm6, %v10107_v23 }
 0x2ac   :  { %1503 = vmatmul.mubr.bf16.gmra.mrb[52].mxu1 %v10106_v49 }
 0x2ad   :  { %1732 = vmatprep.mubr.bf16.mxu1 %v13440_v7  ;;  %v10167_v7 = vcombine.low %v10140_v42, %v10140_v42  ;;  %v13489_v42 = vld [vmem:[%s18645_s4 + $0x204] ss:$16 sps:$4 sm:$0xff]  }
 0x2b4   :  { %1733 = vmatmul.mubr.bf16.vlgmr.msra.gmra.mrb[56].mxu1 %v13438_v19 }
 0x2b5   :  { %1789 = vmatpush1.bf16.msra.mxu1 %v15190_v12  ;;  %1740 = vmatprep.mubr.bf16.mxu1 %v13441_v15 }
 0x2b6   :  { %1790 = vmatprep.subr.bf16.mxu1 %v18691_v26 }
 0x2b9   :  { %1791 = vmatpush1.bf16.msra.mxu1 %v15193_v54 }
 0x2ba   :  { %1792 = vmatprep.subr.bf16.mxu1 %v18691_v26 }
 0x2bc   :  { %1741 = vmatmul.mubr.bf16.gmra.mrb[60].mxu1 %v13443_v35 }
 0x2bd   :  { %1793 = vmatpush1.bf16.msra.mxu1 %v15195_v61  ;;  %1748 = vmatprep.mubr.bf16.mxu1 %v13444_v4 }
 0x2be   :  { %1794 = vmatprep.subr.bf16.mxu1 %v18691_v26 }
 0x2c1   :  { %1795 = vmatpush1.bf16.msra.mxu1 %v15197_v55 }
 0x2c2   :  { %1796 = vmatprep.subr.bf16.mxu1 %v18691_v26 }
 0x2c4   :  { %1749 = vmatmul.mubr.bf16.gmra.mrb[64].mxu1 %v13446_v32 }
 0x2c5   :  { %1797 = vmatpush1.bf16.msra.mxu1 %v15199_v48  ;;  %1756 = vmatprep.mubr.bf16.mxu1 %v13447_v36 }
 0x2c6   :  { %1798 = vmatprep.subr.bf16.mxu1 %v18691_v26 }
 0x2c9   :  { %1799 = vmatpush1.bf16.msra.mxu1 %v15202_v59 }
 0x2ca   :  { %1800 = vmatprep.subr.bf16.mxu1 %v18691_v26 }
 0x2cc   :  { %1757 = vmatmul.mubr.bf16.gmra.mrb[68].mxu1 %v13449_v45  ;;  %v13479_v45 = vld [vmem:[%s18645_s4 + $0x1a0] ss:$16 sps:$4 sm:$0xff]  }
 0x2cd   :  { %1801 = vmatpush1.bf16.msra.mxu1 %v15204_v62  ;;  %1764 = vmatprep.mubr.bf16.mxu1 %v13450_v51 }
 0x2ce   :  { %1802 = vmatprep.subr.bf16.mxu1 %v18691_v26 }
 0x2d1   :  { %1803 = vmatpush1.bf16.msra.mxu1 %v15206_v29 }
 0x2d2   :  { %1804 = vmatprep.subr.bf16.mxu1 %v18691_v26 }
 0x2d4   :  { %1765 = vmatmul.mubr.bf16.gmra.mrb[72].mxu1 %v13452_v2 }
 0x2d5   :  { %1805 = vmatpush1.bf16.msra.mxu1 %v15208_v5  ;;  %1772 = vmatprep.mubr.bf16.mxu1 %v13453_v40  ;;  %v13482_v40 = vld [vmem:[%s18645_s4 + $0x1c4] ss:$16 sps:$4 sm:$0xff]  }
 0x2d6   :  { %1806 = vmatprep.subr.bf16.mxu1 %v18691_v26 }
 0x2d9   :  { %1807 = vmatpush1.bf16.msra.mxu1 %v15211_v37 }
 0x2da   :  { %1808 = vmatprep.subr.bf16.mxu1 %v18691_v26 }
 0x2dc   :  { %1773 = vmatmul.mubr.bf16.gmra.mrb[76].mxu1 %v13455_v16 }
 0x2dd   :  { %1809 = vmatpush1.bf16.msra.mxu1 %v15213_v56  ;;  %1780 = vmatprep.mubr.bf16.mxu1 %v10166_v25 }
 0x2de   :  { %1810 = vmatprep.subr.bf16.mxu1 %v18691_v26 }
 0x2e1   :  { %1811 = vmatpush1.bf16.msra.mxu1 %v15215_v44 }
 0x2e2   :  { %1812 = vmatprep.subr.bf16.mxu1 %v18691_v26 }
 0x2e4   :  { %1781 = vmatmul.mubr.bf16.gmra.mrb[80].mxu1 %v10165_v30 }
 0x2e5   :  { %1813 = vmatpush1.bf16.msra.mxu1 %v15296_v57  ;;  %10169 = vmatprep.mubr.msk.bf16.mxu1 %vm1308_vm6, %v13460_v41  ;;  %v13484_v41 = vld [vmem:[%s18645_s4 + $0x1c0] ss:$16 sps:$4 sm:$0xff]  }
 0x2e6   :  { %11695 = vmatprep.subr.bf16.mxu1 %v15174_v14 }
 0x2ec   :  { %1821 = vmatmul.mubr.bf16.vlgmr.msra.gmra.mrb[84].mxu1 %v13458_v47 }
 0x2ed   :  { %11696 = vmatpush3.bf16.msra.mxu1 %v18749_v60  ;;  %10170 = vmatprep.mubr.msk.bf16.mxu1 %vm1308_vm6, %v13461_v22 }
 0x2ee   :  { %11697 = vmatprep.subr.bf16.mxu1 %v15176_v31 }
 0x2f1   :  { %11698 = vmatpush3.bf16.msra.mxu1 %v15160_v13 }
 0x2f2   :  { %11699 = vmatprep.subr.bf16.mxu1 %v15178_v58 }
 0x2f4   :  { %1829 = vmatmul.mubr.bf16.gmra.mrb[88].mxu1 %v13463_v10  ;;  %v13530_v10 = vld [vmem:[%s18648_s5 + $0x38] sm:$0xff]  }
 0x2f5   :  { %11700 = vmatpush3.bf16.msra.mxu1 %v15162_v21  ;;  %10171 = vmatprep.mubr.msk.bf16.mxu1 %vm1308_vm6, %v13465_v17 }
 0x2f6   :  { %11701 = vmatprep.subr.bf16.mxu1 %v15180_v20  ;;  %12586 = vmatpush3.bf16.msra.mxu0 %v13530_v10 }
 0x2f7   :  { %12615 = vmatprep.subr.bf16.mxu0 %v18751_v34 }
 0x2f9   :  { %11702 = vmatpush3.bf16.msra.mxu1 %v15164_v39 }
 0x2fa   :  { %11703 = vmatprep.subr.bf16.mxu1 %v15182_v52 }
 0x2fc   :  { %1837 = vmatmul.mubr.bf16.gmra.mrb[92].mxu1 %v13467_v27 }
 0x2fd   :  { %11704 = vmatpush3.bf16.msra.mxu1 %v15166_v38  ;;  %10172 = vmatprep.mubr.msk.bf16.mxu1 %vm1308_vm6, %v13468_v46 }
 0x2fe   :  { %11705 = vmatprep.subr.bf16.mxu1 %v15184_v43 }
 0x301   :  { %11706 = vmatpush3.bf16.msra.mxu1 %v15168_v6 }
 0x302   :  { %11707 = vmatprep.subr.bf16.mxu1 %v15186_v18 }
 0x304   :  { %1845 = vmatmul.mubr.bf16.gmra.mrb[96].mxu1 %v13470_v53 }
 0x305   :  { %11708 = vmatpush3.bf16.msra.mxu1 %v15170_v9  ;;  %10173 = vmatprep.mubr.msk.bf16.mxu1 %vm1308_vm6, %v13471_v3  ;;  %v13488_v3 = vld [vmem:[%s18645_s4 + $0x1e0] ss:$16 sps:$4 sm:$0xff]  }
 0x306   :  { %11709 = vmatprep.subr.bf16.mxu1 %v15188_v24 }
 0x309   :  { %11710 = vmatpush3.bf16.msra.mxu1 %v15172_v33 }
 0x30a   :  { %2421 = vmatprep.subr.bf16.mxu1 %v18691_v26 }
 0x30c   :  { %1853 = vmatmul.mubr.bf16.gmra.mrb[100].mxu1 %v13473_v8 }
 0x30d   :  { %10174 = vmatprep.mubr.msk.bf16.mxu1 %vm1308_vm6, %v13474_v28 }
 0x314   :  { %1861 = vmatmul.mubr.bf16.gmra.mrb[104].mxu1 %v13476_v50 }
 0x315   :  { %10175 = vmatprep.mubr.msk.bf16.mxu1 %vm1308_vm6, %v10168_v1 }
 0x317   :  { %v11573_v23 = vpop.f32.mrb[0].mxu1 }
 0x318   :  { %v11574_v49 = vpop.f32.mrb[1].mxu1 }
 0x319   :  { %v15498_v19 = vadd.f32 %v11574_v49, %v11573_v23  ;;  %v11576_v15 = vpop.f32.mrb[2].mxu1 }
 0x31a   :  { %v11577_v35 = vpop.f32.mrb[3].mxu1 }
 0x31b   :  { %v15503_v4 = vadd.f32 %v11577_v35, %v11576_v15  ;;  %v13492_v35 = vld [vmem:[%s18645_s4 + $0x224] ss:$16 sps:$4 sm:$0xff]  }
 0x31c   :  { %1869 = vmatmul.mubr.bf16.gmra.mrb[108].mxu1 %v10167_v7  ;;  %v13491_v7 = vld [vmem:[%s18645_s4 + $0x200] ss:$16 sps:$4 sm:$0xff]  }
 0x31d   :  { %2365 = vmatprep.mubr.bf16.mxu1 %v13481_v0 }
 0x31f   :  { %v11579_v32 = vpop.f32.mrb[4].mxu1 }
 0x320   :  { %v11580_v36 = vpop.f32.mrb[5].mxu1 }
 0x321   :  { %v15508_v51 = vadd.f32 %v11580_v36, %v11579_v32  ;;  %v11582_v2 = vpop.f32.mrb[6].mxu1 }
 0x322   :  { %v11583_v11 = vpop.f32.mrb[7].mxu1 }
 0x323   :  { %v15513_v16 = vadd.f32 %v11583_v11, %v11582_v2 }
 0x324   :  { %2366 = vmatmul.mubr.bf16.vlgmr.msra.gmra.mrb[112].mxu1 %v13479_v45 }
 0x325   :  { %2422 = vmatpush1.bf16.msra.mxu1 %v15190_v12  ;;  %2373 = vmatprep.mubr.bf16.mxu1 %v13482_v40  ;;  %v13494_v40 = vld [vmem:[%s18645_s4 + $0x220] ss:$16 sps:$4 sm:$0xff]  }
 0x326   :  { %2423 = vmatprep.subr.bf16.mxu1 %v18691_v26 }
 0x327   :  { %v11585_v25 = vpop.f32.mrb[8].mxu1 }
 0x328   :  { %v11586_v30 = vpop.f32.mrb[9].mxu1 }
 0x329   :  { %v15520_v47 = vadd.f32 %v11586_v30, %v11585_v25  ;;  %2424 = vmatpush1.bf16.msra.mxu1 %v15193_v54  ;;  %v11588_v22 = vpop.f32.mrb[10].mxu1  ;;  %v13495_v30 = vld [vmem:[%s18645_s4 + $0x244] ss:$16 sps:$4 sm:$0xff]  }
 0x32a   :  { %v11589_v17 = vpop.f32.mrb[11].mxu1  ;;  %2425 = vmatprep.subr.bf16.mxu1 %v18691_v26 }
 0x32b   :  { %v15530_v27 = vadd.f32 %v11589_v17, %v11588_v22 }
 0x32c   :  { %2374 = vmatmul.mubr.bf16.gmra.mrb[116].mxu1 %v13484_v41 }
 0x32d   :  { %2426 = vmatpush1.bf16.msra.mxu1 %v15195_v61  ;;  %2381 = vmatprep.mubr.bf16.mxu1 %v13485_v63  ;;  %v10230_v63 = vld [vmem:[%s18645_s4 + $0x260] sm:$0x11] }
 0x32e   :  { %2427 = vmatprep.subr.bf16.mxu1 %v18691_v26 }
 0x32f   :  { %v11591_v46 = vpop.f32.mrb[12].mxu1 }
 0x330   :  { %v11592_v53 = vpop.f32.mrb[13].mxu1 }
 0x331   :  { %v15538_v8 = vadd.f32 %v11592_v53, %v11591_v46  ;;  %2428 = vmatpush1.bf16.msra.mxu1 %v15197_v55  ;;  %v11594_v28 = vpop.f32.mrb[14].mxu1  ;;  %v13497_v46 = vld [vmem:[%s18645_s4 + $0x240] ss:$16 sps:$4 sm:$0xff]  }
 0x332   :  { %v11595_v50 = vpop.f32.mrb[15].mxu1  ;;  %2429 = vmatprep.subr.bf16.mxu1 %v18691_v26 }
 0x333   :  { %v15545_v1 = vadd.f32 %v11595_v50, %v11594_v28  ;;  %v10257_v28 = vcombine.high %v10230_v63, %v10230_v63 }
 0x334   :  { %2382 = vmatmul.mubr.bf16.gmra.mrb[120].mxu1 %v13488_v3 }
 0x335   :  { %2430 = vmatpush1.bf16.msra.mxu1 %v15199_v48  ;;  %2389 = vmatprep.mubr.bf16.mxu1 %v13489_v42 }
 0x336   :  { %2431 = vmatprep.subr.bf16.mxu1 %v18691_v26 }
 0x337   :  { %v11597_v23 = vpop.f32.mrb[16].mxu1 }
 0x338   :  { %v11598_v49 = vpop.f32.mrb[17].mxu1 }
 0x339   :  { %v15552_v15 = vadd.f32 %v11598_v49, %v11597_v23  ;;  %2432 = vmatpush1.bf16.msra.mxu1 %v15202_v59  ;;  %v11600_v0 = vpop.f32.mrb[18].mxu1 }
 0x33a   :  { %v11601_v32 = vpop.f32.mrb[19].mxu1  ;;  %2433 = vmatprep.subr.bf16.mxu1 %v18691_v26 }
 0x33b   :  { %v15559_v36 = vadd.f32 %v11601_v32, %v11600_v0 }
 0x33c   :  { %2390 = vmatmul.mubr.bf16.gmra.mrb[124].mxu1 %v13491_v7  ;;  %v10256_v7 = vcombine.low %v10230_v63, %v10230_v63 }
 0x33d   :  { %2434 = vmatpush1.bf16.msra.mxu1 %v15204_v62  ;;  %2397 = vmatprep.mubr.bf16.mxu1 %v13492_v35  ;;  %v13502_v35 = vld [vmem:[%s18645_s4 + $0x1ac] ss:$16 sps:$4 sm:$0xff]  }
 0x33e   :  { %2435 = vmatprep.subr.bf16.mxu1 %v18691_v26 }
 0x33f   :  { %v11603_v45 = vpop.f32.mrb[20].mxu1 }
 0x340   :  { %v11604_v2 = vpop.f32.mrb[21].mxu1 }
 0x341   :  { %v15566_v11 = vadd.f32 %v11604_v2, %v11603_v45  ;;  %2436 = vmatpush1.bf16.msra.mxu1 %v15206_v29  ;;  %v11606_v25 = vpop.f32.mrb[22].mxu1  ;;  %v13539_v2 = vld [vmem:[%s18645_s4 + $0x310] ss:$16 sps:$4 sm:$0xff]  }
 0x342   :  { %v11607_v41 = vpop.f32.mrb[23].mxu1  ;;  %2437 = vmatprep.subr.bf16.mxu1 %v18691_v26 }
 0x343   :  { %v15573_v22 = vadd.f32 %v11607_v41, %v11606_v25  ;;  %v13503_v41 = vld [vmem:[%s18645_s4 + $0x1cc] ss:$16 sps:$4 sm:$0xff]  }
 0x344   :  { %2398 = vmatmul.mubr.bf16.gmra.mrb[128].mxu1 %v13494_v40 }
 0x345   :  { %2438 = vmatpush1.bf16.msra.mxu1 %v15208_v5  ;;  %2405 = vmatprep.mubr.bf16.mxu1 %v13495_v30 }
 0x346   :  { %2439 = vmatprep.subr.bf16.mxu1 %v18691_v26 }
 0x347   :  { %v11609_v10 = vpop.f32.mrb[24].mxu1 }
 0x348   :  { %v11610_v17 = vpop.f32.mrb[25].mxu1 }
 0x349   :  { %v15583_v53 = vadd.f32 %v11610_v17, %v11609_v10  ;;  %2440 = vmatpush1.bf16.msra.mxu1 %v15211_v37  ;;  %v11612_v3 = vpop.f32.mrb[26].mxu1 }
 0x34a   :  { %v11613_v42 = vpop.f32.mrb[27].mxu1  ;;  %2441 = vmatprep.subr.bf16.mxu1 %v18691_v26 }
 0x34b   :  { %v13506_v42 = vld [vmem:[%s18645_s4 + $0x1ec] ss:$16 sps:$4 sm:$0xff]  }
 0x34c   :  { %2406 = vmatmul.mubr.bf16.gmra.mrb[132].mxu1 %v13497_v46 }
 0x34d   :  { %2442 = vmatpush1.bf16.msra.mxu1 %v15213_v56  ;;  %2413 = vmatprep.mubr.bf16.mxu1 %v10257_v28 }
 0x34e   :  { %2443 = vmatprep.subr.bf16.mxu1 %v18691_v26 }
 0x34f   :  { %v1456_v50 = vpop.f32.mrb[28].mxu1 }
 0x350   :  { %v15590_v23 = vadd.f32 %v15498_v19, %v1456_v50  ;;  %v1458_v49 = vpop.f32.mrb[29].mxu1 }
 0x351   :  { %2444 = vmatpush1.bf16.msra.mxu1 %v15215_v44  ;;  %v1459_v0 = vpop.f32.mrb[30].mxu1 }
 0x352   :  { %v15597_v32 = vadd.f32 %v15503_v4, %v1459_v0  ;;  %v1461_v45 = vpop.f32.mrb[31].mxu1  ;;  %2445 = vmatprep.subr.bf16.mxu1 %v18691_v26  ;;  %v13500_v4 = vld [vmem:[%s18645_s4 + $0x1a8] ss:$16 sps:$4 sm:$0xff]  }
 0x354   :  { %2414 = vmatmul.mubr.bf16.gmra.mrb[136].mxu1 %v10256_v7 }
 0x355   :  { %2446 = vmatpush1.bf16.msra.mxu1 %v15296_v57  ;;  %10260 = vmatprep.mubr.msk.bf16.mxu1 %vm1308_vm6, %v13502_v35 }
 0x356   :  { %11764 = vmatprep.subr.bf16.mxu1 %v15174_v14 }
 0x357   :  { %v1464_v19 = vpop.f32.mrb[32].mxu1 }
 0x358   :  { %v15606_v40 = vadd.f32 %v15508_v51, %v1464_v19  ;;  %v1466_v25 = vpop.f32.mrb[33].mxu1  ;;  %v13510_v19 = vld [vmem:[%s18645_s4 + $0x20c] ss:$16 sps:$4 sm:$0xff]  }
 0x359   :  { %v1467_v30 = vpop.f32.mrb[34].mxu1 }
 0x35a   :  { %v15615_v63 = vadd.f32 %v15513_v16, %v1467_v30  ;;  %v1469_v10 = vpop.f32.mrb[35].mxu1  ;;  %v13505_v16 = vld [vmem:[%s18645_s4 + $0x1c8] ss:$16 sps:$4 sm:$0xff]  }
 0x35c   :  { %2454 = vmatmul.mubr.bf16.vlgmr.msra.gmra.mrb[140].mxu1 %v13500_v4 }
 0x35d   :  { %11765 = vmatpush3.bf16.msra.mxu1 %v18749_v60  ;;  %10261 = vmatprep.mubr.msk.bf16.mxu1 %vm1308_vm6, %v13503_v41 }
 0x35e   :  { %11766 = vmatprep.subr.bf16.mxu1 %v15176_v31 }
 0x35f   :  { %v1472_v51 = vpop.f32.mrb[36].mxu1 }
 0x360   :  { %v15623_v46 = vadd.f32 %v15520_v47, %v1472_v51  ;;  %v1474_v3 = vpop.f32.mrb[37].mxu1 }
 0x361   :  { %11767 = vmatpush3.bf16.msra.mxu1 %v15160_v13  ;;  %v1475_v28 = vpop.f32.mrb[38].mxu1  ;;  %v13513_v3 = vld [vmem:[%s18645_s4 + $0x22c] ss:$16 sps:$4 sm:$0xff]  }
 0x362   :  { %v15633_v50 = vadd.f32 %v15530_v27, %v1475_v28  ;;  %11768 = vmatprep.subr.bf16.mxu1 %v15178_v58  ;;  %v1477_v49 = vpop.f32.mrb[39].mxu1  ;;  %v13508_v27 = vld [vmem:[%s18645_s4 + $0x1e8] ss:$16 sps:$4 sm:$0xff]  }
 0x364   :  { %2462 = vmatmul.mubr.bf16.gmra.mrb[144].mxu1 %v13505_v16 }
 0x365   :  { %11769 = vmatpush3.bf16.msra.mxu1 %v15162_v21  ;;  %10262 = vmatprep.mubr.msk.bf16.mxu1 %vm1308_vm6, %v13506_v42 }
 0x366   :  { %11770 = vmatprep.subr.bf16.mxu1 %v15180_v20 }
 0x367   :  { %v1480_v7 = vpop.f32.mrb[40].mxu1 }
 0x368   :  { %v15642_v0 = vadd.f32 %v15538_v8, %v1480_v7  ;;  %v1482_v35 = vpop.f32.mrb[41].mxu1 }
 0x369   :  { %11771 = vmatpush3.bf16.msra.mxu1 %v15164_v39  ;;  %v1483_v45 = vpop.f32.mrb[42].mxu1 }
 0x36a   :  { %v15652_v25 = vadd.f32 %v15545_v1, %v1483_v45  ;;  %11772 = vmatprep.subr.bf16.mxu1 %v15182_v52  ;;  %v1485_v4 = vpop.f32.mrb[43].mxu1  ;;  %v13512_v1 = vld [vmem:[%s18645_s4 + $0x208] ss:$16 sps:$4 sm:$0xff]  }
 0x36b   :  { %v10231_v4 = vld [vmem:[%s18645_s4 + $0x268] sm:$0x11] }
 0x36c   :  { %2470 = vmatmul.mubr.bf16.gmra.mrb[148].mxu1 %v13508_v27  ;;  %v13516_v27 = vld [vmem:[%s18645_s4 + $0x24c] ss:$16 sps:$4 sm:$0xff]  }
 0x36d   :  { %11773 = vmatpush3.bf16.msra.mxu1 %v15166_v38  ;;  %10263 = vmatprep.mubr.msk.bf16.mxu1 %vm1308_vm6, %v13510_v19 }
 0x36e   :  { %11774 = vmatprep.subr.bf16.mxu1 %v15184_v43 }
 0x36f   :  { %v1488_v30 = vpop.f32.mrb[44].mxu1 }
 0x370   :  { %v15661_v41 = vadd.f32 %v15552_v15, %v1488_v30  ;;  %v1490_v10 = vpop.f32.mrb[45].mxu1 }
 0x371   :  { %11775 = vmatpush3.bf16.msra.mxu1 %v15168_v6  ;;  %v1491_v51 = vpop.f32.mrb[46].mxu1 }
 0x372   :  { %18752 = vst [vmem:[#allocation11_spill] sm:$0xff] %v15661_v41  ;;  %v15671_v16 = vadd.f32 %v15559_v36, %v1491_v51  ;;  %11776 = vmatprep.subr.bf16.mxu1 %v15186_v18  ;;  %v1493_v28 = vpop.f32.mrb[47].mxu1  ;;  %v13515_v36 = vld [vmem:[%s18645_s4 + $0x228] ss:$16 sps:$4 sm:$0xff]   ;;  %v13544_v41 = vld [vmem:[%s18645_s4 + $0x344] ss:$16 sps:$4 sm:$0xff]  }
 0x374   :  { %18753 = vst [vmem:[#allocation12_spill] sm:$0xff] %v15671_v16  ;;  %2478 = vmatmul.mubr.bf16.gmra.mrb[152].mxu1 %v13512_v1 }
 0x375   :  { %11777 = vmatpush3.bf16.msra.mxu1 %v15170_v9  ;;  %10264 = vmatprep.mubr.msk.bf16.mxu1 %vm1308_vm6, %v13513_v3  ;;  %v10259_v3 = vcombine.high %v10231_v4, %v10231_v4 }
 0x376   :  { %11778 = vmatprep.subr.bf16.mxu1 %v15188_v24 }
 0x377   :  { %v1496_v42 = vpop.f32.mrb[48].mxu1 }
 0x378   :  { %v15680_v49 = vadd.f32 %v15566_v11, %v1496_v42  ;;  %v1498_v7 = vpop.f32.mrb[49].mxu1 }
 0x379   :  { %11779 = vmatpush3.bf16.msra.mxu1 %v15172_v33  ;;  %v1499_v35 = vpop.f32.mrb[50].mxu1 }
 0x37a   :  { %18754 = vst [vmem:[#allocation13_spill] sm:$0xff] %v15680_v49  ;;  %v15690_v45 = vadd.f32 %v15573_v22, %v1499_v35  ;;  %11833 = vmatprep.subr.bf16.mxu1 %v15174_v14  ;;  %v1501_v19 = vpop.f32.mrb[51].mxu1  ;;  %v13518_v22 = vld [vmem:[%s18645_s4 + $0x248] ss:$16 sps:$4 sm:$0xff]  }
 0x37c   :  { %18755 = vst [vmem:[#allocation14_spill] sm:$0xff] %v15690_v45  ;;  %2486 = vmatmul.mubr.bf16.gmra.mrb[156].mxu1 %v13515_v36  ;;  %v10258_v36 = vcombine.low %v10231_v4, %v10231_v4 }
 0x37d   :  { %10265 = vmatprep.mubr.msk.bf16.mxu1 %vm1308_vm6, %v13516_v27 }
 0x37f   :  { %v1504_v30 = vpop.f32.mrb[52].mxu1 }
 0x380   :  { %v15700_v10 = vadd.f32 %v15583_v53, %v1504_v30  ;;  %v1506_v1 = vpop.f32.mrb[53].mxu1  ;;  %v13523_v53 = vld [vmem:[%s18645_s4 + $0x274] ss:$16 sps:$4 sm:$0xff]  }
 0x381   :  { %v1507_v51 = vpop.f32.mrb[54].mxu1 }
 0x382   :  { %18756 = vst [vmem:[#allocation15_spill] sm:$0xff] %v15700_v10  ;;  %v1508_v28 = vpop.f32.mrb[55].mxu1 }
 0x383   :  { %v13524_v28 = vld [vmem:[%s18645_s4 + $0x294] ss:$16 sps:$4 sm:$0xff]  }
 0x384   :  { %2494 = vmatmul.mubr.bf16.gmra.mrb[160].mxu1 %v13518_v22  ;;  %v13521_v22 = vld [vmem:[%s18645_s4 + $0x270] ss:$16 sps:$4 sm:$0xff]  }
 0x385   :  { %10266 = vmatprep.mubr.msk.bf16.mxu1 %vm1308_vm6, %v10259_v3 }
 0x387   :  { %v11631_v42 = vpop.f32.mrb[56].mxu1 }
 0x388   :  { %v11632_v7 = vpop.f32.mrb[57].mxu1 }
 0x389   :  { %v15706_v35 = vadd.f32 %v11632_v7, %v11631_v42  ;;  %v11634_v27 = vpop.f32.mrb[58].mxu1 }
 0x38a   :  { %v11635_v19 = vpop.f32.mrb[59].mxu1 }
 0x38b   :  { %v15711_v30 = vadd.f32 %v11635_v19, %v11634_v27 }
 0x38c   :  { %2502 = vmatmul.mubr.bf16.gmra.mrb[164].mxu1 %v10258_v36 }
 0x38d   :  { %2878 = vmatprep.mubr.bf16.mxu1 %v13523_v53  ;;  %v13526_v53 = vld [vmem:[%s18645_s4 + $0x290] ss:$16 sps:$4 sm:$0xff]  }
 0x38f   :  { %v11637_v1 = vpop.f32.mrb[60].mxu1 }
 0x390   :  { %v11638_v51 = vpop.f32.mrb[61].mxu1 }
 0x391   :  { %v15716_v3 = vadd.f32 %v11638_v51, %v11637_v1  ;;  %v11640_v4 = vpop.f32.mrb[62].mxu1  ;;  %v13527_v51 = vld [vmem:[%s18645_s4 + $0x2b4] ss:$16 sps:$4 sm:$0xff]  }
 0x392   :  { %v11641_v42 = vpop.f32.mrb[63].mxu1 }
 0x393   :  { %v15721_v7 = vadd.f32 %v11641_v42, %v11640_v4 }
 0x394   :  { %2879 = vmatmul.mubr.bf16.vlgmr.msra.gmra.mrb[168].mxu1 %v13521_v22 }
 0x395   :  { %11834 = vmatpush3.bf16.msra.mxu1 %v18749_v60  ;;  %2886 = vmatprep.mubr.bf16.mxu1 %v13524_v28 }
 0x396   :  { %11835 = vmatprep.subr.bf16.mxu1 %v15176_v31 }
 0x397   :  { %v11643_v36 = vpop.f32.mrb[64].mxu1 }
 0x398   :  { %v11644_v27 = vpop.f32.mrb[65].mxu1 }
 0x399   :  { %v15728_v19 = vadd.f32 %v11644_v27, %v11643_v36  ;;  %11836 = vmatpush3.bf16.msra.mxu1 %v15160_v13  ;;  %v11646_v1 = vpop.f32.mrb[66].mxu1  ;;  %v13529_v36 = vld [vmem:[%s18645_s4 + $0x2b0] ss:$16 sps:$4 sm:$0xff]  }
 0x39a   :  { %11837 = vmatprep.subr.bf16.mxu1 %v15178_v58  ;;  %v11647_v22 = vpop.f32.mrb[67].mxu1 }
 0x39b   :  { %v15735_v4 = vadd.f32 %v11647_v22, %v11646_v1 }
 0x39c   :  { %2887 = vmatmul.mubr.bf16.gmra.mrb[172].mxu1 %v13526_v53  ;;  %v13531_v53 = vld [vmem:[%s18645_s4 + $0x2d4] ss:$16 sps:$4 sm:$0xff]  }
 0x39d   :  { %11838 = vmatpush3.bf16.msra.mxu1 %v15162_v21  ;;  %2894 = vmatprep.mubr.bf16.mxu1 %v13527_v51 }
 0x39e   :  { %11839 = vmatprep.subr.bf16.mxu1 %v15180_v20 }
 0x39f   :  { %v11649_v28 = vpop.f32.mrb[68].mxu1 }
 0x3a0   :  { %v11650_v42 = vpop.f32.mrb[69].mxu1 }
 0x3a1   :  { %v15742_v27 = vadd.f32 %v11650_v42, %v11649_v28  ;;  %11840 = vmatpush3.bf16.msra.mxu1 %v15164_v39  ;;  %v11652_v11 = vpop.f32.mrb[70].mxu1  ;;  %v13533_v42 = vld [vmem:[%s18645_s4 + $0x2d0] ss:$16 sps:$4 sm:$0xff]  }
 0x3a2   :  { %11841 = vmatprep.subr.bf16.mxu1 %v15182_v52  ;;  %v11653_v1 = vpop.f32.mrb[71].mxu1 }
 0x3a3   :  { %v15749_v51 = vadd.f32 %v11653_v1, %v11652_v11  ;;  %v13534_v11 = vld [vmem:[%s18645_s4 + $0x2f4] ss:$16 sps:$4 sm:$0xff]  }
 0x3a4   :  { %2895 = vmatmul.mubr.bf16.gmra.mrb[176].mxu1 %v13529_v36 }
 0x3a5   :  { %11842 = vmatpush3.bf16.msra.mxu1 %v15166_v38  ;;  %2902 = vmatprep.mubr.bf16.mxu1 %v13531_v53 }
 0x3a6   :  { %11843 = vmatprep.subr.bf16.mxu1 %v15184_v43 }
 0x3a7   :  { %v11655_v22 = vpop.f32.mrb[72].mxu1 }
 0x3a8   :  { %v11656_v28 = vpop.f32.mrb[73].mxu1 }
 0x3a9   :  { %v15756_v15 = vadd.f32 %v11656_v28, %v11655_v22  ;;  %11844 = vmatpush3.bf16.msra.mxu1 %v15168_v6  ;;  %v11658_v8 = vpop.f32.mrb[74].mxu1  ;;  %v13536_v28 = vld [vmem:[%s18645_s4 + $0x2f0] ss:$16 sps:$4 sm:$0xff]  }
 0x3aa   :  { %11845 = vmatprep.subr.bf16.mxu1 %v15186_v18  ;;  %v11659_v36 = vpop.f32.mrb[75].mxu1 }
 0x3ab   :  { %v15763_v53 = vadd.f32 %v11659_v36, %v11658_v8  ;;  %v13537_v8 = vld [vmem:[%s18645_s4 + $0x314] ss:$16 sps:$4 sm:$0xff]  }
 0x3ac   :  { %2903 = vmatmul.mubr.bf16.gmra.mrb[180].mxu1 %v13533_v42  ;;  %v10310_v36 = vld [vmem:[%s18645_s4 + $0x330] sm:$0x11] }
 0x3ad   :  { %11846 = vmatpush3.bf16.msra.mxu1 %v15170_v9  ;;  %2910 = vmatprep.mubr.bf16.mxu1 %v13534_v11  ;;  %v10337_v45 = vcombine.high %v10310_v36, %v10310_v36 }
 0x3ae   :  { %11847 = vmatprep.subr.bf16.mxu1 %v15188_v24 }
 0x3af   :  { %v11661_v1 = vpop.f32.mrb[76].mxu1 }
 0x3b0   :  { %v11662_v22 = vpop.f32.mrb[77].mxu1 }
 0x3b1   :  { %v15770_v47 = vadd.f32 %v11662_v22, %v11661_v1  ;;  %11848 = vmatpush3.bf16.msra.mxu1 %v15172_v33  ;;  %v11664_v17 = vpop.f32.mrb[78].mxu1 }
 0x3b2   :  { %v11665_v42 = vpop.f32.mrb[79].mxu1  ;;  %3447 = vmatprep.subr.bf16.mxu1 %v18691_v26 }
 0x3b3   :  { %v15777_v11 = vadd.f32 %v11665_v42, %v11664_v17  ;;  %v10336_v42 = vcombine.low %v10310_v36, %v10310_v36 }
 0x3b4   :  { %2911 = vmatmul.mubr.bf16.gmra.mrb[184].mxu1 %v13536_v28 }
 0x3b5   :  { %2918 = vmatprep.mubr.bf16.mxu1 %v13537_v8 }
 0x3b7   :  { %v11667_v1 = vpop.f32.mrb[80].mxu1 }
 0x3b8   :  { %v11668_v22 = vpop.f32.mrb[81].mxu1 }
 0x3b9   :  { %v15785_v10 = vadd.f32 %v11668_v22, %v11667_v1  ;;  %v11670_v49 = vpop.f32.mrb[82].mxu1  ;;  %v18757_v22 = vmov 0  }
 0x3ba   :  { %v11671_v33 = vpop.f32.mrb[83].mxu1  ;;  %v13551_v49 = vld [vmem:[%s18648_s5] sm:$0xff]  }
 0x3bc   :  { %2919 = vmatmul.mubr.bf16.gmra.mrb[188].mxu1 %v13539_v2 }
 0x3bd   :  { %2926 = vmatprep.mubr.bf16.mxu1 %v10337_v45  ;;  %v13558_v45 = vld [vmem:[%s18648_s5 + $0x8] sm:$0xff]  }
 0x3bf   :  { %v1822_v17 = vpop.f32.mrb[84].mxu1 }
 0x3c0   :  { %v1823_v28 = vadd.f32 %v15706_v35, %v1822_v17  ;;  %v1824_v8 = vpop.f32.mrb[85].mxu1  ;;  %v13545_v35 = vld [vmem:[%s18645_s4 + $0x364] ss:$16 sps:$4 sm:$0xff]  }
 0x3c1   :  { %v1825_v26 = vpop.f32.mrb[86].mxu1 }
 0x3c2   :  { %v1826_v16 = vadd.f32 %v15711_v30, %v1825_v26  ;;  %v1827_v24 = vpop.f32.mrb[87].mxu1 }
 0x3c4   :  { %v1876_v33 = vpack.c.bf16 %v1826_v16, %v1823_v28  ;;  %2927 = vmatmul.mubr.bf16.gmra.mrb[192].mxu1 %v10336_v42  ;;  %v13542_v16 = vld [vmem:[%s18645_s4 + $0x340] ss:$16 sps:$4 sm:$0xff]  }
 0x3c5   :  { %3391 = vmatprep.mubr.bf16.mxu1 %v13544_v41  ;;  %v13547_v42 = vld [vmem:[%s18645_s4 + $0x360] ss:$16 sps:$4 sm:$0xff]  }
 0x3c6   :  { %12588 = vmatmul.mubr.msk.bf16.vlgmr.msra.gmra.mrb[116].mxu0 %vm636_vm3, %v1876_v33  ;;  %v13548_v33 = vld [vmem:[%s18645_s4 + $0x384] ss:$16 sps:$4 sm:$0xff]  }
 0x3c7   :  { %v1830_v2 = vpop.f32.mrb[88].mxu1  ;;  %12591 = vmatprep.mubr.msk.bf16.mxu0 %vm14187_vm0, %v18751_v34  ;;  %12616 = vmatpush3.bf16.msra.mxu0 %v13551_v49 }
 0x3c8   :  { %v1831_v24 = vadd.f32 %v15716_v3, %v1830_v2  ;;  %v1832_v26 = vpop.f32.mrb[89].mxu1  ;;  %12617 = vmatprep.subr.bf16.mxu0 %v18751_v34  ;;  %v13562_v3 = vld [vmem:[%s18648_s5 + $0x10] sm:$0xff]  }
 0x3c9   :  { %v1833_v41 = vpop.f32.mrb[90].mxu1 }
 0x3ca   :  { %v1834_v30 = vadd.f32 %v15721_v7, %v1833_v41  ;;  %v1835_v36 = vpop.f32.mrb[91].mxu1  ;;  %v13563_v7 = vld [vmem:[%s18648_s5 + $0x18] sm:$0xff]  }
 0x3cb   :  { %12618 = vmatpush3.bf16.msra.mxu0 %v13558_v45 }
 0x3cc   :  { %v1877_v1 = vpack.c.bf16 %v1834_v30, %v1831_v24  ;;  %3392 = vmatmul.mubr.bf16.vlgmr.msra.gmra.mrb[196].mxu1 %v13542_v16  ;;  %12619 = vmatprep.subr.bf16.mxu0 %v18751_v34  ;;  %v13550_v16 = vld [vmem:[%s18645_s4 + $0x380] ss:$16 sps:$4 sm:$0xff]  }
 0x3cd   :  { %3448 = vmatpush1.bf16.msra.mxu1 %v15190_v12  ;;  %3399 = vmatprep.mubr.bf16.mxu1 %v13545_v35  ;;  %v13552_v35 = vld [vmem:[%s18645_s4 + $0x3a4] ss:$16 sps:$4 sm:$0xff]  }
 0x3ce   :  { %12592 = vmatmul.mubr.msk.bf16.gmra.mrb[120].mxu0 %vm636_vm3, %v1877_v1  ;;  %3449 = vmatprep.subr.bf16.mxu1 %v18757_v22 }
 0x3cf   :  { %v1838_v17 = vpop.f32.mrb[92].mxu1  ;;  %12595 = vmatprep.mubr.msk.bf16.mxu0 %vm14187_vm0, %v18751_v34  ;;  %12620 = vmatpush3.bf16.msra.mxu0 %v13562_v3 }
 0x3d0   :  { %v1839_v28 = vadd.f32 %v15728_v19, %v1838_v17  ;;  %v1840_v8 = vpop.f32.mrb[93].mxu1  ;;  %12621 = vmatprep.subr.bf16.mxu0 %v18751_v34 }
 0x3d1   :  { %3450 = vmatpush1.bf16.msra.mxu1 %v15193_v54  ;;  %v1841_v49 = vpop.f32.mrb[94].mxu1 }
 0x3d2   :  { %v1842_v2 = vadd.f32 %v15735_v4, %v1841_v49  ;;  %v1843_v45 = vpop.f32.mrb[95].mxu1  ;;  %3451 = vmatprep.subr.bf16.mxu1 %v18757_v22 }
 0x3d3   :  { %12622 = vmatpush3.bf16.msra.mxu0 %v13563_v7 }
 0x3d4   :  { %v1878_v19 = vpack.c.bf16 %v1842_v2, %v1839_v28  ;;  %3400 = vmatmul.mubr.bf16.gmra.mrb[200].mxu1 %v13547_v42  ;;  %12651 = vmatprep.subr.bf16.mxu0 %v18751_v34  ;;  %v13555_v28 = vld [vmem:[%s18645_s4 + $0x3c4] ss:$16 sps:$4 sm:$0xff]  }
 0x3d5   :  { %3452 = vmatpush1.bf16.msra.mxu1 %v15195_v61  ;;  %3407 = vmatprep.mubr.bf16.mxu1 %v13548_v33 }
 0x3d6   :  { %12596 = vmatmul.mubr.msk.bf16.gmra.mrb[124].mxu0 %vm636_vm3, %v1878_v19  ;;  %3453 = vmatprep.subr.bf16.mxu1 %v18757_v22  ;;  %v13559_v19 = vld [vmem:[%s18645_s4 + $0x3e4] ss:$16 sps:$4 sm:$0xff]  }
 0x3d7   :  { %v1846_v24 = vpop.f32.mrb[96].mxu1  ;;  %12599 = vmatprep.mubr.msk.bf16.mxu0 %vm14187_vm0, %v18751_v34 }
 0x3d8   :  { %v1847_v4 = vadd.f32 %v15742_v27, %v1846_v24  ;;  %v1848_v26 = vpop.f32.mrb[97].mxu1 }
 0x3d9   :  { %3454 = vmatpush1.bf16.msra.mxu1 %v15197_v55  ;;  %v1849_v41 = vpop.f32.mrb[98].mxu1 }
 0x3da   :  { %v1850_v30 = vadd.f32 %v15749_v51, %v1849_v41  ;;  %v1851_v36 = vpop.f32.mrb[99].mxu1  ;;  %3455 = vmatprep.subr.bf16.mxu1 %v18757_v22  ;;  %v13554_v51 = vld [vmem:[%s18645_s4 + $0x3a0] ss:$16 sps:$4 sm:$0xff]  }
 0x3dc   :  { %v1879_v3 = vpack.c.bf16 %v1850_v30, %v1847_v4  ;;  %3408 = vmatmul.mubr.bf16.gmra.mrb[204].mxu1 %v13550_v16 }
 0x3dd   :  { %3456 = vmatpush1.bf16.msra.mxu1 %v15199_v48  ;;  %3415 = vmatprep.mubr.bf16.mxu1 %v13552_v35  ;;  %v13561_v35 = vld [vmem:[%s18645_s4 + $0x3e0] ss:$16 sps:$4 sm:$0xff]  }
 0x3de   :  { %12600 = vmatmul.mubr.msk.bf16.gmra.mrb[128].mxu0 %vm636_vm3, %v1879_v3  ;;  %3457 = vmatprep.subr.bf16.mxu1 %v18757_v22 }
 0x3df   :  { %v1854_v27 = vpop.f32.mrb[100].mxu1  ;;  %12603 = vmatprep.mubr.msk.bf16.mxu0 %vm14187_vm0, %v18751_v34 }
 0x3e0   :  { %v1855_v1 = vadd.f32 %v15756_v15, %v1854_v27  ;;  %v1856_v17 = vpop.f32.mrb[101].mxu1 }
 0x3e1   :  { %3458 = vmatpush1.bf16.msra.mxu1 %v15202_v59  ;;  %v1857_v7 = vpop.f32.mrb[102].mxu1 }
 0x3e2   :  { %v1858_v8 = vadd.f32 %v15763_v53, %v1857_v7  ;;  %v1859_v42 = vpop.f32.mrb[103].mxu1  ;;  %3459 = vmatprep.subr.bf16.mxu1 %v18757_v22  ;;  %v13557_v53 = vld [vmem:[%s18645_s4 + $0x3c0] ss:$16 sps:$4 sm:$0xff]  }
 0x3e4   :  { %v1880_v49 = vpack.c.bf16 %v1858_v8, %v1855_v1  ;;  %3416 = vmatmul.mubr.bf16.gmra.mrb[208].mxu1 %v13554_v51 }
 0x3e5   :  { %3460 = vmatpush1.bf16.msra.mxu1 %v15204_v62  ;;  %3423 = vmatprep.mubr.bf16.mxu1 %v13555_v28  ;;  %v13568_v28 = vld [vmem:[%s18645_s4 + $0x34c] ss:$16 sps:$4 sm:$0xff]  }
 0x3e6   :  { %12604 = vmatmul.mubr.msk.bf16.gmra.mrb[132].mxu0 %vm636_vm3, %v1880_v49  ;;  %3461 = vmatprep.subr.bf16.mxu1 %v18757_v22  ;;  %v13575_v49 = vld [vmem:[%s18648_s5 + $0x40] sm:$0xff]  }
 0x3e7   :  { %v1862_v15 = vpop.f32.mrb[104].mxu1  ;;  %12607 = vmatprep.mubr.msk.bf16.mxu0 %vm14187_vm0, %v18751_v34 }
 0x3e8   :  { %v1863_v33 = vadd.f32 %v15770_v47, %v1862_v15  ;;  %v1864_v2 = vpop.f32.mrb[105].mxu1  ;;  %v10390_v47 = vld [vmem:[%s18645_s4 + $0x400] sm:$0x11]  ;;  %v18758_v15 = vpack.c.bf16 %v15597_v32, %v15590_v23  ;;  %v13569_v32 = vld [vmem:[%s18645_s4 + $0x36c] ss:$16 sps:$4 sm:$0xff]  }
 0x3e9   :  { %3462 = vmatpush1.bf16.msra.mxu1 %v15206_v29  ;;  %v1865_v45 = vpop.f32.mrb[106].mxu1  ;;  %v10417_v36 = vcombine.high %v10390_v47, %v10390_v47  ;;  %v10416_v17 = vcombine.low %v10390_v47, %v10390_v47  ;;  %v13582_v2 = vld [vmem:[%s18648_s5 + $0x48] sm:$0xff]   ;;  %v18759_v47 = vpack.c.bf16 %v15615_v63, %v15606_v40 }
 0x3ea   :  { %v1866_v24 = vadd.f32 %v15777_v11, %v1865_v45  ;;  %v1867_v4 = vpop.f32.mrb[107].mxu1  ;;  %3463 = vmatprep.subr.bf16.mxu1 %v18757_v22  ;;  %v13566_v45 = vld [vmem:[%s18645_s4 + $0x348] ss:$16 sps:$4 sm:$0xff]   ;;  %v13572_v63 = vld [vmem:[%s18645_s4 + $0x38c] ss:$16 sps:$4 sm:$0xff]  }
 0x3ec   :  { %v1881_v26 = vpack.c.bf16 %v1866_v24, %v1863_v33  ;;  %3424 = vmatmul.mubr.bf16.gmra.mrb[212].mxu1 %v13557_v53 }
 0x3ed   :  { %3464 = vmatpush1.bf16.msra.mxu1 %v15208_v5  ;;  %3431 = vmatprep.mubr.bf16.mxu1 %v13559_v19 }
 0x3ee   :  { %12608 = vmatmul.mubr.msk.bf16.gmra.mrb[136].mxu0 %vm636_vm3, %v1881_v26  ;;  %3465 = vmatprep.subr.bf16.mxu1 %v18757_v22  ;;  %v13586_v26 = vld [vmem:[%s18648_s5 + $0x50] sm:$0xff]  }
 0x3ef   :  { %v1870_v16 = vpop.f32.mrb[108].mxu1  ;;  %12611 = vmatprep.mubr.msk.bf16.mxu0 %vm14187_vm0, %v18751_v34 }
 0x3f0   :  { %v1871_v11 = vadd.f32 %v15785_v10, %v1870_v16  ;;  %v1872_v41 = vpop.f32.mrb[109].mxu1 }
 0x3f1   :  { %3466 = vmatpush1.bf16.msra.mxu1 %v15211_v37  ;;  %v1873_v30 = vpop.f32.mrb[110].mxu1 }
 0x3f2   :  { %v1874_v3 = vpop.f32.mrb[111].mxu1  ;;  %3467 = vmatprep.subr.bf16.mxu1 %v18757_v22  ;;  %v1882_v27 = vpack.c.bf16 %v1871_v11, %v1871_v11  ;;  %v13587_v11 = vld [vmem:[%s18648_s5 + $0x58] sm:$0xff]  }
 0x3f4   :  { %3432 = vmatmul.mubr.bf16.gmra.mrb[216].mxu1 %v13561_v35  ;;  %v13571_v35 = vld [vmem:[%s18645_s4 + $0x368] ss:$16 sps:$4 sm:$0xff]  }
 0x3f5   :  { %3468 = vmatpush1.bf16.msra.mxu1 %v15213_v56  ;;  %3439 = vmatprep.mubr.bf16.mxu1 %v10417_v36 }
 0x3f6   :  { %12612 = vmatmul.mubr.msk.bf16.gmra.mrb[140].mxu0 %vm636_vm3, %v1882_v27  ;;  %3469 = vmatprep.subr.bf16.mxu1 %v18757_v22  ;;  %v18760_v27 = vpack.c.bf16 %v15633_v50, %v15623_v46  ;;  %v13576_v46 = vld [vmem:[%s18645_s4 + $0x3ac] ss:$16 sps:$4 sm:$0xff]  }
 0x3f7   :  { %v11711_v10 = vpop.f32.mrb[112].mxu1  ;;  %12623 = vmatprep.mubr.msk.bf16.mxu0 %vm14187_vm0, %v18751_v34 }
 0x3f8   :  { %v11712_v1 = vpop.f32.mrb[113].mxu1 }
 0x3f9   :  { %v15898_v51 = vadd.f32 %v11712_v1, %v11711_v10  ;;  %3470 = vmatpush1.bf16.msra.mxu1 %v15215_v44  ;;  %v11714_v7 = vpop.f32.mrb[114].mxu1 }
 0x3fa   :  { %v11715_v8 = vpop.f32.mrb[115].mxu1  ;;  %3471 = vmatprep.subr.bf16.mxu1 %v18757_v22 }
 0x3fb   :  { %v15905_v42 = vadd.f32 %v11715_v8, %v11714_v7 }
 0x3fc   :  { %3440 = vmatmul.mubr.bf16.gmra.mrb[220].mxu1 %v10416_v17  ;;  %v13574_v17 = vld [vmem:[%s18645_s4 + $0x388] ss:$16 sps:$4 sm:$0xff]  }
 0x3fd   :  { %3472 = vmatpush1.bf16.msra.mxu1 %v15296_v57  ;;  %10420 = vmatprep.mubr.msk.bf16.mxu1 %vm1308_vm6, %v13568_v28 }
 0x3fe   :  { %11902 = vmatprep.subr.bf16.mxu1 %v15174_v14  ;;  %12624 = vmatmul.mubr.msk.bf16.vlgmr.msra.gmra.mrb[116].mxu0 %vm636_vm3, %v18758_v15 }
 0x3ff   :  { %v11717_v33 = vpop.f32.mrb[116].mxu1  ;;  %12627 = vmatprep.mubr.msk.bf16.mxu0 %vm14187_vm0, %v18751_v34  ;;  %12652 = vmatpush3.bf16.msra.mxu0 %v13575_v49  ;;  %v18761_v49 = vpack.c.bf16 %v15652_v25, %v15642_v0  ;;  %v13579_v0 = vld [vmem:[%s18645_s4 + $0x3cc] ss:$16 sps:$4 sm:$0xff]  }
 0x400   :  { %v11718_v53 = vpop.f32.mrb[117].mxu1  ;;  %12653 = vmatprep.subr.bf16.mxu0 %v18751_v34 }
 0x401   :  { %v15926_v19 = vadd.f32 %v11718_v53, %v11717_v33  ;;  %v11720_v23 = vpop.f32.mrb[118].mxu1 }
 0x402   :  { %v11721_v24 = vpop.f32.mrb[119].mxu1 }
 0x403   :  { %v15931_v4 = vadd.f32 %v11721_v24, %v11720_v23  ;;  %12654 = vmatpush3.bf16.msra.mxu0 %v13582_v2  ;;  %v13578_v2 = vld [vmem:[%s18645_s4 + $0x3a8] ss:$16 sps:$4 sm:$0xff]  }
 0x404   :  { %3480 = vmatmul.mubr.bf16.vlgmr.msra.gmra.mrb[224].mxu1 %v13566_v45  ;;  %12655 = vmatprep.subr.bf16.mxu0 %v18751_v34  ;;  %v18763_v24 = vld [vmem:[#allocation12_spill] sm:$0xff] }
 0x405   :  { %11903 = vmatpush3.bf16.msra.mxu1 %v18749_v60  ;;  %10421 = vmatprep.mubr.msk.bf16.mxu1 %vm1308_vm6, %v13569_v32  ;;  %v18762_v32 = vld [vmem:[#allocation10_spill] sm:$0xff] }
 0x406   :  { %11904 = vmatprep.subr.bf16.mxu1 %v15176_v31  ;;  %12628 = vmatmul.mubr.msk.bf16.gmra.mrb[120].mxu0 %vm636_vm3, %v18759_v47 }
 0x407   :  { %v11723_v16 = vpop.f32.mrb[120].mxu1  ;;  %12631 = vmatprep.mubr.msk.bf16.mxu0 %vm14187_vm0, %v18751_v34  ;;  %12656 = vmatpush3.bf16.msra.mxu0 %v13586_v26  ;;  %v18764_v26 = vld [vmem:[#allocation11_spill] sm:$0xff] }
 0x408   :  { %v11724_v41 = vpop.f32.mrb[121].mxu1  ;;  %12657 = vmatprep.subr.bf16.mxu0 %v18751_v34  ;;  %v18765_v47 = vpack.c.bf16 %v18763_v24, %v18764_v26 }
 0x409   :  { %v15953_v30 = vadd.f32 %v11724_v41, %v11723_v16  ;;  %11905 = vmatpush3.bf16.msra.mxu1 %v15160_v13  ;;  %v11726_v40 = vpop.f32.mrb[122].mxu1  ;;  %v13581_v41 = vld [vmem:[%s18645_s4 + $0x3c8] ss:$16 sps:$4 sm:$0xff]  }
 0x40a   :  { %11906 = vmatprep.subr.bf16.mxu1 %v15178_v58  ;;  %v11727_v36 = vpop.f32.mrb[123].mxu1 }
 0x40b   :  { %v15960_v3 = vadd.f32 %v11727_v36, %v11726_v40  ;;  %12658 = vmatpush3.bf16.msra.mxu0 %v13587_v11  ;;  %v18766_v40 = vld [vmem:[#allocation9_spill] sm:$0xff] }
 0x40c   :  { %3488 = vmatmul.mubr.bf16.gmra.mrb[228].mxu1 %v13571_v35  ;;  %2934 = vmatprep.subr.bf16.mxu0 %v18757_v22  ;;  %v13583_v36 = vld [vmem:[%s18645_s4 + $0x3ec] ss:$16 sps:$4 sm:$0xff]  }
 0x40d   :  { %11907 = vmatpush3.bf16.msra.mxu1 %v15162_v21  ;;  %10422 = vmatprep.mubr.msk.bf16.mxu1 %vm1308_vm6, %v13572_v63 }
 0x40e   :  { %11908 = vmatprep.subr.bf16.mxu1 %v15180_v20  ;;  %12632 = vmatmul.mubr.msk.bf16.gmra.mrb[124].mxu0 %vm636_vm3, %v18760_v27 }
 0x40f   :  { %v11729_v10 = vpop.f32.mrb[124].mxu1  ;;  %12635 = vmatprep.mubr.msk.bf16.mxu0 %vm14187_vm0, %v18751_v34 }
 0x410   :  { %v11730_v1 = vpop.f32.mrb[125].mxu1 }
 0x411   :  { %v15975_v7 = vadd.f32 %v11730_v1, %v11729_v10  ;;  %11909 = vmatpush3.bf16.msra.mxu1 %v15164_v39  ;;  %v11732_v28 = vpop.f32.mrb[126].mxu1  ;;  %v18767_v1 = vld [vmem:[#allocation14_spill] sm:$0xff] }
 0x412   :  { %11910 = vmatprep.subr.bf16.mxu1 %v15182_v52  ;;  %v11733_v50 = vpop.f32.mrb[127].mxu1 }
 0x413   :  { %v15982_v8 = vadd.f32 %v11733_v50, %v11732_v28 }
 0x414   :  { %3496 = vmatmul.mubr.bf16.gmra.mrb[232].mxu1 %v13574_v17  ;;  %v18768_v17 = vld [vmem:[#allocation13_spill] sm:$0xff] }
 0x415   :  { %11911 = vmatpush3.bf16.msra.mxu1 %v15166_v38  ;;  %10423 = vmatprep.mubr.msk.bf16.mxu1 %vm1308_vm6, %v13576_v46  ;;  %v18769_v28 = vpack.c.bf16 %v18767_v1, %v18768_v17  ;;  %v10391_v46 = vld [vmem:[%s18645_s4 + $0x408] sm:$0x11] }
 0x416   :  { %11912 = vmatprep.subr.bf16.mxu1 %v15184_v43  ;;  %12636 = vmatmul.mubr.msk.bf16.gmra.mrb[128].mxu0 %vm636_vm3, %v18761_v49 }
 0x417   :  { %v11735_v15 = vpop.f32.mrb[128].mxu1  ;;  %12639 = vmatprep.mubr.msk.bf16.mxu0 %vm14187_vm0, %v18751_v34 }
 0x418   :  { %v11736_v33 = vpop.f32.mrb[129].mxu1 }
 0x419   :  { %v15996_v53 = vadd.f32 %v11736_v33, %v11735_v15  ;;  %11913 = vmatpush3.bf16.msra.mxu1 %v15168_v6  ;;  %v11738_v45 = vpop.f32.mrb[130].mxu1  ;;  %v13585_v15 = vld [vmem:[%s18645_s4 + $0x3e8] ss:$16 sps:$4 sm:$0xff]  }
 0x41a   :  { %11914 = vmatprep.subr.bf16.mxu1 %v15186_v18  ;;  %v11739_v25 = vpop.f32.mrb[131].mxu1 }
 0x41b   :  { %v16003_v23 = vadd.f32 %v11739_v25, %v11738_v45  ;;  %v10419_v45 = vcombine.high %v10391_v46, %v10391_v46  ;;  %v18770_v25 = vld [vmem:[#allocation15_spill] sm:$0xff] }
 0x41c   :  { %3504 = vmatmul.mubr.bf16.gmra.mrb[236].mxu1 %v13578_v2  ;;  %v1516_v24 = vpack.c.bf16 %v18770_v25, %v18770_v25 }
 0x41d   :  { %11915 = vmatpush3.bf16.msra.mxu1 %v15170_v9  ;;  %10424 = vmatprep.mubr.msk.bf16.mxu1 %vm1308_vm6, %v13579_v0 }
 0x41e   :  { %11916 = vmatprep.subr.bf16.mxu1 %v18762_v32  ;;  %12640 = vmatmul.mubr.msk.bf16.gmra.mrb[132].mxu0 %vm636_vm3, %v18765_v47 }
 0x41f   :  { %v11741_v16 = vpop.f32.mrb[132].mxu1  ;;  %12643 = vmatprep.mubr.msk.bf16.mxu0 %vm14187_vm0, %v18751_v34 }
 0x420   :  { %v11742_v11 = vpop.f32.mrb[133].mxu1 }
 0x421   :  { %v16017_v35 = vadd.f32 %v11742_v11, %v11741_v16  ;;  %11917 = vmatpush3.bf16.msra.mxu1 %v18766_v40  ;;  %v11744_v63 = vpop.f32.mrb[134].mxu1  ;;  %v10418_v11 = vcombine.low %v10391_v46, %v10391_v46 }
 0x422   :  { %11971 = vmatprep.subr.bf16.mxu1 %v15174_v14  ;;  %v11745_v27 = vpop.f32.mrb[135].mxu1 }
 0x423   :  { %v16024_v10 = vadd.f32 %v11745_v27, %v11744_v63  ;;  %v13592_v63 = vld [vmem:[%s18645_s4 + $0x414] ss:$16 sps:$4 sm:$0xff]  }
 0x424   :  { %3512 = vmatmul.mubr.bf16.gmra.mrb[240].mxu1 %v13581_v41 }
 0x425   :  { %10425 = vmatprep.mubr.msk.bf16.mxu1 %vm1308_vm6, %v13583_v36 }
 0x426   :  { %12644 = vmatmul.mubr.msk.bf16.gmra.mrb[136].mxu0 %vm636_vm3, %v18769_v28 }
 0x427   :  { %v11747_v50 = vpop.f32.mrb[136].mxu1  ;;  %12647 = vmatprep.mubr.msk.bf16.mxu0 %vm14187_vm0, %v18751_v34 }
 0x428   :  { %v11748_v49 = vpop.f32.mrb[137].mxu1 }
 0x429   :  { %v16039_v33 = vadd.f32 %v11748_v49, %v11747_v50  ;;  %v11750_v2 = vpop.f32.mrb[138].mxu1  ;;  %v13595_v50 = vld [vmem:[%s18645_s4 + $0x434] ss:$16 sps:$4 sm:$0xff]  }
 0x42a   :  { %v11751_v0 = vpop.f32.mrb[139].mxu1 }
 0x42b   :  { %v13593_v0 = vld [vmem:[%s18645_s4 + $0x430] ss:$16 sps:$4 sm:$0xff]  }
 0x42c   :  { %3520 = vmatmul.mubr.bf16.gmra.mrb[244].mxu1 %v13585_v15 }
 0x42d   :  { %10426 = vmatprep.mubr.msk.bf16.mxu1 %vm1308_vm6, %v10419_v45 }
 0x42e   :  { %12648 = vmatmul.mubr.msk.bf16.gmra.mrb[140].mxu0 %vm636_vm3, %v1516_v24  ;;  %v13598_v24 = vld [vmem:[%s18645_s4 + $0x454] ss:$16 sps:$4 sm:$0xff]  }
 0x42f   :  { %v2455_v26 = vpop.f32.mrb[140].mxu1  ;;  %12659 = vmatprep.mubr.msk.bf16.mxu0 %vm14187_vm0, %v18751_v34 }
 0x430   :  { %v2456_v47 = vadd.f32 %v15898_v51, %v2455_v26  ;;  %v2457_v16 = vpop.f32.mrb[141].mxu1 }
 0x431   :  { %v2458_v41 = vpop.f32.mrb[142].mxu1 }
 0x432   :  { %v2459_v36 = vadd.f32 %v15905_v42, %v2458_v41  ;;  %v2460_v27 = vpop.f32.mrb[143].mxu1  ;;  %v13590_v42 = vld [vmem:[%s18645_s4 + $0x410] ss:$16 sps:$4 sm:$0xff]  }
 0x433   :  { %v13596_v41 = vld [vmem:[%s18645_s4 + $0x450] ss:$16 sps:$4 sm:$0xff]  }
 0x434   :  { %v2509_v1 = vpack.c.bf16 %v2459_v36, %v2456_v47  ;;  %3528 = vmatmul.mubr.bf16.gmra.mrb[248].mxu1 %v10418_v11  ;;  %v13601_v36 = vld [vmem:[%s18645_s4 + $0x474] ss:$16 sps:$4 sm:$0xff]  }
 0x435   :  { %3904 = vmatprep.mubr.bf16.mxu1 %v13592_v63 }
 0x436   :  { %12660 = vmatmul.mubr.msk.bf16.vlgmr.msra.gmra.mrb[116].mxu0 %vm636_vm3, %v2509_v1 }
 0x437   :  { %2935 = vmatpush1.bf16.msra.mxu0 %v15190_v12  ;;  %v2463_v17 = vpop.f32.mrb[144].mxu1  ;;  %12663 = vmatprep.mubr.msk.bf16.mxu0 %vm14187_vm0, %v18751_v34 }
 0x438   :  { %v2464_v51 = vadd.f32 %v15926_v19, %v2463_v17  ;;  %v2465_v28 = vpop.f32.mrb[145].mxu1  ;;  %2936 = vmatprep.subr.bf16.mxu0 %v18757_v22 }
 0x439   :  { %v2466_v46 = vpop.f32.mrb[146].mxu1  ;;  %v13599_v28 = vld [vmem:[%s18645_s4 + $0x470] ss:$16 sps:$4 sm:$0xff]  }
 0x43a   :  { %v2467_v49 = vadd.f32 %v15931_v4, %v2466_v46  ;;  %v2468_v15 = vpop.f32.mrb[147].mxu1  ;;  %v13604_v46 = vld [vmem:[%s18645_s4 + $0x494] ss:$16 sps:$4 sm:$0xff]  }
 0x43b   :  { %2937 = vmatpush1.bf16.msra.mxu0 %v15193_v54 }
 0x43c   :  { %v2510_v2 = vpack.c.bf16 %v2467_v49, %v2464_v51  ;;  %3905 = vmatmul.mubr.bf16.vlgmr.msra.gmra.mrb[252].mxu1 %v13590_v42  ;;  %2938 = vmatprep.subr.bf16.mxu0 %v18757_v22 }
 0x43d   :  { %11972 = vmatpush3.bf16.msra.mxu1 %v18749_v60  ;;  %3912 = vmatprep.mubr.bf16.mxu1 %v13595_v50 }
 0x43e   :  { %11973 = vmatprep.subr.bf16.mxu1 %v15176_v31  ;;  %12664 = vmatmul.mubr.msk.bf16.gmra.mrb[120].mxu0 %vm636_vm3, %v2510_v2 }
 0x43f   :  { %2939 = vmatpush1.bf16.msra.mxu0 %v15195_v61  ;;  %v2471_v19 = vpop.f32.mrb[148].mxu1  ;;  %12667 = vmatprep.mubr.msk.bf16.mxu0 %vm14187_vm0, %v18751_v34 }
 0x440   :  { %v2472_v4 = vadd.f32 %v15953_v30, %v2471_v19  ;;  %v2473_v45 = vpop.f32.mrb[149].mxu1  ;;  %2940 = vmatprep.subr.bf16.mxu0 %v18757_v22  ;;  %v13602_v19 = vld [vmem:[%s18645_s4 + $0x490] ss:$16 sps:$4 sm:$0xff]  }
 0x441   :  { %11974 = vmatpush3.bf16.msra.mxu1 %v15160_v13  ;;  %v2474_v25 = vpop.f32.mrb[150].mxu1  ;;  %v13607_v45 = vld [vmem:[%s18645_s4 + $0x4b4] ss:$16 sps:$4 sm:$0xff]  }
 0x442   :  { %v2475_v26 = vadd.f32 %v15960_v3, %v2474_v25  ;;  %11975 = vmatprep.subr.bf16.mxu1 %v15178_v58  ;;  %v2476_v47 = vpop.f32.mrb[151].mxu1 }
 0x443   :  { %2941 = vmatpush1.bf16.msra.mxu0 %v15197_v55 }
 0x444   :  { %v2511_v30 = vpack.c.bf16 %v2475_v26, %v2472_v4  ;;  %3913 = vmatmul.mubr.bf16.gmra.mrb[0].mxu1 %v13593_v0  ;;  %2942 = vmatprep.subr.bf16.mxu0 %v18757_v22 }
 0x445   :  { %11976 = vmatpush3.bf16.msra.mxu1 %v15162_v21  ;;  %3920 = vmatprep.mubr.bf16.mxu1 %v13598_v24  ;;  %v10470_v24 = vld [vmem:[%s18645_s4 + $0x4d0] sm:$0x11] }
 0x446   :  { %11977 = vmatprep.subr.bf16.mxu1 %v15180_v20  ;;  %12668 = vmatmul.mubr.msk.bf16.gmra.mrb[124].mxu0 %vm636_vm3, %v2511_v30  ;;  %v13605_v30 = vld [vmem:[%s18645_s4 + $0x4b0] ss:$16 sps:$4 sm:$0xff]  }
 0x447   :  { %2943 = vmatpush1.bf16.msra.mxu0 %v15199_v48  ;;  %v2479_v16 = vpop.f32.mrb[152].mxu1  ;;  %12671 = vmatprep.mubr.msk.bf16.mxu0 %vm14187_vm0, %v18751_v34 }
 0x448   :  { %v2480_v3 = vadd.f32 %v15975_v7, %v2479_v16  ;;  %v2481_v11 = vpop.f32.mrb[153].mxu1  ;;  %2944 = vmatprep.subr.bf16.mxu0 %v18757_v22 }
 0x449   :  { %11978 = vmatpush3.bf16.msra.mxu1 %v15164_v39  ;;  %v2482_v63 = vpop.f32.mrb[154].mxu1 }
 0x44a   :  { %v2483_v27 = vadd.f32 %v15982_v8, %v2482_v63  ;;  %11979 = vmatprep.subr.bf16.mxu1 %v15182_v52  ;;  %v2484_v1 = vpop.f32.mrb[155].mxu1 }
 0x44b   :  { %2945 = vmatpush1.bf16.msra.mxu0 %v15202_v59  ;;  %v13616_v1 = vld [vmem:[%s18645_s4 + $0x29c] ss:$16 sps:$4 sm:$0xff]  }
 0x44c   :  { %v2512_v7 = vpack.c.bf16 %v2483_v27, %v2480_v3  ;;  %3921 = vmatmul.mubr.bf16.gmra.mrb[4].mxu1 %v13596_v41  ;;  %2946 = vmatprep.subr.bf16.mxu0 %v18757_v22  ;;  %v10497_v3 = vcombine.high %v10470_v24, %v10470_v24  ;;  %v13612_v41 = vld [vmem:[%s18645_s4 + $0x27c] ss:$16 sps:$4 sm:$0xff]   ;;  %v13610_v27 = vld [vmem:[%s18645_s4 + $0x278] ss:$16 sps:$4 sm:$0xff]  }
 0x44d   :  { %11980 = vmatpush3.bf16.msra.mxu1 %v15166_v38  ;;  %3928 = vmatprep.mubr.bf16.mxu1 %v13601_v36  ;;  %v13615_v36 = vld [vmem:[%s18645_s4 + $0x4e4] ss:$16 sps:$4 sm:$0xff]  }
 0x44e   :  { %11981 = vmatprep.subr.bf16.mxu1 %v15184_v43  ;;  %12672 = vmatmul.mubr.msk.bf16.gmra.mrb[128].mxu0 %vm636_vm3, %v2512_v7  ;;  %v13613_v7 = vld [vmem:[%s18645_s4 + $0x4e0] ss:$16 sps:$4 sm:$0xff]  }
 0x44f   :  { %2947 = vmatpush1.bf16.msra.mxu0 %v15204_v62  ;;  %v2487_v17 = vpop.f32.mrb[156].mxu1  ;;  %12675 = vmatprep.mubr.msk.bf16.mxu0 %vm14187_vm0, %v18751_v34 }
 0x450   :  { %v2488_v8 = vadd.f32 %v15996_v53, %v2487_v17  ;;  %v2489_v51 = vpop.f32.mrb[157].mxu1  ;;  %2948 = vmatprep.subr.bf16.mxu0 %v18757_v22  ;;  %v13621_v17 = vld [vmem:[%s18645_s4 + $0x504] ss:$16 sps:$4 sm:$0xff]  }
 0x451   :  { %11982 = vmatpush3.bf16.msra.mxu1 %v15168_v6  ;;  %v2490_v42 = vpop.f32.mrb[158].mxu1  ;;  %v13622_v51 = vld [vmem:[%s18645_s4 + $0x2bc] ss:$16 sps:$4 sm:$0xff]  }
 0x452   :  { %v2491_v50 = vadd.f32 %v16003_v23, %v2490_v42  ;;  %11983 = vmatprep.subr.bf16.mxu1 %v15186_v18  ;;  %v2492_v49 = vpop.f32.mrb[159].mxu1  ;;  %v13627_v42 = vld [vmem:[%s18645_s4 + $0x524] ss:$16 sps:$4 sm:$0xff]  }
 0x453   :  { %2949 = vmatpush1.bf16.msra.mxu0 %v15206_v29  ;;  %v13625_v49 = vld [vmem:[%s18645_s4 + $0x520] ss:$16 sps:$4 sm:$0xff]  }
 0x454   :  { %v2513_v53 = vpack.c.bf16 %v2491_v50, %v2488_v8  ;;  %3929 = vmatmul.mubr.bf16.gmra.mrb[8].mxu1 %v13599_v28  ;;  %2950 = vmatprep.subr.bf16.mxu0 %v18757_v22  ;;  %v13618_v8 = vld [vmem:[%s18645_s4 + $0x298] ss:$16 sps:$4 sm:$0xff]   ;;  %v13619_v28 = vld [vmem:[%s18645_s4 + $0x500] ss:$16 sps:$4 sm:$0xff]   ;;  %v13628_v50 = vld [vmem:[%s18645_s4 + $0x2dc] ss:$16 sps:$4 sm:$0xff]  }
 0x455   :  { %11984 = vmatpush3.bf16.msra.mxu1 %v15170_v9  ;;  %3936 = vmatprep.mubr.bf16.mxu1 %v13604_v46  ;;  %v13624_v46 = vld [vmem:[%s18645_s4 + $0x2b8] ss:$16 sps:$4 sm:$0xff]  }
 0x456   :  { %11985 = vmatprep.subr.bf16.mxu1 %v18762_v32  ;;  %12676 = vmatmul.mubr.msk.bf16.gmra.mrb[132].mxu0 %vm636_vm3, %v2513_v53  ;;  %v13633_v53 = vld [vmem:[%s18645_s4 + $0x544] ss:$16 sps:$4 sm:$0xff]  }
 0x457   :  { %2951 = vmatpush1.bf16.msra.mxu0 %v15208_v5  ;;  %v2495_v15 = vpop.f32.mrb[160].mxu1  ;;  %12679 = vmatprep.mubr.msk.bf16.mxu0 %vm14187_vm0, %v18751_v34 }
 0x458   :  { %v2496_v23 = vadd.f32 %v16017_v35, %v2495_v15  ;;  %v2497_v2 = vpop.f32.mrb[161].mxu1  ;;  %2952 = vmatprep.subr.bf16.mxu0 %v18757_v22  ;;  %v13630_v15 = vld [vmem:[%s18645_s4 + $0x2d8] ss:$16 sps:$4 sm:$0xff]  }
 0x459   :  { %11986 = vmatpush3.bf16.msra.mxu1 %v18766_v40  ;;  %v2498_v4 = vpop.f32.mrb[162].mxu1 }
 0x45a   :  { %v2499_v0 = vadd.f32 %v16024_v10, %v2498_v4  ;;  %v2500_v25 = vpop.f32.mrb[163].mxu1  ;;  %4473 = vmatprep.subr.bf16.mxu1 %v18757_v22 }
 0x45b   :  { %2953 = vmatpush1.bf16.msra.mxu0 %v15211_v37  ;;  %v13639_v25 = vld [vmem:[%s18645_s4 + $0x564] ss:$16 sps:$4 sm:$0xff]  }
 0x45c   :  { %v2514_v35 = vpack.c.bf16 %v2499_v0, %v2496_v23  ;;  %3937 = vmatmul.mubr.bf16.gmra.mrb[12].mxu1 %v13602_v19  ;;  %2954 = vmatprep.subr.bf16.mxu0 %v18757_v22  ;;  %v13634_v23 = vld [vmem:[%s18645_s4 + $0x2fc] ss:$16 sps:$4 sm:$0xff]   ;;  %v13631_v0 = vld [vmem:[%s18645_s4 + $0x540] ss:$16 sps:$4 sm:$0xff]  }
 0x45d   :  { %3944 = vmatprep.mubr.bf16.mxu1 %v13607_v45 }
 0x45e   :  { %12680 = vmatmul.mubr.msk.bf16.gmra.mrb[136].mxu0 %vm636_vm3, %v2514_v35  ;;  %v13636_v35 = vld [vmem:[%s18645_s4 + $0x2f8] ss:$16 sps:$4 sm:$0xff]  }
 0x45f   :  { %2955 = vmatpush1.bf16.msra.mxu0 %v15213_v56  ;;  %v2503_v26 = vpop.f32.mrb[164].mxu1  ;;  %12683 = vmatprep.mubr.msk.bf16.mxu0 %vm14187_vm0, %v18751_v34 }
 0x460   :  { %v2504_v10 = vadd.f32 %v16039_v33, %v2503_v26  ;;  %v2505_v47 = vpop.f32.mrb[165].mxu1  ;;  %2956 = vmatprep.subr.bf16.mxu0 %v18757_v22  ;;  %v10496_v33 = vcombine.low %v10470_v24, %v10470_v24  ;;  %v13640_v24 = vld [vmem:[%s18645_s4 + $0x31c] ss:$16 sps:$4 sm:$0xff]  }
 0x461   :  { %v2506_v16 = vpop.f32.mrb[166].mxu1 }
 0x462   :  { %v2507_v11 = vpop.f32.mrb[167].mxu1  ;;  %v2515_v63 = vpack.c.bf16 %v2504_v10, %v2504_v10 }
 0x463   :  { %2957 = vmatpush1.bf16.msra.mxu0 %v15215_v44  ;;  %v13637_v11 = vld [vmem:[%s18645_s4 + $0x560] ss:$16 sps:$4 sm:$0xff]  }
 0x464   :  { %3945 = vmatmul.mubr.bf16.gmra.mrb[16].mxu1 %v13605_v30  ;;  %2958 = vmatprep.subr.bf16.mxu0 %v18757_v22 }
 0x465   :  { %3952 = vmatprep.mubr.bf16.mxu1 %v10497_v3 }
 0x466   :  { %12684 = vmatmul.mubr.msk.bf16.gmra.mrb[140].mxu0 %vm636_vm3, %v2515_v63 }
 0x467   :  { %2959 = vmatpush1.bf16.msra.mxu0 %v15296_v57  ;;  %10340 = vmatprep.mubr.msk.bf16.mxu0 %vm1308_vm6, %v13612_v41  ;;  %v11780_v2 = vpop.f32.mrb[168].mxu1  ;;  %v10311_v41 = vld [vmem:[%s18645_s4 + $0x338] sm:$0x11] }
 0x468   :  { %12687 = vmatprep.subr.bf16.mxu0 %v18751_v34  ;;  %v11781_v19 = vpop.f32.mrb[169].mxu1 }
 0x469   :  { %v11783_v4 = vpop.f32.mrb[170].mxu1  ;;  %v16240_v16 = vadd.f32 %v11781_v19, %v11780_v2  ;;  %v10338_v19 = vcombine.low %v10311_v41, %v10311_v41 }
 0x46a   :  { %v11784_v45 = vpop.f32.mrb[171].mxu1 }
 0x46b   :  { %v16242_v3 = vadd.f32 %v11784_v45, %v11783_v4 }
 0x46c   :  { %3953 = vmatmul.mubr.bf16.gmra.mrb[20].mxu1 %v10496_v33  ;;  %v13645_v33 = vld [vmem:[%s18645_s4 + $0x584] ss:$16 sps:$4 sm:$0xff]  }
 0x46d   :  { %4417 = vmatprep.mubr.bf16.mxu1 %v13615_v36 }
 0x46e   :  { %2967 = vmatmul.mubr.bf16.vlgmr.msra.gmra.mrb[144].mxu0 %v13610_v27  ;;  %v13642_v27 = vld [vmem:[%s18645_s4 + $0x318] ss:$16 sps:$4 sm:$0xff]  }
 0x46f   :  { %10341 = vmatprep.mubr.msk.bf16.mxu0 %vm1308_vm6, %v13616_v1  ;;  %v11786_v26 = vpop.f32.mrb[172].mxu1 }
 0x470   :  { %v11787_v10 = vpop.f32.mrb[173].mxu1 }
 0x471   :  { %v11789_v47 = vpop.f32.mrb[174].mxu1 }
 0x472   :  { %v11790_v30 = vpop.f32.mrb[175].mxu1 }
 0x474   :  { %4418 = vmatmul.mubr.bf16.vlgmr.msra.gmra.mrb[24].mxu1 %v13613_v7  ;;  %v10339_v7 = vcombine.high %v10311_v41, %v10311_v41 }
 0x475   :  { %4474 = vmatpush1.bf16.msra.mxu1 %v15190_v12  ;;  %4425 = vmatprep.mubr.bf16.mxu1 %v13621_v17 }
 0x476   :  { %2975 = vmatmul.mubr.bf16.gmra.mrb[148].mxu0 %v13618_v8  ;;  %4475 = vmatprep.subr.bf16.mxu1 %v18757_v22 }
 0x477   :  { %10342 = vmatprep.mubr.msk.bf16.mxu0 %vm1308_vm6, %v13622_v51  ;;  %v11792_v63 = vpop.f32.mrb[176].mxu1 }
 0x478   :  { %v11793_v36 = vpop.f32.mrb[177].mxu1 }
 0x479   :  { %4476 = vmatpush1.bf16.msra.mxu1 %v15193_v54  ;;  %v11795_v1 = vpop.f32.mrb[178].mxu1 }
 0x47a   :  { %4477 = vmatprep.subr.bf16.mxu1 %v18757_v22  ;;  %v11796_v17 = vpop.f32.mrb[179].mxu1 }
 0x47c   :  { %4426 = vmatmul.mubr.bf16.gmra.mrb[28].mxu1 %v13619_v28  ;;  %v10550_v28 = vld [vmem:[%s18645_s4 + $0x5a0] sm:$0x11] }
 0x47d   :  { %4478 = vmatpush1.bf16.msra.mxu1 %v15195_v61  ;;  %4433 = vmatprep.mubr.bf16.mxu1 %v13627_v42 }
 0x47e   :  { %2983 = vmatmul.mubr.bf16.gmra.mrb[152].mxu0 %v13624_v46  ;;  %4479 = vmatprep.subr.bf16.mxu1 %v18757_v22 }
 0x47f   :  { %10343 = vmatprep.mubr.msk.bf16.mxu0 %vm1308_vm6, %v13628_v50  ;;  %v11798_v8 = vpop.f32.mrb[180].mxu1  ;;  %v16264_v50 = vadd.f32 %v11787_v10, %v11786_v26  ;;  %v16279_v26 = vadd.f32 %v11796_v17, %v11795_v1  ;;  %v10576_v10 = vcombine.low %v10550_v28, %v10550_v28 }
 0x480   :  { %v11799_v51 = vpop.f32.mrb[181].mxu1 }
 0x481   :  { %4480 = vmatpush1.bf16.msra.mxu1 %v15197_v55  ;;  %v11801_v42 = vpop.f32.mrb[182].mxu1  ;;  %v16295_v17 = vadd.f32 %v11799_v51, %v11798_v8  ;;  %v13693_v8 = vld [vmem:[%s18648_s5 + $0x60] sm:$0xff]  }
 0x482   :  { %4481 = vmatprep.subr.bf16.mxu1 %v18757_v22  ;;  %v11802_v46 = vpop.f32.mrb[183].mxu1  ;;  %12688 = vmatpush3.bf16.msra.mxu0 %v13693_v8 }
 0x483   :  { %12689 = vmatprep.subr.bf16.mxu0 %v18751_v34 }
 0x484   :  { %4434 = vmatmul.mubr.bf16.gmra.mrb[32].mxu1 %v13625_v49  ;;  %v16266_v49 = vadd.f32 %v11790_v30, %v11789_v47  ;;  %v13652_v30 = vld [vmem:[%s18645_s4 + $0x4ec] ss:$16 sps:$4 sm:$0xff]  }
 0x485   :  { %4482 = vmatpush1.bf16.msra.mxu1 %v15199_v48  ;;  %4441 = vmatprep.mubr.bf16.mxu1 %v13633_v53  ;;  %v13643_v53 = vld [vmem:[%s18645_s4 + $0x580] ss:$16 sps:$4 sm:$0xff]  }
 0x486   :  { %2991 = vmatmul.mubr.bf16.gmra.mrb[156].mxu0 %v13630_v15  ;;  %4483 = vmatprep.subr.bf16.mxu1 %v18757_v22 }
 0x487   :  { %10344 = vmatprep.mubr.msk.bf16.mxu0 %vm1308_vm6, %v13634_v23  ;;  %v11804_v15 = vpop.f32.mrb[184].mxu1  ;;  %v10577_v23 = vcombine.high %v10550_v28, %v10550_v28  ;;  %v16297_v28 = vadd.f32 %v11802_v46, %v11801_v42 }
 0x488   :  { %v11805_v2 = vpop.f32.mrb[185].mxu1 }
 0x489   :  { %4484 = vmatpush1.bf16.msra.mxu1 %v15202_v59  ;;  %v11807_v4 = vpop.f32.mrb[186].mxu1  ;;  %18771 = vst [vmem:[#allocation16_spill] sm:$0xff] %v16297_v28 }
 0x48a   :  { %4485 = vmatprep.subr.bf16.mxu1 %v18757_v22  ;;  %v11808_v45 = vpop.f32.mrb[187].mxu1 }
 0x48c   :  { %4442 = vmatmul.mubr.bf16.gmra.mrb[36].mxu1 %v13631_v0 }
 0x48d   :  { %4486 = vmatpush1.bf16.msra.mxu1 %v15204_v62  ;;  %4449 = vmatprep.mubr.bf16.mxu1 %v13639_v25 }
 0x48e   :  { %2999 = vmatmul.mubr.bf16.gmra.mrb[160].mxu0 %v13636_v35  ;;  %4487 = vmatprep.subr.bf16.mxu1 %v18757_v22 }
 0x48f   :  { %10345 = vmatprep.mubr.msk.bf16.mxu0 %vm1308_vm6, %v13640_v24  ;;  %v11810_v0 = vpop.f32.mrb[188].mxu1  ;;  %v16277_v24 = vadd.f32 %v11793_v36, %v11792_v63 }
 0x490   :  { %v11811_v25 = vpop.f32.mrb[189].mxu1 }
 0x491   :  { %4488 = vmatpush1.bf16.msra.mxu1 %v15206_v29  ;;  %v11813_v35 = vpop.f32.mrb[190].mxu1 }
 0x492   :  { %4489 = vmatprep.subr.bf16.mxu1 %v18757_v22  ;;  %v11814_v47 = vpop.f32.mrb[191].mxu1 }
 0x493   :  { %v16339_v8 = vadd.f32 %v11814_v47, %v11813_v35 }
 0x494   :  { %4450 = vmatmul.mubr.bf16.gmra.mrb[40].mxu1 %v13637_v11 }
 0x495   :  { %4490 = vmatpush1.bf16.msra.mxu1 %v15208_v5  ;;  %4457 = vmatprep.mubr.bf16.mxu1 %v13645_v33  ;;  %18775 = vst [vmem:[#allocation20_spill] sm:$0xff] %v16339_v8 }
 0x496   :  { %3007 = vmatmul.mubr.bf16.gmra.mrb[164].mxu0 %v13642_v27  ;;  %4491 = vmatprep.subr.bf16.mxu1 %v18757_v22 }
 0x497   :  { %10346 = vmatprep.mubr.msk.bf16.mxu0 %vm1308_vm6, %v10339_v7  ;;  %v16285_v11 = vpop.f32.mrb[192].mxu1 }
 0x498   :  { %v16288_v41 = vpop.f32.mrb[193].mxu1 }
 0x499   :  { %4492 = vmatpush1.bf16.msra.mxu1 %v15211_v37  ;;  %v11819_v33 = vpop.f32.mrb[194].mxu1 }
 0x49a   :  { %4493 = vmatprep.subr.bf16.mxu1 %v18757_v22  ;;  %v11820_v63 = vpop.f32.mrb[195].mxu1 }
 0x49c   :  { %4458 = vmatmul.mubr.bf16.gmra.mrb[44].mxu1 %v13643_v53  ;;  %v13650_v53 = vld [vmem:[%s18645_s4 + $0x4e8] ss:$16 sps:$4 sm:$0xff]  }
 0x49d   :  { %4494 = vmatpush1.bf16.msra.mxu1 %v15213_v56  ;;  %4465 = vmatprep.mubr.bf16.mxu1 %v10577_v23 }
 0x49e   :  { %3015 = vmatmul.mubr.bf16.gmra.mrb[168].mxu0 %v10338_v19  ;;  %4495 = vmatprep.subr.bf16.mxu1 %v18757_v22  ;;  %v13655_v19 = vld [vmem:[%s18645_s4 + $0x50c] ss:$16 sps:$4 sm:$0xff]  }
 0x49f   :  { %12695 = vmatprep.mubr.msk.bf16.mxu0 %vm14187_vm0, %v18751_v34  ;;  %v11849_v36 = vpop.f32.mrb[196].mxu1 }
 0x4a0   :  { %v11850_v27 = vpop.f32.mrb[197].mxu1 }
 0x4a1   :  { %4496 = vmatpush1.bf16.msra.mxu1 %v15215_v44  ;;  %v16293_v1 = vadd.f32 %v11850_v27, %v11849_v36  ;;  %v11852_v7 = vpop.f32.mrb[198].mxu1  ;;  %v16318_v27 = vadd.f32 %v11805_v2, %v11804_v15 }
 0x4a2   :  { %4497 = vmatprep.subr.bf16.mxu1 %v18757_v22  ;;  %v11853_v23 = vpop.f32.mrb[199].mxu1 }
 0x4a3   :  { %18772 = vst [vmem:[#allocation17_spill] sm:$0xff] %v16318_v27 }
 0x4a4   :  { %4466 = vmatmul.mubr.bf16.gmra.mrb[48].mxu1 %v10576_v10  ;;  %v16305_v10 = vadd.f32 %v11853_v23, %v11852_v7  ;;  %v16320_v7 = vadd.f32 %v11808_v45, %v11807_v4  ;;  %v16337_v45 = vadd.f32 %v11811_v25, %v11810_v0  ;;  %v13694_v0 = vld [vmem:[%s18648_s5 + $0x68] sm:$0xff]  }
 0x4a5   :  { %4498 = vmatpush1.bf16.msra.mxu1 %v15296_v57  ;;  %10580 = vmatprep.mubr.msk.bf16.mxu1 %vm1308_vm6, %v13652_v30 }
 0x4a6   :  { %12040 = vmatprep.subr.bf16.mxu1 %v15174_v14  ;;  %18773 = vst [vmem:[#allocation18_spill] sm:$0xff] %v16320_v7  ;;  %18774 = vst [vmem:[#allocation19_spill] sm:$0xff] %v16337_v45  ;;  %12690 = vmatpush3.bf16.msra.mxu0 %v13694_v0 }
 0x4a7   :  { %v11855_v30 = vpop.f32.mrb[200].mxu1  ;;  %12691 = vmatprep.subr.bf16.mxu0 %v18751_v34 }
 0x4a8   :  { %v11856_v33 = vpop.f32.mrb[201].mxu1 }
 0x4a9   :  { %v16310_v51 = vadd.f32 %v11856_v33, %v11855_v30  ;;  %v11858_v42 = vpop.f32.mrb[202].mxu1 }
 0x4aa   :  { %v11859_v46 = vpop.f32.mrb[203].mxu1 }
 0x4ab   :  { %v16314_v63 = vadd.f32 %v11859_v46, %v11858_v42  ;;  %v13656_v42 = vld [vmem:[%s18645_s4 + $0x528] ss:$16 sps:$4 sm:$0xff]  }
 0x4ac   :  { %4506 = vmatmul.mubr.bf16.vlgmr.msra.gmra.mrb[52].mxu1 %v13650_v53  ;;  %v13653_v53 = vld [vmem:[%s18645_s4 + $0x508] ss:$16 sps:$4 sm:$0xff]  }
 0x4ad   :  { %12041 = vmatpush3.bf16.msra.mxu1 %v18749_v60  ;;  %10581 = vmatprep.mubr.msk.bf16.mxu1 %vm1308_vm6, %v13655_v19  ;;  %v13658_v19 = vld [vmem:[%s18645_s4 + $0x52c] ss:$16 sps:$4 sm:$0xff]  }
 0x4ae   :  { %12042 = vmatprep.subr.bf16.mxu1 %v15176_v31 }
 0x4af   :  { %v11861_v36 = vpop.f32.mrb[204].mxu1 }
 0x4b0   :  { %v11862_v23 = vpop.f32.mrb[205].mxu1 }
 0x4b1   :  { %12043 = vmatpush3.bf16.msra.mxu1 %v15160_v13  ;;  %v16329_v30 = vadd.f32 %v11862_v23, %v11861_v36  ;;  %v11864_v33 = vpop.f32.mrb[206].mxu1  ;;  %v13661_v36 = vld [vmem:[%s18645_s4 + $0x54c] ss:$16 sps:$4 sm:$0xff]  }
 0x4b2   :  { %12044 = vmatprep.subr.bf16.mxu1 %v15178_v58  ;;  %v11865_v15 = vpop.f32.mrb[207].mxu1 }
 0x4b3   :  { %v16332_v2 = vadd.f32 %v11865_v15, %v11864_v33  ;;  %v13659_v33 = vld [vmem:[%s18645_s4 + $0x548] ss:$16 sps:$4 sm:$0xff]  }
 0x4b4   :  { %4514 = vmatmul.mubr.bf16.gmra.mrb[56].mxu1 %v13653_v53 }
 0x4b5   :  { %12045 = vmatpush3.bf16.msra.mxu1 %v15162_v21  ;;  %10582 = vmatprep.mubr.msk.bf16.mxu1 %vm1308_vm6, %v13658_v19  ;;  %v16362_v19 = vadd.f32 %v16288_v41, %v16285_v11  ;;  %v13695_v11 = vld [vmem:[%s18648_s5 + $0x70] sm:$0xff]  }
 0x4b6   :  { %12046 = vmatprep.subr.bf16.mxu1 %v15180_v20  ;;  %12692 = vmatpush3.bf16.msra.mxu0 %v13695_v11  ;;  %v10551_v11 = vld [vmem:[%s18645_s4 + $0x5a8] sm:$0x11] }
 0x4b7   :  { %v11867_v4 = vpop.f32.mrb[208].mxu1  ;;  %18776 = vst [vmem:[#allocation23_spill] sm:$0xff] %v16362_v19  ;;  %12693 = vmatprep.subr.bf16.mxu0 %v18751_v34  ;;  %v10579_v19 = vcombine.high %v10551_v11, %v10551_v11 }
 0x4b8   :  { %v11868_v46 = vpop.f32.mrb[209].mxu1 }
 0x4b9   :  { %12047 = vmatpush3.bf16.msra.mxu1 %v15164_v39  ;;  %v16348_v53 = vadd.f32 %v11868_v46, %v11867_v4  ;;  %v11870_v23 = vpop.f32.mrb[210].mxu1  ;;  %v13664_v4 = vld [vmem:[%s18645_s4 + $0x56c] ss:$16 sps:$4 sm:$0xff]  }
 0x4ba   :  { %12048 = vmatprep.subr.bf16.mxu1 %v15182_v52  ;;  %v11871_v25 = vpop.f32.mrb[211].mxu1 }
 0x4bb   :  { %v16354_v35 = vadd.f32 %v11871_v25, %v11870_v23  ;;  %v13696_v23 = vld [vmem:[%s18648_s5 + $0x78] sm:$0xff]  }
 0x4bc   :  { %4522 = vmatmul.mubr.bf16.gmra.mrb[60].mxu1 %v13656_v42  ;;  %v13662_v25 = vld [vmem:[%s18645_s4 + $0x568] ss:$16 sps:$4 sm:$0xff]   ;;  %12694 = vmatpush3.bf16.msra.mxu0 %v13696_v23 }
 0x4bd   :  { %12049 = vmatpush3.bf16.msra.mxu1 %v15166_v38  ;;  %10583 = vmatprep.mubr.msk.bf16.mxu1 %vm1308_vm6, %v13661_v36 }
 0x4be   :  { %12050 = vmatprep.subr.bf16.mxu1 %v15184_v43  ;;  %12723 = vmatprep.subr.bf16.mxu0 %v18751_v34 }
 0x4bf   :  { %v11873_v47 = vpop.f32.mrb[212].mxu1 }
 0x4c0   :  { %v11874_v15 = vpop.f32.mrb[213].mxu1 }
 0x4c1   :  { %12051 = vmatpush3.bf16.msra.mxu1 %v15168_v6  ;;  %v16371_v42 = vadd.f32 %v11874_v15, %v11873_v47  ;;  %v11876_v46 = vpop.f32.mrb[214].mxu1 }
 0x4c2   :  { %12052 = vmatprep.subr.bf16.mxu1 %v15186_v18  ;;  %v11877_v36 = vpop.f32.mrb[215].mxu1 }
 0x4c3   :  { %v16377_v41 = vadd.f32 %v11877_v36, %v11876_v46 }
 0x4c4   :  { %4530 = vmatmul.mubr.bf16.gmra.mrb[64].mxu1 %v13659_v33  ;;  %v13667_v33 = vld [vmem:[%s18645_s4 + $0x58c] ss:$16 sps:$4 sm:$0xff]  }
 0x4c5   :  { %12053 = vmatpush3.bf16.msra.mxu1 %v15170_v9  ;;  %10584 = vmatprep.mubr.msk.bf16.mxu1 %vm1308_vm6, %v13664_v4 }
 0x4c6   :  { %12054 = vmatprep.subr.bf16.mxu1 %v18762_v32 }
 0x4c7   :  { %v11879_v0 = vpop.f32.mrb[216].mxu1 }
 0x4c8   :  { %v11880_v47 = vpop.f32.mrb[217].mxu1 }
 0x4c9   :  { %12055 = vmatpush3.bf16.msra.mxu1 %v18766_v40  ;;  %v16393_v15 = vadd.f32 %v11880_v47, %v11879_v0  ;;  %v11882_v4 = vpop.f32.mrb[218].mxu1  ;;  %v13665_v0 = vld [vmem:[%s18645_s4 + $0x588] ss:$16 sps:$4 sm:$0xff]  }
 0x4ca   :  { %12109 = vmatprep.subr.bf16.mxu1 %v15174_v14  ;;  %v11883_v46 = vpop.f32.mrb[219].mxu1 }
 0x4cb   :  { %v16397_v36 = vadd.f32 %v11883_v46, %v11882_v4  ;;  %v13672_v46 = vld [vmem:[%s18645_s4 + $0x5b4] ss:$16 sps:$4 sm:$0xff]  }
 0x4cc   :  { %4538 = vmatmul.mubr.bf16.gmra.mrb[68].mxu1 %v13662_v25  ;;  %v10578_v25 = vcombine.low %v10551_v11, %v10551_v11 }
 0x4cd   :  { %10585 = vmatprep.mubr.msk.bf16.mxu1 %vm1308_vm6, %v13667_v33 }
 0x4cf   :  { %v11885_v23 = vpop.f32.mrb[220].mxu1 }
 0x4d0   :  { %v11886_v47 = vpop.f32.mrb[221].mxu1 }
 0x4d1   :  { %v11888_v8 = vpop.f32.mrb[222].mxu1 }
 0x4d2   :  { %v11889_v45 = vpop.f32.mrb[223].mxu1 }
 0x4d4   :  { %4546 = vmatmul.mubr.bf16.gmra.mrb[72].mxu1 %v13665_v0 }
 0x4d5   :  { %10586 = vmatprep.mubr.msk.bf16.mxu1 %vm1308_vm6, %v10579_v19 }
 0x4d7   :  { %v3481_v14 = vpop.f32.mrb[224].mxu1 }
 0x4d8   :  { %v16408_v33 = vadd.f32 %v16293_v1, %v3481_v14  ;;  %v3483_v4 = vpop.f32.mrb[225].mxu1  ;;  %v13670_v1 = vld [vmem:[%s18645_s4 + $0x5b0] ss:$16 sps:$4 sm:$0xff]  }
 0x4d9   :  { %v3484_v7 = vpop.f32.mrb[226].mxu1 }
 0x4da   :  { %v16414_v27 = vadd.f32 %v16305_v10, %v3484_v7  ;;  %v3486_v28 = vpop.f32.mrb[227].mxu1  ;;  %v13675_v10 = vld [vmem:[%s18645_s4 + $0x5d4] ss:$16 sps:$4 sm:$0xff]  }
 0x4dc   :  { %4554 = vmatmul.mubr.bf16.gmra.mrb[76].mxu1 %v10578_v25  ;;  %v3535_v45 = vpack.c.bf16 %v16414_v27, %v16408_v33  ;;  %v13673_v25 = vld [vmem:[%s18645_s4 + $0x5d0] ss:$16 sps:$4 sm:$0xff]  }
 0x4dd   :  { %4930 = vmatprep.mubr.bf16.mxu1 %v13672_v46  ;;  %v13678_v46 = vld [vmem:[%s18645_s4 + $0x5f4] ss:$16 sps:$4 sm:$0xff]  }
 0x4df   :  { %v3489_v8 = vpop.f32.mrb[228].mxu1 }
 0x4e0   :  { %v16422_v19 = vadd.f32 %v16310_v51, %v3489_v8  ;;  %v3491_v11 = vpop.f32.mrb[229].mxu1 }
 0x4e1   :  { %v3492_v7 = vpop.f32.mrb[230].mxu1  ;;  %v13681_v11 = vld [vmem:[%s18645_s4 + $0x614] ss:$16 sps:$4 sm:$0xff]  }
 0x4e2   :  { %v16428_v28 = vadd.f32 %v16314_v63, %v3492_v7  ;;  %v3494_v0 = vpop.f32.mrb[231].mxu1 }
 0x4e3   :  { %v13679_v0 = vld [vmem:[%s18645_s4 + $0x610] ss:$16 sps:$4 sm:$0xff]  }
 0x4e4   :  { %4931 = vmatmul.mubr.bf16.vlgmr.msra.gmra.mrb[80].mxu1 %v13670_v1  ;;  %v3536_v14 = vpack.c.bf16 %v16428_v28, %v16422_v19 }
 0x4e5   :  { %12110 = vmatpush3.bf16.msra.mxu1 %v18749_v60  ;;  %4938 = vmatprep.mubr.bf16.mxu1 %v13675_v10 }
 0x4e6   :  { %12111 = vmatprep.subr.bf16.mxu1 %v15176_v31 }
 0x4e7   :  { %v3497_v51 = vpop.f32.mrb[232].mxu1 }
 0x4e8   :  { %v16438_v4 = vadd.f32 %v16329_v30, %v3497_v51  ;;  %v3499_v63 = vpop.f32.mrb[233].mxu1  ;;  %v13676_v30 = vld [vmem:[%s18645_s4 + $0x5f0] ss:$16 sps:$4 sm:$0xff]  }
 0x4e9   :  { %12112 = vmatpush3.bf16.msra.mxu1 %v15160_v13  ;;  %v3500_v8 = vpop.f32.mrb[234].mxu1 }
 0x4ea   :  { %12113 = vmatprep.subr.bf16.mxu1 %v15178_v58  ;;  %v16446_v31 = vadd.f32 %v16332_v2, %v3500_v8  ;;  %v3502_v60 = vpop.f32.mrb[235].mxu1  ;;  %v13685_v8 = vld [vmem:[%s18645_s4 + $0x650] ss:$16 sps:$4 sm:$0xff]  }
 0x4ec   :  { %4939 = vmatmul.mubr.bf16.gmra.mrb[84].mxu1 %v13673_v25  ;;  %v3537_v1 = vpack.c.bf16 %v16446_v31, %v16438_v4  ;;  %v13687_v25 = vld [vmem:[%s18645_s4 + $0x654] ss:$16 sps:$4 sm:$0xff]  }
 0x4ed   :  { %12114 = vmatpush3.bf16.msra.mxu1 %v15162_v21  ;;  %4946 = vmatprep.mubr.bf16.mxu1 %v13678_v46 }
 0x4ee   :  { %12115 = vmatprep.subr.bf16.mxu1 %v15180_v20 }
 0x4ef   :  { %v3505_v13 = vpop.f32.mrb[236].mxu1 }
 0x4f0   :  { %v16456_v58 = vadd.f32 %v16348_v53, %v3505_v13  ;;  %v3507_v2 = vpop.f32.mrb[237].mxu1  ;;  %v11887_v53 = vadd.f32 %v11886_v47, %v11885_v23  ;;  %v13684_v23 = vld [vmem:[%s18645_s4 + $0x634] ss:$16 sps:$4 sm:$0xff]  }
 0x4f1   :  { %12116 = vmatpush3.bf16.msra.mxu1 %v15164_v39  ;;  %v3508_v10 = vpop.f32.mrb[238].mxu1 }
 0x4f2   :  { %12117 = vmatprep.subr.bf16.mxu1 %v15182_v52  ;;  %v16464_v21 = vadd.f32 %v16354_v35, %v3508_v10  ;;  %v3510_v20 = vpop.f32.mrb[239].mxu1  ;;  %v13692_v10 = vld [vmem:[%s18645_s4 + $0x684] ss:$16 sps:$4 sm:$0xff]  }
 0x4f3   :  { %v13690_v20 = vld [vmem:[%s18645_s4 + $0x680] ss:$16 sps:$4 sm:$0xff]  }
 0x4f4   :  { %4947 = vmatmul.mubr.bf16.gmra.mrb[88].mxu1 %v13676_v30  ;;  %v3538_v7 = vpack.c.bf16 %v16464_v21, %v16456_v58 }
 0x4f5   :  { %12118 = vmatpush3.bf16.msra.mxu1 %v15166_v38  ;;  %4954 = vmatprep.mubr.bf16.mxu1 %v13681_v11 }
 0x4f6   :  { %12119 = vmatprep.subr.bf16.mxu1 %v15184_v43 }
 0x4f7   :  { %v3513_v39 = vpop.f32.mrb[240].mxu1 }
 0x4f8   :  { %v16474_v52 = vadd.f32 %v16371_v42, %v3513_v39  ;;  %v3515_v35 = vpop.f32.mrb[241].mxu1  ;;  %v13682_v42 = vld [vmem:[%s18645_s4 + $0x630] ss:$16 sps:$4 sm:$0xff]  }
 0x4f9   :  { %12120 = vmatpush3.bf16.msra.mxu1 %v15168_v6  ;;  %v3516_v47 = vpop.f32.mrb[242].mxu1 }
 0x4fa   :  { %12121 = vmatprep.subr.bf16.mxu1 %v15186_v18  ;;  %v16482_v38 = vadd.f32 %v16377_v41, %v3516_v47  ;;  %v3518_v43 = vpop.f32.mrb[243].mxu1 }
 0x4fc   :  { %4955 = vmatmul.mubr.bf16.gmra.mrb[92].mxu1 %v13679_v0  ;;  %v3539_v51 = vpack.c.bf16 %v16482_v38, %v16474_v52  ;;  %v13703_v52 = vld [vmem:[%s18645_s4 + $0x41c] ss:$16 sps:$4 sm:$0xff]  }
 0x4fd   :  { %12122 = vmatpush3.bf16.msra.mxu1 %v15170_v9  ;;  %4962 = vmatprep.mubr.bf16.mxu1 %v13684_v23 }
 0x4fe   :  { %12123 = vmatprep.subr.bf16.mxu1 %v18762_v32 }
 0x4ff   :  { %v3521_v6 = vpop.f32.mrb[244].mxu1 }
 0x500   :  { %v16492_v18 = vadd.f32 %v16393_v15, %v3521_v6  ;;  %v3523_v41 = vpop.f32.mrb[245].mxu1  ;;  %v13697_v6 = vld [vmem:[%s18648_s5 + $0x80] sm:$0xff]  }
 0x501   :  { %12124 = vmatpush3.bf16.msra.mxu1 %v18766_v40  ;;  %v3524_v63 = vpop.f32.mrb[246].mxu1  ;;  %v10630_v40 = vld [vmem:[%s18645_s4 + $0x670] sm:$0x11]  ;;  %v13698_v41 = vld [vmem:[%s18648_s5 + $0x88] sm:$0xff]  }
 0x502   :  { %5499 = vmatprep.subr.bf16.mxu1 %v18757_v22  ;;  %v16500_v9 = vadd.f32 %v16397_v36, %v3524_v63  ;;  %v3526_v32 = vpop.f32.mrb[247].mxu1  ;;  %v10657_v36 = vcombine.high %v10630_v40, %v10630_v40  ;;  %v10656_v11 = vcombine.low %v10630_v40, %v10630_v40 }
 0x504   :  { %4963 = vmatmul.mubr.bf16.gmra.mrb[96].mxu1 %v13682_v42  ;;  %v3540_v46 = vpack.c.bf16 %v16500_v9, %v16492_v18  ;;  %v13704_v18 = vld [vmem:[%s18645_s4 + $0x43c] ss:$16 sps:$4 sm:$0xff]   ;;  %v13721_v9 = vld [vmem:[%s18648_s5 + $0xa0] sm:$0xff]  }
 0x505   :  { %4970 = vmatprep.mubr.bf16.mxu1 %v13687_v25 }
 0x507   :  { %v3529_v15 = vpop.f32.mrb[248].mxu1 }
 0x508   :  { %v16510_v60 = vadd.f32 %v11887_v53, %v3529_v15  ;;  %v3531_v13 = vpop.f32.mrb[249].mxu1 }
 0x509   :  { %v3532_v30 = vpop.f32.mrb[250].mxu1  ;;  %v13700_v13 = vld [vmem:[%s18648_s5 + $0x98] sm:$0xff]  }
 0x50a   :  { %v3533_v2 = vpop.f32.mrb[251].mxu1  ;;  %v3541_v38 = vpack.c.bf16 %v16510_v60, %v16510_v60  ;;  %v13706_v60 = vld [vmem:[%s18645_s4 + $0x438] ss:$16 sps:$4 sm:$0xff]  }
 0x50c   :  { %4971 = vmatmul.mubr.bf16.gmra.mrb[100].mxu1 %v13685_v8 }
 0x50d   :  { %4978 = vmatprep.mubr.bf16.mxu1 %v10657_v36 }
 0x514   :  { %4979 = vmatmul.mubr.bf16.gmra.mrb[104].mxu1 %v10656_v11 }
 0x515   :  { %5443 = vmatprep.mubr.bf16.mxu1 %v13692_v10 }
 0x51c   :  { %5444 = vmatmul.mubr.bf16.vlgmr.msra.gmra.mrb[108].mxu1 %v13690_v20 }
 0x51d   :  { %5500 = vmatpush1.bf16.msra.mxu1 %v15190_v12 }
 0x51e   :  { %5501 = vmatprep.subr.bf16.mxu1 %v18757_v22 }
 0x521   :  { %5502 = vmatpush1.bf16.msra.mxu1 %v15193_v54 }
 0x522   :  { %5503 = vmatprep.subr.bf16.mxu1 %v18757_v22 }
 0x525   :  { %5504 = vmatpush1.bf16.msra.mxu1 %v15195_v61 }
 0x526   :  { %5505 = vmatprep.subr.bf16.mxu1 %v18757_v22 }
 0x529   :  { %5506 = vmatpush1.bf16.msra.mxu1 %v15197_v55 }
 0x52a   :  { %5507 = vmatprep.subr.bf16.mxu1 %v18757_v22 }
 0x52d   :  { %5508 = vmatpush1.bf16.msra.mxu1 %v15199_v48 }
 0x52e   :  { %5509 = vmatprep.subr.bf16.mxu1 %v18757_v22 }
 0x531   :  { %5510 = vmatpush1.bf16.msra.mxu1 %v15202_v59 }
 0x532   :  { %5511 = vmatprep.subr.bf16.mxu1 %v18757_v22 }
 0x535   :  { %5512 = vmatpush1.bf16.msra.mxu1 %v15204_v62 }
 0x536   :  { %5513 = vmatprep.subr.bf16.mxu1 %v18757_v22 }
 0x539   :  { %5514 = vmatpush1.bf16.msra.mxu1 %v15206_v29 }
 0x53a   :  { %5515 = vmatprep.subr.bf16.mxu1 %v18757_v22 }
 0x53d   :  { %5516 = vmatpush1.bf16.msra.mxu1 %v15208_v5 }
 0x53e   :  { %5517 = vmatprep.subr.bf16.mxu1 %v18757_v22 }
 0x541   :  { %5518 = vmatpush1.bf16.msra.mxu1 %v15211_v37  ;;  %v2968_v53 = vpop.f32.mrb[144].mxu0 }
 0x542   :  { %v2969_v39 = vadd.f32 %v16240_v16, %v2968_v53  ;;  %v2970_v0 = vpop.f32.mrb[145].mxu0  ;;  %5519 = vmatprep.subr.bf16.mxu1 %v18757_v22 }
 0x543   :  { %v2971_v35 = vpop.f32.mrb[146].mxu0 }
 0x544   :  { %v2972_v23 = vadd.f32 %v16242_v3, %v2971_v35  ;;  %v2973_v47 = vpop.f32.mrb[147].mxu0 }
 0x545   :  { %5520 = vmatpush1.bf16.msra.mxu1 %v15213_v56  ;;  %v18778_v47 = vld [vmem:[#allocation17_spill] sm:$0xff] }
 0x546   :  { %v3022_v43 = vpack.c.bf16 %v2972_v23, %v2969_v39  ;;  %5521 = vmatprep.subr.bf16.mxu1 %v18757_v22  ;;  %v18777_v39 = vld [vmem:[#allocation16_spill] sm:$0xff] }
 0x548   :  { %12696 = vmatmul.mubr.msk.bf16.vlgmr.msra.gmra.mrb[116].mxu0 %vm636_vm3, %v3022_v43 }
 0x549   :  { %5522 = vmatpush1.bf16.msra.mxu1 %v15215_v44  ;;  %v2976_v16 = vpop.f32.mrb[148].mxu0  ;;  %12699 = vmatprep.mubr.msk.bf16.mxu0 %vm14187_vm0, %v18751_v34 }
 0x54a   :  { %v2977_v3 = vadd.f32 %v16264_v50, %v2976_v16  ;;  %v2978_v42 = vpop.f32.mrb[149].mxu0  ;;  %5523 = vmatprep.subr.bf16.mxu1 %v18757_v22  ;;  %12724 = vmatpush3.bf16.msra.mxu0 %v13697_v6  ;;  %v13699_v50 = vld [vmem:[%s18648_s5 + $0x90] sm:$0xff]  }
 0x54b   :  { %v2979_v25 = vpop.f32.mrb[150].mxu0  ;;  %12725 = vmatprep.subr.bf16.mxu0 %v18751_v34 }
 0x54c   :  { %v2980_v63 = vadd.f32 %v16266_v49, %v2979_v25  ;;  %v2981_v32 = vpop.f32.mrb[151].mxu0  ;;  %v11918_v25 = vpop.f32.mrb[252].mxu1 }
 0x54d   :  { %5524 = vmatpush1.bf16.msra.mxu1 %v15296_v57  ;;  %v11919_v32 = vpop.f32.mrb[253].mxu1 }
 0x54e   :  { %v3023_v40 = vpack.c.bf16 %v2980_v63, %v2977_v3  ;;  %12726 = vmatpush3.bf16.msra.mxu0 %v13698_v41  ;;  %v18779_v3 = vld [vmem:[#allocation18_spill] sm:$0xff] }
 0x54f   :  { %12727 = vmatprep.subr.bf16.mxu0 %v18751_v34 }
 0x550   :  { %12700 = vmatmul.mubr.msk.bf16.gmra.mrb[120].mxu0 %vm636_vm3, %v3023_v40  ;;  %v18780_v40 = vld [vmem:[#allocation19_spill] sm:$0xff] }
 0x551   :  { %v2984_v15 = vpop.f32.mrb[152].mxu0  ;;  %12703 = vmatprep.mubr.msk.bf16.mxu0 %vm14187_vm0, %v18751_v34 }
 0x552   :  { %v2985_v8 = vadd.f32 %v16277_v24, %v2984_v15  ;;  %v2986_v49 = vpop.f32.mrb[153].mxu0  ;;  %12728 = vmatpush3.bf16.msra.mxu0 %v13699_v50 }
 0x553   :  { %v2987_v36 = vpop.f32.mrb[154].mxu0  ;;  %12729 = vmatprep.subr.bf16.mxu0 %v18751_v34  ;;  %v11921_v49 = vpop.f32.mrb[254].mxu1 }
 0x554   :  { %v2988_v30 = vadd.f32 %v16279_v26, %v2987_v36  ;;  %v2989_v2 = vpop.f32.mrb[155].mxu0  ;;  %v11922_v36 = vpop.f32.mrb[255].mxu1 }
 0x556   :  { %v3024_v11 = vpack.c.bf16 %v2988_v30, %v2985_v8  ;;  %12730 = vmatpush3.bf16.msra.mxu0 %v13700_v13  ;;  %v16585_v8 = vadd.f32 %v11919_v32, %v11918_v25  ;;  %v18781_v30 = vld [vmem:[#allocation20_spill] sm:$0xff] }
 0x557   :  { %3960 = vmatprep.subr.bf16.mxu0 %v18757_v22 }
 0x558   :  { %12704 = vmatmul.mubr.msk.bf16.gmra.mrb[124].mxu0 %vm636_vm3, %v3024_v11 }
 0x559   :  { %v2992_v10 = vpop.f32.mrb[156].mxu0  ;;  %12707 = vmatprep.mubr.msk.bf16.mxu0 %vm14187_vm0, %v18751_v34 }
 0x55a   :  { %v2993_v24 = vadd.f32 %v16295_v17, %v2992_v10  ;;  %v2994_v20 = vpop.f32.mrb[157].mxu0  ;;  %v16588_v10 = vadd.f32 %v11922_v36, %v11921_v49 }
 0x55b   :  { %v2995_v53 = vpop.f32.mrb[158].mxu0 }
 0x55c   :  { %v2996_v0 = vadd.f32 %v18777_v39, %v2995_v53  ;;  %v2997_v35 = vpop.f32.mrb[159].mxu0 }
 0x55e   :  { %v3025_v23 = vpack.c.bf16 %v2996_v0, %v2993_v24  ;;  %v11924_v24 = vpop.f32.mrb[0].mxu1 }
 0x55f   :  { %v11925_v20 = vpop.f32.mrb[1].mxu1 }
 0x560   :  { %12708 = vmatmul.mubr.msk.bf16.gmra.mrb[128].mxu0 %vm636_vm3, %v3025_v23  ;;  %v16590_v39 = vadd.f32 %v11925_v20, %v11924_v24  ;;  %v11927_v0 = vpop.f32.mrb[2].mxu1 }
 0x561   :  { %v3000_v26 = vpop.f32.mrb[160].mxu0  ;;  %12711 = vmatprep.mubr.msk.bf16.mxu0 %vm14187_vm0, %v18751_v34  ;;  %v11928_v35 = vpop.f32.mrb[3].mxu1 }
 0x562   :  { %v3001_v43 = vadd.f32 %v18778_v47, %v3000_v26  ;;  %v3002_v6 = vpop.f32.mrb[161].mxu0  ;;  %v16593_v23 = vadd.f32 %v11928_v35, %v11927_v0  ;;  %v11930_v26 = vpop.f32.mrb[4].mxu1 }
 0x563   :  { %v3003_v16 = vpop.f32.mrb[162].mxu0  ;;  %v18782_v6 = vld [vmem:[#allocation23_spill] sm:$0xff] }
 0x564   :  { %v3004_v42 = vadd.f32 %v18779_v3, %v3003_v16  ;;  %v3005_v41 = vpop.f32.mrb[163].mxu0 }
 0x566   :  { %v3026_v17 = vpack.c.bf16 %v3004_v42, %v3001_v43  ;;  %v11931_v43 = vpop.f32.mrb[5].mxu1 }
 0x567   :  { %v16598_v42 = vadd.f32 %v11931_v43, %v11930_v26  ;;  %v11933_v41 = vpop.f32.mrb[6].mxu1 }
 0x568   :  { %12712 = vmatmul.mubr.msk.bf16.gmra.mrb[132].mxu0 %vm636_vm3, %v3026_v17  ;;  %v11934_v25 = vpop.f32.mrb[7].mxu1 }
 0x569   :  { %v3008_v63 = vpop.f32.mrb[164].mxu0  ;;  %12715 = vmatprep.mubr.msk.bf16.mxu0 %vm14187_vm0, %v18751_v34  ;;  %v16600_v32 = vadd.f32 %v11934_v25, %v11933_v41 }
 0x56a   :  { %v3009_v50 = vadd.f32 %v18780_v40, %v3008_v63  ;;  %v3010_v15 = vpop.f32.mrb[165].mxu0  ;;  %v11936_v40 = vpop.f32.mrb[8].mxu1 }
 0x56b   :  { %v3011_v13 = vpop.f32.mrb[166].mxu0 }
 0x56c   :  { %v3012_v2 = vadd.f32 %v18781_v30, %v3011_v13  ;;  %v3013_v11 = vpop.f32.mrb[167].mxu0 }
 0x56e   :  { %v3027_v53 = vpack.c.bf16 %v3012_v2, %v3009_v50  ;;  %v11937_v50 = vpop.f32.mrb[9].mxu1 }
 0x56f   :  { %v16602_v49 = vadd.f32 %v11937_v50, %v11936_v40  ;;  %v11939_v13 = vpop.f32.mrb[10].mxu1 }
 0x570   :  { %12716 = vmatmul.mubr.msk.bf16.gmra.mrb[136].mxu0 %vm636_vm3, %v3027_v53  ;;  %v11940_v36 = vpop.f32.mrb[11].mxu1 }
 0x571   :  { %v3016_v47 = vpop.f32.mrb[168].mxu0  ;;  %12719 = vmatprep.mubr.msk.bf16.mxu0 %vm14187_vm0, %v18751_v34  ;;  %v16605_v30 = vadd.f32 %v11940_v36, %v11939_v13  ;;  %v11942_v2 = vpop.f32.mrb[12].mxu1 }
 0x572   :  { %v3017_v16 = vadd.f32 %v18782_v6, %v3016_v47  ;;  %v3018_v3 = vpop.f32.mrb[169].mxu0  ;;  %v11943_v11 = vpop.f32.mrb[13].mxu1 }
 0x573   :  { %v3019_v17 = vpop.f32.mrb[170].mxu0  ;;  %v16609_v24 = vadd.f32 %v11943_v11, %v11942_v2  ;;  %v11945_v20 = vpop.f32.mrb[14].mxu1 }
 0x574   :  { %v3020_v63 = vpop.f32.mrb[171].mxu0  ;;  %v3028_v15 = vpack.c.bf16 %v3017_v16, %v3017_v16  ;;  %v11946_v53 = vpop.f32.mrb[15].mxu1 }
 0x575   :  { %v16611_v0 = vadd.f32 %v11946_v53, %v11945_v20  ;;  %v11948_v35 = vpop.f32.mrb[16].mxu1 }
 0x576   :  { %v11949_v26 = vpop.f32.mrb[17].mxu1 }
 0x577   :  { %v16613_v47 = vadd.f32 %v11949_v26, %v11948_v35  ;;  %v11951_v43 = vpop.f32.mrb[18].mxu1 }
 0x578   :  { %12720 = vmatmul.mubr.msk.bf16.gmra.mrb[140].mxu0 %vm636_vm3, %v3028_v15  ;;  %v11952_v6 = vpop.f32.mrb[19].mxu1 }
 0x579   :  { %12731 = vmatprep.mubr.msk.bf16.mxu0 %vm14187_vm0, %v18751_v34  ;;  %v16619_v16 = vadd.f32 %v11952_v6, %v11951_v43  ;;  %v11954_v3 = vpop.f32.mrb[20].mxu1 }
 0x57a   :  { %v11955_v41 = vpop.f32.mrb[21].mxu1 }
 0x57b   :  { %v16625_v17 = vadd.f32 %v11955_v41, %v11954_v3  ;;  %v11957_v25 = vpop.f32.mrb[22].mxu1 }
 0x57c   :  { %v11958_v63 = vpop.f32.mrb[23].mxu1 }
 0x57d   :  { %v11987_v40 = vpop.f32.mrb[24].mxu1 }
 0x57e   :  { %v11988_v27 = vpop.f32.mrb[25].mxu1 }
 0x57f   :  { %v16629_v33 = vadd.f32 %v11988_v27, %v11987_v40 }
 0x580   :  { %12732 = vmatmul.mubr.msk.bf16.vlgmr.msra.gmra.mrb[116].mxu0 %vm636_vm3, %v3535_v45  ;;  %v11990_v45 = vpop.f32.mrb[26].mxu1 }
 0x581   :  { %3961 = vmatpush1.bf16.msra.mxu0 %v15190_v12  ;;  %12735 = vmatprep.mubr.msk.bf16.mxu0 %vm14187_vm0, %v18751_v34  ;;  %v11991_v50 = vpop.f32.mrb[27].mxu1 }
 0x582   :  { %3962 = vmatprep.subr.bf16.mxu0 %v18757_v22  ;;  %v16635_v15 = vadd.f32 %v11991_v50, %v11990_v45  ;;  %v11993_v13 = vpop.f32.mrb[28].mxu1 }
 0x583   :  { %v11994_v36 = vpop.f32.mrb[29].mxu1 }
 0x584   :  { %v16641_v2 = vadd.f32 %v11994_v36, %v11993_v13  ;;  %v11996_v11 = vpop.f32.mrb[30].mxu1 }
 0x585   :  { %3963 = vmatpush1.bf16.msra.mxu0 %v15193_v54  ;;  %v11997_v20 = vpop.f32.mrb[31].mxu1 }
 0x586   :  { %3964 = vmatprep.subr.bf16.mxu0 %v18757_v22  ;;  %v16643_v53 = vadd.f32 %v11997_v20, %v11996_v11  ;;  %v11999_v19 = vpop.f32.mrb[32].mxu1 }
 0x587   :  { %v12000_v28 = vpop.f32.mrb[33].mxu1 }
 0x588   :  { %12736 = vmatmul.mubr.msk.bf16.gmra.mrb[120].mxu0 %vm636_vm3, %v3536_v14  ;;  %v16647_v14 = vadd.f32 %v12000_v28, %v11999_v19  ;;  %v12002_v35 = vpop.f32.mrb[34].mxu1 }
 0x589   :  { %3965 = vmatpush1.bf16.msra.mxu0 %v15195_v61  ;;  %12739 = vmatprep.mubr.msk.bf16.mxu0 %vm14187_vm0, %v18751_v34  ;;  %v12003_v26 = vpop.f32.mrb[35].mxu1 }
 0x58a   :  { %3966 = vmatprep.subr.bf16.mxu0 %v18757_v22  ;;  %v16653_v43 = vadd.f32 %v12003_v26, %v12002_v35  ;;  %v12005_v6 = vpop.f32.mrb[36].mxu1 }
 0x58b   :  { %v12006_v3 = vpop.f32.mrb[37].mxu1 }
 0x58c   :  { %v16659_v41 = vadd.f32 %v12006_v3, %v12005_v6  ;;  %v12008_v25 = vpop.f32.mrb[38].mxu1  ;;  %v13707_v6 = vld [vmem:[%s18645_s4 + $0x45c] ss:$16 sps:$4 sm:$0xff]   ;;  %v13709_v3 = vld [vmem:[%s18645_s4 + $0x458] ss:$16 sps:$4 sm:$0xff]  }
 0x58d   :  { %3967 = vmatpush1.bf16.msra.mxu0 %v15197_v55  ;;  %v12009_v63 = vpop.f32.mrb[39].mxu1 }
 0x58e   :  { %3968 = vmatprep.subr.bf16.mxu0 %v18757_v22  ;;  %v16661_v40 = vadd.f32 %v12009_v63, %v12008_v25  ;;  %v12011_v4 = vpop.f32.mrb[40].mxu1  ;;  %v13710_v25 = vld [vmem:[%s18645_s4 + $0x47c] ss:$16 sps:$4 sm:$0xff]   ;;  %v13712_v63 = vld [vmem:[%s18645_s4 + $0x478] ss:$16 sps:$4 sm:$0xff]  }
 0x58f   :  { %v12012_v31 = vpop.f32.mrb[41].mxu1 }
 0x590   :  { %12740 = vmatmul.mubr.msk.bf16.gmra.mrb[124].mxu0 %vm636_vm3, %v3537_v1  ;;  %v16665_v1 = vadd.f32 %v12012_v31, %v12011_v4  ;;  %v12014_v27 = vpop.f32.mrb[42].mxu1  ;;  %v13713_v4 = vld [vmem:[%s18645_s4 + $0x49c] ss:$16 sps:$4 sm:$0xff]   ;;  %v13715_v31 = vld [vmem:[%s18645_s4 + $0x498] ss:$16 sps:$4 sm:$0xff]  }
 0x591   :  { %3969 = vmatpush1.bf16.msra.mxu0 %v15199_v48  ;;  %12743 = vmatprep.mubr.msk.bf16.mxu0 %vm14187_vm0, %v18751_v34  ;;  %v12015_v45 = vpop.f32.mrb[43].mxu1 }
 0x592   :  { %3970 = vmatprep.subr.bf16.mxu0 %v18757_v22  ;;  %v16671_v50 = vadd.f32 %v12015_v45, %v12014_v27  ;;  %v12017_v13 = vpop.f32.mrb[44].mxu1  ;;  %v13716_v27 = vld [vmem:[%s18645_s4 + $0x4bc] ss:$16 sps:$4 sm:$0xff]  }
 0x593   :  { %v12018_v36 = vpop.f32.mrb[45].mxu1  ;;  %v10471_v45 = vld [vmem:[%s18645_s4 + $0x4d8] sm:$0x11] }
 0x594   :  { %v16677_v11 = vadd.f32 %v12018_v36, %v12017_v13  ;;  %v12020_v20 = vpop.f32.mrb[46].mxu1  ;;  %v13718_v13 = vld [vmem:[%s18645_s4 + $0x4b8] ss:$16 sps:$4 sm:$0xff]   ;;  %v10499_v36 = vcombine.high %v10471_v45, %v10471_v45 }
 0x595   :  { %3971 = vmatpush1.bf16.msra.mxu0 %v15202_v59  ;;  %v12021_v19 = vpop.f32.mrb[47].mxu1 }
 0x596   :  { %3972 = vmatprep.subr.bf16.mxu0 %v18757_v22  ;;  %v16679_v28 = vadd.f32 %v12021_v19, %v12020_v20  ;;  %v12023_v58 = vpop.f32.mrb[48].mxu1  ;;  %v10498_v20 = vcombine.low %v10471_v45, %v10471_v45  ;;  %v13723_v19 = vld [vmem:[%s18648_s5 + $0xb0] sm:$0xff]  }
 0x597   :  { %v12024_v21 = vpop.f32.mrb[49].mxu1 }
 0x598   :  { %12744 = vmatmul.mubr.msk.bf16.gmra.mrb[128].mxu0 %vm636_vm3, %v3538_v7  ;;  %v16683_v7 = vadd.f32 %v12024_v21, %v12023_v58  ;;  %v12026_v35 = vpop.f32.mrb[50].mxu1 }
 0x599   :  { %3973 = vmatpush1.bf16.msra.mxu0 %v15204_v62  ;;  %12747 = vmatprep.mubr.msk.bf16.mxu0 %vm14187_vm0, %v18751_v34  ;;  %v12027_v26 = vpop.f32.mrb[51].mxu1 }
 0x59a   :  { %3974 = vmatprep.subr.bf16.mxu0 %v18757_v22  ;;  %v4507_v58 = vpop.f32.mrb[52].mxu1 }
 0x59b   :  { %v16770_v21 = vadd.f32 %v16629_v33, %v4507_v58  ;;  %v4509_v35 = vpop.f32.mrb[53].mxu1 }
 0x59c   :  { %v4510_v26 = vpop.f32.mrb[54].mxu1 }
 0x59d   :  { %3975 = vmatpush1.bf16.msra.mxu0 %v15206_v29 }
 0x59e   :  { %3976 = vmatprep.subr.bf16.mxu0 %v18757_v22 }
 0x5a0   :  { %12748 = vmatmul.mubr.msk.bf16.gmra.mrb[132].mxu0 %vm636_vm3, %v3539_v51  ;;  %v13701_v51 = vld [vmem:[%s18645_s4 + $0x418] ss:$16 sps:$4 sm:$0xff]  }
 0x5a1   :  { %3977 = vmatpush1.bf16.msra.mxu0 %v15208_v5  ;;  %12751 = vmatprep.mubr.msk.bf16.mxu0 %vm14187_vm0, %v18751_v34 }
 0x5a2   :  { %3978 = vmatprep.subr.bf16.mxu0 %v18757_v22 }
 0x5a5   :  { %3979 = vmatpush1.bf16.msra.mxu0 %v15211_v37 }
 0x5a6   :  { %3980 = vmatprep.subr.bf16.mxu0 %v18757_v22 }
 0x5a8   :  { %12752 = vmatmul.mubr.msk.bf16.gmra.mrb[136].mxu0 %vm636_vm3, %v3540_v46  ;;  %v13722_v46 = vld [vmem:[%s18648_s5 + $0xa8] sm:$0xff]  }
 0x5a9   :  { %3981 = vmatpush1.bf16.msra.mxu0 %v15213_v56  ;;  %12755 = vmatprep.mubr.msk.bf16.mxu0 %vm14187_vm0, %v18751_v34 }
 0x5aa   :  { %3982 = vmatprep.subr.bf16.mxu0 %v18757_v22 }
 0x5ad   :  { %3983 = vmatpush1.bf16.msra.mxu0 %v15215_v44 }
 0x5ae   :  { %3984 = vmatprep.subr.bf16.mxu0 %v18757_v22 }
 0x5b0   :  { %12756 = vmatmul.mubr.msk.bf16.gmra.mrb[140].mxu0 %vm636_vm3, %v3541_v38  ;;  %v16777_v38 = vadd.f32 %v16635_v15, %v4510_v26 }
 0x5b1   :  { %3985 = vmatpush1.bf16.msra.mxu0 %v15296_v57  ;;  %10500 = vmatprep.mubr.msk.bf16.mxu0 %vm1308_vm6, %v13703_v52  ;;  %v13724_v52 = vld [vmem:[%s18648_s5 + $0xb8] sm:$0xff]  }
 0x5b2   :  { %12759 = vmatprep.subr.bf16.mxu0 %v18751_v34 }
 0x5b8   :  { %3993 = vmatmul.mubr.bf16.vlgmr.msra.gmra.mrb[172].mxu0 %v13701_v51  ;;  %v4512_v51 = vpop.f32.mrb[55].mxu1 }
 0x5b9   :  { %10501 = vmatprep.mubr.msk.bf16.mxu0 %vm1308_vm6, %v13704_v18  ;;  %12760 = vmatpush3.bf16.msra.mxu0 %v13721_v9  ;;  %v4561_v18 = vpack.c.bf16 %v16777_v38, %v16770_v21  ;;  %v4515_v33 = vpop.f32.mrb[56].mxu1 }
 0x5ba   :  { %12761 = vmatprep.subr.bf16.mxu0 %v18751_v34  ;;  %v16783_v9 = vadd.f32 %v16641_v2, %v4515_v33 }
 0x5bd   :  { %12762 = vmatpush3.bf16.msra.mxu0 %v13722_v46  ;;  %v4517_v46 = vpop.f32.mrb[57].mxu1 }
 0x5be   :  { %12763 = vmatprep.subr.bf16.mxu0 %v18751_v34 }
 0x5c0   :  { %4001 = vmatmul.mubr.bf16.gmra.mrb[176].mxu0 %v13706_v60  ;;  %v4518_v60 = vpop.f32.mrb[58].mxu1 }
 0x5c1   :  { %10502 = vmatprep.mubr.msk.bf16.mxu0 %vm1308_vm6, %v13707_v6  ;;  %12764 = vmatpush3.bf16.msra.mxu0 %v13723_v19  ;;  %v16786_v6 = vadd.f32 %v16643_v53, %v4518_v60 }
 0x5c2   :  { %12765 = vmatprep.subr.bf16.mxu0 %v18751_v34 }
 0x5c3   :  { %v4562_v15 = vpack.c.bf16 %v16786_v6, %v16783_v9  ;;  %v13775_v9 = vld [vmem:[%s18645_s4 + $0x638] ss:$16 sps:$4 sm:$0xff]   ;;  %v13776_v6 = vld [vmem:[%s18645_s4 + $0x65c] ss:$16 sps:$4 sm:$0xff]  }
 0x5c5   :  { %12766 = vmatpush3.bf16.msra.mxu0 %v13724_v52 }
 0x5c6   :  { %12795 = vmatprep.subr.bf16.mxu0 %v18751_v34 }
 0x5c8   :  { %4009 = vmatmul.mubr.bf16.gmra.mrb[180].mxu0 %v13709_v3  ;;  %v4520_v3 = vpop.f32.mrb[59].mxu1 }
 0x5c9   :  { %10503 = vmatprep.mubr.msk.bf16.mxu0 %vm1308_vm6, %v13710_v25  ;;  %v4523_v25 = vpop.f32.mrb[60].mxu1 }
 0x5d0   :  { %4017 = vmatmul.mubr.bf16.gmra.mrb[184].mxu0 %v13712_v63  ;;  %v16791_v63 = vadd.f32 %v16647_v14, %v4523_v25 }
 0x5d1   :  { %10504 = vmatprep.mubr.msk.bf16.mxu0 %vm1308_vm6, %v13713_v4  ;;  %v4525_v4 = vpop.f32.mrb[61].mxu1 }
 0x5d8   :  { %4025 = vmatmul.mubr.bf16.gmra.mrb[188].mxu0 %v13715_v31  ;;  %v4526_v31 = vpop.f32.mrb[62].mxu1 }
 0x5d9   :  { %10505 = vmatprep.mubr.msk.bf16.mxu0 %vm1308_vm6, %v13716_v27  ;;  %v16794_v27 = vadd.f32 %v16653_v43, %v4526_v31  ;;  %v4528_v2 = vpop.f32.mrb[63].mxu1 }
 0x5db   :  { %v4563_v45 = vpack.c.bf16 %v16794_v27, %v16791_v63  ;;  %v13781_v63 = vld [vmem:[%s18645_s4 + $0x658] ss:$16 sps:$4 sm:$0xff]  }
 0x5e0   :  { %4033 = vmatmul.mubr.bf16.gmra.mrb[192].mxu0 %v13718_v13  ;;  %v4531_v13 = vpop.f32.mrb[64].mxu1 }
 0x5e1   :  { %10506 = vmatprep.mubr.msk.bf16.mxu0 %vm1308_vm6, %v10499_v36  ;;  %v16799_v53 = vadd.f32 %v16659_v41, %v4531_v13  ;;  %v4533_v36 = vpop.f32.mrb[65].mxu1 }
 0x5e8   :  { %4041 = vmatmul.mubr.bf16.gmra.mrb[196].mxu0 %v10498_v20  ;;  %v4534_v20 = vpop.f32.mrb[66].mxu1 }
 0x5e9   :  { %12767 = vmatprep.mubr.msk.bf16.mxu0 %vm14187_vm0, %v18751_v34  ;;  %v16802_v19 = vadd.f32 %v16661_v40, %v4534_v20  ;;  %v4536_v14 = vpop.f32.mrb[67].mxu1  ;;  %v13732_v20 = vld [vmem:[%s18645_s4 + $0x6c0] ss:$16 sps:$4 sm:$0xff]  }
 0x5ea   :  { %v4539_v35 = vpop.f32.mrb[68].mxu1  ;;  %v13735_v14 = vld [vmem:[%s18645_s4 + $0x6e0] ss:$16 sps:$4 sm:$0xff]  }
 0x5eb   :  { %v4564_v58 = vpack.c.bf16 %v16802_v19, %v16799_v53  ;;  %v16807_v43 = vadd.f32 %v16665_v1, %v4539_v35  ;;  %v4541_v26 = vpop.f32.mrb[69].mxu1  ;;  %v13737_v35 = vld [vmem:[%s18645_s4 + $0x6e4] ss:$16 sps:$4 sm:$0xff]  }
 0x5ec   :  { %v4542_v52 = vpop.f32.mrb[70].mxu1  ;;  %v13738_v26 = vld [vmem:[%s18645_s4 + $0x700] ss:$16 sps:$4 sm:$0xff]  }
 0x5ed   :  { %v16810_v51 = vadd.f32 %v16671_v50, %v4542_v52  ;;  %v4544_v41 = vpop.f32.mrb[71].mxu1  ;;  %v13740_v52 = vld [vmem:[%s18645_s4 + $0x704] ss:$16 sps:$4 sm:$0xff]  }
 0x5ee   :  { %v4547_v46 = vpop.f32.mrb[72].mxu1  ;;  %v13741_v41 = vld [vmem:[%s18645_s4 + $0x720] ss:$16 sps:$4 sm:$0xff]  }
 0x5ef   :  { %v4565_v33 = vpack.c.bf16 %v16810_v51, %v16807_v43  ;;  %v16815_v40 = vadd.f32 %v16677_v11, %v4547_v46  ;;  %v4549_v60 = vpop.f32.mrb[73].mxu1  ;;  %v13729_v11 = vld [vmem:[%s18645_s4 + $0x6a0] ss:$16 sps:$4 sm:$0xff]   ;;  %v13743_v46 = vld [vmem:[%s18645_s4 + $0x724] ss:$16 sps:$4 sm:$0xff]  }
 0x5f0   :  { %v4550_v3 = vpop.f32.mrb[74].mxu1  ;;  %v10710_v60 = vld [vmem:[%s18645_s4 + $0x740] sm:$0x11] }
 0x5f1   :  { %v16818_v25 = vadd.f32 %v16679_v28, %v4550_v3  ;;  %v4552_v1 = vpop.f32.mrb[75].mxu1  ;;  %v13731_v28 = vld [vmem:[%s18645_s4 + $0x6a4] ss:$16 sps:$4 sm:$0xff]   ;;  %v10736_v3 = vcombine.low %v10710_v60, %v10710_v60 }
 0x5f2   :  { %v4555_v31 = vpop.f32.mrb[76].mxu1  ;;  %5451 = vmatprep.mubr.bf16.mxu1 %v13731_v28  ;;  %v10737_v1 = vcombine.high %v10710_v60, %v10710_v60  ;;  %v13762_v28 = vld [vmem:[%s18645_s4 + $0x6cc] ss:$16 sps:$4 sm:$0xff]  }
 0x5f3   :  { %v4566_v4 = vpack.c.bf16 %v16818_v25, %v16815_v40  ;;  %v16823_v50 = vadd.f32 %v16683_v7, %v4555_v31  ;;  %v4557_v2 = vpop.f32.mrb[77].mxu1  ;;  %5452 = vmatmul.mubr.bf16.gmra.mrb[112].mxu1 %v13729_v11  ;;  %v13734_v7 = vld [vmem:[%s18645_s4 + $0x6c4] ss:$16 sps:$4 sm:$0xff]   ;;  %v13751_v31 = vld [vmem:[%s18645_s4 + $0x68c] ss:$16 sps:$4 sm:$0xff]  }
 0x5f4   :  { %v4558_v13 = vpop.f32.mrb[78].mxu1  ;;  %5459 = vmatprep.mubr.bf16.mxu1 %v13734_v7  ;;  %v13749_v2 = vld [vmem:[%s18645_s4 + $0x688] ss:$16 sps:$4 sm:$0xff]   ;;  %v13768_v60 = vld [vmem:[%s18645_s4 + $0x6ec] ss:$16 sps:$4 sm:$0xff]  }
 0x5f5   :  { %v4559_v36 = vpop.f32.mrb[79].mxu1  ;;  %v13756_v13 = vld [vmem:[%s18645_s4 + $0x6ac] ss:$16 sps:$4 sm:$0xff]  }
 0x5f6   :  { %v13754_v36 = vld [vmem:[%s18645_s4 + $0x6a8] ss:$16 sps:$4 sm:$0xff]  }
 0x5fb   :  { %5460 = vmatmul.mubr.bf16.gmra.mrb[116].mxu1 %v13732_v20 }
 0x5fc   :  { %5467 = vmatprep.mubr.bf16.mxu1 %v13737_v35 }
 0x603   :  { %5468 = vmatmul.mubr.bf16.gmra.mrb[120].mxu1 %v13735_v14 }
 0x604   :  { %5475 = vmatprep.mubr.bf16.mxu1 %v13740_v52  ;;  %v13725_v52 = vld [vmem:[%s18648_s5 + $0xc0] sm:$0xff]  }
 0x60b   :  { %5476 = vmatmul.mubr.bf16.gmra.mrb[124].mxu1 %v13738_v26 }
 0x60c   :  { %5483 = vmatprep.mubr.bf16.mxu1 %v13743_v46  ;;  %v13760_v46 = vld [vmem:[%s18645_s4 + $0x6c8] ss:$16 sps:$4 sm:$0xff]  }
 0x613   :  { %5484 = vmatmul.mubr.bf16.gmra.mrb[128].mxu1 %v13741_v41 }
 0x614   :  { %5491 = vmatprep.mubr.bf16.mxu1 %v10737_v1 }
 0x61b   :  { %5492 = vmatmul.mubr.bf16.gmra.mrb[132].mxu1 %v10736_v3 }
 0x61c   :  { %10740 = vmatprep.mubr.msk.bf16.mxu1 %vm1308_vm6, %v13751_v31 }
 0x623   :  { %5532 = vmatmul.mubr.bf16.vlgmr.msra.gmra.mrb[136].mxu1 %v13749_v2 }
 0x624   :  { %10741 = vmatprep.mubr.msk.bf16.mxu1 %vm1308_vm6, %v13756_v13 }
 0x62b   :  { %5540 = vmatmul.mubr.bf16.gmra.mrb[140].mxu1 %v13754_v36  ;;  %v13727_v36 = vld [vmem:[%s18648_s5 + $0xd0] sm:$0xff]  }
 0x62c   :  { %10742 = vmatprep.mubr.msk.bf16.mxu1 %vm1308_vm6, %v13762_v28 }
 0x633   :  { %5548 = vmatmul.mubr.bf16.gmra.mrb[144].mxu1 %v13760_v46  ;;  %v13772_v46 = vld [vmem:[%s18645_s4 + $0x708] ss:$16 sps:$4 sm:$0xff]  }
 0x634   :  { %10743 = vmatprep.mubr.msk.bf16.mxu1 %vm1308_vm6, %v13768_v60 }
 0x68b   :  { %v3994_v11 = vpop.f32.mrb[172].mxu0 }
 0x68c   :  { %v3995_v20 = vadd.f32 %v16585_v8, %v3994_v11  ;;  %v3996_v7 = vpop.f32.mrb[173].mxu0 }
 0x68d   :  { %v3997_v14 = vpop.f32.mrb[174].mxu0 }
 0x68e   :  { %v3998_v35 = vadd.f32 %v16588_v10, %v3997_v14  ;;  %v3999_v26 = vpop.f32.mrb[175].mxu0  ;;  %v13726_v10 = vld [vmem:[%s18648_s5 + $0xc8] sm:$0xff]  }
 0x690   :  { %v4048_v41 = vpack.c.bf16 %v3998_v35, %v3995_v20  ;;  %v13774_v20 = vld [vmem:[%s18645_s4 + $0x70c] ss:$16 sps:$4 sm:$0xff]  }
 0x692   :  { %12768 = vmatmul.mubr.msk.bf16.vlgmr.msra.gmra.mrb[116].mxu0 %vm636_vm3, %v4048_v41 }
 0x693   :  { %v4002_v8 = vpop.f32.mrb[176].mxu0  ;;  %12771 = vmatprep.mubr.msk.bf16.mxu0 %vm14187_vm0, %v18751_v34  ;;  %12796 = vmatpush3.bf16.msra.mxu0 %v13725_v52 }
 0x694   :  { %v4003_v3 = vadd.f32 %v16590_v39, %v4002_v8  ;;  %v4004_v1 = vpop.f32.mrb[177].mxu0  ;;  %12797 = vmatprep.subr.bf16.mxu0 %v18751_v34  ;;  %v13766_v39 = vld [vmem:[%s18645_s4 + $0x6e8] ss:$16 sps:$4 sm:$0xff]   ;;  %v13780_v8 = vld [vmem:[%s18645_s4 + $0x72c] ss:$16 sps:$4 sm:$0xff]  }
 0x695   :  { %v4005_v31 = vpop.f32.mrb[178].mxu0  ;;  %5556 = vmatmul.mubr.bf16.gmra.mrb[148].mxu1 %v13766_v39 }
 0x696   :  { %v4006_v2 = vadd.f32 %v16593_v23, %v4005_v31  ;;  %v4007_v13 = vpop.f32.mrb[179].mxu0  ;;  %v13728_v23 = vld [vmem:[%s18648_s5 + $0xd8] sm:$0xff]   ;;  %10744 = vmatprep.mubr.msk.bf16.mxu1 %vm1308_vm6, %v13774_v20  ;;  %v12056_v20 = vpop.f32.mrb[80].mxu1 }
 0x697   :  { %12798 = vmatpush3.bf16.msra.mxu0 %v13726_v10 }
 0x698   :  { %v4049_v11 = vpack.c.bf16 %v4006_v2, %v4003_v3  ;;  %12799 = vmatprep.subr.bf16.mxu0 %v18751_v34  ;;  %v13778_v2 = vld [vmem:[%s18645_s4 + $0x728] ss:$16 sps:$4 sm:$0xff]  }
 0x69a   :  { %12772 = vmatmul.mubr.msk.bf16.gmra.mrb[120].mxu0 %vm636_vm3, %v4049_v11 }
 0x69b   :  { %v4010_v28 = vpop.f32.mrb[180].mxu0  ;;  %12775 = vmatprep.mubr.msk.bf16.mxu0 %vm14187_vm0, %v18751_v34  ;;  %12800 = vmatpush3.bf16.msra.mxu0 %v13727_v36 }
 0x69c   :  { %v4011_v7 = vadd.f32 %v16598_v42, %v4010_v28  ;;  %v4012_v14 = vpop.f32.mrb[181].mxu0  ;;  %12801 = vmatprep.subr.bf16.mxu0 %v18751_v34 }
 0x69d   :  { %v4013_v35 = vpop.f32.mrb[182].mxu0  ;;  %5564 = vmatmul.mubr.bf16.gmra.mrb[152].mxu1 %v13772_v46 }
 0x69e   :  { %v4014_v26 = vadd.f32 %v16600_v32, %v4013_v35  ;;  %v4015_v52 = vpop.f32.mrb[183].mxu0  ;;  %10745 = vmatprep.mubr.msk.bf16.mxu1 %vm1308_vm6, %v13780_v8  ;;  %v12057_v35 = vpop.f32.mrb[81].mxu1 }
 0x69f   :  { %12802 = vmatpush3.bf16.msra.mxu0 %v13728_v23  ;;  %v10711_v23 = vld [vmem:[%s18645_s4 + $0x748] sm:$0x11] }
 0x6a0   :  { %v4050_v41 = vpack.c.bf16 %v4014_v26, %v4011_v7  ;;  %4986 = vmatprep.subr.bf16.mxu0 %v18757_v22  ;;  %v10738_v14 = vcombine.low %v10711_v23, %v10711_v23 }
 0x6a2   :  { %12776 = vmatmul.mubr.msk.bf16.gmra.mrb[124].mxu0 %vm636_vm3, %v4050_v41  ;;  %v12059_v41 = vpop.f32.mrb[82].mxu1 }
 0x6a3   :  { %v4018_v42 = vpop.f32.mrb[184].mxu0  ;;  %12779 = vmatprep.mubr.msk.bf16.mxu0 %vm14187_vm0, %v18751_v34 }
 0x6a4   :  { %v4019_v32 = vadd.f32 %v16602_v49, %v4018_v42  ;;  %v4020_v10 = vpop.f32.mrb[185].mxu0  ;;  %v12060_v42 = vpop.f32.mrb[83].mxu1 }
 0x6a5   :  { %v4021_v60 = vpop.f32.mrb[186].mxu0  ;;  %5572 = vmatmul.mubr.bf16.gmra.mrb[156].mxu1 %v13778_v2  ;;  %v16949_v10 = vadd.f32 %v12060_v42, %v12059_v41 }
 0x6a6   :  { %v4022_v3 = vadd.f32 %v16605_v30, %v4021_v60  ;;  %v4023_v1 = vpop.f32.mrb[187].mxu0  ;;  %v12062_v60 = vpop.f32.mrb[84].mxu1 }
 0x6a8   :  { %v4051_v31 = vpack.c.bf16 %v4022_v3, %v4019_v32  ;;  %v12063_v3 = vpop.f32.mrb[85].mxu1 }
 0x6aa   :  { %12780 = vmatmul.mubr.msk.bf16.gmra.mrb[128].mxu0 %vm636_vm3, %v4051_v31  ;;  %v16951_v31 = vadd.f32 %v12063_v3, %v12062_v60 }
 0x6ab   :  { %v4026_v13 = vpop.f32.mrb[188].mxu0  ;;  %12783 = vmatprep.mubr.msk.bf16.mxu0 %vm14187_vm0, %v18751_v34 }
 0x6ac   :  { %v4027_v49 = vadd.f32 %v16609_v24, %v4026_v13  ;;  %v4028_v36 = vpop.f32.mrb[189].mxu0  ;;  %v10739_v24 = vcombine.high %v10711_v23, %v10711_v23 }
 0x6ad   :  { %v4029_v11 = vpop.f32.mrb[190].mxu0 }
 0x6ae   :  { %v4030_v39 = vadd.f32 %v16611_v0, %v4029_v11  ;;  %v4031_v30 = vpop.f32.mrb[191].mxu0  ;;  %v16945_v0 = vadd.f32 %v12057_v35, %v12056_v20  ;;  %10746 = vmatprep.mubr.msk.bf16.mxu1 %vm1308_vm6, %v10739_v24 }
 0x6af   :  { %5580 = vmatmul.mubr.bf16.gmra.mrb[160].mxu1 %v10738_v14 }
 0x6b0   :  { %v4052_v28 = vpack.c.bf16 %v4030_v39, %v4027_v49 }
 0x6b2   :  { %12784 = vmatmul.mubr.msk.bf16.gmra.mrb[132].mxu0 %vm636_vm3, %v4052_v28 }
 0x6b3   :  { %v4034_v7 = vpop.f32.mrb[192].mxu0  ;;  %12787 = vmatprep.mubr.msk.bf16.mxu0 %vm14187_vm0, %v18751_v34 }
 0x6b4   :  { %v4035_v26 = vadd.f32 %v16613_v47, %v4034_v7  ;;  %v4036_v52 = vpop.f32.mrb[193].mxu0  ;;  %v12065_v47 = vpop.f32.mrb[86].mxu1 }
 0x6b5   :  { %v4037_v46 = vpop.f32.mrb[194].mxu0  ;;  %v12066_v2 = vpop.f32.mrb[87].mxu1 }
 0x6b6   :  { %v4038_v8 = vadd.f32 %v16619_v16, %v4037_v46  ;;  %v4039_v32 = vpop.f32.mrb[195].mxu0  ;;  %v16954_v13 = vadd.f32 %v12066_v2, %v12065_v47  ;;  %v12068_v49 = vpop.f32.mrb[88].mxu1 }
 0x6b7   :  { %v12069_v16 = vpop.f32.mrb[89].mxu1 }
 0x6b8   :  { %v4053_v1 = vpack.c.bf16 %v4038_v8, %v4035_v26  ;;  %v16959_v30 = vadd.f32 %v12069_v16, %v12068_v49  ;;  %v12071_v28 = vpop.f32.mrb[90].mxu1 }
 0x6b9   :  { %v12072_v20 = vpop.f32.mrb[91].mxu1 }
 0x6ba   :  { %12788 = vmatmul.mubr.msk.bf16.gmra.mrb[136].mxu0 %vm636_vm3, %v4053_v1  ;;  %v16961_v14 = vadd.f32 %v12072_v20, %v12071_v28  ;;  %v12074_v24 = vpop.f32.mrb[92].mxu1 }
 0x6bb   :  { %v4042_v36 = vpop.f32.mrb[196].mxu0  ;;  %12791 = vmatprep.mubr.msk.bf16.mxu0 %vm14187_vm0, %v18751_v34  ;;  %v12075_v35 = vpop.f32.mrb[93].mxu1 }
 0x6bc   :  { %v4043_v11 = vadd.f32 %v16625_v17, %v4042_v36  ;;  %v4044_v39 = vpop.f32.mrb[197].mxu0  ;;  %v16963_v52 = vadd.f32 %v12075_v35, %v12074_v24  ;;  %v12077_v41 = vpop.f32.mrb[94].mxu1 }
 0x6bd   :  { %v4045_v23 = vpop.f32.mrb[198].mxu0  ;;  %v12078_v46 = vpop.f32.mrb[95].mxu1 }
 0x6be   :  { %v4046_v7 = vpop.f32.mrb[199].mxu0  ;;  %v4054_v26 = vpack.c.bf16 %v4043_v11, %v4043_v11  ;;  %v16966_v42 = vadd.f32 %v12078_v46, %v12077_v41  ;;  %v12080_v17 = vpop.f32.mrb[96].mxu1 }
 0x6bf   :  { %v12081_v8 = vpop.f32.mrb[97].mxu1 }
 0x6c0   :  { %v16970_v32 = vadd.f32 %v12081_v8, %v12080_v17  ;;  %v12083_v60 = vpop.f32.mrb[98].mxu1 }
 0x6c1   :  { %v12084_v3 = vpop.f32.mrb[99].mxu1 }
 0x6c2   :  { %12792 = vmatmul.mubr.msk.bf16.gmra.mrb[140].mxu0 %vm636_vm3, %v4054_v26  ;;  %v16972_v1 = vadd.f32 %v12084_v3, %v12083_v60  ;;  %v12086_v47 = vpop.f32.mrb[100].mxu1 }
 0x6c3   :  { %12803 = vmatprep.mubr.msk.bf16.mxu0 %vm14187_vm0, %v18751_v34  ;;  %v12087_v2 = vpop.f32.mrb[101].mxu1 }
 0x6c4   :  { %v16974_v49 = vadd.f32 %v12087_v2, %v12086_v47  ;;  %v12089_v36 = vpop.f32.mrb[102].mxu1 }
 0x6c5   :  { %v12090_v16 = vpop.f32.mrb[103].mxu1 }
 0x6c6   :  { %v16980_v11 = vadd.f32 %v12090_v16, %v12089_v36  ;;  %v12092_v39 = vpop.f32.mrb[104].mxu1 }
 0x6c7   :  { %v12093_v28 = vpop.f32.mrb[105].mxu1 }
 0x6c8   :  { %v16986_v23 = vadd.f32 %v12093_v28, %v12092_v39  ;;  %v12095_v20 = vpop.f32.mrb[106].mxu1 }
 0x6c9   :  { %v12096_v7 = vpop.f32.mrb[107].mxu1 }
 0x6ca   :  { %12804 = vmatmul.mubr.msk.bf16.vlgmr.msra.gmra.mrb[116].mxu0 %vm636_vm3, %v4561_v18  ;;  %v12125_v24 = vpop.f32.mrb[108].mxu1 }
 0x6cb   :  { %4987 = vmatpush1.bf16.msra.mxu0 %v15190_v12  ;;  %12807 = vmatprep.mubr.msk.bf16.mxu0 %vm14187_vm0, %v18751_v34  ;;  %v12126_v21 = vpop.f32.mrb[109].mxu1 }
 0x6cc   :  { %4988 = vmatprep.subr.bf16.mxu0 %v18757_v22  ;;  %v16990_v38 = vadd.f32 %v12126_v21, %v12125_v24  ;;  %v12128_v18 = vpop.f32.mrb[110].mxu1 }
 0x6cd   :  { %v12129_v12 = vpop.f32.mrb[111].mxu1 }
 0x6ce   :  { %v16996_v35 = vadd.f32 %v12129_v12, %v12128_v18  ;;  %v12131_v27 = vpop.f32.mrb[112].mxu1 }
 0x6cf   :  { %4989 = vmatpush1.bf16.msra.mxu0 %v15193_v54  ;;  %v13748_v54 = vld [vmem:[%s18645_s4 + $0x5bc] ss:$16 sps:$4 sm:$0xff]   ;;  %v12132_v53 = vpop.f32.mrb[113].mxu1 }
 0x6d0   :  { %4990 = vmatprep.subr.bf16.mxu0 %v18757_v22  ;;  %v12133_v19 = vadd.f32 %v12132_v53, %v12131_v27 }
 0x6d2   :  { %12808 = vmatmul.mubr.msk.bf16.gmra.mrb[120].mxu0 %vm636_vm3, %v4562_v15  ;;  %v10631_v15 = vld [vmem:[%s18645_s4 + $0x678] sm:$0x11] }
 0x6d3   :  { %4991 = vmatpush1.bf16.msra.mxu0 %v15195_v61  ;;  %12811 = vmatprep.mubr.msk.bf16.mxu0 %vm14187_vm0, %v18751_v34  ;;  %v4567_v61 = vpack.c.bf16 %v16823_v50, %v16823_v50 }
 0x6d4   :  { %4992 = vmatprep.subr.bf16.mxu0 %v18757_v22 }
 0x6d7   :  { %4993 = vmatpush1.bf16.msra.mxu0 %v15197_v55  ;;  %v13746_v55 = vld [vmem:[%s18645_s4 + $0x5b8] ss:$16 sps:$4 sm:$0xff]  }
 0x6d8   :  { %4994 = vmatprep.subr.bf16.mxu0 %v18757_v22 }
 0x6da   :  { %12812 = vmatmul.mubr.msk.bf16.gmra.mrb[124].mxu0 %vm636_vm3, %v4563_v45  ;;  %v10659_v45 = vcombine.high %v10631_v15, %v10631_v15 }
 0x6db   :  { %4995 = vmatpush1.bf16.msra.mxu0 %v15199_v48  ;;  %12815 = vmatprep.mubr.msk.bf16.mxu0 %vm14187_vm0, %v18751_v34  ;;  %v13752_v48 = vld [vmem:[%s18645_s4 + $0x5dc] ss:$16 sps:$4 sm:$0xff]  }
 0x6dc   :  { %4996 = vmatprep.subr.bf16.mxu0 %v18757_v22 }
 0x6df   :  { %4997 = vmatpush1.bf16.msra.mxu0 %v15202_v59  ;;  %v13786_v59 = vld [vmem:[%s18648_s5 + $0xe0] sm:$0xff]  }
 0x6e0   :  { %4998 = vmatprep.subr.bf16.mxu0 %v18757_v22 }
 0x6e2   :  { %12816 = vmatmul.mubr.msk.bf16.gmra.mrb[128].mxu0 %vm636_vm3, %v4564_v58  ;;  %v12134_v58 = vpop.f32.mrb[114].mxu1 }
 0x6e3   :  { %4999 = vmatpush1.bf16.msra.mxu0 %v15204_v62  ;;  %12819 = vmatprep.mubr.msk.bf16.mxu0 %vm14187_vm0, %v18751_v34  ;;  %v13787_v62 = vld [vmem:[%s18648_s5 + $0xe8] sm:$0xff]   ;;  %v12135_v43 = vpop.f32.mrb[115].mxu1 }
 0x6e4   :  { %5000 = vmatprep.subr.bf16.mxu0 %v18757_v22  ;;  %v12136_v51 = vadd.f32 %v12135_v43, %v12134_v58  ;;  %v12137_v40 = vpop.f32.mrb[116].mxu1 }
 0x6e5   :  { %v12138_v25 = vpop.f32.mrb[117].mxu1 }
 0x6e6   :  { %v12140_v50 = vpop.f32.mrb[118].mxu1 }
 0x6e7   :  { %5001 = vmatpush1.bf16.msra.mxu0 %v15206_v29  ;;  %v13757_v29 = vld [vmem:[%s18645_s4 + $0x5d8] ss:$16 sps:$4 sm:$0xff]   ;;  %v12141_v26 = vpop.f32.mrb[119].mxu1 }
 0x6e8   :  { %5002 = vmatprep.subr.bf16.mxu0 %v18757_v22  ;;  %v12142_v41 = vadd.f32 %v12141_v26, %v12140_v50  ;;  %v12143_v46 = vpop.f32.mrb[120].mxu1 }
 0x6e9   :  { %v12144_v17 = vpop.f32.mrb[121].mxu1 }
 0x6ea   :  { %12820 = vmatmul.mubr.msk.bf16.gmra.mrb[132].mxu0 %vm636_vm3, %v4565_v33  ;;  %v10658_v33 = vcombine.low %v10631_v15, %v10631_v15  ;;  %v12145_v8 = vadd.f32 %v12144_v17, %v12143_v46  ;;  %v12146_v60 = vpop.f32.mrb[122].mxu1 }
 0x6eb   :  { %5003 = vmatpush1.bf16.msra.mxu0 %v15208_v5  ;;  %12823 = vmatprep.mubr.msk.bf16.mxu0 %vm14187_vm0, %v18751_v34  ;;  %v13758_v5 = vld [vmem:[%s18645_s4 + $0x5fc] ss:$16 sps:$4 sm:$0xff]   ;;  %v12147_v3 = vpop.f32.mrb[123].mxu1 }
 0x6ec   :  { %5004 = vmatprep.subr.bf16.mxu0 %v18757_v22  ;;  %v12148_v47 = vadd.f32 %v12147_v3, %v12146_v60  ;;  %v12149_v2 = vpop.f32.mrb[124].mxu1 }
 0x6ed   :  { %v12150_v36 = vpop.f32.mrb[125].mxu1 }
 0x6ee   :  { %v12151_v16 = vadd.f32 %v12150_v36, %v12149_v2  ;;  %v12152_v39 = vpop.f32.mrb[126].mxu1 }
 0x6ef   :  { %5005 = vmatpush1.bf16.msra.mxu0 %v15211_v37  ;;  %v13763_v37 = vld [vmem:[%s18645_s4 + $0x5f8] ss:$16 sps:$4 sm:$0xff]   ;;  %v12153_v28 = vpop.f32.mrb[127].mxu1 }
 0x6f0   :  { %5006 = vmatprep.subr.bf16.mxu0 %v18757_v22  ;;  %v12154_v20 = vadd.f32 %v12153_v28, %v12152_v39  ;;  %v12155_v7 = vpop.f32.mrb[128].mxu1 }
 0x6f1   :  { %v12156_v24 = vpop.f32.mrb[129].mxu1 }
 0x6f2   :  { %12824 = vmatmul.mubr.msk.bf16.gmra.mrb[136].mxu0 %vm636_vm3, %v4566_v4  ;;  %v12139_v4 = vadd.f32 %v12138_v25, %v12137_v40  ;;  %v12157_v21 = vadd.f32 %v12156_v24, %v12155_v7  ;;  %v12158_v18 = vpop.f32.mrb[130].mxu1 }
 0x6f3   :  { %5007 = vmatpush1.bf16.msra.mxu0 %v15213_v56  ;;  %12827 = vmatprep.mubr.msk.bf16.mxu0 %vm14187_vm0, %v18751_v34  ;;  %v13764_v56 = vld [vmem:[%s18645_s4 + $0x61c] ss:$16 sps:$4 sm:$0xff]   ;;  %v12159_v12 = vpop.f32.mrb[131].mxu1 }
 0x6f4   :  { %5008 = vmatprep.subr.bf16.mxu0 %v18757_v22 }
 0x6f7   :  { %5009 = vmatpush1.bf16.msra.mxu0 %v15215_v44  ;;  %v13769_v44 = vld [vmem:[%s18645_s4 + $0x618] ss:$16 sps:$4 sm:$0xff]  }
 0x6f8   :  { %5010 = vmatprep.subr.bf16.mxu0 %v18757_v22 }
 0x6fa   :  { %12828 = vmatmul.mubr.msk.bf16.gmra.mrb[140].mxu0 %vm636_vm3, %v4567_v61  ;;  %v12161_v61 = vpop.f32.mrb[132].mxu1 }
 0x6fb   :  { %5011 = vmatpush1.bf16.msra.mxu0 %v15296_v57  ;;  %10660 = vmatprep.mubr.msk.bf16.mxu0 %vm1308_vm6, %v13748_v54  ;;  %v13770_v57 = vld [vmem:[%s18645_s4 + $0x63c] ss:$16 sps:$4 sm:$0xff]   ;;  %v12160_v54 = vadd.f32 %v12159_v12, %v12158_v18 }
 0x6fc   :  { %12831 = vmatprep.subr.bf16.mxu0 %v18751_v34 }
 0x702   :  { %5019 = vmatmul.mubr.bf16.vlgmr.msra.gmra.mrb[200].mxu0 %v13746_v55  ;;  %v12162_v55 = vpop.f32.mrb[133].mxu1 }
 0x703   :  { %10661 = vmatprep.mubr.msk.bf16.mxu0 %vm1308_vm6, %v13752_v48  ;;  %12832 = vmatpush3.bf16.msra.mxu0 %v13786_v59  ;;  %v12163_v48 = vadd.f32 %v12162_v55, %v12161_v61  ;;  %v12164_v59 = vpop.f32.mrb[134].mxu1 }
 0x704   :  { %12833 = vmatprep.subr.bf16.mxu0 %v18751_v34 }
 0x707   :  { %12834 = vmatpush3.bf16.msra.mxu0 %v13787_v62  ;;  %v12165_v62 = vpop.f32.mrb[135].mxu1 }
 0x708   :  { %12835 = vmatprep.subr.bf16.mxu0 %v18751_v34 }
 0x70a   :  { %5027 = vmatmul.mubr.bf16.gmra.mrb[204].mxu0 %v13757_v29  ;;  %v13788_v29 = vld [vmem:[%s18648_s5 + $0xf0] sm:$0xff]  }
 0x70b   :  { %10662 = vmatprep.mubr.msk.bf16.mxu0 %vm1308_vm6, %v13758_v5  ;;  %v5533_v5 = vpop.f32.mrb[136].mxu1  ;;  %12836 = vmatpush3.bf16.msra.mxu0 %v13788_v29 }
 0x70c   :  { %12837 = vmatprep.subr.bf16.mxu0 %v18751_v34 }
 0x712   :  { %5035 = vmatmul.mubr.bf16.gmra.mrb[208].mxu0 %v13763_v37  ;;  %v17109_v37 = vadd.f32 %v16990_v38, %v5533_v5 }
 0x713   :  { %10663 = vmatprep.mubr.msk.bf16.mxu0 %vm1308_vm6, %v13764_v56  ;;  %v5535_v56 = vpop.f32.mrb[137].mxu1 }
 0x71a   :  { %5043 = vmatmul.mubr.bf16.gmra.mrb[212].mxu0 %v13769_v44  ;;  %v5536_v44 = vpop.f32.mrb[138].mxu1 }
 0x71b   :  { %10664 = vmatprep.mubr.msk.bf16.mxu0 %vm1308_vm6, %v13770_v57  ;;  %v13789_v57 = vld [vmem:[%s18648_s5 + $0xf8] sm:$0xff]  }
 0x71c   :  { %12838 = vmatpush3.bf16.msra.mxu0 %v13789_v57 }
 0x71d   :  { %12867 = vmatprep.subr.bf16.mxu0 %v18751_v34 }
 0x722   :  { %5051 = vmatmul.mubr.bf16.gmra.mrb[216].mxu0 %v13775_v9  ;;  %v17116_v9 = vadd.f32 %v16996_v35, %v5536_v44 }
 0x723   :  { %10665 = vmatprep.mubr.msk.bf16.mxu0 %vm1308_vm6, %v13776_v6  ;;  %v5538_v6 = vpop.f32.mrb[139].mxu1 }
 0x724   :  { %v5587_v15 = vpack.c.bf16 %v17116_v9, %v17109_v37  ;;  %v5541_v38 = vpop.f32.mrb[140].mxu1  ;;  %v13794_v37 = vld [vmem:[%s18649_s8] sm:$0xff]  }
 0x725   :  { %v5543_v27 = vpop.f32.mrb[141].mxu1  ;;  %12917 = vmatprep.mubr.msk.bf16.mxu1 %vm5881_vm7, %v13794_v37 }
 0x72a   :  { %5059 = vmatmul.mubr.bf16.gmra.mrb[220].mxu0 %v13781_v63  ;;  %v17121_v63 = vadd.f32 %v12133_v19, %v5541_v38 }
 0x72b   :  { %10666 = vmatprep.mubr.msk.bf16.mxu0 %vm1308_vm6, %v10659_v45  ;;  %v5544_v45 = vpop.f32.mrb[142].mxu1 }
 0x72c   :  { %v17123_v53 = vadd.f32 %v12136_v51, %v5544_v45  ;;  %v5546_v58 = vpop.f32.mrb[143].mxu1 }
 0x72d   :  { %v5549_v35 = vpop.f32.mrb[144].mxu1 }
 0x72e   :  { %v5588_v43 = vpack.c.bf16 %v17123_v53, %v17121_v63  ;;  %v5551_v40 = vpop.f32.mrb[145].mxu1 }
 0x72f   :  { %v5552_v25 = vpop.f32.mrb[146].mxu1 }
 0x730   :  { %v17129_v50 = vadd.f32 %v12142_v41, %v5552_v25  ;;  %v5554_v26 = vpop.f32.mrb[147].mxu1 }
 0x731   :  { %v13792_v26 = vld [vmem:[%s18648_s5 + $0x110] sm:$0xff]  }
 0x732   :  { %5067 = vmatmul.mubr.bf16.gmra.mrb[224].mxu0 %v10658_v33  ;;  %v17127_v33 = vadd.f32 %v12139_v4, %v5549_v35 }
 0x733   :  { %12839 = vmatprep.mubr.msk.bf16.mxu0 %vm14187_vm0, %v18751_v34 }
 0x734   :  { %v5589_v19 = vpack.c.bf16 %v17129_v50, %v17127_v33 }
 0x768   :  { %v5557_v46 = vpop.f32.mrb[148].mxu1 }
 0x769   :  { %v17133_v17 = vadd.f32 %v12145_v8, %v5557_v46  ;;  %v5559_v51 = vpop.f32.mrb[149].mxu1 }
 0x76a   :  { %v5560_v60 = vpop.f32.mrb[150].mxu1 }
 0x76b   :  { %v17135_v3 = vadd.f32 %v12148_v47, %v5560_v60  ;;  %v5562_v2 = vpop.f32.mrb[151].mxu1 }
 0x76d   :  { %v5590_v4 = vpack.c.bf16 %v17135_v3, %v17133_v17 }
 0x770   :  { %v5565_v36 = vpop.f32.mrb[152].mxu1 }
 0x771   :  { %v17139_v39 = vadd.f32 %v12151_v16, %v5565_v36  ;;  %v5567_v41 = vpop.f32.mrb[153].mxu1 }
 0x772   :  { %v5568_v28 = vpop.f32.mrb[154].mxu1 }
 0x773   :  { %v17141_v7 = vadd.f32 %v12154_v20, %v5568_v28  ;;  %v5570_v24 = vpop.f32.mrb[155].mxu1 }
 0x775   :  { %v5591_v8 = vpack.c.bf16 %v17141_v7, %v17139_v39 }
 0x778   :  { %v5573_v18 = vpop.f32.mrb[156].mxu1 }
 0x779   :  { %v17145_v12 = vadd.f32 %v12157_v21, %v5573_v18  ;;  %v5575_v47 = vpop.f32.mrb[157].mxu1 }
 0x77a   :  { %v5576_v61 = vpop.f32.mrb[158].mxu1 }
 0x77b   :  { %v17147_v55 = vadd.f32 %v12160_v54, %v5576_v61  ;;  %v5578_v59 = vpop.f32.mrb[159].mxu1  ;;  %v13790_v54 = vld [vmem:[%s18648_s5 + $0x100] sm:$0xff]  }
 0x77d   :  { %v5592_v16 = vpack.c.bf16 %v17147_v55, %v17145_v12 }
 0x782   :  { %v5581_v62 = vpop.f32.mrb[160].mxu1 }
 0x783   :  { %v17151_v29 = vadd.f32 %v12163_v48, %v5581_v62  ;;  %v5583_v20 = vpop.f32.mrb[161].mxu1 }
 0x784   :  { %v5584_v5 = vpop.f32.mrb[162].mxu1 }
 0x785   :  { %v5585_v56 = vpop.f32.mrb[163].mxu1 }
 0x7d5   :  { %v5020_v44 = vpop.f32.mrb[200].mxu0 }
 0x7d6   :  { %v5021_v57 = vadd.f32 %v16945_v0, %v5020_v44  ;;  %v5022_v6 = vpop.f32.mrb[201].mxu0  ;;  %v13791_v0 = vld [vmem:[%s18648_s5 + $0x108] sm:$0xff]  }
 0x7d7   :  { %v5023_v21 = vpop.f32.mrb[202].mxu0 }
 0x7d8   :  { %v5024_v38 = vadd.f32 %v16949_v10, %v5023_v21  ;;  %v5025_v27 = vpop.f32.mrb[203].mxu0 }
 0x7da   :  { %v5074_v45 = vpack.c.bf16 %v5024_v38, %v5021_v57 }
 0x7dc   :  { %12840 = vmatmul.mubr.msk.bf16.vlgmr.msra.gmra.mrb[116].mxu0 %vm636_vm3, %v5074_v45 }
 0x7dd   :  { %v5028_v48 = vpop.f32.mrb[204].mxu0  ;;  %12843 = vmatprep.mubr.msk.bf16.mxu0 %vm14187_vm0, %v18751_v34  ;;  %12868 = vmatpush3.bf16.msra.mxu0 %v13790_v54 }
 0x7de   :  { %v5029_v58 = vadd.f32 %v16951_v31, %v5028_v48  ;;  %v5030_v10 = vpop.f32.mrb[205].mxu0  ;;  %12869 = vmatprep.subr.bf16.mxu0 %v18751_v34  ;;  %v13793_v31 = vld [vmem:[%s18648_s5 + $0x118] sm:$0xff]  }
 0x7df   :  { %v5031_v35 = vpop.f32.mrb[206].mxu0 }
 0x7e0   :  { %v5032_v40 = vadd.f32 %v16954_v13, %v5031_v35  ;;  %v5033_v25 = vpop.f32.mrb[207].mxu0 }
 0x7e1   :  { %12870 = vmatpush3.bf16.msra.mxu0 %v13791_v0 }
 0x7e2   :  { %v5075_v46 = vpack.c.bf16 %v5032_v40, %v5029_v58  ;;  %12871 = vmatprep.subr.bf16.mxu0 %v18751_v34 }
 0x7e4   :  { %12844 = vmatmul.mubr.msk.bf16.gmra.mrb[120].mxu0 %vm636_vm3, %v5075_v46 }
 0x7e5   :  { %v5036_v51 = vpop.f32.mrb[208].mxu0  ;;  %12847 = vmatprep.mubr.msk.bf16.mxu0 %vm14187_vm0, %v18751_v34  ;;  %12872 = vmatpush3.bf16.msra.mxu0 %v13792_v26 }
 0x7e6   :  { %v5037_v13 = vadd.f32 %v16959_v30, %v5036_v51  ;;  %v5038_v60 = vpop.f32.mrb[209].mxu0  ;;  %12873 = vmatprep.subr.bf16.mxu0 %v18751_v34 }
 0x7e7   :  { %v5039_v2 = vpop.f32.mrb[210].mxu0 }
 0x7e8   :  { %v5040_v36 = vadd.f32 %v16961_v14, %v5039_v2  ;;  %v5041_v41 = vpop.f32.mrb[211].mxu0 }
 0x7e9   :  { %12874 = vmatpush3.bf16.msra.mxu0 %v13793_v31 }
 0x7ea   :  { %v5076_v28 = vpack.c.bf16 %v5040_v36, %v5037_v13 }
 0x7ec   :  { %12848 = vmatmul.mubr.msk.bf16.gmra.mrb[124].mxu0 %vm636_vm3, %v5076_v28 }
 0x7ed   :  { %v5044_v24 = vpop.f32.mrb[212].mxu0  ;;  %12851 = vmatprep.mubr.msk.bf16.mxu0 %vm14187_vm0, %v18751_v34 }
 0x7ee   :  { %v5045_v18 = vadd.f32 %v16963_v52, %v5044_v24  ;;  %v5046_v47 = vpop.f32.mrb[213].mxu0 }
 0x7ef   :  { %v5047_v61 = vpop.f32.mrb[214].mxu0 }
 0x7f0   :  { %v5048_v30 = vadd.f32 %v16966_v42, %v5047_v61  ;;  %v5049_v59 = vpop.f32.mrb[215].mxu0 }
 0x7f2   :  { %v5077_v62 = vpack.c.bf16 %v5048_v30, %v5045_v18 }
 0x7f4   :  { %12852 = vmatmul.mubr.msk.bf16.gmra.mrb[128].mxu0 %vm636_vm3, %v5077_v62 }
 0x7f5   :  { %v5052_v14 = vpop.f32.mrb[216].mxu0  ;;  %12855 = vmatprep.mubr.msk.bf16.mxu0 %vm14187_vm0, %v18751_v34 }
 0x7f6   :  { %v5053_v20 = vadd.f32 %v16970_v32, %v5052_v14  ;;  %v5054_v5 = vpop.f32.mrb[217].mxu0 }
 0x7f7   :  { %v5055_v56 = vpop.f32.mrb[218].mxu0 }
 0x7f8   :  { %v5056_v44 = vadd.f32 %v16972_v1, %v5055_v56  ;;  %v5057_v57 = vpop.f32.mrb[219].mxu0 }
 0x7fa   :  { %v5078_v52 = vpack.c.bf16 %v5056_v44, %v5053_v20 }
 0x7fc   :  { %12856 = vmatmul.mubr.msk.bf16.gmra.mrb[132].mxu0 %vm636_vm3, %v5078_v52 }
 0x7fd   :  { %v5060_v6 = vpop.f32.mrb[220].mxu0  ;;  %12859 = vmatprep.mubr.msk.bf16.mxu0 %vm14187_vm0, %v18751_v34 }
 0x7fe   :  { %v5061_v42 = vadd.f32 %v16974_v49, %v5060_v6  ;;  %v5062_v21 = vpop.f32.mrb[221].mxu0  ;;  %v5593_v49 = vpack.c.bf16 %v17151_v29, %v17151_v29 }
 0x7ff   :  { %v5063_v38 = vpop.f32.mrb[222].mxu0 }
 0x800   :  { %v5064_v27 = vadd.f32 %v16980_v11, %v5063_v38  ;;  %v5065_v54 = vpop.f32.mrb[223].mxu0 }
 0x802   :  { %v5079_v32 = vpack.c.bf16 %v5064_v27, %v5061_v42 }
 0x804   :  { %12860 = vmatmul.mubr.msk.bf16.gmra.mrb[136].mxu0 %vm636_vm3, %v5079_v32 }
 0x805   :  { %v5068_v45 = vpop.f32.mrb[224].mxu0  ;;  %12863 = vmatprep.mubr.msk.bf16.mxu0 %vm14187_vm0, %v18751_v34 }
 0x806   :  { %v5069_v1 = vadd.f32 %v16986_v23, %v5068_v45  ;;  %v5070_v48 = vpop.f32.mrb[225].mxu0 }
 0x807   :  { %v5071_v0 = vpop.f32.mrb[226].mxu0 }
 0x808   :  { %v5072_v58 = vpop.f32.mrb[227].mxu0  ;;  %v5080_v10 = vpack.c.bf16 %v5069_v1, %v5069_v1 }
 0x80c   :  { %12864 = vmatmul.mubr.msk.bf16.gmra.mrb[140].mxu0 %vm636_vm3, %v5080_v10 }
 0x80d   :  { %12875 = vmatprep.mubr.msk.bf16.mxu0 %vm14187_vm0, %v18751_v34 }
 0x814   :  { %12876 = vmatmul.mubr.msk.bf16.vlgmr.msra.gmra.mrb[116].mxu0 %vm636_vm3, %v5587_v15 }
 0x815   :  { %12879 = vmatprep.mubr.msk.bf16.mxu0 %vm14187_vm0, %v18751_v34 }
 0x81c   :  { %12880 = vmatmul.mubr.msk.bf16.gmra.mrb[120].mxu0 %vm636_vm3, %v5588_v43 }
 0x81d   :  { %12883 = vmatprep.mubr.msk.bf16.mxu0 %vm14187_vm0, %v18751_v34 }
 0x824   :  { %12884 = vmatmul.mubr.msk.bf16.gmra.mrb[124].mxu0 %vm636_vm3, %v5589_v19 }
 0x825   :  { %12887 = vmatprep.mubr.msk.bf16.mxu0 %vm14187_vm0, %v18751_v34 }
 0x82c   :  { %12888 = vmatmul.mubr.msk.bf16.gmra.mrb[128].mxu0 %vm636_vm3, %v5590_v4 }
 0x82d   :  { %12891 = vmatprep.mubr.msk.bf16.mxu0 %vm14187_vm0, %v18751_v34 }
 0x834   :  { %12892 = vmatmul.mubr.msk.bf16.gmra.mrb[132].mxu0 %vm636_vm3, %v5591_v8 }
 0x835   :  { %12895 = vmatprep.mubr.msk.bf16.mxu0 %vm14187_vm0, %v18751_v34 }
 0x83c   :  { %12896 = vmatmul.mubr.msk.bf16.gmra.mrb[136].mxu0 %vm636_vm3, %v5592_v16 }
 0x83d   :  { %12899 = vmatprep.mubr.msk.bf16.mxu0 %vm14187_vm0, %v18751_v34 }
 0x844   :  { %12900 = vmatmul.mubr.msk.bf16.gmra.mrb[140].mxu0 %vm636_vm3, %v5593_v49 }
 0x845   :  { %6154 = vmatprep.mubr.bf16.mxu0 %v18757_v22 }
 0x8e7   :  { %v17242_v11 = vpop.f32.mrb[116].mxu0 }
 0x8e8   :  { %v12877_v23 = vpop.f32.mrb[117].mxu0  ;;  %v5771_v34 = vmul.f32 %v17242_v11, %v17242_v11 }
 0x8e9   :  { %v17247_v9 = vpop.f32.mrb[118].mxu0 }
 0x8ea   :  { %v5751_v15 = vadd.f32 %v17247_v9, %v17242_v11  ;;  %v5772_v63 = vmul.f32 %v17247_v9, %v17247_v9  ;;  %v12878_v53 = vpop.f32.mrb[119].mxu0 }
 0x8ec   :  { %v5784_v43 = vadd.f32 %v5772_v63, %v5771_v34 }
 0x8ef   :  { %v17256_v33 = vpop.f32.mrb[120].mxu0 }
 0x8f0   :  { %v5752_v50 = vadd.f32 %v5751_v15, %v17256_v33  ;;  %v5773_v19 = vmul.f32 %v17256_v33, %v17256_v33  ;;  %v12881_v17 = vpop.f32.mrb[121].mxu0 }
 0x8f1   :  { %v17261_v3 = vpop.f32.mrb[122].mxu0 }
 0x8f2   :  { %v5785_v4 = vadd.f32 %v5784_v43, %v5773_v19  ;;  %v5753_v39 = vadd.f32 %v5752_v50, %v17261_v3  ;;  %v5774_v7 = vmul.f32 %v17261_v3, %v17261_v3  ;;  %v12882_v8 = vpop.f32.mrb[123].mxu0 }
 0x8f4   :  { %v5786_v12 = vadd.f32 %v5785_v4, %v5774_v7 }
 0x8f7   :  { %v17266_v55 = vpop.f32.mrb[124].mxu0 }
 0x8f8   :  { %v5754_v16 = vadd.f32 %v5753_v39, %v17266_v55  ;;  %v5775_v29 = vmul.f32 %v17266_v55, %v17266_v55  ;;  %v12885_v35 = vpop.f32.mrb[125].mxu0 }
 0x8f9   :  { %v17271_v40 = vpop.f32.mrb[126].mxu0 }
 0x8fa   :  { %v5787_v25 = vadd.f32 %v5786_v12, %v5775_v29  ;;  %v5755_v26 = vadd.f32 %v5754_v16, %v17271_v40  ;;  %v5776_v46 = vmul.f32 %v17271_v40, %v17271_v40  ;;  %v12886_v51 = vpop.f32.mrb[127].mxu0 }
 0x8fc   :  { %v5788_v31 = vadd.f32 %v5787_v25, %v5776_v46 }
 0x8ff   :  { %v17276_v13 = vpop.f32.mrb[128].mxu0 }
 0x900   :  { %v5756_v60 = vadd.f32 %v5755_v26, %v17276_v13  ;;  %v5777_v2 = vmul.f32 %v17276_v13, %v17276_v13  ;;  %v12889_v36 = vpop.f32.mrb[129].mxu0 }
 0x901   :  { %v17281_v41 = vpop.f32.mrb[130].mxu0 }
 0x902   :  { %v5789_v28 = vadd.f32 %v5788_v31, %v5777_v2  ;;  %v5757_v24 = vadd.f32 %v5756_v60, %v17281_v41  ;;  %v5778_v18 = vmul.f32 %v17281_v41, %v17281_v41  ;;  %v12890_v47 = vpop.f32.mrb[131].mxu0  ;;  %v5749_v60 = vld [vmem:[%s18650_s6] sm:$0x1] }
 0x904   :  { %v5790_v61 = vadd.f32 %v5789_v28, %v5778_v18  ;;  %v5750_v28 = vld [vmem:[%s18651_s7] sm:$0x1]  ;;  %v18783_v18 = vld [vmem:[#allocation22_spill] sm:$0xff] }
 0x907   :  { %v17286_v30 = vpop.f32.mrb[132].mxu0 }
 0x908   :  { %v5758_v59 = vadd.f32 %v5757_v24, %v17286_v30  ;;  %v5779_v62 = vmul.f32 %v17286_v30, %v17286_v30  ;;  %v12893_v14 = vpop.f32.mrb[133].mxu0 }
 0x909   :  { %v5717_v20 = vpop.f32.mrb[134].mxu0 }
 0x90a   :  { %v5791_v5 = vadd.f32 %v5790_v61, %v5779_v62  ;;  %v5759_v56 = vadd.f32 %v5758_v59, %v5717_v20  ;;  %v5780_v44 = vmul.f32 %v5717_v20, %v5717_v20  ;;  %v12894_v57 = vpop.f32.mrb[135].mxu0 }
 0x90c   :  { %v5792_v52 = vadd.f32 %v5791_v5, %v5780_v44 }
 0x90f   :  { %v5722_v6 = vpop.f32.mrb[136].mxu0 }
 0x910   :  { %v5760_v42 = vadd.f32 %v5759_v56, %v5722_v6  ;;  %v5781_v21 = vmul.f32 %v5722_v6, %v5722_v6  ;;  %v12897_v38 = vpop.f32.mrb[137].mxu0 }
 0x911   :  { %v5725_v27 = vpop.f32.mrb[138].mxu0 }
 0x912   :  { %v5793_v54 = vadd.f32 %v5792_v52, %v5781_v21  ;;  %v5761_v32 = vadd.f32 %v5760_v42, %v5725_v27  ;;  %v5782_v45 = vmul.f32 %v5725_v27, %v5725_v27  ;;  %v12898_v1 = vpop.f32.mrb[139].mxu0 }
 0x914   :  { %v5794_v48 = vadd.f32 %v5793_v54, %v5782_v45 }
 0x917   :  { %v5730_v0 = vpop.f32.mrb[140].mxu0 }
 0x918   :  { %v5762_v58 = vsel %vm366_vm1, %v5730_v0, 0.0  ;;  %v5783_v10 = vmul.f32 %v5730_v0, %v5730_v0  ;;  %v12901_v49 = vpop.f32.mrb[141].mxu0 }
 0x919   :  { %v5763_v23 = vadd.f32 %v5762_v58, %v5761_v32  ;;  %v5733_v37 = vpop.f32.mrb[142].mxu0 }
 0x91a   :  { %v5795_v34 = vsel %vm366_vm1, %v5783_v10, 0.0  ;;  %v12902_v15 = vpop.f32.mrb[143].mxu0 }
 0x91b   :  { %v5764_v63 = vrot.slane %v5763_v23, 4  ;;  %v5796_v53 = vadd.f32 %v5795_v34, %v5794_v48 }
 0x91d   :  { %v5765_v43 = vadd.f32 %v5764_v63, %v5763_v23  ;;  %v5797_v50 = vrot.slane %v5796_v53, 4 }
 0x91f   :  { %v5766_v19 = vrot.slane %v5765_v43, 2  ;;  %v5798_v17 = vadd.f32 %v5797_v50, %v5796_v53 }
 0x921   :  { %v5767_v4 = vadd.f32 %v5766_v19, %v5765_v43  ;;  %v5799_v39 = vrot.slane %v5798_v17, 2 }
 0x923   :  { %v5768_v7 = vrot.slane %v5767_v4, 1  ;;  %v5800_v8 = vadd.f32 %v5799_v39, %v5798_v17 }
 0x925   :  { %v5769_v12 = vadd.f32 %v5768_v7, %v5767_v4  ;;  %v5801_v16 = vrot.slane %v5800_v8, 1 }
 0x927   :  { %v5770_v29 = vmul.f32 0.010204081, %v5769_v12  ;;  %v5802_v35 = vadd.f32 %v5801_v16, %v5800_v8 }
 0x929   :  { %v5803_v25 = vmul.f32 0.010204081, %v5802_v35  ;;  %v5804_v26 = vmul.f32 %v5770_v29, %v5770_v29  ;;  %v13796_v35 = vld [vmem:[%s18649_s8 + $0xc] sm:$0xff]  }
 0x92b   :  { %v5805_v46 = vsub.f32 %v5803_v25, %v5804_v26  ;;  %v13797_v25 = vld [vmem:[%s18649_s8 + $0x14] ss:$0 sps:$4 sm:$0x11]   ;;  %v13798_v26 = vld [vmem:[%s18649_s8 + $0x18] sm:$0xff]  }
 0x92d   :  { %v5806_v51 = vmax.f32 %v5805_v46, 0.0  ;;  %v13799_v46 = vld [vmem:[%s18649_s8 + $0x20] ss:$0 sps:$4 sm:$0x11]  }
 0x92f   :  { %v5807_v31 = vadd.f32 1e-05, %v5806_v51  ;;  %v13800_v51 = vld [vmem:[%s18649_s8 + $0x24] sm:$0xff]  }
 0x931   :  { %14174 = vrsqrt.f32 %v5807_v31  ;;  %v13801_v31 = vld [vmem:[%s18649_s8 + $0x2c] ss:$0 sps:$4 sm:$0x11]  }
 0x93b   :  { %v14175_v2 = vpop.eup %14174 }
 0x93c   :  { %v5809_v36 = vmul.f32 %v14175_v2, %v5749_v60  ;;  %v13802_v60 = vld [vmem:[%s18649_s8 + $0x30] sm:$0xff]   ;;  %v13810_v2 = vld [vmem:[%s18652_s9 + $0x80] ss:$8 sps:$4 sm:$0xff]  }
 0x93e   :  { %v5810_v24 = vmul.f32 %v5809_v36, %v5770_v29  ;;  %v5816_v47 = vrot.slane %v5809_v36, %v18783_v18  ;;  %v13795_v29 = vld [vmem:[%s18649_s8 + $0x8] ss:$0 sps:$4 sm:$0x11]   ;;  %v13812_v36 = vld [vmem:[%s18652_s9 + $0x84] ss:$8 sps:$4 sm:$0xff]  }
 0x93f   :  { %6122 = vmatprep.subr.bf16.mxu0 %v13812_v36 }
 0x940   :  { %v5811_v61 = vsub.f32 %v5750_v28, %v5810_v24  ;;  %v5818_v59 = vmul.f32 %v5816_v47, %v17242_v11  ;;  %v5819_v62 = vmul.f32 %v5816_v47, %v17247_v9  ;;  %v5820_v14 = vmul.f32 %v5816_v47, %v17256_v33  ;;  %v13813_v28 = vld [vmem:[%s18652_s9 + $0x90] ss:$8 sps:$4 sm:$0xff]   ;;  %v13815_v24 = vld [vmem:[%s18652_s9 + $0x94] ss:$8 sps:$4 sm:$0xff]   ;;  %6123 = vmatpush1.bf16.msra.mxu0 %v13810_v2  ;;  %v13866_v2 = vld [vmem:[%s18652_s9 + $0x120] ss:$8 sps:$4 sm:$0xff]  }
 0x941   :  { %v5821_v5 = vmul.f32 %v5816_v47, %v17261_v3  ;;  %v5822_v56 = vmul.f32 %v5816_v47, %v17266_v55  ;;  %v5823_v44 = vmul.f32 %v5816_v47, %v17271_v40  ;;  %v5824_v57 = vmul.f32 %v5816_v47, %v17276_v13  ;;  %6124 = vmatprep.subr.bf16.mxu0 %v13815_v24  ;;  %v13869_v24 = vld [vmem:[%s18652_s9 + $0x130] ss:$8 sps:$4 sm:$0xff]  }
 0x942   :  { %v5825_v52 = vmul.f32 %v5816_v47, %v17281_v41  ;;  %v5826_v42 = vmul.f32 %v5816_v47, %v17286_v30  ;;  %v5827_v21 = vmul.f32 %v5816_v47, %v5717_v20  ;;  %v5828_v38 = vmul.f32 %v5816_v47, %v5722_v6 }
 0x943   :  { %v5829_v54 = vmul.f32 %v5816_v47, %v5725_v27  ;;  %v5830_v11 = vmul.f32 %v5816_v47, %v5730_v0  ;;  %v5835_v9 = vrot.slane %v5811_v61, %v18783_v18  ;;  %v13816_v47 = vld [vmem:[%s18652_s9 + $0xa0] ss:$8 sps:$4 sm:$0xff]   ;;  %v13818_v61 = vld [vmem:[%s18652_s9 + $0xa4] ss:$8 sps:$4 sm:$0xff]  }
 0x944   :  { %6125 = vmatpush1.bf16.msra.mxu0 %v13813_v28  ;;  %v13871_v28 = vld [vmem:[%s18652_s9 + $0x134] ss:$8 sps:$4 sm:$0xff]  }
 0x945   :  { %v5837_v32 = vadd.f32 %v5835_v9, %v5818_v59  ;;  %v5838_v33 = vadd.f32 %v5835_v9, %v5819_v62  ;;  %v5839_v45 = vadd.f32 %v5835_v9, %v5820_v14  ;;  %v5840_v3 = vadd.f32 %v5835_v9, %v5821_v5  ;;  %6126 = vmatprep.subr.bf16.mxu0 %v13818_v61  ;;  %v13821_v59 = vld [vmem:[%s18652_s9 + $0xb4] ss:$8 sps:$4 sm:$0xff]   ;;  %v13819_v62 = vld [vmem:[%s18652_s9 + $0xb0] ss:$8 sps:$4 sm:$0xff]   ;;  %v13824_v14 = vld [vmem:[%s18652_s9 + $0xc4] ss:$8 sps:$4 sm:$0xff]  }
 0x946   :  { %v5841_v1 = vadd.f32 %v5835_v9, %v5822_v56  ;;  %v5842_v55 = vadd.f32 %v5835_v9, %v5823_v44  ;;  %v5843_v48 = vadd.f32 %v5835_v9, %v5824_v57  ;;  %v5844_v40 = vadd.f32 %v5835_v9, %v5825_v52  ;;  %v13822_v5 = vld [vmem:[%s18652_s9 + $0xc0] ss:$8 sps:$4 sm:$0xff]   ;;  %v13827_v56 = vld [vmem:[%s18652_s9 + $0xd4] ss:$8 sps:$4 sm:$0xff]   ;;  %v13825_v44 = vld [vmem:[%s18652_s9 + $0xd0] ss:$8 sps:$4 sm:$0xff]  }
 0x947   :  { %v5845_v58 = vadd.f32 %v5835_v9, %v5826_v42  ;;  %v5846_v13 = vadd.f32 %v5835_v9, %v5827_v21  ;;  %v5847_v10 = vadd.f32 %v5835_v9, %v5828_v38  ;;  %v5848_v41 = vadd.f32 %v5835_v9, %v5829_v54  ;;  %v13830_v57 = vld [vmem:[%s18652_s9 + $0xe4] ss:$8 sps:$4 sm:$0xff]   ;;  %v13828_v52 = vld [vmem:[%s18652_s9 + $0xe0] ss:$8 sps:$4 sm:$0xff]   ;;  %v13831_v38 = vld [vmem:[%s18652_s9 + $0xf0] ss:$8 sps:$4 sm:$0xff]  }
 0x948   :  { %v5849_v49 = vadd.f32 %v5835_v9, %v5830_v11  ;;  %v5850_v30 = vmax.f32 %v5837_v32, 0.0  ;;  %v5851_v20 = vmax.f32 %v5838_v33, 0.0  ;;  %v5852_v6 = vmax.f32 %v5839_v45, 0.0  ;;  %6127 = vmatpush1.bf16.msra.mxu0 %v13816_v47  ;;  %v13803_v42 = vld [vmem:[%s18649_s8 + $0x38] ss:$0 sps:$4 sm:$0x11]  }
 0x949   :  { %v5853_v27 = vmax.f32 %v5840_v3, 0.0  ;;  %v5854_v0 = vmax.f32 %v5841_v1, 0.0  ;;  %v5855_v23 = vmax.f32 %v5842_v55, 0.0  ;;  %v5856_v37 = vmax.f32 %v5843_v48, 0.0  ;;  %6128 = vmatprep.subr.bf16.mxu0 %v13821_v59  ;;  %v13804_v21 = vld [vmem:[%s18649_s8 + $0x3c] sm:$0xff]   ;;  %v13806_v32 = vld [vmem:[%s18649_s8 + $0x48] sm:$0xff]  }
 0x94a   :  { %v5857_v34 = vmax.f32 %v5844_v40, 0.0  ;;  %v5858_v15 = vmax.f32 %v5845_v58, 0.0  ;;  %v5859_v63 = vmax.f32 %v5846_v13, 0.0  ;;  %v5860_v53 = vmax.f32 %v5847_v10, 0.0  ;;  %v13833_v54 = vld [vmem:[%s18652_s9 + $0xf4] ss:$8 sps:$4 sm:$0xff]  }
 0x94b   :  { %v5861_v43 = vmax.f32 %v5848_v41, 0.0  ;;  %v17310_v50 = vpack.c.bf16 %v5851_v20, %v5850_v30  ;;  %v17312_v19 = vpack.c.bf16 %v5853_v27, %v5852_v6  ;;  %v17314_v17 = vpack.c.bf16 %v5855_v23, %v5854_v0  ;;  %v13836_v11 = vld [vmem:[%s18652_s9 + $0x4] ss:$8 sps:$4 sm:$0xff]   ;;  %v13807_v33 = vld [vmem:[%s18649_s8 + $0x50] ss:$0 sps:$4 sm:$0x11]  }
 0x94c   :  { %v17316_v4 = vpack.c.bf16 %v5857_v34, %v5856_v37  ;;  %v17318_v39 = vpack.c.bf16 %v5859_v63, %v5858_v15  ;;  %v5862_v8 = vmax.f32 %v5849_v49, 0.0  ;;  %6129 = vmatpush1.bf16.msra.mxu0 %v13819_v62  ;;  %v13805_v9 = vld [vmem:[%s18649_s8 + $0x44] ss:$0 sps:$4 sm:$0x11]   ;;  %v13808_v45 = vld [vmem:[%s18649_s8 + $0x54] sm:$0xff]  }
 0x94d   :  { %v17320_v7 = vpack.c.bf16 %v5861_v43, %v5860_v53  ;;  %12903 = vmatprep.subr.bf16.mxu1 %v17310_v50  ;;  %6130 = vmatprep.subr.bf16.mxu0 %v13824_v14  ;;  %v13809_v3 = vld [vmem:[%s18649_s8 + $0x5c] ss:$0 sps:$4 sm:$0x11]   ;;  %v13864_v1 = vld [vmem:[%s18649_s8 + $0x60] sm:$0xff]   ;;  %v13837_v23 = vld [vmem:[%s18652_s9 + $0x10] ss:$8 sps:$4 sm:$0xff]  }
 0x94e   :  { %12904 = vmatpush3.bf16.msra.mxu1 %v17310_v50  ;;  %v17333_v12 = vpack.c.bf16 %v5862_v8, %v5862_v8  ;;  %v13865_v10 = vld [vmem:[%s18649_s8 + $0x68] ss:$0 sps:$4 sm:$0x11]   ;;  %v13839_v0 = vld [vmem:[%s18652_s9 + $0x14] ss:$8 sps:$4 sm:$0xff]  }
 0x94f   :  { %12905 = vmatprep.subr.bf16.mxu1 %v17312_v19  ;;  %v13834_v6 = vld [vmem:[%s18652_s9] ss:$8 sps:$4 sm:$0xff]   ;;  %v13842_v37 = vld [vmem:[%s18652_s9 + $0x24] ss:$8 sps:$4 sm:$0xff]   ;;  %v13845_v63 = vld [vmem:[%s18652_s9 + $0x34] ss:$8 sps:$4 sm:$0xff]  }
 0x950   :  { %v17340_v16 = vsel %vm1330_vm5, %v17333_v12, 0  ;;  %6131 = vmatpush1.bf16.msra.mxu0 %v13822_v5  ;;  %v13840_v34 = vld [vmem:[%s18652_s9 + $0x20] ss:$8 sps:$4 sm:$0xff]   ;;  %v13843_v53 = vld [vmem:[%s18652_s9 + $0x30] ss:$8 sps:$4 sm:$0xff]  }
 0x951   :  { %6132 = vmatprep.subr.bf16.mxu0 %v13827_v56  ;;  %v13848_v43 = vld [vmem:[%s18652_s9 + $0x44] ss:$8 sps:$4 sm:$0xff]   ;;  %v13872_v61 = vld [vmem:[%s18652_s9 + $0x140] ss:$8 sps:$4 sm:$0xff]   ;;  %v13877_v59 = vld [vmem:[%s18652_s9 + $0x154] ss:$8 sps:$4 sm:$0xff]  }
 0x952   :  { %12906 = vmatpush3.bf16.msra.mxu1 %v17312_v19  ;;  %v13874_v47 = vld [vmem:[%s18652_s9 + $0x144] ss:$8 sps:$4 sm:$0xff]   ;;  %v13875_v62 = vld [vmem:[%s18652_s9 + $0x150] ss:$8 sps:$4 sm:$0xff]  }
 0x953   :  { %12907 = vmatprep.subr.bf16.mxu1 %v17314_v17  ;;  %v13880_v14 = vld [vmem:[%s18652_s9 + $0x164] ss:$8 sps:$4 sm:$0xff]  }
 0x954   :  { %6133 = vmatpush1.bf16.msra.mxu0 %v13825_v44 }
 0x955   :  { %6134 = vmatprep.subr.bf16.mxu0 %v13830_v57  ;;  %v13878_v57 = vld [vmem:[%s18652_s9 + $0x160] ss:$8 sps:$4 sm:$0xff]  }
 0x956   :  { %12908 = vmatpush3.bf16.msra.mxu1 %v17314_v17 }
 0x957   :  { %12909 = vmatprep.subr.bf16.mxu1 %v17316_v4 }
 0x958   :  { %6135 = vmatpush1.bf16.msra.mxu0 %v13828_v52 }
 0x959   :  { %6136 = vmatprep.subr.bf16.mxu0 %v13833_v54  ;;  %v13886_v54 = vld [vmem:[%s18652_s9 + $0x184] ss:$8 sps:$4 sm:$0xff]  }
 0x95a   :  { %12910 = vmatpush3.bf16.msra.mxu1 %v17316_v4 }
 0x95b   :  { %12911 = vmatprep.subr.bf16.mxu1 %v17318_v39 }
 0x95c   :  { %6137 = vmatpush1.bf16.msra.mxu0 %v13831_v38  ;;  %v13881_v38 = vld [vmem:[%s18652_s9 + $0x170] ss:$8 sps:$4 sm:$0xff]  }
 0x95d   :  { %6253 = vmatprep.subr.bf16.mxu0 %v13836_v11  ;;  %v13884_v11 = vld [vmem:[%s18652_s9 + $0x180] ss:$8 sps:$4 sm:$0xff]  }
 0x95e   :  { %12912 = vmatpush3.bf16.msra.mxu1 %v17318_v39 }
 0x95f   :  { %12913 = vmatprep.subr.bf16.mxu1 %v17320_v7 }
 0x962   :  { %12914 = vmatpush3.bf16.msra.mxu1 %v17320_v7 }
 0x963   :  { %13353 = vmatprep.subr.msk.bf16.mxu1 %vm1330_vm5, %v17333_v12 }
 0x966   :  { %12916 = vmatpush3.bf16.msra.mxu1 %v17340_v16 }
 0x967   :  { %12921 = vmatprep.subr.bf16.mxu1 %v17310_v50 }
 0x969   :  { %12918 = vmatmul.mubr.msk.bf16.vlgmr.msra.gmra.mrb[164].mxu1 %vm5881_vm7, %v13795_v29  ;;  %v13855_v29 = vld [vmem:[%s18652_s9 + $0x70] ss:$8 sps:$4 sm:$0xff]  }
 0x96a   :  { %12922 = vmatpush3.bf16.msra.mxu1 %v17310_v50  ;;  %12935 = vmatprep.mubr.msk.bf16.mxu1 %vm5881_vm7, %v13796_v35 }
 0x96b   :  { %12923 = vmatprep.subr.bf16.mxu1 %v17312_v19 }
 0x96e   :  { %12924 = vmatpush3.bf16.msra.mxu1 %v17312_v19 }
 0x96f   :  { %12925 = vmatprep.subr.bf16.mxu1 %v17314_v17 }
 0x972   :  { %12926 = vmatpush3.bf16.msra.mxu1 %v17314_v17 }
 0x973   :  { %12927 = vmatprep.subr.bf16.mxu1 %v17316_v4 }
 0x976   :  { %12928 = vmatpush3.bf16.msra.mxu1 %v17316_v4 }
 0x977   :  { %12929 = vmatprep.subr.bf16.mxu1 %v17318_v39 }
 0x97a   :  { %12930 = vmatpush3.bf16.msra.mxu1 %v17318_v39 }
 0x97b   :  { %12931 = vmatprep.subr.bf16.mxu1 %v17320_v7 }
 0x97e   :  { %12932 = vmatpush3.bf16.msra.mxu1 %v17320_v7 }
 0x97f   :  { %13354 = vmatprep.subr.msk.bf16.mxu1 %vm1330_vm5, %v17333_v12 }
 0x982   :  { %12934 = vmatpush3.bf16.msra.mxu1 %v17340_v16 }
 0x983   :  { %12939 = vmatprep.subr.bf16.mxu1 %v17310_v50 }
 0x985   :  { %12936 = vmatmul.mubr.msk.bf16.vlgmr.msra.gmra.mrb[168].mxu1 %vm5881_vm7, %v13797_v25  ;;  %v13860_v25 = vld [vmem:[%s18652_s9 + $0x104] ss:$8 sps:$4 sm:$0xff]  }
 0x986   :  { %12940 = vmatpush3.bf16.msra.mxu1 %v17310_v50  ;;  %12953 = vmatprep.mubr.msk.bf16.mxu1 %vm5881_vm7, %v13798_v26 }
 0x987   :  { %12941 = vmatprep.subr.bf16.mxu1 %v17312_v19 }
 0x98a   :  { %12942 = vmatpush3.bf16.msra.mxu1 %v17312_v19 }
 0x98b   :  { %12943 = vmatprep.subr.bf16.mxu1 %v17314_v17 }
 0x98e   :  { %12944 = vmatpush3.bf16.msra.mxu1 %v17314_v17 }
 0x98f   :  { %12945 = vmatprep.subr.bf16.mxu1 %v17316_v4 }
 0x992   :  { %12946 = vmatpush3.bf16.msra.mxu1 %v17316_v4 }
 0x993   :  { %12947 = vmatprep.subr.bf16.mxu1 %v17318_v39 }
 0x996   :  { %12948 = vmatpush3.bf16.msra.mxu1 %v17318_v39 }
 0x997   :  { %12949 = vmatprep.subr.bf16.mxu1 %v17320_v7 }
 0x99a   :  { %12950 = vmatpush3.bf16.msra.mxu1 %v17320_v7 }
 0x99b   :  { %13355 = vmatprep.subr.msk.bf16.mxu1 %vm1330_vm5, %v17333_v12 }
 0x99e   :  { %12952 = vmatpush3.bf16.msra.mxu1 %v17340_v16 }
 0x99f   :  { %12957 = vmatprep.subr.bf16.mxu1 %v17310_v50 }
 0x9a1   :  { %12954 = vmatmul.mubr.msk.bf16.vlgmr.msra.gmra.mrb[172].mxu1 %vm5881_vm7, %v13799_v46  ;;  %v13858_v46 = vld [vmem:[%s18652_s9 + $0x100] ss:$8 sps:$4 sm:$0xff]  }
 0x9a2   :  { %12958 = vmatpush3.bf16.msra.mxu1 %v17310_v50  ;;  %12971 = vmatprep.mubr.msk.bf16.mxu1 %vm5881_vm7, %v13800_v51  ;;  %v13863_v51 = vld [vmem:[%s18652_s9 + $0x114] ss:$8 sps:$4 sm:$0xff]  }
 0x9a3   :  { %12959 = vmatprep.subr.bf16.mxu1 %v17312_v19 }
 0x9a6   :  { %12960 = vmatpush3.bf16.msra.mxu1 %v17312_v19 }
 0x9a7   :  { %12961 = vmatprep.subr.bf16.mxu1 %v17314_v17 }
 0x9aa   :  { %12962 = vmatpush3.bf16.msra.mxu1 %v17314_v17 }
 0x9ab   :  { %12963 = vmatprep.subr.bf16.mxu1 %v17316_v4 }
 0x9ae   :  { %12964 = vmatpush3.bf16.msra.mxu1 %v17316_v4 }
 0x9af   :  { %12965 = vmatprep.subr.bf16.mxu1 %v17318_v39 }
 0x9b2   :  { %12966 = vmatpush3.bf16.msra.mxu1 %v17318_v39 }
 0x9b3   :  { %12967 = vmatprep.subr.bf16.mxu1 %v17320_v7 }
 0x9b6   :  { %12968 = vmatpush3.bf16.msra.mxu1 %v17320_v7 }
 0x9b7   :  { %13356 = vmatprep.subr.msk.bf16.mxu1 %vm1330_vm5, %v17333_v12 }
 0x9ba   :  { %12970 = vmatpush3.bf16.msra.mxu1 %v17340_v16 }
 0x9bb   :  { %12975 = vmatprep.subr.bf16.mxu1 %v17310_v50 }
 0x9bd   :  { %12972 = vmatmul.mubr.msk.bf16.vlgmr.msra.gmra.mrb[176].mxu1 %vm5881_vm7, %v13801_v31  ;;  %v13861_v31 = vld [vmem:[%s18652_s9 + $0x110] ss:$8 sps:$4 sm:$0xff]  }
 0x9be   :  { %12976 = vmatpush3.bf16.msra.mxu1 %v17310_v50  ;;  %12989 = vmatprep.mubr.msk.bf16.mxu1 %vm5881_vm7, %v13802_v60  ;;  %v13868_v60 = vld [vmem:[%s18652_s9 + $0x124] ss:$8 sps:$4 sm:$0xff]  }
 0x9bf   :  { %12977 = vmatprep.subr.bf16.mxu1 %v17312_v19 }
 0x9c2   :  { %12978 = vmatpush3.bf16.msra.mxu1 %v17312_v19 }
 0x9c3   :  { %12979 = vmatprep.subr.bf16.mxu1 %v17314_v17 }
 0x9c6   :  { %12980 = vmatpush3.bf16.msra.mxu1 %v17314_v17 }
 0x9c7   :  { %12981 = vmatprep.subr.bf16.mxu1 %v17316_v4 }
 0x9ca   :  { %12982 = vmatpush3.bf16.msra.mxu1 %v17316_v4 }
 0x9cb   :  { %12983 = vmatprep.subr.bf16.mxu1 %v17318_v39 }
 0x9ce   :  { %12984 = vmatpush3.bf16.msra.mxu1 %v17318_v39 }
 0x9cf   :  { %12985 = vmatprep.subr.bf16.mxu1 %v17320_v7 }
 0x9d2   :  { %12986 = vmatpush3.bf16.msra.mxu1 %v17320_v7 }
 0x9d3   :  { %13357 = vmatprep.subr.msk.bf16.mxu1 %vm1330_vm5, %v17333_v12 }
 0x9d6   :  { %12988 = vmatpush3.bf16.msra.mxu1 %v17340_v16 }
 0x9d7   :  { %12993 = vmatprep.subr.bf16.mxu1 %v17310_v50 }
 0x9d9   :  { %12990 = vmatmul.mubr.msk.bf16.vlgmr.msra.gmra.mrb[180].mxu1 %vm5881_vm7, %v13803_v42  ;;  %v13883_v42 = vld [vmem:[%s18652_s9 + $0x174] ss:$8 sps:$4 sm:$0xff]  }
 0x9da   :  { %12994 = vmatpush3.bf16.msra.mxu1 %v17310_v50  ;;  %13007 = vmatprep.mubr.msk.bf16.mxu1 %vm5881_vm7, %v13804_v21 }
 0x9db   :  { %12995 = vmatprep.subr.bf16.mxu1 %v17312_v19 }
 0x9de   :  { %12996 = vmatpush3.bf16.msra.mxu1 %v17312_v19 }
 0x9df   :  { %12997 = vmatprep.subr.bf16.mxu1 %v17314_v17 }
 0x9e2   :  { %12998 = vmatpush3.bf16.msra.mxu1 %v17314_v17 }
 0x9e3   :  { %12999 = vmatprep.subr.bf16.mxu1 %v17316_v4 }
 0x9e6   :  { %13000 = vmatpush3.bf16.msra.mxu1 %v17316_v4 }
 0x9e7   :  { %13001 = vmatprep.subr.bf16.mxu1 %v17318_v39 }
 0x9ea   :  { %13002 = vmatpush3.bf16.msra.mxu1 %v17318_v39 }
 0x9eb   :  { %13003 = vmatprep.subr.bf16.mxu1 %v17320_v7 }
 0x9ee   :  { %13004 = vmatpush3.bf16.msra.mxu1 %v17320_v7 }
 0x9ef   :  { %13358 = vmatprep.subr.msk.bf16.mxu1 %vm1330_vm5, %v17333_v12 }
 0x9f2   :  { %13006 = vmatpush3.bf16.msra.mxu1 %v17340_v16 }
 0x9f3   :  { %13011 = vmatprep.subr.bf16.mxu1 %v17310_v50 }
 0x9f5   :  { %13008 = vmatmul.mubr.msk.bf16.vlgmr.msra.gmra.mrb[184].mxu1 %vm5881_vm7, %v13805_v9  ;;  %v13889_v9 = vld [vmem:[%s18652_s9 + $0x194] ss:$8 sps:$4 sm:$0xff]  }
 0x9f6   :  { %13012 = vmatpush3.bf16.msra.mxu1 %v17310_v50  ;;  %13025 = vmatprep.mubr.msk.bf16.mxu1 %vm5881_vm7, %v13806_v32  ;;  %v13887_v32 = vld [vmem:[%s18652_s9 + $0x190] ss:$8 sps:$4 sm:$0xff]  }
 0x9f7   :  { %13013 = vmatprep.subr.bf16.mxu1 %v17312_v19 }
 0x9fa   :  { %13014 = vmatpush3.bf16.msra.mxu1 %v17312_v19 }
 0x9fb   :  { %13015 = vmatprep.subr.bf16.mxu1 %v17314_v17 }
 0x9fe   :  { %13016 = vmatpush3.bf16.msra.mxu1 %v17314_v17 }
 0x9ff   :  { %13017 = vmatprep.subr.bf16.mxu1 %v17316_v4 }
 0xa02   :  { %13018 = vmatpush3.bf16.msra.mxu1 %v17316_v4 }
 0xa03   :  { %13019 = vmatprep.subr.bf16.mxu1 %v17318_v39 }
 0xa06   :  { %13020 = vmatpush3.bf16.msra.mxu1 %v17318_v39 }
 0xa07   :  { %13021 = vmatprep.subr.bf16.mxu1 %v17320_v7 }
 0xa0a   :  { %13022 = vmatpush3.bf16.msra.mxu1 %v17320_v7 }
 0xa0b   :  { %13359 = vmatprep.subr.msk.bf16.mxu1 %vm1330_vm5, %v17333_v12 }
 0xa0e   :  { %13024 = vmatpush3.bf16.msra.mxu1 %v17340_v16 }
 0xa0f   :  { %13029 = vmatprep.subr.bf16.mxu1 %v17310_v50 }
 0xa11   :  { %13026 = vmatmul.mubr.msk.bf16.vlgmr.msra.gmra.mrb[188].mxu1 %vm5881_vm7, %v13807_v33  ;;  %v13892_v33 = vld [vmem:[%s18652_s9 + $0x1a4] ss:$8 sps:$4 sm:$0xff]  }
 0xa12   :  { %13030 = vmatpush3.bf16.msra.mxu1 %v17310_v50  ;;  %13043 = vmatprep.mubr.msk.bf16.mxu1 %vm5881_vm7, %v13808_v45  ;;  %v13890_v45 = vld [vmem:[%s18652_s9 + $0x1a0] ss:$8 sps:$4 sm:$0xff]  }
 0xa13   :  { %13031 = vmatprep.subr.bf16.mxu1 %v17312_v19 }
 0xa16   :  { %13032 = vmatpush3.bf16.msra.mxu1 %v17312_v19 }
 0xa17   :  { %13033 = vmatprep.subr.bf16.mxu1 %v17314_v17 }
 0xa1a   :  { %13034 = vmatpush3.bf16.msra.mxu1 %v17314_v17 }
 0xa1b   :  { %13035 = vmatprep.subr.bf16.mxu1 %v17316_v4 }
 0xa1e   :  { %13036 = vmatpush3.bf16.msra.mxu1 %v17316_v4 }
 0xa1f   :  { %13037 = vmatprep.subr.bf16.mxu1 %v17318_v39 }
 0xa22   :  { %13038 = vmatpush3.bf16.msra.mxu1 %v17318_v39 }
 0xa23   :  { %13039 = vmatprep.subr.bf16.mxu1 %v17320_v7 }
 0xa26   :  { %13040 = vmatpush3.bf16.msra.mxu1 %v17320_v7 }
 0xa27   :  { %13360 = vmatprep.subr.msk.bf16.mxu1 %vm1330_vm5, %v17333_v12 }
 0xa2a   :  { %13042 = vmatpush3.bf16.msra.mxu1 %v17340_v16 }
 0xa2b   :  { %13047 = vmatprep.subr.bf16.mxu1 %v17310_v50 }
 0xa2d   :  { %13044 = vmatmul.mubr.msk.bf16.vlgmr.msra.gmra.mrb[192].mxu1 %vm5881_vm7, %v13809_v3 }
 0xa2e   :  { %13048 = vmatpush3.bf16.msra.mxu1 %v17310_v50  ;;  %13061 = vmatprep.mubr.msk.bf16.mxu1 %vm5881_vm7, %v13864_v1  ;;  %v13846_v50 = vld [vmem:[%s18652_s9 + $0x40] ss:$8 sps:$4 sm:$0xff]   ;;  %v13895_v1 = vld [vmem:[%s18652_s9 + $0x1b4] ss:$8 sps:$4 sm:$0xff]  }
 0xa2f   :  { %13049 = vmatprep.subr.bf16.mxu1 %v17312_v19 }
 0xa32   :  { %13050 = vmatpush3.bf16.msra.mxu1 %v17312_v19  ;;  %v13851_v19 = vld [vmem:[%s18652_s9 + $0x54] ss:$8 sps:$4 sm:$0xff]  }
 0xa33   :  { %13051 = vmatprep.subr.bf16.mxu1 %v17314_v17 }
 0xa36   :  { %13052 = vmatpush3.bf16.msra.mxu1 %v17314_v17  ;;  %v13849_v17 = vld [vmem:[%s18652_s9 + $0x50] ss:$8 sps:$4 sm:$0xff]  }
 0xa37   :  { %13053 = vmatprep.subr.bf16.mxu1 %v17316_v4 }
 0xa3a   :  { %13054 = vmatpush3.bf16.msra.mxu1 %v17316_v4  ;;  %v13854_v4 = vld [vmem:[%s18652_s9 + $0x64] ss:$8 sps:$4 sm:$0xff]  }
 0xa3b   :  { %13055 = vmatprep.subr.bf16.mxu1 %v17318_v39 }
 0xa3c   :  { %v17572_v55 = vpop.f32.mrb[164].mxu1 }
 0xa3d   :  { %v5925_v48 = vpop.f32.mrb[165].mxu1  ;;  %v5940_v36 = vpack.c.bf16 %v17572_v55, %v17572_v55  ;;  %v13893_v55 = vld [vmem:[%s18652_s9 + $0x1b0] ss:$8 sps:$4 sm:$0xff]  }
 0xa3e   :  { %13056 = vmatpush3.bf16.msra.mxu1 %v17318_v39  ;;  %v12920_v40 = vpop.f32.mrb[166].mxu1  ;;  %v13852_v39 = vld [vmem:[%s18652_s9 + $0x60] ss:$8 sps:$4 sm:$0xff]  }
 0xa3f   :  { %13057 = vmatprep.subr.bf16.mxu1 %v17320_v7  ;;  %v5928_v58 = vpop.f32.mrb[167].mxu1  ;;  %v13896_v40 = vld [vmem:[%s18652_s9 + $0x1c0] ss:$8 sps:$4 sm:$0xff]  }
 0xa40   :  { %v5939_v13 = vpack.c.bf16 %v5928_v58, %v5925_v48  ;;  %v13898_v48 = vld [vmem:[%s18652_s9 + $0x1c4] ss:$8 sps:$4 sm:$0xff]   ;;  %v13901_v58 = vld [vmem:[%s18652_s9 + $0x1d4] ss:$8 sps:$4 sm:$0xff]  }
 0xa42   :  { %13058 = vmatpush3.bf16.msra.mxu1 %v17320_v7  ;;  %v13857_v7 = vld [vmem:[%s18652_s9 + $0x74] ss:$8 sps:$4 sm:$0xff]  }
 0xa43   :  { %13361 = vmatprep.subr.msk.bf16.mxu1 %vm1330_vm5, %v17333_v12 }
 0xa46   :  { %13060 = vmatpush3.bf16.msra.mxu1 %v17340_v16 }
 0xa49   :  { %13062 = vmatmul.mubr.msk.bf16.vlgmr.msra.gmra.mrb[196].mxu1 %vm5881_vm7, %v13865_v10 }
 0xa4a   :  { %8043 = vmatprep.mubr.bf16.mxu1 %v18757_v22 }
 0xa58   :  { %v12937_v41 = vpop.f32.mrb[168].mxu1 }
 0xa59   :  { %v6009_v49 = vpop.f32.mrb[169].mxu1  ;;  %v6024_v15 = vpack.c.bf16 %v12937_v41, %v12937_v41 }
 0xa5a   :  { %v12938_v30 = vpop.f32.mrb[170].mxu1 }
 0xa5b   :  { %v6012_v20 = vpop.f32.mrb[171].mxu1 }
 0xa5c   :  { %v6023_v27 = vpack.c.bf16 %v6012_v20, %v6009_v49  ;;  %v13899_v49 = vld [vmem:[%s18652_s9 + $0x1d0] ss:$8 sps:$4 sm:$0xff]   ;;  %v13904_v20 = vld [vmem:[%s18652_s9 + $0x1e4] ss:$8 sps:$4 sm:$0xff]  }
 0xa5e   :  { %6155 = vmatmul.mubr.bf16.vlgmr.msra.gmra.mrb[228].mxu0 %v6023_v27  ;;  %v13902_v27 = vld [vmem:[%s18652_s9 + $0x1e0] ss:$8 sps:$4 sm:$0xff]  }
 0xa5f   :  { %6254 = vmatpush1.bf16.msra.mxu0 %v13834_v6  ;;  %6164 = vmatprep.mubr.bf16.mxu0 %v18757_v22 }
 0xa60   :  { %6255 = vmatprep.subr.bf16.mxu0 %v13839_v0  ;;  %v13907_v0 = vld [vmem:[%s18652_s9 + $0x1f4] ss:$8 sps:$4 sm:$0xff]  }
 0xa63   :  { %6256 = vmatpush1.bf16.msra.mxu0 %v13837_v23  ;;  %v13905_v23 = vld [vmem:[%s18652_s9 + $0x1f0] ss:$8 sps:$4 sm:$0xff]  }
 0xa64   :  { %6257 = vmatprep.subr.bf16.mxu0 %v13842_v37  ;;  %v13910_v37 = vld [vmem:[%s18652_s9 + $0x204] ss:$8 sps:$4 sm:$0xff]  }
 0xa66   :  { %6165 = vmatmul.mubr.bf16.gmra.mrb[232].mxu0 %v6024_v15  ;;  %v13913_v15 = vld [vmem:[%s18652_s9 + $0x214] ss:$8 sps:$4 sm:$0xff]  }
 0xa67   :  { %6258 = vmatpush1.bf16.msra.mxu0 %v13840_v34  ;;  %6285 = vmatprep.mubr.bf16.mxu0 %v18757_v22  ;;  %v13908_v34 = vld [vmem:[%s18652_s9 + $0x200] ss:$8 sps:$4 sm:$0xff]  }
 0xa68   :  { %6259 = vmatprep.subr.bf16.mxu0 %v13845_v63  ;;  %v13911_v63 = vld [vmem:[%s18652_s9 + $0x210] ss:$8 sps:$4 sm:$0xff]  }
 0xa6b   :  { %6260 = vmatpush1.bf16.msra.mxu0 %v13843_v53  ;;  %v13916_v53 = vld [vmem:[%s18652_s9 + $0x224] ss:$8 sps:$4 sm:$0xff]  }
 0xa6c   :  { %6261 = vmatprep.subr.bf16.mxu0 %v13848_v43  ;;  %v13914_v43 = vld [vmem:[%s18652_s9 + $0x220] ss:$8 sps:$4 sm:$0xff]  }
 0xa6f   :  { %6262 = vmatpush1.bf16.msra.mxu0 %v13846_v50 }
 0xa70   :  { %6263 = vmatprep.subr.bf16.mxu0 %v13851_v19  ;;  %v13919_v19 = vld [vmem:[%s18652_s9 + $0x234] ss:$8 sps:$4 sm:$0xff]  }
 0xa73   :  { %6264 = vmatpush1.bf16.msra.mxu0 %v13849_v17  ;;  %v13917_v17 = vld [vmem:[%s18652_s9 + $0x230] ss:$8 sps:$4 sm:$0xff]  }
 0xa74   :  { %6265 = vmatprep.subr.bf16.mxu0 %v13854_v4  ;;  %v17629_v8 = vpop.f32.mrb[172].mxu1  ;;  %v13922_v4 = vld [vmem:[%s18652_s9 + $0x244] ss:$8 sps:$4 sm:$0xff]  }
 0xa75   :  { %v6356_v12 = vpop.f32.mrb[173].mxu1  ;;  %v6371_v3 = vpack.c.bf16 %v17629_v8, %v17629_v8 }
 0xa76   :  { %v12956_v16 = vpop.f32.mrb[174].mxu1 }
 0xa77   :  { %6266 = vmatpush1.bf16.msra.mxu0 %v13852_v39  ;;  %v6359_v35 = vpop.f32.mrb[175].mxu1 }
 0xa78   :  { %6267 = vmatprep.subr.bf16.mxu0 %v13857_v7  ;;  %v6370_v26 = vpack.c.bf16 %v6359_v35, %v6356_v12  ;;  %v13920_v12 = vld [vmem:[%s18652_s9 + $0x240] ss:$8 sps:$4 sm:$0xff]  }
 0xa7b   :  { %6268 = vmatpush1.bf16.msra.mxu0 %v13855_v29  ;;  %v13925_v29 = vld [vmem:[%s18652_s9 + $0x254] ss:$8 sps:$4 sm:$0xff]  }
 0xa7c   :  { %6469 = vmatprep.subr.bf16.mxu0 %v13860_v25  ;;  %v13923_v25 = vld [vmem:[%s18652_s9 + $0x250] ss:$8 sps:$4 sm:$0xff]  }
 0xa7e   :  { %6286 = vmatmul.mubr.bf16.vlgmr.msra.gmra.mrb[228].mxu0 %v5939_v13 }
 0xa7f   :  { %6470 = vmatpush1.bf16.msra.mxu0 %v13858_v46  ;;  %6295 = vmatprep.mubr.bf16.mxu0 %v18757_v22  ;;  %v13926_v46 = vld [vmem:[%s18652_s9 + $0x260] ss:$8 sps:$4 sm:$0xff]  }
 0xa80   :  { %6471 = vmatprep.subr.bf16.mxu0 %v13863_v51  ;;  %v13931_v51 = vld [vmem:[%s18652_s9 + $0x274] ss:$8 sps:$4 sm:$0xff]  }
 0xa83   :  { %6472 = vmatpush1.bf16.msra.mxu0 %v13861_v31  ;;  %v13929_v31 = vld [vmem:[%s18652_s9 + $0x270] ss:$8 sps:$4 sm:$0xff]  }
 0xa84   :  { %6473 = vmatprep.subr.bf16.mxu0 %v13868_v60  ;;  %v13934_v60 = vld [vmem:[%s18652_s9 + $0x284] ss:$8 sps:$4 sm:$0xff]  }
 0xa86   :  { %6296 = vmatmul.mubr.bf16.gmra.mrb[232].mxu0 %v5940_v36  ;;  %v13937_v36 = vld [vmem:[%s18652_s9 + $0x294] ss:$8 sps:$4 sm:$0xff]  }
 0xa87   :  { %6474 = vmatpush1.bf16.msra.mxu0 %v13866_v2  ;;  %6501 = vmatprep.mubr.bf16.mxu0 %v18757_v22  ;;  %v13932_v2 = vld [vmem:[%s18652_s9 + $0x280] ss:$8 sps:$4 sm:$0xff]  }
 0xa88   :  { %6475 = vmatprep.subr.bf16.mxu0 %v13871_v28  ;;  %v13935_v28 = vld [vmem:[%s18652_s9 + $0x290] ss:$8 sps:$4 sm:$0xff]  }
 0xa8b   :  { %6476 = vmatpush1.bf16.msra.mxu0 %v13869_v24  ;;  %v13940_v24 = vld [vmem:[%s18652_s9 + $0x2a4] ss:$8 sps:$4 sm:$0xff]  }
 0xa8c   :  { %6477 = vmatprep.subr.bf16.mxu0 %v13874_v47  ;;  %v13938_v47 = vld [vmem:[%s18652_s9 + $0x2a0] ss:$8 sps:$4 sm:$0xff]  }
 0xa8f   :  { %6478 = vmatpush1.bf16.msra.mxu0 %v13872_v61 }
 0xa90   :  { %6479 = vmatprep.subr.bf16.mxu0 %v13877_v59  ;;  %v17677_v5 = vpop.f32.mrb[176].mxu1  ;;  %v13943_v59 = vld [vmem:[%s18652_s9 + $0x2b4] ss:$8 sps:$4 sm:$0xff]  }
 0xa91   :  { %v6578_v56 = vpop.f32.mrb[177].mxu1  ;;  %v6593_v50 = vpack.c.bf16 %v17677_v5, %v17677_v5 }
 0xa92   :  { %v12974_v44 = vpop.f32.mrb[178].mxu1 }
 0xa93   :  { %6480 = vmatpush1.bf16.msra.mxu0 %v13875_v62  ;;  %v6581_v52 = vpop.f32.mrb[179].mxu1 }
 0xa94   :  { %6481 = vmatprep.subr.bf16.mxu0 %v13880_v14  ;;  %v6592_v21 = vpack.c.bf16 %v6581_v52, %v6578_v56  ;;  %v13941_v56 = vld [vmem:[%s18652_s9 + $0x2b0] ss:$8 sps:$4 sm:$0xff]  }
 0xa97   :  { %6482 = vmatpush1.bf16.msra.mxu0 %v13878_v57  ;;  %v13946_v57 = vld [vmem:[%s18652_s9 + $0x2c4] ss:$8 sps:$4 sm:$0xff]  }
 0xa98   :  { %6483 = vmatprep.subr.bf16.mxu0 %v13883_v42  ;;  %v13944_v42 = vld [vmem:[%s18652_s9 + $0x2c0] ss:$8 sps:$4 sm:$0xff]  }
 0xa9b   :  { %6484 = vmatpush1.bf16.msra.mxu0 %v13881_v38  ;;  %v13947_v38 = vld [vmem:[%s18652_s9 + $0x2d0] ss:$8 sps:$4 sm:$0xff]  }
 0xa9c   :  { %6691 = vmatprep.subr.bf16.mxu0 %v13886_v54  ;;  %v13952_v54 = vld [vmem:[%s18652_s9 + $0x2e4] ss:$8 sps:$4 sm:$0xff]  }
 0xa9e   :  { %6502 = vmatmul.mubr.bf16.vlgmr.msra.gmra.mrb[228].mxu0 %v6370_v26  ;;  %v13928_v26 = vld [vmem:[%s18652_s9 + $0x264] ss:$8 sps:$4 sm:$0xff]  }
 0xa9f   :  { %6692 = vmatpush1.bf16.msra.mxu0 %v13884_v11  ;;  %6511 = vmatprep.mubr.bf16.mxu0 %v18757_v22  ;;  %v13950_v11 = vld [vmem:[%s18652_s9 + $0x2e0] ss:$8 sps:$4 sm:$0xff]  }
 0xaa0   :  { %6693 = vmatprep.subr.bf16.mxu0 %v13889_v9  ;;  %v13955_v9 = vld [vmem:[%s18652_s9 + $0x2f4] ss:$8 sps:$4 sm:$0xff]  }
 0xaa3   :  { %6694 = vmatpush1.bf16.msra.mxu0 %v13887_v32  ;;  %v13953_v32 = vld [vmem:[%s18652_s9 + $0x2f0] ss:$8 sps:$4 sm:$0xff]  }
 0xaa4   :  { %6695 = vmatprep.subr.bf16.mxu0 %v13892_v33  ;;  %v13958_v33 = vld [vmem:[%s18652_s9 + $0x304] ss:$8 sps:$4 sm:$0xff]  }
 0xaa6   :  { %6512 = vmatmul.mubr.bf16.gmra.mrb[232].mxu0 %v6371_v3  ;;  %v13961_v3 = vld [vmem:[%s18652_s9 + $0x314] ss:$8 sps:$4 sm:$0xff]  }
 0xaa7   :  { %6696 = vmatpush1.bf16.msra.mxu0 %v13890_v45  ;;  %6723 = vmatprep.mubr.bf16.mxu0 %v18757_v22  ;;  %v13956_v45 = vld [vmem:[%s18652_s9 + $0x300] ss:$8 sps:$4 sm:$0xff]  }
 0xaa8   :  { %6697 = vmatprep.subr.bf16.mxu0 %v13895_v1  ;;  %v13959_v1 = vld [vmem:[%s18652_s9 + $0x310] ss:$8 sps:$4 sm:$0xff]  }
 0xaab   :  { %6698 = vmatpush1.bf16.msra.mxu0 %v13893_v55  ;;  %v13964_v55 = vld [vmem:[%s18652_s9 + $0x324] ss:$8 sps:$4 sm:$0xff]  }
 0xaac   :  { %6699 = vmatprep.subr.bf16.mxu0 %v13898_v48  ;;  %v17725_v13 = vpop.f32.mrb[180].mxu1 }
 0xaad   :  { %v6800_v10 = vpop.f32.mrb[181].mxu1  ;;  %v6815_v61 = vpack.c.bf16 %v17725_v13, %v17725_v13  ;;  %v13962_v13 = vld [vmem:[%s18652_s9 + $0x320] ss:$8 sps:$4 sm:$0xff]  }
 0xaae   :  { %v12992_v41 = vpop.f32.mrb[182].mxu1 }
 0xaaf   :  { %6700 = vmatpush1.bf16.msra.mxu0 %v13896_v40  ;;  %v6803_v30 = vpop.f32.mrb[183].mxu1 }
 0xab0   :  { %6701 = vmatprep.subr.bf16.mxu0 %v13901_v58  ;;  %v6814_v6 = vpack.c.bf16 %v6803_v30, %v6800_v10 }
 0xab3   :  { %6702 = vmatpush1.bf16.msra.mxu0 %v13899_v49  ;;  %v13967_v49 = vld [vmem:[%s18652_s9 + $0x334] ss:$8 sps:$4 sm:$0xff]  }
 0xab4   :  { %6703 = vmatprep.subr.bf16.mxu0 %v13904_v20  ;;  %v13965_v20 = vld [vmem:[%s18652_s9 + $0x330] ss:$8 sps:$4 sm:$0xff]  }
 0xab7   :  { %6704 = vmatpush1.bf16.msra.mxu0 %v13902_v27  ;;  %v13968_v27 = vld [vmem:[%s18652_s9 + $0x340] ss:$8 sps:$4 sm:$0xff]  }
 0xab8   :  { %6705 = vmatprep.subr.bf16.mxu0 %v13907_v0  ;;  %v13973_v0 = vld [vmem:[%s18652_s9 + $0x354] ss:$8 sps:$4 sm:$0xff]  }
 0xabb   :  { %6706 = vmatpush1.bf16.msra.mxu0 %v13905_v23  ;;  %v13971_v23 = vld [vmem:[%s18652_s9 + $0x350] ss:$8 sps:$4 sm:$0xff]  }
 0xabc   :  { %6913 = vmatprep.subr.bf16.mxu0 %v13910_v37  ;;  %v13976_v37 = vld [vmem:[%s18652_s9 + $0x364] ss:$8 sps:$4 sm:$0xff]  }
 0xabe   :  { %6724 = vmatmul.mubr.bf16.vlgmr.msra.gmra.mrb[228].mxu0 %v6592_v21  ;;  %v13949_v21 = vld [vmem:[%s18652_s9 + $0x2d4] ss:$8 sps:$4 sm:$0xff]  }
 0xabf   :  { %6914 = vmatpush1.bf16.msra.mxu0 %v13908_v34  ;;  %6733 = vmatprep.mubr.bf16.mxu0 %v18757_v22  ;;  %v13974_v34 = vld [vmem:[%s18652_s9 + $0x360] ss:$8 sps:$4 sm:$0xff]  }
 0xac0   :  { %6915 = vmatprep.subr.bf16.mxu0 %v13913_v15  ;;  %v13979_v15 = vld [vmem:[%s18652_s9 + $0x374] ss:$8 sps:$4 sm:$0xff]  }
 0xac3   :  { %6916 = vmatpush1.bf16.msra.mxu0 %v13911_v63  ;;  %v13977_v63 = vld [vmem:[%s18652_s9 + $0x370] ss:$8 sps:$4 sm:$0xff]  }
 0xac4   :  { %6917 = vmatprep.subr.bf16.mxu0 %v13916_v53  ;;  %v13982_v53 = vld [vmem:[%s18652_s9 + $0x384] ss:$8 sps:$4 sm:$0xff]  }
 0xac6   :  { %6734 = vmatmul.mubr.bf16.gmra.mrb[232].mxu0 %v6593_v50  ;;  %v13985_v50 = vld [vmem:[%s18652_s9 + $0x394] ss:$8 sps:$4 sm:$0xff]  }
 0xac7   :  { %6918 = vmatpush1.bf16.msra.mxu0 %v13914_v43  ;;  %6945 = vmatprep.mubr.bf16.mxu0 %v18757_v22  ;;  %v13980_v43 = vld [vmem:[%s18652_s9 + $0x380] ss:$8 sps:$4 sm:$0xff]  }
 0xac8   :  { %6919 = vmatprep.subr.bf16.mxu0 %v13919_v19  ;;  %v17773_v39 = vpop.f32.mrb[184].mxu1 }
 0xac9   :  { %v17775_v7 = vpop.f32.mrb[185].mxu1  ;;  %v7037_v41 = vpack.c.bf16 %v17773_v39, %v17773_v39  ;;  %v13983_v39 = vld [vmem:[%s18652_s9 + $0x390] ss:$8 sps:$4 sm:$0xff]  }
 0xaca   :  { %v13010_v8 = vpop.f32.mrb[186].mxu1 }
 0xacb   :  { %6920 = vmatpush1.bf16.msra.mxu0 %v13917_v17  ;;  %v7025_v16 = vpop.f32.mrb[187].mxu1  ;;  %v13988_v8 = vld [vmem:[%s18652_s9 + $0x3a4] ss:$8 sps:$4 sm:$0xff]  }
 0xacc   :  { %6921 = vmatprep.subr.bf16.mxu0 %v13922_v4  ;;  %v7036_v35 = vpack.c.bf16 %v7025_v16, %v17775_v7  ;;  %v13986_v16 = vld [vmem:[%s18652_s9 + $0x3a0] ss:$8 sps:$4 sm:$0xff]  }
 0xacf   :  { %6922 = vmatpush1.bf16.msra.mxu0 %v13920_v12 }
 0xad0   :  { %6923 = vmatprep.subr.bf16.mxu0 %v13925_v29 }
 0xad3   :  { %6924 = vmatpush1.bf16.msra.mxu0 %v13923_v25  ;;  %v13989_v25 = vld [vmem:[%s18652_s9 + $0x3b0] ss:$8 sps:$4 sm:$0xff]  }
 0xad4   :  { %6925 = vmatprep.subr.bf16.mxu0 %v13928_v26  ;;  %v13994_v26 = vld [vmem:[%s18652_s9 + $0x3c4] ss:$8 sps:$4 sm:$0xff]  }
 0xad7   :  { %6926 = vmatpush1.bf16.msra.mxu0 %v13926_v46  ;;  %v13992_v46 = vld [vmem:[%s18652_s9 + $0x3c0] ss:$8 sps:$4 sm:$0xff]  }
 0xad8   :  { %6927 = vmatprep.subr.bf16.mxu0 %v13931_v51  ;;  %v13997_v51 = vld [vmem:[%s18652_s9 + $0x3d4] ss:$8 sps:$4 sm:$0xff]  }
 0xadb   :  { %6928 = vmatpush1.bf16.msra.mxu0 %v13929_v31  ;;  %v13995_v31 = vld [vmem:[%s18652_s9 + $0x3d0] ss:$8 sps:$4 sm:$0xff]  }
 0xadc   :  { %7135 = vmatprep.subr.bf16.mxu0 %v13934_v60  ;;  %v14000_v60 = vld [vmem:[%s18652_s9 + $0x3e4] ss:$8 sps:$4 sm:$0xff]  }
 0xade   :  { %6946 = vmatmul.mubr.bf16.vlgmr.msra.gmra.mrb[228].mxu0 %v6814_v6  ;;  %v13970_v6 = vld [vmem:[%s18652_s9 + $0x344] ss:$8 sps:$4 sm:$0xff]  }
 0xadf   :  { %7136 = vmatpush1.bf16.msra.mxu0 %v13932_v2  ;;  %6955 = vmatprep.mubr.bf16.mxu0 %v18757_v22  ;;  %v13998_v2 = vld [vmem:[%s18652_s9 + $0x3e0] ss:$8 sps:$4 sm:$0xff]  }
 0xae0   :  { %7137 = vmatprep.subr.bf16.mxu0 %v13937_v36  ;;  %v14003_v36 = vld [vmem:[%s18652_s9 + $0x3f4] ss:$8 sps:$4 sm:$0xff]  }
 0xae3   :  { %7138 = vmatpush1.bf16.msra.mxu0 %v13935_v28  ;;  %v14001_v28 = vld [vmem:[%s18652_s9 + $0x3f0] ss:$8 sps:$4 sm:$0xff]  }
 0xae4   :  { %7139 = vmatprep.subr.bf16.mxu0 %v13940_v24  ;;  %v17823_v62 = vpop.f32.mrb[188].mxu1  ;;  %v14006_v24 = vld [vmem:[%s18652_s9 + $0x404] ss:$8 sps:$4 sm:$0xff]  }
 0xae5   :  { %v17825_v14 = vpop.f32.mrb[189].mxu1  ;;  %v7259_v29 = vpack.c.bf16 %v17823_v62, %v17823_v62  ;;  %v14012_v62 = vld [vmem:[%s18652_s9 + $0x424] ss:$8 sps:$4 sm:$0xff]  }
 0xae6   :  { %6956 = vmatmul.mubr.bf16.gmra.mrb[232].mxu0 %v6815_v61  ;;  %v13028_v5 = vpop.f32.mrb[190].mxu1  ;;  %v14009_v61 = vld [vmem:[%s18652_s9 + $0x414] ss:$8 sps:$4 sm:$0xff]  }
 0xae7   :  { %7140 = vmatpush1.bf16.msra.mxu0 %v13938_v47  ;;  %7167 = vmatprep.mubr.bf16.mxu0 %v18757_v22  ;;  %v17831_v44 = vpop.f32.mrb[191].mxu1  ;;  %v14004_v47 = vld [vmem:[%s18652_s9 + $0x400] ss:$8 sps:$4 sm:$0xff]  }
 0xae8   :  { %7141 = vmatprep.subr.bf16.mxu0 %v13943_v59  ;;  %v7258_v52 = vpack.c.bf16 %v17831_v44, %v17825_v14  ;;  %v14007_v59 = vld [vmem:[%s18652_s9 + $0x410] ss:$8 sps:$4 sm:$0xff]   ;;  %v14010_v14 = vld [vmem:[%s18652_s9 + $0x420] ss:$8 sps:$4 sm:$0xff]  }
 0xae9   :  { %v14013_v44 = vld [vmem:[%s18652_s9 + $0x430] ss:$8 sps:$4 sm:$0xff]  }
 0xaeb   :  { %7142 = vmatpush1.bf16.msra.mxu0 %v13941_v56  ;;  %v14015_v56 = vld [vmem:[%s18652_s9 + $0x434] ss:$8 sps:$4 sm:$0xff]  }
 0xaec   :  { %7143 = vmatprep.subr.bf16.mxu0 %v13946_v57  ;;  %v14018_v57 = vld [vmem:[%s18652_s9 + $0x444] ss:$8 sps:$4 sm:$0xff]  }
 0xaef   :  { %7144 = vmatpush1.bf16.msra.mxu0 %v13944_v42  ;;  %v14021_v42 = vld [vmem:[%s18652_s9 + $0x454] ss:$8 sps:$4 sm:$0xff]  }
 0xaf0   :  { %7145 = vmatprep.subr.bf16.mxu0 %v13949_v21  ;;  %v14019_v21 = vld [vmem:[%s18652_s9 + $0x450] ss:$8 sps:$4 sm:$0xff]  }
 0xaf3   :  { %7146 = vmatpush1.bf16.msra.mxu0 %v13947_v38  ;;  %v14024_v38 = vld [vmem:[%s18652_s9 + $0x464] ss:$8 sps:$4 sm:$0xff]  }
 0xaf4   :  { %7147 = vmatprep.subr.bf16.mxu0 %v13952_v54  ;;  %v14022_v54 = vld [vmem:[%s18652_s9 + $0x460] ss:$8 sps:$4 sm:$0xff]  }
 0xaf7   :  { %7148 = vmatpush1.bf16.msra.mxu0 %v13950_v11  ;;  %v14027_v11 = vld [vmem:[%s18652_s9 + $0x474] ss:$8 sps:$4 sm:$0xff]  }
 0xaf8   :  { %7149 = vmatprep.subr.bf16.mxu0 %v13955_v9  ;;  %v14025_v9 = vld [vmem:[%s18652_s9 + $0x470] ss:$8 sps:$4 sm:$0xff]  }
 0xafb   :  { %7150 = vmatpush1.bf16.msra.mxu0 %v13953_v32 }
 0xafc   :  { %7357 = vmatprep.subr.bf16.mxu0 %v13958_v33 }
 0xafe   :  { %7168 = vmatmul.mubr.bf16.vlgmr.msra.gmra.mrb[228].mxu0 %v7036_v35  ;;  %v13991_v35 = vld [vmem:[%s18652_s9 + $0x3b4] ss:$8 sps:$4 sm:$0xff]  }
 0xaff   :  { %7358 = vmatpush1.bf16.msra.mxu0 %v13956_v45  ;;  %7177 = vmatprep.mubr.bf16.mxu0 %v18757_v22 }
 0xb00   :  { %7359 = vmatprep.subr.bf16.mxu0 %v13961_v3  ;;  %v17875_v48 = vpop.f32.mrb[192].mxu1 }
 0xb01   :  { %v17877_v40 = vpop.f32.mrb[193].mxu1  ;;  %v7481_v5 = vpack.c.bf16 %v17875_v48, %v17875_v48 }
 0xb02   :  { %v13046_v58 = vpop.f32.mrb[194].mxu1 }
 0xb03   :  { %7360 = vmatpush1.bf16.msra.mxu0 %v13959_v1  ;;  %v17882_v10 = vpop.f32.mrb[195].mxu1 }
 0xb04   :  { %7361 = vmatprep.subr.bf16.mxu0 %v13964_v55  ;;  %v7480_v30 = vpack.c.bf16 %v17882_v10, %v17877_v40 }
 0xb06   :  { %7178 = vmatmul.mubr.bf16.gmra.mrb[232].mxu0 %v7037_v41 }
 0xb07   :  { %7362 = vmatpush1.bf16.msra.mxu0 %v13962_v13  ;;  %7389 = vmatprep.mubr.bf16.mxu0 %v18757_v22 }
 0xb08   :  { %7363 = vmatprep.subr.bf16.mxu0 %v13967_v49 }
 0xb0b   :  { %7364 = vmatpush1.bf16.msra.mxu0 %v13965_v20 }
 0xb0c   :  { %7365 = vmatprep.subr.bf16.mxu0 %v13970_v6 }
 0xb0f   :  { %7366 = vmatpush1.bf16.msra.mxu0 %v13968_v27 }
 0xb10   :  { %7367 = vmatprep.subr.bf16.mxu0 %v13973_v0 }
 0xb13   :  { %7368 = vmatpush1.bf16.msra.mxu0 %v13971_v23 }
 0xb14   :  { %7369 = vmatprep.subr.bf16.mxu0 %v13976_v37 }
 0xb17   :  { %7370 = vmatpush1.bf16.msra.mxu0 %v13974_v34 }
 0xb18   :  { %7371 = vmatprep.subr.bf16.mxu0 %v13979_v15 }
 0xb1b   :  { %7372 = vmatpush1.bf16.msra.mxu0 %v13977_v63 }
 0xb1c   :  { %7579 = vmatprep.subr.bf16.mxu0 %v13982_v53  ;;  %v17928_v19 = vpop.f32.mrb[196].mxu1 }
 0xb1d   :  { %v17930_v17 = vpop.f32.mrb[197].mxu1  ;;  %v7703_v32 = vpack.c.bf16 %v17928_v19, %v17928_v19 }
 0xb1e   :  { %7390 = vmatmul.mubr.bf16.vlgmr.msra.gmra.mrb[228].mxu0 %v7258_v52  ;;  %v13064_v4 = vpop.f32.mrb[198].mxu1  ;;  %v14016_v52 = vld [vmem:[%s18652_s9 + $0x440] ss:$8 sps:$4 sm:$0xff]  }
 0xb1f   :  { %7580 = vmatpush1.bf16.msra.mxu0 %v13980_v43  ;;  %7399 = vmatprep.mubr.bf16.mxu0 %v18757_v22  ;;  %v17939_v7 = vpop.f32.mrb[199].mxu1 }
 0xb20   :  { %7581 = vmatprep.subr.bf16.mxu0 %v13985_v50  ;;  %v7702_v12 = vpack.c.bf16 %v17939_v7, %v17930_v17 }
 0xb23   :  { %7582 = vmatpush1.bf16.msra.mxu0 %v13983_v39 }
 0xb24   :  { %7583 = vmatprep.subr.bf16.mxu0 %v13988_v8 }
 0xb26   :  { %7400 = vmatmul.mubr.bf16.gmra.mrb[232].mxu0 %v7259_v29 }
 0xb27   :  { %7584 = vmatpush1.bf16.msra.mxu0 %v13986_v16  ;;  %7611 = vmatprep.mubr.bf16.mxu0 %v18757_v22 }
 0xb28   :  { %7585 = vmatprep.subr.bf16.mxu0 %v13991_v35 }
 0xb2b   :  { %7586 = vmatpush1.bf16.msra.mxu0 %v13989_v25 }
 0xb2c   :  { %7587 = vmatprep.subr.bf16.mxu0 %v13994_v26 }
 0xb2f   :  { %7588 = vmatpush1.bf16.msra.mxu0 %v13992_v46 }
 0xb30   :  { %7589 = vmatprep.subr.bf16.mxu0 %v13997_v51 }
 0xb33   :  { %7590 = vmatpush1.bf16.msra.mxu0 %v13995_v31 }
 0xb34   :  { %7591 = vmatprep.subr.bf16.mxu0 %v14000_v60 }
 0xb37   :  { %7592 = vmatpush1.bf16.msra.mxu0 %v13998_v2 }
 0xb38   :  { %7593 = vmatprep.subr.bf16.mxu0 %v14003_v36 }
 0xb3b   :  { %7594 = vmatpush1.bf16.msra.mxu0 %v14001_v28 }
 0xb3c   :  { %7801 = vmatprep.subr.bf16.mxu0 %v14006_v24 }
 0xb3e   :  { %7612 = vmatmul.mubr.bf16.vlgmr.msra.gmra.mrb[228].mxu0 %v7480_v30 }
 0xb3f   :  { %7802 = vmatpush1.bf16.msra.mxu0 %v14004_v47  ;;  %7621 = vmatprep.mubr.bf16.mxu0 %v18757_v22 }
 0xb40   :  { %7803 = vmatprep.subr.bf16.mxu0 %v14009_v61 }
 0xb43   :  { %7804 = vmatpush1.bf16.msra.mxu0 %v14007_v59 }
 0xb44   :  { %7805 = vmatprep.subr.bf16.mxu0 %v14012_v62 }
 0xb46   :  { %7622 = vmatmul.mubr.bf16.gmra.mrb[232].mxu0 %v7481_v5 }
 0xb47   :  { %7806 = vmatpush1.bf16.msra.mxu0 %v14010_v14  ;;  %7833 = vmatprep.mubr.bf16.mxu0 %v18757_v22 }
 0xb48   :  { %7807 = vmatprep.subr.bf16.mxu0 %v14015_v56 }
 0xb4b   :  { %7808 = vmatpush1.bf16.msra.mxu0 %v14013_v44 }
 0xb4c   :  { %7809 = vmatprep.subr.bf16.mxu0 %v14018_v57 }
 0xb4f   :  { %7810 = vmatpush1.bf16.msra.mxu0 %v14016_v52 }
 0xb50   :  { %7811 = vmatprep.subr.bf16.mxu0 %v14021_v42 }
 0xb53   :  { %7812 = vmatpush1.bf16.msra.mxu0 %v14019_v21 }
 0xb54   :  { %7813 = vmatprep.subr.bf16.mxu0 %v14024_v38 }
 0xb57   :  { %7814 = vmatpush1.bf16.msra.mxu0 %v14022_v54 }
 0xb58   :  { %7815 = vmatprep.subr.bf16.mxu0 %v14027_v11 }
 0xb5b   :  { %7816 = vmatpush1.bf16.msra.mxu0 %v14025_v9  ;;  %v18784_v9 = vld [vmem:[#allocation21_spill] sm:$0xff] }
 0xb5e   :  { %7834 = vmatmul.mubr.bf16.vlgmr.msra.gmra.mrb[228].mxu0 %v7702_v12 }
 0xb5f   :  { %7843 = vmatprep.mubr.bf16.mxu0 %v18757_v22 }
 0xb66   :  { %7844 = vmatmul.mubr.bf16.gmra.mrb[232].mxu0 %v7703_v32  ;;  %v7942_v32 = vsub.s32 1, %v18784_v9 }
 0xc31   :  { %v18043_v33 = vpop.f32.mrb[228].mxu0 }
 0xc32   :  { %v18045_v45 = vpop.f32.mrb[229].mxu0  ;;  %v7880_v1 = vmul.f32 %v18043_v33, %v18043_v33 }
 0xc33   :  { %v18047_v3 = vpop.f32.mrb[230].mxu0  ;;  %v7881_v58 = vmul.f32 %v18045_v45, %v18045_v45 }
 0xc34   :  { %v7860_v55 = vadd.f32 %v18047_v3, %v18043_v33  ;;  %v7882_v48 = vmul.f32 %v18047_v3, %v18047_v3  ;;  %v18055_v40 = vpop.f32.mrb[231].mxu0 }
 0xc35   :  { %v7869_v13 = vadd.f32 %v18055_v40, %v18045_v45  ;;  %v7883_v10 = vmul.f32 %v18055_v40, %v18055_v40 }
 0xc36   :  { %v7886_v41 = vadd.f32 %v7882_v48, %v7880_v1  ;;  %v14189_v48 = vmov 1966171168  }
 0xc37   :  { %v7895_v49 = vadd.f32 %v7883_v10, %v7881_v58  ;;  %v7920_v58 = vunpack.c.l.s4 %v14189_v48  ;;  %v14043_v48 = vld [vmem:[%s18653_s13 + $0xb8] sm:$0xff]  }
 0xc39   :  { %v18063_v30 = vpop.f32.mrb[232].mxu0 }
 0xc3a   :  { %v7861_v20 = vsel %vm366_vm1, %v18063_v30, 0.0  ;;  %v7884_v6 = vmul.f32 %v18063_v30, %v18063_v30  ;;  %v18069_v27 = vpop.f32.mrb[233].mxu0 }
 0xc3b   :  { %v7862_v0 = vadd.f32 %v7861_v20, %v7860_v55  ;;  %v7870_v23 = vsel %vm366_vm1, %v18069_v27, 0.0  ;;  %v7885_v37 = vmul.f32 %v18069_v27, %v18069_v27  ;;  %v7849_v34 = vpop.f32.mrb[234].mxu0 }
 0xc3c   :  { %v7887_v15 = vsel %vm366_vm1, %v7884_v6, 0.0  ;;  %v7871_v63 = vadd.f32 %v7870_v23, %v7869_v13  ;;  %v7850_v53 = vpop.f32.mrb[235].mxu0  ;;  %v7921_v13 = vunpack.c.0.s8 %v7920_v58  ;;  %v7858_v6 = vld [vmem:[%s18654_s10] sm:$0x3] }
 0xc3d   :  { %v7863_v43 = vrot.slane %v7862_v0, 4  ;;  %v7888_v50 = vadd.f32 %v7887_v15, %v7886_v41  ;;  %v7896_v19 = vsel %vm366_vm1, %v7885_v37, 0.0  ;;  %v14044_v58 = vld [vmem:[%s18653_s13 + $0x40] sm:$0xff]  }
 0xc3e   :  { %v7872_v17 = vrot.slane %v7871_v63, 4  ;;  %v7897_v4 = vadd.f32 %v7896_v19, %v7895_v49  ;;  %v7924_v41 = vsub.s32 %v7921_v13, %v18784_v9  ;;  %v14039_v9 = vld [vmem:[%s18653_s13 + $0xa8] sm:$0xff]   ;;  %v14076_v13 = vld [vmem:[%s18653_s13 + $0x140] sm:$0xff]  }
 0xc3f   :  { %v7864_v39 = vadd.f32 %v7863_v43, %v7862_v0  ;;  %v7889_v7 = vrot.slane %v7888_v50, 4  ;;  %12303 = vmatprep.subr.bf16.mxu0 %v14076_v13  ;;  %v14089_v13 = vld [vmem:[%s18653_s13 + $0x130] sm:$0xff]  }
 0xc40   :  { %v7873_v8 = vadd.f32 %v7872_v17, %v7871_v63  ;;  %v7898_v12 = vrot.slane %v7897_v4, 4 }
 0xc41   :  { %v7865_v16 = vrot.slane %v7864_v39, 2  ;;  %v7890_v29 = vadd.f32 %v7889_v7, %v7888_v50 }
 0xc42   :  { %v7874_v35 = vrot.slane %v7873_v8, 2  ;;  %v7899_v25 = vadd.f32 %v7898_v12, %v7897_v4 }
 0xc43   :  { %v7866_v26 = vadd.f32 %v7865_v16, %v7864_v39  ;;  %v7891_v46 = vrot.slane %v7890_v29, 2 }
 0xc44   :  { %v7875_v51 = vadd.f32 %v7874_v35, %v7873_v8  ;;  %v7900_v31 = vrot.slane %v7899_v25, 2  ;;  %v7859_v8 = vld [vmem:[%s18655_s11] sm:$0x3] }
 0xc45   :  { %v7867_v60 = vrot.slane %v7866_v26, 1  ;;  %v7892_v2 = vadd.f32 %v7891_v46, %v7890_v29 }
 0xc46   :  { %v7876_v36 = vrot.slane %v7875_v51, 1  ;;  %v7901_v28 = vadd.f32 %v7900_v31, %v7899_v25 }
 0xc47   :  { %v7868_v24 = vadd.f32 %v7867_v60, %v7866_v26  ;;  %v7893_v47 = vrot.slane %v7892_v2, 1 }
 0xc48   :  { %v7877_v61 = vadd.f32 %v7876_v36, %v7875_v51  ;;  %v7902_v59 = vrot.slane %v7901_v28, 1 }
 0xc49   :  { %v7878_v62 = vmul.f32 0.055555556, %v7868_v24  ;;  %v7894_v14 = vadd.f32 %v7893_v47, %v7892_v2 }
 0xc4a   :  { %v7879_v5 = vmul.f32 0.055555556, %v7877_v61  ;;  %v7903_v56 = vadd.f32 %v7902_v59, %v7901_v28  ;;  %v8000_v59 = vld [vmem:[%s18656_s12] sm:$0x1] }
 0xc4b   :  { %v7904_v44 = vmul.f32 0.055555556, %v7894_v14  ;;  %v7906_v57 = vmul.f32 %v7878_v62, %v7878_v62  ;;  %v11100_v14 = vld [vmem:[%s18656_s12 + $0x1] sm:$0x1] }
 0xc4c   :  { %v7905_v52 = vmul.f32 0.055555556, %v7903_v56  ;;  %v7907_v42 = vmul.f32 %v7879_v5, %v7879_v5  ;;  %v14030_v56 = vld [vmem:[%s18653_s13 + $0xc8] sm:$0xff]  }
 0xc4d   :  { %v7908_v21 = vsub.f32 %v7904_v44, %v7906_v57  ;;  %v14031_v44 = vld [vmem:[%s18653_s13 + $0x88] sm:$0xff]   ;;  %v14032_v57 = vld [vmem:[%s18653_s13 + $0xd0] sm:$0xff]  }
 0xc4e   :  { %v7909_v38 = vsub.f32 %v7905_v52, %v7907_v42  ;;  %v14033_v52 = vld [vmem:[%s18653_s13 + $0x90] sm:$0xff]   ;;  %v14034_v42 = vld [vmem:[%s18653_s13 + $0xd8] sm:$0xff]  }
 0xc4f   :  { %v7910_v54 = vmax.f32 %v7908_v21, 0.0  ;;  %v14035_v21 = vld [vmem:[%s18653_s13 + $0x98] sm:$0xff]  }
 0xc50   :  { %v7911_v11 = vmax.f32 %v7909_v38, 0.0  ;;  %v14036_v38 = vld [vmem:[%s18653_s13 + $0xe0] sm:$0xff]  }
 0xc51   :  { %v7912_v1 = vadd.f32 1e-05, %v7910_v54  ;;  %v14037_v54 = vld [vmem:[%s18653_s13 + $0xa0] sm:$0xff]  }
 0xc52   :  { %v7913_v55 = vadd.f32 1e-05, %v7911_v11  ;;  %v14038_v11 = vld [vmem:[%s18653_s13 + $0xe8] sm:$0xff]  }
 0xc53   :  { %14176 = vrsqrt.f32 %v7912_v1  ;;  %v14041_v1 = vld [vmem:[%s18653_s13 + $0xb0] sm:$0xff]  }
 0xc54   :  { %14178 = vrsqrt.f32 %v7913_v55  ;;  %v14042_v55 = vld [vmem:[%s18653_s13 + $0xf8] sm:$0xff]  }
 0xc5d   :  { %v14177_v10 = vpop.eup %14176 }
 0xc5e   :  { %v14179_v49 = vpop.eup %14178 }
 0xc5f   :  { %v7918_v20 = vcombine.low %v14177_v10, %v14179_v49  ;;  %v14077_v10 = vld [vmem:[%s18653_s13 + $0x100] sm:$0xff]   ;;  %v14079_v49 = vld [vmem:[%s18653_s13 + $0x108] sm:$0xff]  }
 0xc60   :  { %12304 = vmatpush3.bf16.msra.mxu0 %v14077_v10  ;;  %v14090_v10 = vld [vmem:[%s18653_s13 + $0x178] sm:$0xff]  }
 0xc61   :  { %v7925_v0 = vrot.slane %v7918_v20, %v7924_v41  ;;  %v14080_v20 = vld [vmem:[%s18653_s13 + $0x150] sm:$0xff]  }
 0xc63   :  { %v7932_v23 = vrot.slane %v7925_v0, %v7924_v41 }
 0xc65   :  { %v7934_v37 = vmul.f32 %v7932_v23, %v7858_v6  ;;  %v14081_v6 = vld [vmem:[%s18653_s13 + $0x110] sm:$0xff]  }
 0xc67   :  { %v7939_v34 = vrot.slane %v7934_v37, %v18783_v18  ;;  %v7943_v15 = vrot.slane %v7934_v37, %v7942_v32 }
 0xc69   :  { %v7946_v63 = vmul.f32 %v7939_v34, %v7878_v62  ;;  %v7947_v53 = vmul.f32 %v7943_v15, %v7879_v5  ;;  %v7967_v43 = vmul.f32 %v7939_v34, %v18043_v33  ;;  %v7968_v50 = vmul.f32 %v7943_v15, %v18045_v45  ;;  %v14028_v62 = vld [vmem:[%s18653_s13 + $0xc0] sm:$0xff]  }
 0xc6a   :  { %v7969_v19 = vmul.f32 %v7939_v34, %v18047_v3  ;;  %v7970_v17 = vmul.f32 %v7943_v15, %v18055_v40  ;;  %v7971_v4 = vmul.f32 %v7939_v34, %v18063_v30  ;;  %v7972_v39 = vmul.f32 %v7943_v15, %v18069_v27  ;;  %v14029_v5 = vld [vmem:[%s18653_s13 + $0x80] sm:$0xff]  }
 0xc6b   :  { %v7950_v7 = vcombine.low %v7946_v63, %v7947_v53 }
 0xc6d   :  { %v7957_v12 = vrot.slane %v7950_v7, %v7924_v41  ;;  %v14047_v7 = vld [vmem:[%s18653_s13 + $0x8] sm:$0xff]  }
 0xc6f   :  { %v7964_v16 = vrot.slane %v7957_v12, %v7924_v41  ;;  %v14078_v41 = vld [vmem:[%s18653_s13 + $0x148] sm:$0xff]   ;;  %v14049_v12 = vld [vmem:[%s18653_s13 + $0x10] sm:$0xff]  }
 0xc70   :  { %12305 = vmatprep.subr.bf16.mxu0 %v14078_v41  ;;  %v14091_v41 = vld [vmem:[%s18653_s13 + $0x138] sm:$0xff]  }
 0xc71   :  { %v7966_v29 = vsub.f32 %v7859_v8, %v7964_v16  ;;  %12306 = vmatpush3.bf16.msra.mxu0 %v14079_v49  ;;  %v14048_v8 = vld [vmem:[%s18653_s13 + $0x50] sm:$0xff]   ;;  %v14050_v16 = vld [vmem:[%s18653_s13 + $0x58] sm:$0xff]   ;;  %v14092_v49 = vld [vmem:[%s18653_s13 + $0x240] sm:$0xff]  }
 0xc72   :  { %12307 = vmatprep.subr.bf16.mxu0 %v14080_v20 }
 0xc73   :  { %v7977_v33 = vrot.slane %v7966_v29, %v18783_v18  ;;  %v7981_v35 = vrot.slane %v7966_v29, %v7942_v32  ;;  %v14040_v32 = vld [vmem:[%s18653_s13 + $0xf0] sm:$0xff]   ;;  %v14051_v29 = vld [vmem:[%s18653_s13 + $0x18] sm:$0xff]  }
 0xc75   :  { %v7984_v45 = vadd.f32 %v7977_v33, %v7967_v43  ;;  %v7985_v25 = vadd.f32 %v7981_v35, %v7968_v50  ;;  %v7986_v3 = vadd.f32 %v7977_v33, %v7969_v19  ;;  %v7987_v26 = vadd.f32 %v7981_v35, %v7970_v17  ;;  %12308 = vmatpush3.bf16.msra.mxu0 %v14081_v6  ;;  %v14045_v43 = vld [vmem:[%s18653_s13] sm:$0xff]   ;;  %v14046_v17 = vld [vmem:[%s18653_s13 + $0x48] sm:$0xff]  }
 0xc76   :  { %v7988_v40 = vadd.f32 %v7977_v33, %v7971_v4  ;;  %v7989_v46 = vadd.f32 %v7981_v35, %v7972_v39  ;;  %v14052_v33 = vld [vmem:[%s18653_s13 + $0x60] sm:$0xff]  }
 0xc77   :  { %v7990_v30 = vmax.f32 %v7984_v45, 0.0  ;;  %v7991_v51 = vmax.f32 %v7985_v25, 0.0  ;;  %v7992_v27 = vmax.f32 %v7986_v3, 0.0  ;;  %v7993_v31 = vmax.f32 %v7987_v26, 0.0  ;;  %v14053_v35 = vld [vmem:[%s18653_s13 + $0x20] sm:$0xff]   ;;  %v14054_v45 = vld [vmem:[%s18653_s13 + $0x68] sm:$0xff]  }
 0xc78   :  { %v7994_v60 = vmax.f32 %v7988_v40, 0.0  ;;  %v7995_v2 = vmax.f32 %v7989_v46, 0.0  ;;  %v14055_v25 = vld [vmem:[%s18653_s13 + $0x28] sm:$0xff]   ;;  %v14056_v3 = vld [vmem:[%s18653_s13 + $0x70] sm:$0xff]   ;;  %v14058_v40 = vld [vmem:[%s18653_s13 + $0x78] sm:$0xff]  }
 0xc79   :  { %v18093_v36 = vpack.c.bf16 %v7992_v27, %v7990_v30  ;;  %v18095_v28 = vpack.c.bf16 %v7993_v31, %v7991_v51  ;;  %v14057_v26 = vld [vmem:[%s18653_s13 + $0x30] sm:$0xff]   ;;  %v14059_v46 = vld [vmem:[%s18653_s13 + $0x38] sm:$0xff]   ;;  %v11167_v51 = vld [vmem:[%s18656_s12 + $0x2] sm:$0x1] }
 0xc7a   :  { %v7998_v24 = vpack.c.bf16 %v7994_v60, %v7994_v60  ;;  %v18097_v47 = vpack.c.bf16 %v7995_v2, %v7995_v2  ;;  %v14060_v27 = vld [vmem:[%s18653_s13 + $0x1c0] sm:$0xff]   ;;  %v14062_v2 = vld [vmem:[%s18653_s13 + $0x1c8] sm:$0xff]  }
 0xc7b   :  { %8011 = vmatprep.subr.bf16.mxu1 %v18095_v28  ;;  %v11218_v31 = vld [vmem:[%s18656_s12 + $0x3] sm:$0x1] }
 0xc7c   :  { %8012 = vmatpush1.bf16.msra.mxu1 %v18093_v36  ;;  %v18104_v61 = vsel %vm1330_vm5, %v7998_v24, 0  ;;  %v14061_v60 = vld [vmem:[%s18653_s13 + $0x180] sm:$0xff]   ;;  %v14063_v24 = vld [vmem:[%s18653_s13 + $0x188] sm:$0xff]  }
 0xc7d   :  { %11098 = vmatprep.subr.msk.bf16.mxu1 %vm1330_vm5, %v18097_v47 }
 0xc80   :  { %8014 = vmatpush1.bf16.msra.mxu1 %v18104_v61 }
 0xc81   :  { %8091 = vmatprep.subr.bf16.mxu1 %v18095_v28 }
 0xc83   :  { %11099 = vmatmul.mubr.msk.bf16.vlgmr.msra.gmra.mrb[200].mxu1 %vm8001_vm8, %v8000_v59  ;;  %v14064_v59 = vld [vmem:[%s18653_s13 + $0x1d0] sm:$0xff]  }
 0xc84   :  { %8092 = vmatpush1.bf16.msra.mxu1 %v18093_v36  ;;  %8123 = vmatprep.mubr.bf16.mxu1 %v18757_v22 }
 0xc85   :  { %11101 = vmatprep.subr.msk.bf16.mxu1 %vm1330_vm5, %v18097_v47 }
 0xc88   :  { %8094 = vmatpush1.bf16.msra.mxu1 %v18104_v61 }
 0xc89   :  { %12259 = vmatprep.subr.bf16.mxu1 %v14028_v62  ;;  %v14065_v62 = vld [vmem:[%s18653_s13 + $0x190] sm:$0xff]  }
 0xc8b   :  { %11102 = vmatmul.mubr.msk.bf16.vlgmr.msra.gmra.mrb[204].mxu1 %vm8001_vm8, %v11100_v14  ;;  %v14066_v14 = vld [vmem:[%s18653_s13 + $0x1d8] sm:$0xff]  }
 0xc8c   :  { %12260 = vmatpush3.bf16.msra.mxu1 %v14029_v5  ;;  %v14067_v5 = vld [vmem:[%s18653_s13 + $0x198] sm:$0xff]  }
 0xc8d   :  { %12261 = vmatprep.subr.bf16.mxu1 %v14030_v56  ;;  %v14068_v56 = vld [vmem:[%s18653_s13 + $0x1e0] sm:$0xff]  }
 0xc90   :  { %12262 = vmatpush3.bf16.msra.mxu1 %v14031_v44  ;;  %v14069_v44 = vld [vmem:[%s18653_s13 + $0x1a0] sm:$0xff]  }
 0xc91   :  { %12263 = vmatprep.subr.bf16.mxu1 %v14032_v57  ;;  %v14070_v57 = vld [vmem:[%s18653_s13 + $0x1e8] sm:$0xff]  }
 0xc94   :  { %12264 = vmatpush3.bf16.msra.mxu1 %v14033_v52  ;;  %v14071_v52 = vld [vmem:[%s18653_s13 + $0x1a8] sm:$0xff]  }
 0xc95   :  { %12265 = vmatprep.subr.bf16.mxu1 %v14034_v42  ;;  %v14072_v42 = vld [vmem:[%s18653_s13 + $0x1f0] sm:$0xff]  }
 0xc98   :  { %12266 = vmatpush3.bf16.msra.mxu1 %v14035_v21  ;;  %v14073_v21 = vld [vmem:[%s18653_s13 + $0x1b0] sm:$0xff]  }
 0xc99   :  { %12267 = vmatprep.subr.bf16.mxu1 %v14036_v38  ;;  %v14074_v38 = vld [vmem:[%s18653_s13 + $0x1f8] sm:$0xff]  }
 0xc9c   :  { %12268 = vmatpush3.bf16.msra.mxu1 %v14037_v54  ;;  %v14075_v54 = vld [vmem:[%s18653_s13 + $0x1b8] sm:$0xff]  }
 0xc9d   :  { %12269 = vmatprep.subr.bf16.mxu1 %v14038_v11  ;;  %v14082_v11 = vld [vmem:[%s18653_s13 + $0x158] sm:$0xff]  }
 0xc9e   :  { %12309 = vmatprep.subr.bf16.mxu0 %v14082_v11  ;;  %v14115_v11 = vld [vmem:[%s18653_s13 + $0x298] sm:$0xff]  }
 0xca0   :  { %12270 = vmatpush3.bf16.msra.mxu1 %v14039_v9  ;;  %v14083_v9 = vld [vmem:[%s18653_s13 + $0x118] sm:$0xff]  }
 0xca1   :  { %12271 = vmatprep.subr.bf16.mxu1 %v14040_v32  ;;  %v14084_v32 = vld [vmem:[%s18653_s13 + $0x160] sm:$0xff]   ;;  %12310 = vmatpush3.bf16.msra.mxu0 %v14083_v9 }
 0xca2   :  { %12311 = vmatprep.subr.bf16.mxu0 %v14084_v32  ;;  %v14116_v9 = vld [vmem:[%s18653_s13 + $0x2e0] sm:$0xff]  }
 0xca3   :  { %v14117_v32 = vld [vmem:[%s18653_s13 + $0x2a0] sm:$0xff]  }
 0xca4   :  { %12272 = vmatpush3.bf16.msra.mxu1 %v14041_v1  ;;  %v14085_v1 = vld [vmem:[%s18653_s13 + $0x120] sm:$0xff]  }
 0xca5   :  { %12273 = vmatprep.subr.bf16.mxu1 %v14042_v55  ;;  %12312 = vmatpush3.bf16.msra.mxu0 %v14085_v1  ;;  %v14086_v55 = vld [vmem:[%s18653_s13 + $0x168] sm:$0xff]  }
 0xca6   :  { %12313 = vmatprep.subr.bf16.mxu0 %v14086_v55  ;;  %v14118_v1 = vld [vmem:[%s18653_s13 + $0x2e8] sm:$0xff]  }
 0xca7   :  { %v14119_v55 = vld [vmem:[%s18653_s13 + $0x2a8] sm:$0xff]  }
 0xca8   :  { %12274 = vmatpush3.bf16.msra.mxu1 %v14043_v48  ;;  %v14087_v48 = vld [vmem:[%s18653_s13 + $0x128] sm:$0xff]  }
 0xca9   :  { %12281 = vmatprep.subr.bf16.mxu1 %v14044_v58  ;;  %12314 = vmatpush3.bf16.msra.mxu0 %v14087_v48  ;;  %v14088_v58 = vld [vmem:[%s18653_s13 + $0x170] sm:$0xff]  }
 0xcaa   :  { %12315 = vmatprep.subr.bf16.mxu0 %v14088_v58  ;;  %v14120_v48 = vld [vmem:[%s18653_s13 + $0x2f0] sm:$0xff]  }
 0xcab   :  { %v14121_v58 = vld [vmem:[%s18653_s13 + $0x2b0] sm:$0xff]  }
 0xcad   :  { %12316 = vmatpush3.bf16.msra.mxu0 %v14089_v13  ;;  %v14122_v13 = vld [vmem:[%s18653_s13 + $0x2f8] sm:$0xff]  }
 0xcae   :  { %12317 = vmatprep.subr.bf16.mxu0 %v14090_v10  ;;  %v14123_v10 = vld [vmem:[%s18653_s13 + $0x2b8] sm:$0xff]  }
 0xcb1   :  { %12318 = vmatpush3.bf16.msra.mxu0 %v14091_v41 }
 0xcb2   :  { %12347 = vmatprep.subr.bf16.mxu0 %v14092_v49 }
 0xd56   :  { %v8045_v0 = vpop.f32.mrb[200].mxu1 }
 0xd57   :  { %v8047_v23 = vpop.f32.mrb[201].mxu1  ;;  %v8052_v30 = vpack.c.bf16 %v8045_v0, %v8045_v0 }
 0xd58   :  { %v8049_v37 = vpop.f32.mrb[202].mxu1  ;;  %v8053_v39 = vpack.c.bf16 %v8047_v23, %v8047_v23 }
 0xd59   :  { %v8050_v34 = vpop.f32.mrb[203].mxu1 }
 0xd5e   :  { %v8125_v15 = vpop.f32.mrb[204].mxu1 }
 0xd5f   :  { %v8127_v63 = vpop.f32.mrb[205].mxu1  ;;  %v8132_v19 = vpack.c.bf16 %v8125_v15, %v8125_v15 }
 0xd60   :  { %v8133_v53 = vpack.c.bf16 %v8127_v63, %v8127_v63  ;;  %v8129_v50 = vpop.f32.mrb[206].mxu1 }
 0xd61   :  { %v8130_v4 = vpop.f32.mrb[207].mxu1 }
 0xd62   :  { %8295 = vmatprep.mubr.bf16.mxu1 %v8133_v53 }
 0xd63   :  { %8296 = vmatmul.mubr.bf16.vlgmr.msra.gmra.mrb[208].mxu1 %v8132_v19 }
 0xd64   :  { %12282 = vmatpush3.bf16.msra.mxu1 %v14045_v43  ;;  %8431 = vmatprep.mubr.bf16.mxu1 %v8053_v39  ;;  %v14093_v39 = vld [vmem:[%s18653_s13 + $0x200] sm:$0xff]  }
 0xd65   :  { %12283 = vmatprep.subr.bf16.mxu1 %v14046_v17 }
 0xd68   :  { %12284 = vmatpush3.bf16.msra.mxu1 %v14047_v7 }
 0xd69   :  { %12285 = vmatprep.subr.bf16.mxu1 %v14048_v8 }
 0xd6c   :  { %12286 = vmatpush3.bf16.msra.mxu1 %v14049_v12 }
 0xd6d   :  { %12287 = vmatprep.subr.bf16.mxu1 %v14050_v16  ;;  %v14094_v16 = vld [vmem:[%s18653_s13 + $0x248] sm:$0xff]  }
 0xd70   :  { %12288 = vmatpush3.bf16.msra.mxu1 %v14051_v29  ;;  %v14095_v29 = vld [vmem:[%s18653_s13 + $0x208] sm:$0xff]  }
 0xd71   :  { %12289 = vmatprep.subr.bf16.mxu1 %v14052_v33  ;;  %v14096_v33 = vld [vmem:[%s18653_s13 + $0x250] sm:$0xff]  }
 0xd74   :  { %12290 = vmatpush3.bf16.msra.mxu1 %v14053_v35 }
 0xd75   :  { %12291 = vmatprep.subr.bf16.mxu1 %v14054_v45 }
 0xd78   :  { %12292 = vmatpush3.bf16.msra.mxu1 %v14055_v25 }
 0xd79   :  { %12293 = vmatprep.subr.bf16.mxu1 %v14056_v3  ;;  %v14097_v3 = vld [vmem:[%s18653_s13 + $0x210] sm:$0xff]  }
 0xd7c   :  { %12294 = vmatpush3.bf16.msra.mxu1 %v14057_v26 }
 0xd7d   :  { %12295 = vmatprep.subr.bf16.mxu1 %v14058_v40 }
 0xd80   :  { %12296 = vmatpush3.bf16.msra.mxu1 %v14059_v46  ;;  %v14098_v46 = vld [vmem:[%s18653_s13 + $0x258] sm:$0xff]  }
 0xd81   :  { %8444 = vmatprep.subr.bf16.mxu1 %v18095_v28 }
 0xd83   :  { %8432 = vmatmul.mubr.bf16.vlgmr.msra.gmra.mrb[212].mxu1 %v8052_v30 }
 0xd84   :  { %8445 = vmatpush1.bf16.msra.mxu1 %v18093_v36  ;;  %8476 = vmatprep.mubr.bf16.mxu1 %v18757_v22 }
 0xd85   :  { %11168 = vmatprep.subr.msk.bf16.mxu1 %vm1330_vm5, %v18097_v47 }
 0xd88   :  { %8447 = vmatpush1.bf16.msra.mxu1 %v18104_v61 }
 0xd89   :  { %8662 = vmatprep.subr.bf16.mxu1 %v18095_v28 }
 0xd8b   :  { %11169 = vmatmul.mubr.msk.bf16.vlgmr.msra.gmra.mrb[216].mxu1 %vm8001_vm8, %v11167_v51  ;;  %v14099_v51 = vld [vmem:[%s18653_s13 + $0x218] sm:$0xff]  }
 0xd8c   :  { %8663 = vmatpush1.bf16.msra.mxu1 %v18093_v36  ;;  %8694 = vmatprep.mubr.bf16.mxu1 %v18757_v22 }
 0xd8d   :  { %11219 = vmatprep.subr.msk.bf16.mxu1 %vm1330_vm5, %v18097_v47 }
 0xd90   :  { %8665 = vmatpush1.bf16.msra.mxu1 %v18104_v61 }
 0xd91   :  { %12325 = vmatprep.subr.bf16.mxu1 %v14060_v27  ;;  %v14100_v27 = vld [vmem:[%s18653_s13 + $0x260] sm:$0xff]  }
 0xd93   :  { %11220 = vmatmul.mubr.msk.bf16.vlgmr.msra.gmra.mrb[220].mxu1 %vm8001_vm8, %v11218_v31  ;;  %v11269_v31 = vld [vmem:[%s18656_s12 + $0x4] sm:$0x1] }
 0xd94   :  { %12326 = vmatpush3.bf16.msra.mxu1 %v14061_v60  ;;  %v14101_v60 = vld [vmem:[%s18653_s13 + $0x220] sm:$0xff]  }
 0xd95   :  { %12327 = vmatprep.subr.bf16.mxu1 %v14062_v2  ;;  %v14102_v2 = vld [vmem:[%s18653_s13 + $0x268] sm:$0xff]  }
 0xd98   :  { %12328 = vmatpush3.bf16.msra.mxu1 %v14063_v24  ;;  %v14103_v24 = vld [vmem:[%s18653_s13 + $0x228] sm:$0xff]  }
 0xd99   :  { %12329 = vmatprep.subr.bf16.mxu1 %v14064_v59  ;;  %v14104_v59 = vld [vmem:[%s18653_s13 + $0x270] sm:$0xff]  }
 0xd9c   :  { %12330 = vmatpush3.bf16.msra.mxu1 %v14065_v62  ;;  %v14105_v62 = vld [vmem:[%s18653_s13 + $0x2c0] sm:$0xff]  }
 0xd9d   :  { %12331 = vmatprep.subr.bf16.mxu1 %v14066_v14  ;;  %v14106_v14 = vld [vmem:[%s18653_s13 + $0x230] sm:$0xff]  }
 0xda0   :  { %12332 = vmatpush3.bf16.msra.mxu1 %v14067_v5  ;;  %v11320_v5 = vld [vmem:[%s18656_s12 + $0x5] sm:$0x1] }
 0xda1   :  { %12333 = vmatprep.subr.bf16.mxu1 %v14068_v56  ;;  %v14107_v56 = vld [vmem:[%s18653_s13 + $0x280] sm:$0xff]  }
 0xda4   :  { %12334 = vmatpush3.bf16.msra.mxu1 %v14069_v44  ;;  %v14108_v44 = vld [vmem:[%s18653_s13 + $0x278] sm:$0xff]  }
 0xda5   :  { %12335 = vmatprep.subr.bf16.mxu1 %v14070_v57  ;;  %v14109_v57 = vld [vmem:[%s18653_s13 + $0x2c8] sm:$0xff]  }
 0xda8   :  { %12336 = vmatpush3.bf16.msra.mxu1 %v14071_v52  ;;  %v14110_v52 = vld [vmem:[%s18653_s13 + $0x238] sm:$0xff]  }
 0xda9   :  { %12337 = vmatprep.subr.bf16.mxu1 %v14072_v42  ;;  %v14111_v42 = vld [vmem:[%s18653_s13 + $0x288] sm:$0xff]  }
 0xdac   :  { %12338 = vmatpush3.bf16.msra.mxu1 %v14073_v21  ;;  %v14112_v21 = vld [vmem:[%s18653_s13 + $0x2d0] sm:$0xff]  }
 0xdad   :  { %12339 = vmatprep.subr.bf16.mxu1 %v14074_v38  ;;  %v14113_v38 = vld [vmem:[%s18653_s13 + $0x290] sm:$0xff]  }
 0xdb0   :  { %12340 = vmatpush3.bf16.msra.mxu1 %v14075_v54  ;;  %v14114_v54 = vld [vmem:[%s18653_s13 + $0x2d8] sm:$0xff]  }
 0xdb1   :  { %8880 = vmatprep.subr.bf16.mxu1 %v18095_v28 }
 0xe36   :  { %v12275_v20 = vpop.f32.mrb[208].mxu1 }
 0xe37   :  { %v12276_v6 = vpop.f32.mrb[209].mxu1 }
 0xe38   :  { %v12277_v0 = vadd.f32 %v12276_v6, %v12275_v20  ;;  %v12278_v23 = vpop.f32.mrb[210].mxu1 }
 0xe39   :  { %v12279_v37 = vpop.f32.mrb[211].mxu1 }
 0xe56   :  { %v12297_v34 = vpop.f32.mrb[212].mxu1 }
 0xe57   :  { %v12298_v15 = vpop.f32.mrb[213].mxu1 }
 0xe58   :  { %v12299_v63 = vadd.f32 %v12298_v15, %v12297_v34  ;;  %v12300_v53 = vpop.f32.mrb[214].mxu1 }
 0xe59   :  { %v12301_v43 = vpop.f32.mrb[215].mxu1 }
 0xe5a   :  { %v18337_v50 = vadd.f32 %v12299_v63, %v12277_v0 }
 0xe5e   :  { %v8478_v19 = vpop.f32.mrb[216].mxu1 }
 0xe5f   :  { %v8480_v17 = vpop.f32.mrb[217].mxu1  ;;  %v8485_v8 = vpack.c.bf16 %v8478_v19, %v8478_v19 }
 0xe60   :  { %v8486_v4 = vpack.c.bf16 %v8480_v17, %v8480_v17  ;;  %v8482_v7 = vpop.f32.mrb[218].mxu1 }
 0xe61   :  { %v8483_v12 = vpop.f32.mrb[219].mxu1 }
 0xe62   :  { %8648 = vmatprep.mubr.bf16.mxu0 %v8486_v4 }
 0xe63   :  { %8649 = vmatmul.mubr.bf16.vlgmr.msra.gmra.mrb[236].mxu0 %v8485_v8 }
 0xe64   :  { %12348 = vmatpush3.bf16.msra.mxu0 %v14093_v39 }
 0xe65   :  { %12349 = vmatprep.subr.bf16.mxu0 %v14094_v16 }
 0xe66   :  { %v8696_v35 = vpop.f32.mrb[220].mxu1 }
 0xe67   :  { %v8698_v45 = vpop.f32.mrb[221].mxu1  ;;  %v8703_v40 = vpack.c.bf16 %v8696_v35, %v8696_v35  ;;  %v11371_v35 = vld [vmem:[%s18656_s12 + $0x6] sm:$0x1] }
 0xe68   :  { %v8704_v25 = vpack.c.bf16 %v8698_v45, %v8698_v45  ;;  %12350 = vmatpush3.bf16.msra.mxu0 %v14095_v29  ;;  %v8700_v26 = vpop.f32.mrb[222].mxu1  ;;  %v14125_v45 = vld [vmem:[%s18653_s13 + $0x300] sm:$0xff]  }
 0xe69   :  { %12351 = vmatprep.subr.bf16.mxu0 %v14096_v33  ;;  %v8701_v30 = vpop.f32.mrb[223].mxu1 }
 0xe6a   :  { %8866 = vmatprep.mubr.bf16.mxu1 %v8704_v25  ;;  %v14140_v30 = vld [vmem:[%s18653_s13 + $0x3c0] sm:$0xff]  }
 0xe6b   :  { %8867 = vmatmul.mubr.bf16.vlgmr.msra.gmra.mrb[224].mxu1 %v8703_v40  ;;  %v14127_v40 = vld [vmem:[%s18653_s13 + $0x308] sm:$0xff]  }
 0xe6c   :  { %8881 = vmatpush1.bf16.msra.mxu1 %v18093_v36  ;;  %12352 = vmatpush3.bf16.msra.mxu0 %v14097_v3  ;;  %v14126_v3 = vld [vmem:[%s18653_s13 + $0x348] sm:$0xff]  }
 0xe6d   :  { %11270 = vmatprep.subr.msk.bf16.mxu1 %vm1330_vm5, %v18097_v47  ;;  %12353 = vmatprep.subr.bf16.mxu0 %v14098_v46  ;;  %v14128_v46 = vld [vmem:[%s18653_s13 + $0x350] sm:$0xff]  }
 0xe6e   :  { %8912 = vmatprep.mubr.bf16.mxu1 %v18757_v22 }
 0xe70   :  { %8883 = vmatpush1.bf16.msra.mxu1 %v18104_v61  ;;  %12354 = vmatpush3.bf16.msra.mxu0 %v14099_v51  ;;  %v14129_v51 = vld [vmem:[%s18653_s13 + $0x310] sm:$0xff]  }
 0xe71   :  { %9098 = vmatprep.subr.bf16.mxu1 %v18095_v28  ;;  %12355 = vmatprep.subr.bf16.mxu0 %v14100_v27  ;;  %v11422_v27 = vld [vmem:[%s18656_s12 + $0x7] sm:$0x1] }
 0xe73   :  { %11271 = vmatmul.mubr.msk.bf16.vlgmr.msra.gmra.mrb[228].mxu1 %vm8001_vm8, %v11269_v31  ;;  %v14141_v31 = vld [vmem:[%s18653_s13 + $0x380] sm:$0xff]  }
 0xe74   :  { %12356 = vmatpush3.bf16.msra.mxu0 %v14101_v60  ;;  %9099 = vmatpush1.bf16.msra.mxu1 %v18093_v36  ;;  %v14130_v60 = vld [vmem:[%s18653_s13 + $0x358] sm:$0xff]  }
 0xe75   :  { %11321 = vmatprep.subr.msk.bf16.mxu1 %vm1330_vm5, %v18097_v47  ;;  %12357 = vmatprep.subr.bf16.mxu0 %v14102_v2  ;;  %v14142_v2 = vld [vmem:[%s18653_s13 + $0x3c8] sm:$0xff]  }
 0xe76   :  { %9130 = vmatprep.mubr.bf16.mxu1 %v18757_v22 }
 0xe78   :  { %12358 = vmatpush3.bf16.msra.mxu0 %v14103_v24  ;;  %9101 = vmatpush1.bf16.msra.mxu1 %v18104_v61  ;;  %v14131_v24 = vld [vmem:[%s18653_s13 + $0x318] sm:$0xff]  }
 0xe79   :  { %12359 = vmatprep.subr.bf16.mxu0 %v14104_v59  ;;  %12369 = vmatprep.subr.bf16.mxu1 %v14105_v62  ;;  %v14143_v59 = vld [vmem:[%s18653_s13 + $0x388] sm:$0xff]   ;;  %v14132_v62 = vld [vmem:[%s18653_s13 + $0x360] sm:$0xff]  }
 0xe7b   :  { %11322 = vmatmul.mubr.msk.bf16.vlgmr.msra.gmra.mrb[232].mxu1 %vm8001_vm8, %v11320_v5  ;;  %v14133_v5 = vld [vmem:[%s18653_s13 + $0x320] sm:$0xff]  }
 0xe7c   :  { %12360 = vmatpush3.bf16.msra.mxu0 %v14106_v14  ;;  %12370 = vmatpush3.bf16.msra.mxu1 %v14107_v56  ;;  %v14144_v14 = vld [vmem:[%s18653_s13 + $0x3d0] sm:$0xff]  }
 0xe7d   :  { %12361 = vmatprep.subr.bf16.mxu0 %v14108_v44  ;;  %12371 = vmatprep.subr.bf16.mxu1 %v14109_v57  ;;  %v14145_v56 = vld [vmem:[%s18653_s13 + $0x390] sm:$0xff]   ;;  %v14134_v44 = vld [vmem:[%s18653_s13 + $0x368] sm:$0xff]  }
 0xe7e   :  { %v14135_v57 = vld [vmem:[%s18653_s13 + $0x328] sm:$0xff]  }
 0xe80   :  { %12362 = vmatpush3.bf16.msra.mxu0 %v14110_v52  ;;  %12372 = vmatpush3.bf16.msra.mxu1 %v14111_v42  ;;  %v14136_v52 = vld [vmem:[%s18653_s13 + $0x370] sm:$0xff]  }
 0xe81   :  { %9316 = vmatprep.subr.bf16.mxu0 %v18095_v28  ;;  %12373 = vmatprep.subr.bf16.mxu1 %v14112_v21  ;;  %v14137_v42 = vld [vmem:[%s18653_s13 + $0x330] sm:$0xff]   ;;  %v14138_v21 = vld [vmem:[%s18653_s13 + $0x378] sm:$0xff]  }
 0xe84   :  { %12374 = vmatpush3.bf16.msra.mxu1 %v14113_v38  ;;  %v14139_v38 = vld [vmem:[%s18653_s13 + $0x338] sm:$0xff]  }
 0xe85   :  { %12375 = vmatprep.subr.bf16.mxu1 %v14114_v54  ;;  %v14146_v54 = vld [vmem:[%s18653_s13 + $0x3d8] sm:$0xff]  }
 0xe88   :  { %12376 = vmatpush3.bf16.msra.mxu1 %v14115_v11  ;;  %v14147_v11 = vld [vmem:[%s18653_s13 + $0x398] sm:$0xff]  }
 0xe89   :  { %12377 = vmatprep.subr.bf16.mxu1 %v14116_v9  ;;  %v14148_v9 = vld [vmem:[%s18653_s13 + $0x3e0] sm:$0xff]  }
 0xe8c   :  { %12378 = vmatpush3.bf16.msra.mxu1 %v14117_v32  ;;  %v14149_v32 = vld [vmem:[%s18653_s13 + $0x3a0] sm:$0xff]  }
 0xe8d   :  { %12379 = vmatprep.subr.bf16.mxu1 %v14118_v1  ;;  %v14151_v1 = vld [vmem:[%s18653_s13 + $0x3a8] sm:$0xff]  }
 0xe90   :  { %12380 = vmatpush3.bf16.msra.mxu1 %v14119_v55  ;;  %v14152_v55 = vld [vmem:[%s18653_s13 + $0x3f0] sm:$0xff]  }
 0xe91   :  { %12381 = vmatprep.subr.bf16.mxu1 %v14120_v48  ;;  %v14153_v48 = vld [vmem:[%s18653_s13 + $0x3b0] sm:$0xff]  }
 0xe94   :  { %12382 = vmatpush3.bf16.msra.mxu1 %v14121_v58  ;;  %v14154_v58 = vld [vmem:[%s18653_s13 + $0x3f8] sm:$0xff]  }
 0xe95   :  { %12383 = vmatprep.subr.bf16.mxu1 %v14122_v13  ;;  %v14155_v13 = vld [vmem:[%s18653_s13 + $0x3b8] sm:$0xff]  }
 0xe98   :  { %12384 = vmatpush3.bf16.msra.mxu1 %v14123_v10 }
 0xe99   :  { %9534 = vmatprep.subr.bf16.mxu1 %v18095_v28 }
 0xf36   :  { %v12319_v41 = vpop.f32.mrb[236].mxu0 }
 0xf37   :  { %v12320_v49 = vpop.f32.mrb[237].mxu0 }
 0xf38   :  { %v12321_v20 = vadd.f32 %v12320_v49, %v12319_v41  ;;  %v12322_v6 = vpop.f32.mrb[238].mxu0 }
 0xf39   :  { %v12323_v0 = vpop.f32.mrb[239].mxu0 }
 0xf3a   :  { %v8656_v23 = vadd.f32 %v12321_v20, %v18337_v50  ;;  %v14124_v50 = vld [vmem:[%s18653_s13 + $0x340] sm:$0xff]  }
 0xf3e   :  { %v12341_v37 = vpop.f32.mrb[224].mxu1 }
 0xf3f   :  { %v12342_v34 = vpop.f32.mrb[225].mxu1 }
 0xf40   :  { %v12343_v15 = vadd.f32 %v12342_v34, %v12341_v37  ;;  %v12344_v63 = vpop.f32.mrb[226].mxu1 }
 0xf41   :  { %v12345_v53 = vpop.f32.mrb[227].mxu1 }
 0xf42   :  { %v18454_v43 = vadd.f32 %v12343_v15, %v8656_v23 }
 0xf46   :  { %v8914_v19 = vpop.f32.mrb[228].mxu1 }
 0xf47   :  { %v8916_v17 = vpop.f32.mrb[229].mxu1  ;;  %v8921_v7 = vpack.c.bf16 %v8914_v19, %v8914_v19 }
 0xf48   :  { %v8922_v4 = vpack.c.bf16 %v8916_v17, %v8916_v17  ;;  %v8918_v39 = vpop.f32.mrb[230].mxu1 }
 0xf49   :  { %v8919_v8 = vpop.f32.mrb[231].mxu1 }
 0xf4a   :  { %9084 = vmatprep.mubr.bf16.mxu0 %v8922_v4 }
 0xf4b   :  { %9085 = vmatmul.mubr.bf16.vlgmr.msra.gmra.mrb[240].mxu0 %v8921_v7 }
 0xf4c   :  { %9317 = vmatpush1.bf16.msra.mxu0 %v18093_v36  ;;  %9348 = vmatprep.mubr.bf16.mxu0 %v18757_v22 }
 0xf4d   :  { %11372 = vmatprep.subr.msk.bf16.mxu0 %vm1330_vm5, %v18097_v47 }
 0xf4e   :  { %v9132_v12 = vpop.f32.mrb[232].mxu1 }
 0xf4f   :  { %v9139_v16 = vpack.c.bf16 %v9132_v12, %v9132_v12  ;;  %v9134_v29 = vpop.f32.mrb[233].mxu1 }
 0xf50   :  { %v9140_v33 = vpack.c.bf16 %v9134_v29, %v9134_v29  ;;  %9319 = vmatpush1.bf16.msra.mxu0 %v18104_v61  ;;  %v9136_v25 = vpop.f32.mrb[234].mxu1 }
 0xf51   :  { %12391 = vmatprep.subr.bf16.mxu0 %v14124_v50  ;;  %v9137_v26 = vpop.f32.mrb[235].mxu1  ;;  %v14161_v25 = vld [vmem:[%s18653_s13 + $0x410] sm:$0xff]  }
 0xf52   :  { %9302 = vmatprep.mubr.bf16.mxu1 %v9140_v33  ;;  %v11473_v33 = vld [vmem:[%s18656_s12 + $0x8] sm:$0x1]  ;;  %v14163_v26 = vld [vmem:[%s18653_s13 + $0x418] sm:$0xff]  }
 0xf53   :  { %9303 = vmatmul.mubr.bf16.vlgmr.msra.gmra.mrb[236].mxu1 %v9139_v16  ;;  %11373 = vmatmul.mubr.msk.bf16.vlgmr.msra.gmra.mrb[244].mxu0 %vm8001_vm8, %v11371_v35 }
 0xf54   :  { %12392 = vmatpush3.bf16.msra.mxu0 %v14125_v45  ;;  %9535 = vmatpush1.bf16.msra.mxu1 %v18093_v36  ;;  %v14160_v45 = vld [vmem:[%s18653_s13 + $0x450] sm:$0xff]  }
 0xf55   :  { %11423 = vmatprep.subr.msk.bf16.mxu1 %vm1330_vm5, %v18097_v47  ;;  %12393 = vmatprep.subr.bf16.mxu0 %v14126_v3  ;;  %v14162_v3 = vld [vmem:[%s18653_s13 + $0x458] sm:$0xff]  }
 0xf56   :  { %9566 = vmatprep.mubr.bf16.mxu1 %v18757_v22 }
 0xf58   :  { %12394 = vmatpush3.bf16.msra.mxu0 %v14127_v40  ;;  %9537 = vmatpush1.bf16.msra.mxu1 %v18104_v61  ;;  %v14164_v40 = vld [vmem:[%s18653_s13 + $0x460] sm:$0xff]  }
 0xf59   :  { %12395 = vmatprep.subr.bf16.mxu0 %v14128_v46  ;;  %12413 = vmatprep.subr.bf16.mxu1 %v14140_v30  ;;  %v14165_v46 = vld [vmem:[%s18653_s13 + $0x420] sm:$0xff]   ;;  %v14166_v30 = vld [vmem:[%s18653_s13 + $0x468] sm:$0xff]  }
 0xf5b   :  { %11424 = vmatmul.mubr.msk.bf16.vlgmr.msra.gmra.mrb[240].mxu1 %vm8001_vm8, %v11422_v27  ;;  %v14168_v27 = vld [vmem:[%s18653_s13 + $0x470] sm:$0xff]  }
 0xf5c   :  { %12396 = vmatpush3.bf16.msra.mxu0 %v14129_v51  ;;  %12414 = vmatpush3.bf16.msra.mxu1 %v14141_v31  ;;  %v14167_v51 = vld [vmem:[%s18653_s13 + $0x428] sm:$0xff]   ;;  %v14169_v31 = vld [vmem:[%s18653_s13 + $0x430] sm:$0xff]  }
 0xf5d   :  { %12397 = vmatprep.subr.bf16.mxu0 %v14130_v60  ;;  %12415 = vmatprep.subr.bf16.mxu1 %v14142_v2  ;;  %v14170_v60 = vld [vmem:[%s18653_s13 + $0x478] sm:$0xff]  }
 0xf5e   :  { %v14171_v2 = vld [vmem:[%s18653_s13 + $0x438] sm:$0xff]  }
 0xf60   :  { %12398 = vmatpush3.bf16.msra.mxu0 %v14131_v24  ;;  %12416 = vmatpush3.bf16.msra.mxu1 %v14143_v59 }
 0xf61   :  { %12399 = vmatprep.subr.bf16.mxu0 %v14132_v62  ;;  %12417 = vmatprep.subr.bf16.mxu1 %v14144_v14 }
 0xf64   :  { %12400 = vmatpush3.bf16.msra.mxu0 %v14133_v5  ;;  %12418 = vmatpush3.bf16.msra.mxu1 %v14145_v56 }
 0xf65   :  { %12401 = vmatprep.subr.bf16.mxu0 %v14134_v44  ;;  %12419 = vmatprep.subr.bf16.mxu1 %v14146_v54 }
 0xf68   :  { %12402 = vmatpush3.bf16.msra.mxu0 %v14135_v57  ;;  %12420 = vmatpush3.bf16.msra.mxu1 %v14147_v11 }
 0xf69   :  { %12403 = vmatprep.subr.bf16.mxu0 %v14136_v52  ;;  %12421 = vmatprep.subr.bf16.mxu1 %v14148_v9 }
 0xf6c   :  { %12404 = vmatpush3.bf16.msra.mxu0 %v14137_v42  ;;  %12422 = vmatpush3.bf16.msra.mxu1 %v14149_v32 }
 0xf6d   :  { %12405 = vmatprep.subr.bf16.mxu0 %v14138_v21 }
 0xf70   :  { %12406 = vmatpush3.bf16.msra.mxu0 %v14139_v38 }
 0xf71   :  { %9752 = vmatprep.subr.bf16.mxu0 %v18095_v28  ;;  %v14150_v28 = vld [vmem:[%s18653_s13 + $0x3e8] sm:$0xff]  }
 0xf72   :  { %12423 = vmatprep.subr.bf16.mxu1 %v14150_v28 }
 0xf73   :  { %12424 = vmatpush3.bf16.msra.mxu1 %v14151_v1 }
 0xf74   :  { %12425 = vmatprep.subr.bf16.mxu1 %v14152_v55  ;;  %v21_v55 = vstv %s18657_s14 }
 0xf75   :  { %22 = vst [vmem:[#allocation2] sm:$0x1] %v21_v55 }
 0xf77   :  { %12426 = vmatpush3.bf16.msra.mxu1 %v14153_v48  ;;  %v23_v48 = vstv %s18658_s15 }
 0xf78   :  { %12427 = vmatprep.subr.bf16.mxu1 %v14154_v58  ;;  %24 = vst [vmem:[#allocation3] sm:$0x1] %v23_v48 }
 0xf7b   :  { %12428 = vmatpush3.bf16.msra.mxu1 %v14155_v13 }
0x101e   :  { %v12363_v10 = vpop.f32.mrb[240].mxu0 }
0x101f   :  { %v12364_v41 = vpop.f32.mrb[241].mxu0 }
0x1020   :  { %v12365_v49 = vadd.f32 %v12364_v41, %v12363_v10  ;;  %v12366_v20 = vpop.f32.mrb[242].mxu0 }
0x1021   :  { %v12367_v6 = vpop.f32.mrb[243].mxu0 }
0x1022   :  { %v9092_v0 = vadd.f32 %v12365_v49, %v18454_v43  ;;  %v14156_v43 = vld [vmem:[%s18653_s13 + $0x440] sm:$0xff]  }
0x1026   :  { %v12385_v23 = vpop.f32.mrb[236].mxu1  ;;  %v9350_v37 = vpop.f32.mrb[244].mxu0 }
0x1027   :  { %v12386_v34 = vpop.f32.mrb[237].mxu1  ;;  %v9352_v15 = vpop.f32.mrb[245].mxu0  ;;  %v9357_v4 = vpack.c.bf16 %v9350_v37, %v9350_v37 }
0x1028   :  { %v12387_v63 = vadd.f32 %v12386_v34, %v12385_v23  ;;  %v9358_v53 = vpack.c.bf16 %v9352_v15, %v9352_v15  ;;  %v12388_v19 = vpop.f32.mrb[238].mxu1  ;;  %v9354_v17 = vpop.f32.mrb[246].mxu0 }
0x1029   :  { %v12389_v39 = vpop.f32.mrb[239].mxu1  ;;  %v9355_v7 = vpop.f32.mrb[247].mxu0 }
0x102a   :  { %v9310_v8 = vadd.f32 %v12387_v63, %v9092_v0  ;;  %9520 = vmatprep.mubr.bf16.mxu0 %v9358_v53 }
0x102b   :  { %9521 = vmatmul.mubr.bf16.vlgmr.msra.gmra.mrb[248].mxu0 %v9357_v4 }
0x102c   :  { %9753 = vmatpush1.bf16.msra.mxu0 %v18093_v36  ;;  %9784 = vmatprep.mubr.bf16.mxu0 %v18757_v22  ;;  %v14157_v22 = vld [vmem:[%s18653_s13 + $0x400] sm:$0xff]  }
0x102d   :  { %11474 = vmatprep.subr.msk.bf16.mxu0 %vm1330_vm5, %v18097_v47  ;;  %v14158_v47 = vld [vmem:[%s18653_s13 + $0x448] sm:$0xff]  }
0x102e   :  { %v9568_v50 = vpop.f32.mrb[240].mxu1 }
0x102f   :  { %v9575_v12 = vpack.c.bf16 %v9568_v50, %v9568_v50  ;;  %v9570_v16 = vpop.f32.mrb[241].mxu1 }
0x1030   :  { %v9576_v29 = vpack.c.bf16 %v9570_v16, %v9570_v16  ;;  %9755 = vmatpush1.bf16.msra.mxu0 %v18104_v61  ;;  %v9572_v36 = vpop.f32.mrb[242].mxu1  ;;  %v14159_v61 = vld [vmem:[%s18653_s13 + $0x408] sm:$0xff]  }
0x1031   :  { %12435 = vmatprep.subr.bf16.mxu0 %v14156_v43  ;;  %v9573_v35 = vpop.f32.mrb[243].mxu1  ;;  %v9965_v36 = vld [vmem:[#allocation2] sm:$0x1] }
0x1032   :  { %9738 = vmatprep.mubr.bf16.mxu1 %v9576_v29 }
0x1033   :  { %9739 = vmatmul.mubr.bf16.vlgmr.msra.gmra.mrb[244].mxu1 %v9575_v12  ;;  %11475 = vmatmul.mubr.msk.bf16.vlgmr.msra.gmra.mrb[252].mxu0 %vm8001_vm8, %v11473_v33 }
0x1034   :  { %12436 = vmatpush3.bf16.msra.mxu0 %v14157_v22 }
0x1035   :  { %12437 = vmatprep.subr.bf16.mxu0 %v14158_v47 }
0x1038   :  { %12438 = vmatpush3.bf16.msra.mxu0 %v14159_v61  ;;  %v9966_v61 = vld [vmem:[#allocation3] sm:$0x1] }
0x1039   :  { %12439 = vmatprep.subr.bf16.mxu0 %v14160_v45 }
0x103c   :  { %12440 = vmatpush3.bf16.msra.mxu0 %v14161_v25 }
0x103d   :  { %12441 = vmatprep.subr.bf16.mxu0 %v14162_v3 }
0x1040   :  { %12442 = vmatpush3.bf16.msra.mxu0 %v14163_v26 }
0x1041   :  { %12443 = vmatprep.subr.bf16.mxu0 %v14164_v40 }
0x1044   :  { %12444 = vmatpush3.bf16.msra.mxu0 %v14165_v46 }
0x1045   :  { %12445 = vmatprep.subr.bf16.mxu0 %v14166_v30 }
0x1048   :  { %12446 = vmatpush3.bf16.msra.mxu0 %v14167_v51 }
0x1049   :  { %12447 = vmatprep.subr.bf16.mxu0 %v14168_v27 }
0x104c   :  { %12448 = vmatpush3.bf16.msra.mxu0 %v14169_v31 }
0x104d   :  { %12449 = vmatprep.subr.bf16.mxu0 %v14170_v60 }
0x1050   :  { %12450 = vmatpush3.bf16.msra.mxu0 %v14171_v2 }
0x10fe   :  { %v12407_v24 = vpop.f32.mrb[248].mxu0 }
0x10ff   :  { %v12408_v59 = vpop.f32.mrb[249].mxu0 }
0x1100   :  { %v12409_v62 = vadd.f32 %v12408_v59, %v12407_v24  ;;  %v12410_v14 = vpop.f32.mrb[250].mxu0 }
0x1101   :  { %v12411_v5 = vpop.f32.mrb[251].mxu0 }
0x1102   :  { %v9528_v56 = vadd.f32 %v12409_v62, %v9310_v8 }
0x1106   :  { %v12429_v44 = vpop.f32.mrb[244].mxu1  ;;  %v9786_v57 = vpop.f32.mrb[252].mxu0 }
0x1107   :  { %v12430_v52 = vpop.f32.mrb[245].mxu1  ;;  %v9788_v42 = vpop.f32.mrb[253].mxu0  ;;  %v9793_v9 = vpack.c.bf16 %v9786_v57, %v9786_v57 }
0x1108   :  { %v12431_v21 = vadd.f32 %v12430_v52, %v12429_v44  ;;  %v9794_v38 = vpack.c.bf16 %v9788_v42, %v9788_v42  ;;  %v9790_v54 = vpop.f32.mrb[254].mxu0  ;;  %v12432_v11 = vpop.f32.mrb[246].mxu1 }
0x1109   :  { %v9791_v32 = vpop.f32.mrb[255].mxu0  ;;  %v12433_v28 = vpop.f32.mrb[247].mxu1 }
0x110a   :  { %v9746_v1 = vadd.f32 %v12431_v21, %v9528_v56  ;;  %9956 = vmatprep.mubr.bf16.mxu0 %v9794_v38 }
0x110b   :  { %9957 = vmatmul.mubr.bf16.vlgmr.msra.gmra.mrb[0].mxu0 %v9793_v9 }
0x11de   :  { %v12451_v58 = vpop.f32.mrb[0].mxu0 }
0x11df   :  { %v12452_v13 = vpop.f32.mrb[1].mxu0 }
0x11e0   :  { %v12453_v10 = vadd.f32 %v12452_v13, %v12451_v58  ;;  %v12454_v41 = vpop.f32.mrb[2].mxu0 }
0x11e1   :  { %v12455_v49 = vpop.f32.mrb[3].mxu0 }
0x11e2   :  { %v9964_v20 = vadd.f32 %v12453_v10, %v9746_v1 }
0x11e4   :  { %v9968_v6 = vsel %vm9967_vm9, %v9964_v20, 0.0  ;;  %v9976_v0 = vmul.f32 %v9964_v20, %v9964_v20 }
0x11e5   :  { %v9969_v23 = vrot.slane %v9968_v6, 4 }
0x11e6   :  { %v9977_v37 = vsel %vm9967_vm9, %v9976_v0, 0.0 }
0x11e7   :  { %v9970_v34 = vadd.f32 %v9969_v23, %v9968_v6  ;;  %v9978_v15 = vrot.slane %v9977_v37, 4 }
0x11e9   :  { %v9971_v63 = vrot.slane %v9970_v34, 2  ;;  %v9979_v53 = vadd.f32 %v9978_v15, %v9977_v37 }
0x11eb   :  { %v9972_v19 = vadd.f32 %v9971_v63, %v9970_v34  ;;  %v9980_v17 = vrot.slane %v9979_v53, 2 }
0x11ed   :  { %v9973_v4 = vrot.slane %v9972_v19, 1  ;;  %v9981_v39 = vadd.f32 %v9980_v17, %v9979_v53 }
0x11ef   :  { %v9974_v7 = vadd.f32 %v9973_v4, %v9972_v19  ;;  %v9982_v8 = vrot.slane %v9981_v39, 1 }
0x11f1   :  { %v9975_v43 = vmul.f32 0.5, %v9974_v7  ;;  %v9983_v50 = vadd.f32 %v9982_v8, %v9981_v39 }
0x11f3   :  { %v9984_v12 = vmul.f32 0.5, %v9983_v50  ;;  %v9985_v16 = vmul.f32 %v9975_v43, %v9975_v43 }
0x11f5   :  { %v9986_v29 = vsub.f32 %v9984_v12, %v9985_v16 }
0x11f7   :  { %v9987_v33 = vmax.f32 %v9986_v29, 0.0 }
0x11f9   :  { %v9988_v22 = vadd.f32 1e-05, %v9987_v33 }
0x11fb   :  { %14180 = vrsqrt.f32 %v9988_v22 }
0x1205   :  { %v14181_v47 = vpop.eup %14180 }
0x1206   :  { %v9990_v35 = vmul.f32 %v14181_v47, %v9965_v36 }
0x1208   :  { %v9991_v45 = vmul.f32 %v9990_v35, %v9975_v43  ;;  %v9997_v25 = vrot.slane %v9990_v35, %v18783_v18 }
0x120a   :  { %v9992_v3 = vsub.f32 %v9966_v61, %v9991_v45  ;;  %v9999_v26 = vmul.f32 %v9997_v25, %v9964_v20 }
0x120c   :  { %v10004_v40 = vrot.slane %v9992_v3, %v18783_v18 }
0x120e   :  { %v10006_v46 = vadd.f32 %v10004_v40, %v9999_v26 }
0x1210   :  { %v10007_v30 = vmax.f32 %v10006_v46, 0.0 }
0x1212   :  { %v11524_v51 = vmul.f32 -1.442695, %v10007_v30 }
0x1214   :  { %14182 = vpow2.f32 %v11524_v51 }
0x121e   :  { %v14183_v27 = vpop.eup %14182 }
0x121f   :  { %v10011_v31 = vadd.f32 1.0, %v14183_v27 }
0x1221   :  { %14184 = vrcp.f32 %v10011_v31 }
0x122b   :  { %v14185_v60 = vpop.eup %14184 }
0x122c   :  { %10014 = vst.msk [vmem:[%s18659_s16] sm:$0x3] %vm9967_vm9, %v14185_v60 }

</bundles_post_ra>
